<compile_context>
chip_gen: v5e
topology: v5e:2x2
jax: 0.10.0
libtpu: 0.0.40
codegen_flags: <defaults>
</compile_context>

<pallas_src>
import functools

import jax
import jax.numpy as jnp
import numpy as np
from jax import lax
from jax.experimental import pallas as pl
from jax.experimental.pallas import tpu as pltpu

BN_EPS = 1e-5
LANE = 128


def _round_up(x, m):
    return ((x + m - 1) // m) * m


def _down_kernel(xp_ref, w1_ref, g1_ref, be1_ref, w2_ref, g2_ref, be2_ref,
                 o_ref, h1pad_ref, hp_ref, *, cmid):
    N, Hp, Wp, Cin = xp_ref.shape              # input channels stay at natural width
    H, W = Hp - 2, Wp - 2
    Cmid_p = w1_ref.shape[-1]                  # lane-padded output channels (x128)
    Cout_p = w2_ref.shape[-1]
    M = N * H * W
    inv_m = 1.0 / M

    def conv3x3(src, cin, w_ref):
        # im2col with the contraction packed to the weight's padded K
        # (round_up(9*cin, 128)) instead of 9*128: one lane-dense wide-K MXU
        # matmul whose K is mostly real data even at tiny channel counts.
        # The narrow-tap concat costs XLU lane shuffles, which have slack
        # while the MXU is the paying unit.
        taps = [src[:, dy:dy + H, dx:dx + W, :cin]
                for dy in range(3) for dx in range(3)]
        kp = w_ref.shape[0]
        if 9 * cin < kp:
            taps.append(jnp.zeros((N, H, W, kp - 9 * cin), src.dtype))
        patches = jnp.concatenate(taps, axis=-1).reshape(M, kp)
        return jnp.dot(patches, w_ref[...], preferred_element_type=jnp.float32)

    def bn_relu(y, g_ref, be_ref):
        # single-pass biased batch statistics (sum & sum-of-squares), f32 math;
        # clamp the E[x^2]-E[x]^2 cancellation so rsqrt never sees var < 0.
        s = jnp.sum(y, axis=0, keepdims=True)
        ss = jnp.sum(y * y, axis=0, keepdims=True)
        mean = s * inv_m
        var = jnp.maximum(ss * inv_m - mean * mean, 0.0)
        scale = g_ref[...] * lax.rsqrt(var + BN_EPS)
        shift = be_ref[...] - mean * scale
        return jnp.maximum(y * scale + shift, 0.0)

    # ---- conv1 -> BN -> ReLU (bf16 MXU operands, f32 accumulation).
    # Conv bias is omitted: it cancels exactly under training-mode BatchNorm.
    h1 = bn_relu(conv3x3(xp_ref[...], Cin, w1_ref), g1_ref, be1_ref)

    # hand-off to conv2: one aligned whole-ref zero fill + one interior store
    # (replaces 4 masked border stores + interior store of the previous version).
    # TODO(synk): bf16 hand-off slab once the interior offset is tile-aligned
    # (odd sublane offsets force sub-word masked packed stores); do it together
    # with the halo-tiled rewrite, where blocks are stored tile-aligned.
    h1pad_ref[...] = jnp.zeros(h1pad_ref.shape, h1pad_ref.dtype)
    h1pad_ref[:, 1:H + 1, 1:W + 1, :] = h1.reshape(N, H, W, Cmid_p)

    # ---- conv2 -> BN -> ReLU. Only the first `cmid` channels of the slab are
    # real, so K2 = 9*cmid (padded to 128) rather than 9*128.
    h2 = bn_relu(conv3x3(h1pad_ref[...].astype(jnp.bfloat16), cmid, w2_ref),
                 g2_ref, be2_ref)

    # ---- MaxPool2d(2, 2): H-pool in registers via the row-pair reshape,
    # W-pool via one half-size scratch store + two stride-2 sublane reads.
    # TODO(synk): fold the W-pool compaction fully in-register (v5e store-slot
    # relief) as part of the tiled epilogue.
    h2r = h2.reshape(N * (H // 2), 2 * W, Cout_p)
    hp_ref[...] = jnp.maximum(h2r[:, :W, :], h2r[:, W:, :])      # pooled over H
    left = hp_ref[:, pl.ds(0, W // 2, 2), :]
    right = hp_ref[:, pl.ds(1, W // 2, 2), :]
    o_ref[...] = jnp.maximum(left, right).reshape(N, H // 2, W // 2, Cout_p)


def init_down_params(key, in_chann, out_chann, mid_chann=None):
    """Deterministic synthetic parameters with the shapes implied by Down.__init__."""
    if mid_chann is None:
        mid_chann = out_chann
    ks = jax.random.split(key, 6)

    def conv_init(k, cin, cout):
        bound = 1.0 / np.sqrt(cin * 9)
        kw, kb = jax.random.split(k)
        w = jax.random.uniform(kw, (3, 3, cin, cout), jnp.float32, -bound, bound)  # HWIO
        b = jax.random.uniform(kb, (cout,), jnp.float32, -bound, bound)
        return w, b

    w1, b1 = conv_init(ks[0], in_chann, mid_chann)
    w2, b2 = conv_init(ks[1], mid_chann, out_chann)
    g1 = 1.0 + 0.1 * jax.random.normal(ks[2], (mid_chann,), jnp.float32)
    be1 = 0.1 * jax.random.normal(ks[3], (mid_chann,), jnp.float32)
    g2 = 1.0 + 0.1 * jax.random.normal(ks[4], (out_chann,), jnp.float32)
    be2 = 0.1 * jax.random.normal(ks[5], (out_chann,), jnp.float32)
    # b1/b2 are kept for the reference; the kernel drops them because training-mode
    # BatchNorm subtracts the batch mean, which cancels any per-channel conv bias.
    return dict(w1=w1, b1=b1, g1=g1, be1=be1, w2=w2, b2=b2, g2=g2, be2=be2)


def down_forward(x_nchw, params):
    w1, w2 = params["w1"], params["w2"]
    Cmid, Cout = w1.shape[3], w2.shape[3]
    Cmid_p, Cout_p = _round_up(Cmid, LANE), _round_up(Cout, LANE)

    x = jnp.transpose(x_nchw, (0, 2, 3, 1)).astype(jnp.float32)     # NCHW -> NHWC
    N, H, W, Cin = x.shape
    assert H % 2 == 0 and W % 2 == 0

    # SAME halo pad; channels stay at natural width (the contraction K is padded
    # instead, see pack_w). bf16 halves input DMA bytes and feeds the MXU directly.
    xp = jnp.pad(x, ((0, 0), (1, 1), (1, 1), (0, 0))).astype(jnp.bfloat16)

    def pack_w(w):
        # HWIO -> (9*cin, cout) im2col layout, then zero-pad the contraction K to
        # the next lane multiple and the output channels to 128; bf16 for the MXU.
        kh, kw, cin, cout = w.shape
        k = kh * kw * cin
        kp, cout_p = _round_up(k, LANE), _round_up(cout, LANE)
        wk = jnp.pad(w.reshape(k, cout), ((0, kp - k), (0, cout_p - cout)))
        return wk.astype(jnp.bfloat16)

    def pack_v(v, cp):                   # (C,) -> lane-aligned (1, Cp) f32 row
        return jnp.pad(v, (0, cp - v.shape[0])).reshape(1, cp).astype(jnp.float32)

    inputs = (xp,
              pack_w(w1), pack_v(params["g1"], Cmid_p), pack_v(params["be1"], Cmid_p),
              pack_w(w2), pack_v(params["g2"], Cout_p), pack_v(params["be2"], Cout_p))

    def full_spec(shape):
        nd = len(shape)
        return pl.BlockSpec(shape, lambda i, nd=nd: (0,) * nd)

    # TODO(synk): halo-tiled multi-pass variant for real UNet shapes (v7x's 64 MiB
    # VMEM / two TensorCores): grid over (N, H-row blocks), each conv pass emitting
    # per-tile sum/sum-sq partials, a tiny finalize for the BN scale/shift, then a
    # normalize+conv2 pass and a BN2+ReLU+pool pass; mark (N, row-block) "parallel"
    # and size row blocks against a <=48 MiB double-buffered working set on v7x
    # (larger on v5e/v6e). grid=(1,) is kept here because BatchNorm's global
    # (N,H,W) statistics couple every tile and the test shapes fit VMEM comfortably.
    out_shape = jax.ShapeDtypeStruct((N, H // 2, W // 2, Cout_p), jnp.float32)
    fn = pl.pallas_call(
        functools.partial(_down_kernel, cmid=Cmid),
        out_shape=out_shape,
        grid_spec=pltpu.PrefetchScalarGridSpec(
            num_scalar_prefetch=0,
            grid=(1,),
            in_specs=[full_spec(a.shape) for a in inputs],
            out_specs=full_spec(out_shape.shape),
            scratch_shapes=[
                pltpu.VMEM((N, H + 2, W + 2, Cmid_p), jnp.float32),   # padded conv1 out
                pltpu.VMEM((N * (H // 2), W, Cout_p), jnp.float32),   # H-pooled buffer
            ],
        ),
        compiler_params=pltpu.CompilerParams(
            dimension_semantics=("arbitrary",),
            vmem_limit_bytes=32 * 1024 * 1024,
        ),
    )
    y_nhwc = fn(*inputs)[..., :Cout]                 # drop channel lane-padding
    return jnp.transpose(y_nhwc, (0, 3, 1, 2))       # NHWC -> NCHW


def down_reference(x_nchw, params):
    """Pure-JAX f32 reference matching the PyTorch forward (training-mode BN)."""
    x = jnp.transpose(x_nchw, (0, 2, 3, 1)).astype(jnp.float32)

    def conv(h, w, b):
        y = lax.conv_general_dilated(h, w, (1, 1), "SAME",
                                     dimension_numbers=("NHWC", "HWIO", "NHWC"))
        return y + b

    def bn_relu(y, g, be):
        m = jnp.mean(y, axis=(0, 1, 2), keepdims=True)
        v = jnp.mean((y - m) ** 2, axis=(0, 1, 2), keepdims=True)
        return jnp.maximum((y - m) * lax.rsqrt(v + BN_EPS) * g + be, 0.0)

    h = bn_relu(conv(x, params["w1"], params["b1"]), params["g1"], params["be1"])
    h = bn_relu(conv(h, params["w2"], params["b2"]), params["g2"], params["be2"])
    N, H, W, C = h.shape
    h = h.reshape(N, H // 2, 2, W // 2, 2, C).max(axis=(2, 4))
    return jnp.transpose(h, (0, 3, 1, 2))


if __name__ == "__main__":
    key = jax.random.PRNGKey(0)
    kx, kp = jax.random.split(key)

    N, Cin, H, W = 2, 4, 16, 16
    Cout = 8                                   # mid_chann defaults to out_chann
    x = jax.random.normal(kx, (N, Cin, H, W), jnp.float32)
    params = init_down_params(kp, Cin, Cout)

    y = down_forward(x, params)
    jax.block_until_ready(y)

    y_ref = down_reference(x, params)
    # bf16 MXU operands (f32 accumulation) -> slightly looser tolerance than pure f32
    np.testing.assert_allclose(np.asarray(y), np.asarray(y_ref), rtol=3e-2, atol=3e-2)
    assert y.shape == (N, Cout, H // 2, W // 2)

    print("KERNEL_OK")
</pallas_src>

<mosaic_0001>
module attributes {stable_mosaic.version = 11 : i64} {
  func.func @_down_kernel(%arg0: i32, %arg1: memref<2x18x18x4xbf16, #tpu.memory_space<vmem>>, %arg2: memref<128x128xbf16, #tpu.memory_space<vmem>>, %arg3: memref<1x128xf32, #tpu.memory_space<vmem>>, %arg4: memref<1x128xf32, #tpu.memory_space<vmem>>, %arg5: memref<128x128xbf16, #tpu.memory_space<vmem>>, %arg6: memref<1x128xf32, #tpu.memory_space<vmem>>, %arg7: memref<1x128xf32, #tpu.memory_space<vmem>>, %arg8: memref<2x8x8x128xf32, #tpu.memory_space<vmem>>, %arg9: memref<2x18x18x128xf32, #tpu.memory_space<vmem>>, %arg10: memref<16x16x128xf32, #tpu.memory_space<vmem>>) attributes {dimension_semantics = [#tpu.dimension_semantics<arbitrary>], iteration_bounds = array<i64: 1>, scalar_prefetch = 0 : i64, scratch_operands = 2 : i64, tpu.core_type = #tpu.core_type<tc>, window_params = [{pipeline_mode = #tpu.pipeline_mode<synchronous>, transform_indices = @transform_0, window_bounds = array<i64: 2, 18, 18, 4>}, {pipeline_mode = #tpu.pipeline_mode<synchronous>, transform_indices = @transform_1, window_bounds = array<i64: 128, 128>}, {pipeline_mode = #tpu.pipeline_mode<synchronous>, transform_indices = @transform_2, window_bounds = array<i64: 1, 128>}, {pipeline_mode = #tpu.pipeline_mode<synchronous>, transform_indices = @transform_3, window_bounds = array<i64: 1, 128>}, {pipeline_mode = #tpu.pipeline_mode<synchronous>, transform_indices = @transform_4, window_bounds = array<i64: 128, 128>}, {pipeline_mode = #tpu.pipeline_mode<synchronous>, transform_indices = @transform_5, window_bounds = array<i64: 1, 128>}, {pipeline_mode = #tpu.pipeline_mode<synchronous>, transform_indices = @transform_6, window_bounds = array<i64: 1, 128>}, {pipeline_mode = #tpu.pipeline_mode<synchronous>, transform_indices = @transform_7, window_bounds = array<i64: 2, 8, 8, 128>}]} {
    %c0 = arith.constant 0 : index
    %c0_0 = arith.constant 0 : index
    %c0_1 = arith.constant 0 : index
    %c0_2 = arith.constant 0 : index
    %0 = vector.load %arg1[%c0, %c0_0, %c0_1, %c0_2] : memref<2x18x18x4xbf16, #tpu.memory_space<vmem>>, vector<2x18x18x4xbf16>
    %1 = vector.extract_strided_slice %0 {offsets = [0, 0, 0, 0], sizes = [2, 16, 16, 4], strides = [1, 1, 1, 1]} : vector<2x18x18x4xbf16> to vector<2x16x16x4xbf16>
    %2 = vector.extract_strided_slice %0 {offsets = [0, 0, 1, 0], sizes = [2, 16, 16, 4], strides = [1, 1, 1, 1]} : vector<2x18x18x4xbf16> to vector<2x16x16x4xbf16>
    %3 = vector.extract_strided_slice %0 {offsets = [0, 0, 2, 0], sizes = [2, 16, 16, 4], strides = [1, 1, 1, 1]} : vector<2x18x18x4xbf16> to vector<2x16x16x4xbf16>
    %4 = vector.extract_strided_slice %0 {offsets = [0, 1, 0, 0], sizes = [2, 16, 16, 4], strides = [1, 1, 1, 1]} : vector<2x18x18x4xbf16> to vector<2x16x16x4xbf16>
    %5 = vector.extract_strided_slice %0 {offsets = [0, 1, 1, 0], sizes = [2, 16, 16, 4], strides = [1, 1, 1, 1]} : vector<2x18x18x4xbf16> to vector<2x16x16x4xbf16>
    %6 = vector.extract_strided_slice %0 {offsets = [0, 1, 2, 0], sizes = [2, 16, 16, 4], strides = [1, 1, 1, 1]} : vector<2x18x18x4xbf16> to vector<2x16x16x4xbf16>
    %7 = vector.extract_strided_slice %0 {offsets = [0, 2, 0, 0], sizes = [2, 16, 16, 4], strides = [1, 1, 1, 1]} : vector<2x18x18x4xbf16> to vector<2x16x16x4xbf16>
    %8 = vector.extract_strided_slice %0 {offsets = [0, 2, 1, 0], sizes = [2, 16, 16, 4], strides = [1, 1, 1, 1]} : vector<2x18x18x4xbf16> to vector<2x16x16x4xbf16>
    %9 = vector.extract_strided_slice %0 {offsets = [0, 2, 2, 0], sizes = [2, 16, 16, 4], strides = [1, 1, 1, 1]} : vector<2x18x18x4xbf16> to vector<2x16x16x4xbf16>
    %cst = arith.constant 0.000000e+00 : bf16
    %10 = vector.broadcast %cst : bf16 to vector<2x16x16x92xbf16>
    %11 = tpu.concatenate %1, %2, %3, %4, %5, %6, %7, %8, %9, %10 in 3 : vector<2x16x16x4xbf16>, vector<2x16x16x4xbf16>, vector<2x16x16x4xbf16>, vector<2x16x16x4xbf16>, vector<2x16x16x4xbf16>, vector<2x16x16x4xbf16>, vector<2x16x16x4xbf16>, vector<2x16x16x4xbf16>, vector<2x16x16x4xbf16>, vector<2x16x16x92xbf16> -> vector<2x16x16x128xbf16>
    %12 = vector.shape_cast %11 : vector<2x16x16x128xbf16> to vector<512x128xbf16>
    %c0_3 = arith.constant 0 : index
    %c0_4 = arith.constant 0 : index
    %13 = vector.load %arg2[%c0_3, %c0_4] : memref<128x128xbf16, #tpu.memory_space<vmem>>, vector<128x128xbf16>
    %cst_5 = arith.constant dense<0.000000e+00> : vector<512x128xf32>
    %14 = tpu.matmul %12, %13, %cst_5 {dimension_numbers = #tpu.dot_dimension_numbers<[1], [0], [0], [1], [0, 0, 1, 1], [], []>} : vector<512x128xbf16>, vector<128x128xbf16>, vector<512x128xf32> -> vector<512x128xf32>
    %cst_6 = arith.constant dense<0.000000e+00> : vector<128xf32>
    %15 = vector.multi_reduction <add>, %14, %cst_6 [0] : vector<512x128xf32> to vector<128xf32>
    %16 = vector.shape_cast %15 : vector<128xf32> to vector<1x128xf32>
    %17 = arith.mulf %14, %14 : vector<512x128xf32>
    %cst_7 = arith.constant dense<0.000000e+00> : vector<128xf32>
    %18 = vector.multi_reduction <add>, %17, %cst_7 [0] : vector<512x128xf32> to vector<128xf32>
    %19 = vector.shape_cast %18 : vector<128xf32> to vector<1x128xf32>
    %cst_8 = arith.constant 0.001953125 : f32
    %20 = vector.broadcast %cst_8 : f32 to vector<1x128xf32>
    %21 = arith.mulf %16, %20 : vector<1x128xf32>
    %cst_9 = arith.constant 0.001953125 : f32
    %22 = vector.broadcast %cst_9 : f32 to vector<1x128xf32>
    %23 = arith.mulf %19, %22 : vector<1x128xf32>
    %24 = arith.mulf %21, %21 : vector<1x128xf32>
    %25 = arith.subf %23, %24 : vector<1x128xf32>
    %cst_10 = arith.constant 0.000000e+00 : f32
    %26 = vector.broadcast %cst_10 : f32 to vector<1x128xf32>
    %27 = arith.maximumf %25, %26 : vector<1x128xf32>
    %c0_11 = arith.constant 0 : index
    %c0_12 = arith.constant 0 : index
    %28 = vector.load %arg3[%c0_11, %c0_12] : memref<1x128xf32, #tpu.memory_space<vmem>>, vector<1x128xf32>
    %cst_13 = arith.constant 9.99999974E-6 : f32
    %29 = vector.broadcast %cst_13 : f32 to vector<1x128xf32>
    %30 = arith.addf %27, %29 : vector<1x128xf32>
    %31 = math.rsqrt %30 : vector<1x128xf32>
    %32 = arith.mulf %28, %31 : vector<1x128xf32>
    %c0_14 = arith.constant 0 : index
    %c0_15 = arith.constant 0 : index
    %33 = vector.load %arg4[%c0_14, %c0_15] : memref<1x128xf32, #tpu.memory_space<vmem>>, vector<1x128xf32>
    %34 = arith.mulf %21, %32 : vector<1x128xf32>
    %35 = arith.subf %33, %34 : vector<1x128xf32>
    %36 = vector.broadcast %32 : vector<1x128xf32> to vector<512x128xf32>
    %37 = arith.mulf %14, %36 : vector<512x128xf32>
    %38 = vector.broadcast %35 : vector<1x128xf32> to vector<512x128xf32>
    %39 = arith.addf %37, %38 : vector<512x128xf32>
    %cst_16 = arith.constant 0.000000e+00 : f32
    %40 = vector.broadcast %cst_16 : f32 to vector<512x128xf32>
    %41 = arith.maximumf %39, %40 : vector<512x128xf32>
    %cst_17 = arith.constant 0.000000e+00 : f32
    %42 = vector.broadcast %cst_17 : f32 to vector<2x18x18x128xf32>
    %c0_18 = arith.constant 0 : index
    %c0_19 = arith.constant 0 : index
    %c0_20 = arith.constant 0 : index
    %c0_21 = arith.constant 0 : index
    %43 = vector.load %arg9[%c0_18, %c0_19, %c0_20, %c0_21] : memref<2x18x18x128xf32, #tpu.memory_space<vmem>>, vector<2x18x18x128xf32>
    tpu.vector_store %arg9[%c0_18, %c0_19, %c0_20, %c0_21], %42 {strides = array<i32>} : memref<2x18x18x128xf32, #tpu.memory_space<vmem>>, vector<2x18x18x128xf32>,
    %44 = vector.shape_cast %41 : vector<512x128xf32> to vector<2x16x16x128xf32>
    %c0_22 = arith.constant 0 : index
    %c1 = arith.constant 1 : index
    %c1_23 = arith.constant 1 : index
    %c0_24 = arith.constant 0 : index
    %45 = vector.load %arg9[%c0_22, %c1, %c1_23, %c0_24] : memref<2x18x18x128xf32, #tpu.memory_space<vmem>>, vector<2x16x16x128xf32>
    tpu.vector_store %arg9[%c0_22, %c1, %c1_23, %c0_24], %44 {strides = array<i32>} : memref<2x18x18x128xf32, #tpu.memory_space<vmem>>, vector<2x16x16x128xf32>,
    %c0_25 = arith.constant 0 : index
    %c0_26 = arith.constant 0 : index
    %c0_27 = arith.constant 0 : index
    %c0_28 = arith.constant 0 : index
    %46 = vector.load %arg9[%c0_25, %c0_26, %c0_27, %c0_28] : memref<2x18x18x128xf32, #tpu.memory_space<vmem>>, vector<2x18x18x128xf32>
    %47 = arith.truncf %46 : vector<2x18x18x128xf32> to vector<2x18x18x128xbf16>
    %48 = vector.extract_strided_slice %47 {offsets = [0, 0, 0, 0], sizes = [2, 16, 16, 8], strides = [1, 1, 1, 1]} : vector<2x18x18x128xbf16> to vector<2x16x16x8xbf16>
    %49 = vector.extract_strided_slice %47 {offsets = [0, 0, 1, 0], sizes = [2, 16, 16, 8], strides = [1, 1, 1, 1]} : vector<2x18x18x128xbf16> to vector<2x16x16x8xbf16>
    %50 = vector.extract_strided_slice %47 {offsets = [0, 0, 2, 0], sizes = [2, 16, 16, 8], strides = [1, 1, 1, 1]} : vector<2x18x18x128xbf16> to vector<2x16x16x8xbf16>
    %51 = vector.extract_strided_slice %47 {offsets = [0, 1, 0, 0], sizes = [2, 16, 16, 8], strides = [1, 1, 1, 1]} : vector<2x18x18x128xbf16> to vector<2x16x16x8xbf16>
    %52 = vector.extract_strided_slice %47 {offsets = [0, 1, 1, 0], sizes = [2, 16, 16, 8], strides = [1, 1, 1, 1]} : vector<2x18x18x128xbf16> to vector<2x16x16x8xbf16>
    %53 = vector.extract_strided_slice %47 {offsets = [0, 1, 2, 0], sizes = [2, 16, 16, 8], strides = [1, 1, 1, 1]} : vector<2x18x18x128xbf16> to vector<2x16x16x8xbf16>
    %54 = vector.extract_strided_slice %47 {offsets = [0, 2, 0, 0], sizes = [2, 16, 16, 8], strides = [1, 1, 1, 1]} : vector<2x18x18x128xbf16> to vector<2x16x16x8xbf16>
    %55 = vector.extract_strided_slice %47 {offsets = [0, 2, 1, 0], sizes = [2, 16, 16, 8], strides = [1, 1, 1, 1]} : vector<2x18x18x128xbf16> to vector<2x16x16x8xbf16>
    %56 = vector.extract_strided_slice %47 {offsets = [0, 2, 2, 0], sizes = [2, 16, 16, 8], strides = [1, 1, 1, 1]} : vector<2x18x18x128xbf16> to vector<2x16x16x8xbf16>
    %cst_29 = arith.constant 0.000000e+00 : bf16
    %57 = vector.broadcast %cst_29 : bf16 to vector<2x16x16x56xbf16>
    %58 = tpu.concatenate %48, %49, %50, %51, %52, %53, %54, %55, %56, %57 in 3 : vector<2x16x16x8xbf16>, vector<2x16x16x8xbf16>, vector<2x16x16x8xbf16>, vector<2x16x16x8xbf16>, vector<2x16x16x8xbf16>, vector<2x16x16x8xbf16>, vector<2x16x16x8xbf16>, vector<2x16x16x8xbf16>, vector<2x16x16x8xbf16>, vector<2x16x16x56xbf16> -> vector<2x16x16x128xbf16>
    %59 = vector.shape_cast %58 : vector<2x16x16x128xbf16> to vector<512x128xbf16>
    %c0_30 = arith.constant 0 : index
    %c0_31 = arith.constant 0 : index
    %60 = vector.load %arg5[%c0_30, %c0_31] : memref<128x128xbf16, #tpu.memory_space<vmem>>, vector<128x128xbf16>
    %cst_32 = arith.constant dense<0.000000e+00> : vector<512x128xf32>
    %61 = tpu.matmul %59, %60, %cst_32 {dimension_numbers = #tpu.dot_dimension_numbers<[1], [0], [0], [1], [0, 0, 1, 1], [], []>} : vector<512x128xbf16>, vector<128x128xbf16>, vector<512x128xf32> -> vector<512x128xf32>
    %cst_33 = arith.constant dense<0.000000e+00> : vector<128xf32>
    %62 = vector.multi_reduction <add>, %61, %cst_33 [0] : vector<512x128xf32> to vector<128xf32>
    %63 = vector.shape_cast %62 : vector<128xf32> to vector<1x128xf32>
    %64 = arith.mulf %61, %61 : vector<512x128xf32>
    %cst_34 = arith.constant dense<0.000000e+00> : vector<128xf32>
    %65 = vector.multi_reduction <add>, %64, %cst_34 [0] : vector<512x128xf32> to vector<128xf32>
    %66 = vector.shape_cast %65 : vector<128xf32> to vector<1x128xf32>
    %cst_35 = arith.constant 0.001953125 : f32
    %67 = vector.broadcast %cst_35 : f32 to vector<1x128xf32>
    %68 = arith.mulf %63, %67 : vector<1x128xf32>
    %cst_36 = arith.constant 0.001953125 : f32
    %69 = vector.broadcast %cst_36 : f32 to vector<1x128xf32>
    %70 = arith.mulf %66, %69 : vector<1x128xf32>
    %71 = arith.mulf %68, %68 : vector<1x128xf32>
    %72 = arith.subf %70, %71 : vector<1x128xf32>
    %cst_37 = arith.constant 0.000000e+00 : f32
    %73 = vector.broadcast %cst_37 : f32 to vector<1x128xf32>
    %74 = arith.maximumf %72, %73 : vector<1x128xf32>
    %c0_38 = arith.constant 0 : index
    %c0_39 = arith.constant 0 : index
    %75 = vector.load %arg6[%c0_38, %c0_39] : memref<1x128xf32, #tpu.memory_space<vmem>>, vector<1x128xf32>
    %cst_40 = arith.constant 9.99999974E-6 : f32
    %76 = vector.broadcast %cst_40 : f32 to vector<1x128xf32>
    %77 = arith.addf %74, %76 : vector<1x128xf32>
    %78 = math.rsqrt %77 : vector<1x128xf32>
    %79 = arith.mulf %75, %78 : vector<1x128xf32>
    %c0_41 = arith.constant 0 : index
    %c0_42 = arith.constant 0 : index
    %80 = vector.load %arg7[%c0_41, %c0_42] : memref<1x128xf32, #tpu.memory_space<vmem>>, vector<1x128xf32>
    %81 = arith.mulf %68, %79 : vector<1x128xf32>
    %82 = arith.subf %80, %81 : vector<1x128xf32>
    %83 = vector.broadcast %79 : vector<1x128xf32> to vector<512x128xf32>
    %84 = arith.mulf %61, %83 : vector<512x128xf32>
    %85 = vector.broadcast %82 : vector<1x128xf32> to vector<512x128xf32>
    %86 = arith.addf %84, %85 : vector<512x128xf32>
    %cst_43 = arith.constant 0.000000e+00 : f32
    %87 = vector.broadcast %cst_43 : f32 to vector<512x128xf32>
    %88 = arith.maximumf %86, %87 : vector<512x128xf32>
    %89 = vector.shape_cast %88 : vector<512x128xf32> to vector<16x32x128xf32>
    %90 = vector.extract_strided_slice %89 {offsets = [0, 0, 0], sizes = [16, 16, 128], strides = [1, 1, 1]} : vector<16x32x128xf32> to vector<16x16x128xf32>
    %91 = vector.extract_strided_slice %89 {offsets = [0, 16, 0], sizes = [16, 16, 128], strides = [1, 1, 1]} : vector<16x32x128xf32> to vector<16x16x128xf32>
    %92 = arith.maximumf %90, %91 : vector<16x16x128xf32>
    %c0_44 = arith.constant 0 : index
    %c0_45 = arith.constant 0 : index
    %c0_46 = arith.constant 0 : index
    %93 = vector.load %arg10[%c0_44, %c0_45, %c0_46] : memref<16x16x128xf32, #tpu.memory_space<vmem>>, vector<16x16x128xf32>
    tpu.vector_store %arg10[%c0_44, %c0_45, %c0_46], %92 {strides = array<i32>} : memref<16x16x128xf32, #tpu.memory_space<vmem>>, vector<16x16x128xf32>,
    %c0_47 = arith.constant 0 : index
    %c0_48 = arith.constant 0 : index
    %c0_49 = arith.constant 0 : index
    %94 = tpu.strided_load %arg10[%c0_47, %c0_48, %c0_49] {strides = array<i32: 1, 2, 1>} : memref<16x16x128xf32, #tpu.memory_space<vmem>>, vector<16x8x128xf32>
    %c0_50 = arith.constant 0 : index
    %c1_51 = arith.constant 1 : index
    %c0_52 = arith.constant 0 : index
    %95 = tpu.strided_load %arg10[%c0_50, %c1_51, %c0_52] {strides = array<i32: 1, 2, 1>} : memref<16x16x128xf32, #tpu.memory_space<vmem>>, vector<16x8x128xf32>
    %96 = arith.maximumf %94, %95 : vector<16x8x128xf32>
    %97 = vector.shape_cast %96 : vector<16x8x128xf32> to vector<2x8x8x128xf32>
    %c0_53 = arith.constant 0 : index
    %c0_54 = arith.constant 0 : index
    %c0_55 = arith.constant 0 : index
    %c0_56 = arith.constant 0 : index
    %98 = vector.load %arg8[%c0_53, %c0_54, %c0_55, %c0_56] : memref<2x8x8x128xf32, #tpu.memory_space<vmem>>, vector<2x8x8x128xf32>
    tpu.vector_store %arg8[%c0_53, %c0_54, %c0_55, %c0_56], %97 {strides = array<i32>} : memref<2x8x8x128xf32, #tpu.memory_space<vmem>>, vector<2x8x8x128xf32>,
    return
  }
  func.func @transform_0(%arg0: i32) -> (i32, i32, i32, i32) {
    %c0_i32 = arith.constant 0 : i32
    %c0_i32_0 = arith.constant 0 : i32
    %c0_i32_1 = arith.constant 0 : i32
    %c0_i32_2 = arith.constant 0 : i32
    %c0_i32_3 = arith.constant 0 : i32
    return %c0_i32, %c0_i32_0, %c0_i32_1, %c0_i32_2 : i32, i32, i32, i32
  }
  func.func @transform_1(%arg0: i32) -> (i32, i32) {
    %c0_i32 = arith.constant 0 : i32
    %c0_i32_0 = arith.constant 0 : i32
    %c0_i32_1 = arith.constant 0 : i32
    return %c0_i32, %c0_i32_0 : i32, i32
  }
  func.func @transform_2(%arg0: i32) -> (i32, i32) {
    %c0_i32 = arith.constant 0 : i32
    %c0_i32_0 = arith.constant 0 : i32
    %c0_i32_1 = arith.constant 0 : i32
    return %c0_i32, %c0_i32_0 : i32, i32
  }
  func.func @transform_3(%arg0: i32) -> (i32, i32) {
    %c0_i32 = arith.constant 0 : i32
    %c0_i32_0 = arith.constant 0 : i32
    %c0_i32_1 = arith.constant 0 : i32
    return %c0_i32, %c0_i32_0 : i32, i32
  }
  func.func @transform_4(%arg0: i32) -> (i32, i32) {
    %c0_i32 = arith.constant 0 : i32
    %c0_i32_0 = arith.constant 0 : i32
    %c0_i32_1 = arith.constant 0 : i32
    return %c0_i32, %c0_i32_0 : i32, i32
  }
  func.func @transform_5(%arg0: i32) -> (i32, i32) {
    %c0_i32 = arith.constant 0 : i32
    %c0_i32_0 = arith.constant 0 : i32
    %c0_i32_1 = arith.constant 0 : i32
    return %c0_i32, %c0_i32_0 : i32, i32
  }
  func.func @transform_6(%arg0: i32) -> (i32, i32) {
    %c0_i32 = arith.constant 0 : i32
    %c0_i32_0 = arith.constant 0 : i32
    %c0_i32_1 = arith.constant 0 : i32
    return %c0_i32, %c0_i32_0 : i32, i32
  }
  func.func @transform_7(%arg0: i32) -> (i32, i32, i32, i32) {
    %c0_i32 = arith.constant 0 : i32
    %c0_i32_0 = arith.constant 0 : i32
    %c0_i32_1 = arith.constant 0 : i32
    %c0_i32_2 = arith.constant 0 : i32
    %c0_i32_3 = arith.constant 0 : i32
    return %c0_i32, %c0_i32_0, %c0_i32_1, %c0_i32_2 : i32, i32, i32, i32
  }
}

</mosaic_0001>

<bundles_post_ra>
// kernel: tpu_custom_call.1
= control target key start
LH: loop header
LB: loop body
LE: loop exit
PB: predicated region body
PF: predicated region fallthrough
CT: control target
= control target key end

     0   :  { %vm392_vm0 = vsmask.f32 7424  ;;  %s6280_s27 = smov 4   ;;  %s11810_s0 = inlined_call_operand.vmem [shape: bf16[2,18,18,4], index: 0, kind: input, shape index: {}]   ;;  %s11811_s1 = inlined_call_operand.vmem [shape: bf16[128,128], index: 1, kind: input, shape index: {}]   ;;  %s11812_s2 = inlined_call_operand.vmem [shape: f32[1,128], index: 2, kind: input, shape index: {}]   ;;  %s11813_s3 = inlined_call_operand.vmem [shape: f32[1,128], index: 3, kind: input, shape index: {}]   ;;  %s11814_s4 = inlined_call_operand.vmem [shape: bf16[128,128], index: 4, kind: input, shape index: {}]   ;;  %s11815_s5 = inlined_call_operand.vmem [shape: f32[1,128], index: 5, kind: input, shape index: {}]   ;;  %s11816_s6 = inlined_call_operand.vmem [shape: f32[1,128], index: 6, kind: input, shape index: {}]   ;;  %s11817_s7 = inlined_call_operand.hbm [shape: f32[2,8,8,128], index: 7, kind: output, shape index: {}]  }
   0x1   :  { %v6338_v0 = vld [vmem:[%s11810_s0 + $0x30] sm:$0xff]  ;;  %v42_v1 = vld [vmem:[%s11810_s0 + $0x38] sm:$0x1]  ;;  %v36_v4 = vld [vmem:[%s11810_s0 + $0x20] sm:$0x1] }
   0x2   :  { %v332_v2 = vunpack.c.l.b16 %v42_v1  ;;  %v6346_v3 = vld [vmem:[%s11810_s0 + $0x18] sm:$0xff]  ;;  %v6354_v5 = vld [vmem:[%s11810_s0] sm:$0xff]  ;;  %v442_v6 = vshrl.u32 %v6338_v0, 16  ;;  %v444_v7 = vshll.u32 %v6338_v0, 16  ;;  %v330_v8 = vunpack.c.l.b16 %v36_v4  ;;  %v30_v9 = vld [vmem:[%s11810_s0 + $0x8] sm:$0x1] }
   0x3   :  { %v418_v11 = vshrl.u32 %v6346_v3, 16  ;;  %v420_v12 = vshll.u32 %v6346_v3, 16  ;;  %v328_v13 = vunpack.c.l.b16 %v30_v9  ;;  %v45_v14 = vld [vmem:[%s11810_s0 + $0x44] sm:$0x1]  ;;  %v394_v17 = vshrl.u32 %v6354_v5, 16  ;;  %v6375_v19 = vld [vmem:[%s11810_s0 + $0x3c] sm:$0xff] }
   0x4   :  { %v6361_v10 = vpack.c.b16 %v332_v2, %v332_v2  ;;  %v446_v15 = vrot.slane %v444_v7, 1  ;;  %v6368_v16 = vpack.c.b16 %v330_v8, %v330_v8  ;;  %v396_v18 = vshll.u32 %v6354_v5, 16  ;;  %v39_v24 = vld [vmem:[%s11810_s0 + $0x2c] sm:$0x1]  ;;  %v6388_v29 = vld [vmem:[%s11810_s0 + $0x24] sm:$0xff]  ;;  %v6433_v58 = vld [vmem:[%s11810_s0 + $0x54] sm:$0xff] }
   0x5   :  { %v422_v21 = vrot.slane %v420_v12, 1  ;;  %v6378_v22 = vpack.c.b16 %v328_v13, %v328_v13  ;;  %v333_v23 = vunpack.c.l.b16 %v45_v14  ;;  %v454_v28 = vshrl.u32 %v6375_v19, 16  ;;  %v6397_v38 = vld [vmem:[%s11810_s0 + $0xc] sm:$0xff]  ;;  %v33_v39 = vld [vmem:[%s11810_s0 + $0x14] sm:$0x1]  ;;  %v6410_v44 = vld [vmem:[%s11810_s0 + $0x60] sm:$0xff] }
   0x6   :  { %v449_v20 = vshll.u32 %v6361_v10, 16  ;;  %v447_v25 = vor.u32 %v446_v15, %v442_v6  ;;  %v425_v26 = vshll.u32 %v6368_v16, 16  ;;  %v398_v27 = vrot.slane %v396_v18, 1  ;;  %v54_v49 = vld [vmem:[%s11810_s0 + $0x68] sm:$0x1] }
   0x7   :  { %v423_v31 = vor.u32 %v422_v21, %v418_v11  ;;  %v401_v32 = vshll.u32 %v6378_v22, 16  ;;  %v6391_v33 = vpack.c.b16 %v333_v23, %v333_v23  ;;  %v456_v36 = vshll.u32 %v6375_v19, 16  ;;  %v51_v59 = vld [vmem:[%s11810_s0 + $0x5c] sm:$0x1]  ;;  %v6448_v7 = vld [vmem:[%s11810_s0 + $0x48] sm:$0xff] }
   0x8   :  { %v451_v30 = vrot.slane %v449_v20, 1  ;;  %v427_v34 = vrot.slane %v425_v26, 1  ;;  %v399_v35 = vor.u32 %v398_v27, %v394_v17  ;;  %v331_v37 = vunpack.c.l.b16 %v39_v24  ;;  %v48_v13 = vld [vmem:[%s11810_s0 + $0x50] sm:$0x1] }
   0x9   :  { %v403_v41 = vrot.slane %v401_v32, 1  ;;  %v461_v42 = vshll.u32 %v6391_v33, 16  ;;  %v430_v43 = vshrl.u32 %v6388_v29, 16  ;;  %v458_v46 = vrot.slane %v456_v36, 1 }
   0xa   :  { %v6403_v40 = vsel %vm392_vm0, %v447_v25, %v451_v30  ;;  %v6415_v45 = vsel %vm392_vm0, %v423_v31, %v427_v34  ;;  %v6417_v47 = vpack.c.b16 %v331_v37, %v331_v37  ;;  %v432_v48 = vshll.u32 %v6388_v29, 16 }
   0xb   :  { %12119 = vst [vmem:[#allocation7_spill] sm:$0xff] %v6403_v40  ;;  %785 = vrot.lane.b32.xlu2 %v6403_v40, %s6280_s27  ;;  %781 = vrot.lane.b32.xlu1 %v6415_v45, %s6280_s27  ;;  %v404_v50 = vsel %vm392_vm0, %v399_v35, %v403_v41  ;;  %v463_v51 = vrot.slane %v461_v42, 1  ;;  %v329_v52 = vunpack.c.l.b16 %v33_v39  ;;  %v406_v53 = vshrl.u32 %v6397_v38, 16 }
   0xc   :  { %12120 = vst [vmem:[#allocation8_spill] sm:$0xff] %v6415_v45  ;;  %777 = vrot.lane.b32.xlu0 %v404_v50, %s6280_s27  ;;  %v459_v54 = vor.u32 %v458_v46, %v454_v28  ;;  %v434_v55 = vrot.slane %v432_v48, 1  ;;  %v437_v56 = vshll.u32 %v6417_v47, 16  ;;  %v408_v57 = vshll.u32 %v6397_v38, 16 }
   0xd   :  { %v6438_v60 = vpack.c.b16 %v329_v52, %v329_v52  ;;  %v336_v61 = vunpack.c.l.b16 %v54_v49  ;;  %v490_v62 = vshrl.u32 %v6410_v44, 16  ;;  %v492_v63 = vshll.u32 %v6410_v44, 16 }
   0xe   :  { %v6443_v1 = vsel %vm392_vm0, %v459_v54, %v463_v51  ;;  %v435_v2 = vor.u32 %v434_v55, %v430_v43  ;;  %v439_v4 = vrot.slane %v437_v56, 1  ;;  %v410_v6 = vrot.slane %v408_v57, 1 }
   0xf   :  { %12121 = vst [vmem:[#allocation9_spill] sm:$0xff] %v6443_v1  ;;  %v413_v8 = vshll.u32 %v6438_v60, 16  ;;  %v6451_v9 = vpack.c.b16 %v336_v61, %v336_v61  ;;  %v494_v11 = vrot.slane %v492_v63, 1  ;;  %v335_v12 = vunpack.c.l.b16 %v51_v59 }
  0x10   :  { %12 = vsyncpa [#allocation5], 0  ;;  %v6457_v14 = vsel %vm392_vm0, %v435_v2, %v439_v4  ;;  %v411_v15 = vor.u32 %v410_v6, %v406_v53  ;;  %v478_v17 = vshrl.u32 %v6433_v58, 16  ;;  %v480_v18 = vshll.u32 %v6433_v58, 16  ;;  %v63_v20 = vld [vmem:[%s11810_s0 + $0x8c] sm:$0x1] }
  0x11   :  { %12122 = vst [vmem:[#allocation10_spill] sm:$0xff] %v6457_v14  ;;  %v415_v21 = vrot.slane %v413_v8, 1  ;;  %v495_v23 = vor.u32 %v494_v11, %v490_v62  ;;  %v497_v24 = vshll.u32 %v6451_v9, 16  ;;  %v6465_v25 = vpack.c.b16 %v335_v12, %v335_v12  ;;  %v6470_v26 = vld [vmem:[%s11810_s0 + $0x84] sm:$0xff]  ;;  %v6485_v37 = vld [vmem:[%s11810_s0 + $0x78] sm:$0xff]  ;;  %v6501_v51 = vld [vmem:[%s11810_s0 + $0x6c] sm:$0xff] }
  0x12   :  { %v482_v27 = vrot.slane %v480_v18, 1  ;;  %v334_v28 = vunpack.c.l.b16 %v48_v13  ;;  %v466_v30 = vshrl.u32 %v6448_v7, 16  ;;  %v468_v31 = vshll.u32 %v6448_v7, 16  ;;  %v60_v39 = vld [vmem:[%s11810_s0 + $0x80] sm:$0x1]  ;;  %v6524_v11 = vld [vmem:[%s11810_s0 + $0xa8] sm:$0xff] }
  0x13   :  { %787 = vrot.lane.b32.xlu2 %v6443_v1, %s6280_s27  ;;  %783 = vrot.lane.b32.xlu1 %v6457_v14, %s6280_s27  ;;  %v6479_v32 = vsel %vm392_vm0, %v411_v15, %v415_v21  ;;  %v499_v34 = vrot.slane %v497_v24, 1  ;;  %v485_v35 = vshll.u32 %v6465_v25, 16  ;;  %v339_v36 = vunpack.c.l.b16 %v63_v20  ;;  %v57_v52 = vld [vmem:[%s11810_s0 + $0x74] sm:$0x1]  ;;  %v72_v63 = vld [vmem:[%s11810_s0 + $0xb0] sm:$0x1] }
  0x14   :  { %12123 = vst [vmem:[#allocation11_spill] sm:$0xff] %v6479_v32  ;;  %779 = vrot.lane.b32.xlu0 %v6479_v32, %s6280_s27  ;;  %v483_v41 = vor.u32 %v482_v27, %v478_v17  ;;  %v6492_v42 = vpack.c.b16 %v334_v28, %v334_v28  ;;  %v470_v43 = vrot.slane %v468_v31, 1  ;;  %v526_v49 = vshrl.u32 %v6470_v26, 16  ;;  %v6531_v17 = vld [vmem:[%s11810_s0 + $0x9c] sm:$0xff]  ;;  %v69_v24 = vld [vmem:[%s11810_s0 + $0xa4] sm:$0x1] }
  0x15   :  { %v487_v46 = vrot.slane %v485_v35, 1  ;;  %v6494_v48 = vpack.c.b16 %v339_v36, %v339_v36  ;;  %v528_v50 = vshll.u32 %v6470_v26, 16  ;;  %v6507_v53 = vsel %vm392_vm0, %v495_v23, %v499_v34  ;;  %v6653_v40 = vld [vmem:[%s11810_s0 + $0xf0] sm:$0xff]  ;;  %s6281_s19 = smov 8   ;;  %s6282_s21 = smov 12  }
  0x16   :  { %12124 = vst [vmem:[#allocation12_spill] sm:$0xff] %v6507_v53  ;;  %v471_v54 = vor.u32 %v470_v43, %v466_v30  ;;  %v473_v55 = vshll.u32 %v6492_v42, 16  ;;  %v338_v56 = vunpack.c.l.b16 %v60_v39  ;;  %v514_v61 = vshrl.u32 %v6485_v37, 16  ;;  %v66_v43 = vld [vmem:[%s11810_s0 + $0x98] sm:$0x1]  ;;  %v6679_v45 = vld [vmem:[%s11810_s0 + $0x12c] sm:$0xff] }
  0x17   :  { %v530_v57 = vrot.slane %v528_v50, 1  ;;  %v533_v59 = vshll.u32 %v6494_v48, 16  ;;  %v516_v62 = vshll.u32 %v6485_v37, 16  ;;  %v6517_v2 = vsel %vm392_vm0, %v483_v41, %v487_v46  ;;  %v6555_v41 = vld [vmem:[%s11810_s0 + $0x90] sm:$0xff]  ;;  %12139 = vst [vmem:[#allocation27_spill] sm:$0xff] %v6679_v45  ;;  %s6283_s10 = smov 16  }
  0x18   :  { %12125 = vst [vmem:[#allocation13_spill] sm:$0xff] %v6517_v2  ;;  %v475_v4 = vrot.slane %v473_v55, 1  ;;  %v6519_v6 = vpack.c.b16 %v338_v56, %v338_v56  ;;  %v337_v8 = vunpack.c.l.b16 %v57_v52  ;;  %v502_v13 = vshrl.u32 %v6501_v51, 16  ;;  %s6284_s15 = smov 20   ;;  %s6285_s16 = smov 32  }
  0x19   :  { %v518_v12 = vrot.slane %v516_v62, 1  ;;  %v504_v15 = vshll.u32 %v6501_v51, 16  ;;  %v342_v23 = vunpack.c.l.b16 %v72_v63  ;;  %v531_v27 = vor.u32 %v530_v57, %v526_v49  ;;  %s6286_s17 = smov 28   ;;  %s6287_s18 = smov 24  }
  0x1a   :  { %v6536_v18 = vsel %vm392_vm0, %v471_v54, %v475_v4  ;;  %v521_v20 = vshll.u32 %v6519_v6, 16  ;;  %v6539_v21 = vpack.c.b16 %v337_v8, %v337_v8  ;;  %v535_v28 = vrot.slane %v533_v59, 1  ;;  %v6565_v54 = vld [vmem:[%s11810_s0 + $0xe4] sm:$0xff]  ;;  %s6292_s8 = smov 56  }
  0x1b   :  { %793 = vrot.lane.b32.xlu2 %v6507_v53, %s6280_s27  ;;  %12126 = vst [vmem:[#allocation14_spill] sm:$0xff] %v6536_v18  ;;  %791 = vrot.lane.b32.xlu1 %v6517_v2, %s6280_s27  ;;  %v519_v30 = vor.u32 %v518_v12, %v514_v61  ;;  %v506_v31 = vrot.slane %v504_v15, 1  ;;  %v6549_v36 = vpack.c.b16 %v342_v23, %v342_v23  ;;  %v564_v39 = vshll.u32 %v6524_v11, 16  ;;  %v87_v61 = vld [vmem:[%s11810_s0 + $0xec] sm:$0x1]  ;;  %v6588_v23 = vld [vmem:[%s11810_s0 + $0xd8] sm:$0xff] }
  0x1c   :  { %789 = vrot.lane.b32.xlu0 %v6536_v18, %s6280_s27  ;;  %v523_v34 = vrot.slane %v521_v20, 1  ;;  %v509_v35 = vshll.u32 %v6539_v21, 16  ;;  %v562_v49 = vshrl.u32 %v6524_v11, 16  ;;  %v341_v50 = vunpack.c.l.b16 %v69_v24  ;;  %12130 = vst [vmem:[#allocation18_spill] sm:$0xff] %v6588_v23  ;;  %v84_v24 = vld [vmem:[%s11810_s0 + $0xe0] sm:$0x1] }
  0x1d   :  { %v507_v46 = vor.u32 %v506_v31, %v502_v13  ;;  %v552_v52 = vshll.u32 %v6531_v17, 16  ;;  %v566_v56 = vrot.slane %v564_v39, 1  ;;  %v569_v57 = vshll.u32 %v6549_v36, 16 }
  0x1e   :  { %v511_v55 = vrot.slane %v509_v35, 1  ;;  %v550_v59 = vshrl.u32 %v6531_v17, 16  ;;  %v6573_v62 = vsel %vm392_vm0, %v531_v27, %v535_v28  ;;  %v6575_v63 = vpack.c.b16 %v341_v50, %v341_v50 }
  0x1f   :  { %12127 = vst [vmem:[#allocation15_spill] sm:$0xff] %v6573_v62  ;;  %v554_v4 = vrot.slane %v552_v52, 1  ;;  %v340_v8 = vunpack.c.l.b16 %v66_v43  ;;  %v6578_v12 = vsel %vm392_vm0, %v519_v30, %v523_v34  ;;  %v538_v15 = vshrl.u32 %v6555_v41, 16 }
  0x20   :  { %12128 = vst [vmem:[#allocation16_spill] sm:$0xff] %v6578_v12  ;;  %v6581_v13 = vsel %vm392_vm0, %v507_v46, %v511_v55  ;;  %v540_v20 = vshll.u32 %v6555_v41, 16  ;;  %v567_v27 = vor.u32 %v566_v56, %v562_v49  ;;  %v557_v28 = vshll.u32 %v6575_v63, 16  ;;  %v6607_v55 = vld [vmem:[%s11810_s0 + $0xb4] sm:$0xff]  ;;  %v75_v56 = vld [vmem:[%s11810_s0 + $0xbc] sm:$0x1] }
  0x21   :  { %12129 = vst [vmem:[#allocation17_spill] sm:$0xff] %v6581_v13  ;;  %v6594_v30 = vpack.c.b16 %v340_v8, %v340_v8  ;;  %v345_v31 = vunpack.c.l.b16 %v87_v61  ;;  %v571_v34 = vrot.slane %v569_v57, 1  ;;  %v555_v35 = vor.u32 %v554_v4, %v550_v59 }
  0x22   :  { %v542_v39 = vrot.slane %v540_v20, 1  ;;  %v600_v43 = vshll.u32 %v6565_v54, 16  ;;  %v559_v46 = vrot.slane %v557_v28, 1  ;;  %v344_v52 = vunpack.c.l.b16 %v84_v24  ;;  %v96_v24 = vld [vmem:[%s11810_s0 + $0x110] sm:$0x1] }
  0x23   :  { %799 = vrot.lane.b32.xlu2 %v6573_v62, %s6280_s27  ;;  %797 = vrot.lane.b32.xlu1 %v6578_v12, %s6280_s27  ;;  %v545_v50 = vshll.u32 %v6594_v30, 16  ;;  %v6602_v49 = vpack.c.b16 %v345_v31, %v345_v31  ;;  %v598_v57 = vshrl.u32 %v6565_v54, 16  ;;  %v588_v59 = vshll.u32 %v6588_v23, 16  ;;  %v6625_v12 = vld [vmem:[%s11810_s0 + $0x108] sm:$0xff] }
  0x24   :  { %795 = vrot.lane.b32.xlu0 %v6581_v13, %s6280_s27  ;;  %v543_v61 = vor.u32 %v542_v39, %v538_v15  ;;  %v602_v8 = vrot.slane %v600_v43, 1  ;;  %v6616_v20 = vpack.c.b16 %v344_v52, %v344_v52  ;;  %v343_v31 = vunpack.c.l.b16 %v75_v56  ;;  %12132 = vst [vmem:[#allocation20_spill] sm:$0xff] %v6625_v12  ;;  %v93_v52 = vld [vmem:[%s11810_s0 + $0x104] sm:$0x1] }
  0x25   :  { %v547_v4 = vrot.slane %v545_v50, 1  ;;  %v605_v28 = vshll.u32 %v6602_v49, 16  ;;  %v6628_v62 = vsel %vm392_vm0, %v567_v27, %v571_v34  ;;  %v6631_v15 = vsel %vm392_vm0, %v555_v35, %v559_v46  ;;  %v6638_v50 = vld [vmem:[%s11810_s0 + $0xfc] sm:$0xff] }
  0x26   :  { %12131 = vst [vmem:[#allocation19_spill] sm:$0xff] %v6616_v20  ;;  %v586_v39 = vshrl.u32 %v6588_v23, 16  ;;  %v576_v43 = vshll.u32 %v6607_v55, 16  ;;  %v590_v56 = vrot.slane %v588_v59, 1  ;;  %v593_v27 = vshll.u32 %v6616_v20, 16 }
  0x27   :  { %12133 = vst [vmem:[#allocation21_spill] sm:$0xff] %v6628_v62  ;;  %v6644_v34 = vpack.c.b16 %v343_v31, %v343_v31  ;;  %v348_v35 = vunpack.c.l.b16 %v96_v24  ;;  %v6647_v46 = vsel %vm392_vm0, %v543_v61, %v547_v4  ;;  %v603_v2 = vor.u32 %v602_v8, %v598_v57  ;;  %v90_v59 = vld [vmem:[%s11810_s0 + $0xf8] sm:$0x1] }
  0x28   :  { %12134 = vst [vmem:[#allocation22_spill] sm:$0xff] %v6631_v15  ;;  %v574_v53 = vshrl.u32 %v6607_v55, 16  ;;  %v578_v13 = vrot.slane %v576_v43, 1  ;;  %v607_v24 = vrot.slane %v605_v28, 1  ;;  %v636_v57 = vshll.u32 %v6625_v12, 16 }
  0x29   :  { %12135 = vst [vmem:[#allocation23_spill] sm:$0xff] %v6638_v50  ;;  %v581_v61 = vshll.u32 %v6644_v34, 16  ;;  %v347_v4 = vunpack.c.l.b16 %v93_v52  ;;  %v6664_v8 = vpack.c.b16 %v348_v35, %v348_v35  ;;  %v624_v31 = vshll.u32 %v6638_v50, 16 }
  0x2a   :  { %12136 = vst [vmem:[#allocation24_spill] sm:$0xff] %v6647_v46  ;;  %v591_v43 = vor.u32 %v590_v56, %v586_v39  ;;  %v595_v1 = vrot.slane %v593_v27, 1  ;;  %v346_v28 = vunpack.c.l.b16 %v90_v59  ;;  %v579_v52 = vor.u32 %v578_v13, %v574_v53  ;;  %v102_v53 = vld [vmem:[%s11810_s0 + $0x128] sm:$0x1] }
  0x2b   :  { %805 = vrot.lane.b32.xlu2 %v6628_v62, %s6280_s27  ;;  %803 = vrot.lane.b32.xlu1 %v6631_v15, %s6280_s27  ;;  %12137 = vst [vmem:[#allocation25_spill] sm:$0xff] %v6664_v8  ;;  %v6669_v18 = vpack.c.b16 %v347_v4, %v347_v4  ;;  %v105_v62 = vld [vmem:[%s11810_s0 + $0x134] sm:$0x1]  ;;  %v583_v32 = vrot.slane %v581_v61, 1  ;;  %v634_v15 = vshrl.u32 %v6625_v12, 16  ;;  %v612_v35 = vshll.u32 %v6653_v40, 16 }
  0x2c   :  { %801 = vrot.lane.b32.xlu0 %v6647_v46, %s6280_s27  ;;  %v6682_v39 = vsel %vm392_vm0, %v603_v2, %v607_v24  ;;  %v638_v56 = vrot.slane %v636_v57, 1  ;;  %v622_v27 = vshrl.u32 %v6638_v50, 16  ;;  %v6685_v59 = vpack.c.b16 %v346_v28, %v346_v28  ;;  %v6697_v57 = vld [vmem:[%s11810_s0 + $0x120] sm:$0xff]  ;;  %v99_v28 = vld [vmem:[%s11810_s0 + $0x11c] sm:$0x1] }
  0x2d   :  { %12138 = vst [vmem:[#allocation26_spill] sm:$0xff] %v6669_v18  ;;  %v641_v13 = vshll.u32 %v6664_v8, 16  ;;  %v626_v61 = vrot.slane %v624_v31, 1  ;;  %v629_v4 = vshll.u32 %v6669_v18, 16  ;;  %v351_v46 = vunpack.c.l.b16 %v105_v62 }
  0x2e   :  { %12140 = vst [vmem:[#allocation28_spill] sm:$0xff] %v6682_v39  ;;  %v596_v14 = vsel %vm392_vm0, %v591_v43, %v595_v1  ;;  %v610_v2 = vshrl.u32 %v6653_v40, 16  ;;  %v614_v24 = vrot.slane %v612_v35, 1  ;;  %v6703_v50 = vsel %vm392_vm0, %v579_v52, %v583_v32  ;;  %v6710_v43 = vld [vmem:[%s11810_s0 + $0x114] sm:$0xff] }
  0x2f   :  { %12141 = vst [vmem:[#allocation29_spill] sm:$0xff] %v6697_v57  ;;  %v617_v31 = vshll.u32 %v6685_v59, 16  ;;  %v672_v62 = vshll.u32 %v6679_v45, 16  ;;  %v350_v1 = vunpack.c.l.b16 %v102_v53  ;;  %v639_v35 = vor.u32 %v638_v56, %v634_v15  ;;  %v114_v53 = vld [vmem:[%s11810_s0 + $0x158] sm:$0x1] }
  0x30   :  { %12142 = vst [vmem:[#allocation30_spill] sm:$0xff] %v6703_v50  ;;  %v6714_v18 = vpack.c.b16 %v351_v46, %v351_v46  ;;  %v643_v32 = vrot.slane %v641_v13, 1  ;;  %v627_v52 = vor.u32 %v626_v61, %v622_v27  ;;  %v631_v8 = vrot.slane %v629_v4, 1  ;;  %v111_v13 = vld [vmem:[%s11810_s0 + $0x14c] sm:$0x1]  ;;  %v6736_v4 = vld [vmem:[%s11810_s0 + $0x150] sm:$0xff] }
  0x31   :  { %v349_v12 = vunpack.c.l.b16 %v99_v28  ;;  %v615_v20 = vor.u32 %v614_v24, %v610_v2  ;;  %v670_v23 = vshrl.u32 %v6679_v45, 16  ;;  %v660_v15 = vshll.u32 %v6697_v57, 16  ;;  %12146 = vst [vmem:[#allocation34_spill] sm:$0xff] %v6736_v4 }
  0x32   :  { %12143 = vst [vmem:[#allocation31_spill] sm:$0xff] %v6714_v18  ;;  %v619_v46 = vrot.slane %v617_v31, 1  ;;  %v648_v27 = vshll.u32 %v6710_v43, 16  ;;  %v677_v61 = vshll.u32 %v6714_v18, 16  ;;  %v354_v2 = vunpack.c.l.b16 %v114_v53  ;;  %v6748_v31 = vld [vmem:[%s11810_s0 + $0x144] sm:$0xff]  ;;  %v6762_v18 = vld [vmem:[%s11810_s0 + $0x138] sm:$0xff] }
  0x33   :  { %811 = vrot.lane.b32.xlu2 %v6682_v39, %s6280_s27  ;;  %809 = vrot.lane.b32.xlu1 %v596_v14, %s6280_s27  ;;  %v6723_v39 = vpack.c.b16 %v350_v1, %v350_v1  ;;  %v674_v14 = vrot.slane %v672_v62, 1  ;;  %v6726_v56 = vpack.c.b16 %v349_v12, %v349_v12  ;;  %v6739_v24 = vsel %vm392_vm0, %v639_v35, %v643_v32  ;;  %v108_v62 = vld [vmem:[%s11810_s0 + $0x140] sm:$0x1] }
  0x34   :  { %807 = vrot.lane.b32.xlu0 %v6703_v50, %s6280_s27  ;;  %12147 = vst [vmem:[#allocation35_spill] sm:$0xff] %v6739_v24  ;;  %v6742_v12 = vsel %vm392_vm0, %v627_v52, %v631_v8  ;;  %v658_v28 = vshrl.u32 %v6697_v57, 16  ;;  %v662_v1 = vrot.slane %v660_v15, 1  ;;  %v646_v35 = vshrl.u32 %v6710_v43, 16 }
  0x35   :  { %12144 = vst [vmem:[#allocation32_spill] sm:$0xff] %v6723_v39  ;;  %v665_v53 = vshll.u32 %v6723_v39, 16  ;;  %v353_v32 = vunpack.c.l.b16 %v111_v13  ;;  %v6756_v8 = vsel %vm392_vm0, %v615_v20, %v619_v46  ;;  %v675_v52 = vor.u32 %v674_v14, %v670_v23 }
  0x36   :  { %12145 = vst [vmem:[#allocation33_spill] sm:$0xff] %v6726_v56  ;;  %v650_v50 = vrot.slane %v648_v27, 1  ;;  %v653_v57 = vshll.u32 %v6726_v56, 16  ;;  %v679_v15 = vrot.slane %v677_v61, 1  ;;  %v6766_v39 = vpack.c.b16 %v354_v2, %v354_v2  ;;  %v123_v27 = vld [vmem:[%s11810_s0 + $0x17c] sm:$0x1] }
  0x37   :  { %12148 = vst [vmem:[#allocation36_spill] sm:$0xff] %v6742_v12  ;;  %v708_v13 = vshll.u32 %v6736_v4, 16  ;;  %v352_v45 = vunpack.c.l.b16 %v108_v62  ;;  %v6771_v23 = vpack.c.b16 %v353_v32, %v353_v32  ;;  %v696_v20 = vshll.u32 %v6748_v31, 16  ;;  %v120_v32 = vld [vmem:[%s11810_s0 + $0x170] sm:$0x1] }
  0x38   :  { %12149 = vst [vmem:[#allocation37_spill] sm:$0xff] %v6748_v31  ;;  %v663_v46 = vor.u32 %v662_v1, %v658_v28  ;;  %v667_v14 = vrot.slane %v665_v53, 1  ;;  %v651_v61 = vor.u32 %v650_v50, %v646_v35  ;;  %v655_v2 = vrot.slane %v653_v57, 1  ;;  %v117_v50 = vld [vmem:[%s11810_s0 + $0x164] sm:$0x1] }
  0x39   :  { %12150 = vst [vmem:[#allocation38_spill] sm:$0xff] %v6756_v8  ;;  %v684_v62 = vshll.u32 %v6762_v18, 16  ;;  %v706_v28 = vshrl.u32 %v6736_v4, 16  ;;  %v710_v1 = vrot.slane %v708_v13, 1  ;;  %v713_v53 = vshll.u32 %v6766_v39, 16 }
  0x3a   :  { %12151 = vst [vmem:[#allocation39_spill] sm:$0xff] %v6762_v18  ;;  %v698_v57 = vrot.slane %v696_v20, 1  ;;  %v701_v35 = vshll.u32 %v6771_v23, 16  ;;  %v682_v13 = vshrl.u32 %v6762_v18, 16  ;;  %v6810_v20 = vsel %vm392_vm0, %v651_v61, %v655_v2 }
  0x3b   :  { %817 = vrot.lane.b32.xlu2 %v6739_v24, %s6280_s27  ;;  %12152 = vst [vmem:[#allocation40_spill] sm:$0xff] %v6766_v39  ;;  %815 = vrot.lane.b32.xlu1 %v6742_v12, %s6280_s27  ;;  %v6779_v24 = vpack.c.b16 %v352_v45, %v352_v45  ;;  %v6786_v12 = vsel %vm392_vm0, %v675_v52, %v679_v15  ;;  %v694_v45 = vshrl.u32 %v6748_v31, 16  ;;  %v357_v52 = vunpack.c.l.b16 %v123_v27  ;;  %v6807_v39 = vld [vmem:[%s11810_s0 + $0x168] sm:$0xff]  ;;  %v6816_v27 = vld [vmem:[%s11810_s0 + $0x15c] sm:$0xff] }
  0x3c   :  { %12153 = vst [vmem:[#allocation41_spill] sm:$0xff] %v6771_v23  ;;  %813 = vrot.lane.b32.xlu0 %v6756_v8, %s6280_s27  ;;  %v6798_v8 = vld [vmem:[%s11810_s0 + $0x174] sm:$0xff]  ;;  %v6801_v15 = vsel %vm392_vm0, %v663_v46, %v667_v14  ;;  %v356_v31 = vunpack.c.l.b16 %v120_v32  ;;  %v686_v23 = vrot.slane %v684_v62, 1  ;;  %v355_v46 = vunpack.c.l.b16 %v117_v50 }
  0x3d   :  { %12154 = vst [vmem:[#allocation42_spill] sm:$0xff] %v6779_v24  ;;  %v689_v4 = vshll.u32 %v6779_v24, 16  ;;  %v711_v14 = vor.u32 %v710_v1, %v706_v28  ;;  %v715_v18 = vrot.slane %v713_v53, 1  ;;  %v699_v32 = vor.u32 %v698_v57, %v694_v45  ;;  %v129_v53 = vld [vmem:[%s11810_s0 + $0x194] sm:$0x1] }
  0x3e   :  { %12155 = vst [vmem:[#allocation43_spill] sm:$0xff] %v6786_v12  ;;  %v703_v61 = vrot.slane %v701_v35, 1  ;;  %v6822_v2 = vpack.c.b16 %v357_v52, %v357_v52  ;;  %v744_v62 = vshll.u32 %v6798_v8, 16  ;;  %v6827_v24 = vpack.c.b16 %v356_v31, %v356_v31  ;;  %v126_v31 = vld [vmem:[%s11810_s0 + $0x188] sm:$0x1] }
  0x3f   :  { %12156 = vst [vmem:[#allocation44_spill] sm:$0xff] %v6798_v8  ;;  %v732_v50 = vshll.u32 %v6807_v39, 16  ;;  %v687_v56 = vor.u32 %v686_v23, %v682_v13  ;;  %v6830_v28 = vpack.c.b16 %v355_v46, %v355_v46  ;;  %v720_v1 = vshll.u32 %v6816_v27, 16 }
  0x40   :  { %12157 = vst [vmem:[#allocation45_spill] sm:$0xff] %v6801_v15  ;;  %v6837_v45 = vsel %vm392_vm0, %v711_v14, %v715_v18  ;;  %v742_v57 = vshrl.u32 %v6798_v8, 16  ;;  %v6844_v23 = vsel %vm392_vm0, %v699_v32, %v703_v61  ;;  %v749_v35 = vshll.u32 %v6822_v2, 16  ;;  %v6853_v14 = vld [vmem:[%s11810_s0 + $0x18c] sm:$0xff] }
  0x41   :  { %12158 = vst [vmem:[#allocation46_spill] sm:$0xff] %v6807_v39  ;;  %v730_v52 = vshrl.u32 %v6807_v39, 16  ;;  %v734_v13 = vrot.slane %v732_v50, 1  ;;  %v737_v46 = vshll.u32 %v6827_v24, 16  ;;  %v718_v18 = vshrl.u32 %v6816_v27, 16 }
  0x42   :  { %12159 = vst [vmem:[#allocation47_spill] sm:$0xff] %v6810_v20  ;;  %v722_v32 = vrot.slane %v720_v1, 1  ;;  %v725_v61 = vshll.u32 %v6830_v28, 16  ;;  %v358_v50 = vunpack.c.l.b16 %v126_v31  ;;  %v768_v39 = vshll.u32 %v6853_v14, 16 }
  0x43   :  { %823 = vrot.lane.b32.xlu2 %v6786_v12, %s6280_s27  ;;  %821 = vrot.lane.b32.xlu1 %v6801_v15, %s6280_s27  ;;  %12160 = vst [vmem:[#allocation48_spill] sm:$0xff] %v6822_v2  ;;  %v691_v12 = vrot.slane %v689_v4, 1  ;;  %v746_v4 = vrot.slane %v744_v62, 1  ;;  %v359_v15 = vunpack.c.l.b16 %v129_v53  ;;  %v6862_v62 = vld [vmem:[%s11810_s0 + $0x180] sm:$0xff]  ;;  %v751_v53 = vrot.slane %v749_v35, 1 }
  0x44   :  { %819 = vrot.lane.b32.xlu0 %v6810_v20, %s6280_s27  ;;  %12161 = vst [vmem:[#allocation49_spill] sm:$0xff] %v6827_v24  ;;  %v723_v2 = vor.u32 %v722_v32, %v718_v18  ;;  %v727_v8 = vrot.slane %v725_v61, 1  ;;  %v6873_v31 = vpack.c.b16 %v358_v50, %v358_v50  ;;  %v770_v35 = vrot.slane %v768_v39, 1 }
  0x45   :  { %12162 = vst [vmem:[#allocation50_spill] sm:$0xff] %v6830_v28  ;;  %v6856_v20 = vsel %vm392_vm0, %v687_v56, %v691_v12  ;;  %v747_v24 = vor.u32 %v746_v4, %v742_v57  ;;  %v735_v56 = vor.u32 %v734_v13, %v730_v52  ;;  %v739_v12 = vrot.slane %v737_v46, 1 }
  0x46   :  { %12163 = vst [vmem:[#allocation51_spill] sm:$0xff] %v6837_v45  ;;  %v6870_v1 = vpack.c.b16 %v359_v15, %v359_v15  ;;  %v766_v4 = vshrl.u32 %v6853_v14, 16  ;;  %v6885_v52 = vsel %vm392_vm0, %v723_v2, %v727_v8  ;;  %v754_v13 = vshrl.u32 %v6862_v62, 16 }
  0x47   :  { %v6877_v28 = vsel %vm392_vm0, %v747_v24, %v751_v53  ;;  %v6880_v57 = vsel %vm392_vm0, %v735_v56, %v739_v12  ;;  %12166 = vst [vmem:[#allocation54_spill] sm:$0xff] %v6885_v52  ;;  %v761_v18 = vshll.u32 %v6873_v31, 16  ;;  %v842_v24 = vrot.slane %v6354_v5, 1 }
  0x48   :  { %12164 = vst [vmem:[#allocation52_spill] sm:$0xff] %v6877_v28  ;;  %v773_v15 = vshll.u32 %v6870_v1, 16  ;;  %v843_v39 = vrot.slane %v6378_v22, 1  ;;  %v771_v8 = vor.u32 %v770_v35, %v766_v4  ;;  %vm841_vm1 = vcmask 1046528  }
  0x49   :  { %12165 = vst [vmem:[#allocation53_spill] sm:$0xff] %v6880_v57  ;;  %v851_v5 = vrot.slane %v6388_v29, 1  ;;  %v852_v22 = vrot.slane %v6417_v47, 1  ;;  %v848_v56 = vrot.slane %v6346_v3, 1  ;;  %v849_v12 = vrot.slane %v6368_v16, 1 }
  0x4a   :  { %v775_v2 = vrot.slane %v773_v15, 1  ;;  %v844_v61 = vsel %vm841_vm1, %v842_v24, %v843_v39  ;;  %v845_v4 = vrot.slane %v6397_v38, 1  ;;  %v846_v35 = vrot.slane %v6438_v60, 1 }
  0x4b   :  { %829 = vrot.lane.b32.xlu2 %v6837_v45, %s6280_s27  ;;  %827 = vrot.lane.b32.xlu1 %v6844_v23, %s6280_s27  ;;  %v756_v45 = vshll.u32 %v6862_v62, 16  ;;  %v6916_v15 = vsel %vm841_vm1, %v851_v5, %v852_v22  ;;  %v860_v3 = vrot.slane %v6448_v7, 1  ;;  %v861_v16 = vrot.slane %v6492_v42, 1 }
  0x4c   :  { %825 = vrot.lane.b32.xlu0 %v6856_v20, %s6280_s27  ;;  %v6899_v50 = vsel %vm392_vm0, %v771_v8, %v775_v2  ;;  %v6922_v29 = vsel %vm841_vm1, %v845_v4, %v846_v35  ;;  %v857_v60 = vrot.slane %v6375_v19, 1  ;;  %v855_v24 = vrot.slane %v6361_v10, 1 }
  0x4d   :  { %v758_v46 = vrot.slane %v756_v45, 1  ;;  %v763_v45 = vrot.slane %v761_v18, 1  ;;  %12167 = vst [vmem:[#allocation55_spill] sm:$0xff] %v6899_v50  ;;  %v854_v18 = vrot.slane %v6338_v0, 1  ;;  %v6939_v39 = vsel %vm841_vm1, %v860_v3, %v861_v16 }
  0x4e   :  { %v869_v19 = vrot.slane %v6501_v51, 1  ;;  %v870_v0 = vrot.slane %v6539_v21, 1  ;;  %v867_v2 = vrot.slane %v6451_v9, 1  ;;  %v878_v9 = vrot.slane %v6555_v41, 1 }
  0x4f   :  { %v759_v32 = vor.u32 %v758_v46, %v754_v13  ;;  %v6919_v13 = vsel %vm841_vm1, %v848_v56, %v849_v12  ;;  %v858_v46 = vrot.slane %v6391_v33, 1  ;;  %v6945_v42 = vsel %vm841_vm1, %v854_v18, %v855_v24 }
  0x50   :  { %v866_v33 = vrot.slane %v6410_v44, 1  ;;  %v879_v22 = vrot.slane %v6594_v30, 1  ;;  %v875_v56 = vrot.slane %v6470_v26, 1  ;;  %v876_v12 = vrot.slane %v6494_v48, 1 }
  0x51   :  { %v6902_v53 = vsel %vm392_vm0, %v759_v32, %v763_v45  ;;  %v6942_v8 = vsel %vm841_vm1, %v857_v60, %v858_v46  ;;  %v863_v32 = vrot.slane %v6433_v58, 1  ;;  %v864_v45 = vrot.slane %v6465_v25, 1 }
  0x52   :  { %12168 = vst [vmem:[#allocation56_spill] sm:$0xff] %v6902_v53  ;;  %v6965_v5 = vsel %vm841_vm1, %v866_v33, %v867_v2  ;;  %v872_v4 = vrot.slane %v6485_v37, 1  ;;  %v873_v35 = vrot.slane %v6519_v6, 1  ;;  %v6985_v3 = vsel %vm841_vm1, %v878_v9, %v879_v22 }
  0x53   :  { %835 = vrot.lane.b32.xlu2 %v6877_v28, %s6280_s27  ;;  %833 = vrot.lane.b32.xlu1 %v6880_v57, %s6280_s27  ;;  %v6968_v21 = vsel %vm841_vm1, %v863_v32, %v864_v45  ;;  %v6988_v16 = vsel %vm841_vm1, %v875_v56, %v876_v12  ;;  %v887_v48 = vrot.slane %v6607_v55, 1  ;;  %v888_v60 = vrot.slane %v6644_v34, 1  ;;  %v12178_v12 = vld [vmem:[#allocation18_spill] sm:$0xff] }
  0x54   :  { %831 = vrot.lane.b32.xlu0 %v6885_v52, %s6280_s27  ;;  %v6991_v30 = vsel %vm841_vm1, %v872_v4, %v873_v35  ;;  %v884_v46 = vrot.slane %v6524_v11, 1  ;;  %v885_v18 = vrot.slane %v6549_v36, 1  ;;  %v896_v36 = vrot.slane %v6653_v40, 1  ;;  %v12179_v35 = vld [vmem:[#allocation19_spill] sm:$0xff] }
  0x55   :  { %v7012_v2 = vsel %vm841_vm1, %v887_v48, %v888_v60  ;;  %v893_v9 = vrot.slane %v6565_v54, 1  ;;  %v894_v22 = vrot.slane %v6602_v49, 1  ;;  %v890_v4 = vrot.slane %v12178_v12, 1 }
  0x56   :  { %12175 = vst [vmem:[#allocation63_spill] sm:$0xff] %v7012_v2  ;;  %v7015_v34 = vsel %vm841_vm1, %v884_v46, %v885_v18  ;;  %v891_v48 = vrot.slane %v12179_v35, 1  ;;  %v905_v49 = vrot.slane %v6710_v43, 1  ;;  %vm1478_vm2 = vcmask 31744  }
  0x57   :  { %vm1543_vm3 = vcmask 64512   ;;  %vm1608_vm4 = vcmask 97280   ;;  %vm1738_vm5 = vcmask 162816   ;;  %vm1673_vm6 = vcmask 130048  }
  0x58   :  { %v892_v18 = vsel %vm841_vm1, %v890_v4, %v891_v48  ;;  %v12188_v4 = vld [vmem:[#allocation23_spill] sm:$0xff]  ;;  %vm1803_vm7 = vcmask 195584   ;;  %vm1868_vm8 = vcmask 228352   ;;  %vm1933_vm9 = vcmask 261120  }
  0x59   :  { %v899_v48 = vrot.slane %v12188_v4, 1  ;;  %vm1998_vm10 = vcmask 293888   ;;  %vm4703_vm14 = vcmask 326656   ;;  %vm4768_vm15 = vcmask 392192  }
  0x5b   :  { %938 = vrot.lane.b32.xlu2 %v844_v61, %s6281_s19  ;;  %839 = vrot.lane.b32.xlu1 %v6899_v50, %s6280_s27  ;;  %v6962_v61 = vsel %vm841_vm1, %v869_v19, %v870_v0  ;;  %v881_v19 = vrot.slane %v6531_v17, 1  ;;  %v882_v0 = vrot.slane %v6575_v63, 1  ;;  %v897_v63 = vrot.slane %v6685_v59, 1 }
  0x5c   :  { %837 = vrot.lane.b32.xlu0 %v6902_v53, %s6280_s27  ;;  %v7042_v59 = vsel %vm841_vm1, %v893_v9, %v894_v22  ;;  %v12186_v9 = vld [vmem:[#allocation25_spill] sm:$0xff] }
  0x5d   :  { %v7018_v32 = vsel %vm841_vm1, %v881_v19, %v882_v0  ;;  %v7039_v46 = vsel %vm841_vm1, %v896_v36, %v897_v63  ;;  %12182 = vst [vmem:[#allocation66_spill] sm:$0xff] %v7042_v59  ;;  %v12183_v19 = vld [vmem:[#allocation33_spill] sm:$0xff]  ;;  %v12185_v36 = vld [vmem:[#allocation20_spill] sm:$0xff]  ;;  %v903_v22 = vrot.slane %v12186_v9, 1  ;;  %v12193_v9 = vld [vmem:[#allocation39_spill] sm:$0xff] }
  0x5e   :  { %12181 = vst [vmem:[#allocation19_spill] sm:$0xff] %v7039_v46  ;;  %v906_v0 = vrot.slane %v12183_v19, 1  ;;  %v902_v63 = vrot.slane %v12185_v36, 1 }
  0x60   :  { %v7066_v19 = vsel %vm841_vm1, %v902_v63, %v903_v22  ;;  %v12197_v22 = vld [vmem:[#allocation31_spill] sm:$0xff] }
  0x63   :  { %944 = vrot.lane.b32.xlu2 %v6916_v15, %s6281_s19  ;;  %942 = vrot.lane.b32.xlu1 %v6919_v13, %s6281_s19 }
  0x64   :  { %940 = vrot.lane.b32.xlu0 %v6922_v29, %s6281_s19 }
  0x65   :  { %v6932_v47 = vpop.permute.xlu2 %785 }
  0x66   :  { %12169 = vst [vmem:[#allocation57_spill] sm:$0xff] %v6932_v47 }
  0x6b   :  { %950 = vrot.lane.b32.xlu2 %v6939_v39, %s6281_s19  ;;  %948 = vrot.lane.b32.xlu1 %v6942_v8, %s6281_s19 }
  0x6c   :  { %946 = vrot.lane.b32.xlu0 %v6945_v42, %s6281_s19 }
  0x6d   :  { %v6955_v10 = vpop.permute.xlu2 %787 }
  0x6e   :  { %12170 = vst [vmem:[#allocation58_spill] sm:$0xff] %v6955_v10  ;;  %v7063_v10 = vsel %vm841_vm1, %v905_v49, %v906_v0  ;;  %v12196_v0 = vld [vmem:[#allocation27_spill] sm:$0xff] }
  0x6f   :  { %12191 = vst [vmem:[#allocation23_spill] sm:$0xff] %v7063_v10  ;;  %v911_v63 = vrot.slane %v12196_v0, 1 }
  0x73   :  { %956 = vrot.lane.b32.xlu2 %v6962_v61, %s6281_s19  ;;  %954 = vrot.lane.b32.xlu1 %v6965_v5, %s6281_s19 }
  0x74   :  { %952 = vrot.lane.b32.xlu0 %v6968_v21, %s6281_s19 }
  0x75   :  { %v6978_v25 = vpop.permute.xlu2 %793 }
  0x76   :  { %12171 = vst [vmem:[#allocation59_spill] sm:$0xff] %v6978_v25 }
  0x7b   :  { %962 = vrot.lane.b32.xlu2 %v6985_v3, %s6281_s19  ;;  %960 = vrot.lane.b32.xlu1 %v6988_v16, %s6281_s19 }
  0x7c   :  { %958 = vrot.lane.b32.xlu0 %v6991_v30, %s6281_s19 }
  0x7d   :  { %v7001_v6 = vpop.permute.xlu2 %799  ;;  %v7005_v24 = vpop.permute.xlu1 %781 }
  0x7e   :  { %12172 = vst [vmem:[#allocation60_spill] sm:$0xff] %v7001_v6  ;;  %v7009_v33 = vpop.permute.xlu0 %777 }
  0x7f   :  { %12173 = vst [vmem:[#allocation61_spill] sm:$0xff] %v7005_v24 }
  0x80   :  { %12174 = vst [vmem:[#allocation62_spill] sm:$0xff] %v7009_v33 }
  0x83   :  { %968 = vrot.lane.b32.xlu2 %v7012_v2, %s6281_s19  ;;  %966 = vrot.lane.b32.xlu1 %v7015_v34, %s6281_s19 }
  0x84   :  { %964 = vrot.lane.b32.xlu0 %v7018_v32, %s6281_s19 }
  0x85   :  { %v7028_v45 = vpop.permute.xlu2 %805  ;;  %v7032_v56 = vpop.permute.xlu1 %783 }
  0x86   :  { %12176 = vst [vmem:[#allocation64_spill] sm:$0xff] %v7028_v45  ;;  %v7036_v60 = vpop.permute.xlu0 %779  ;;  %v12189_v45 = vld [vmem:[#allocation26_spill] sm:$0xff] }
  0x87   :  { %12177 = vst [vmem:[#allocation65_spill] sm:$0xff] %v7032_v56  ;;  %v900_v6 = vrot.slane %v12189_v45, 1  ;;  %v12194_v45 = vld [vmem:[#allocation42_spill] sm:$0xff]  ;;  %v12200_v56 = vld [vmem:[#allocation32_spill] sm:$0xff] }
  0x88   :  { %12180 = vst [vmem:[#allocation18_spill] sm:$0xff] %v7036_v60  ;;  %v909_v24 = vrot.slane %v12200_v56, 1  ;;  %v12205_v56 = vld [vmem:[#allocation50_spill] sm:$0xff] }
  0x89   :  { %12192 = vst [vmem:[#allocation26_spill] sm:$0xff] %v7066_v19 }
  0x8b   :  { %974 = vrot.lane.b32.xlu2 %v7039_v46, %s6281_s19  ;;  %972 = vrot.lane.b32.xlu1 %v7042_v59, %s6281_s19 }
  0x8c   :  { %970 = vrot.lane.b32.xlu0 %v892_v18, %s6281_s19  ;;  %v7069_v18 = vsel %vm841_vm1, %v899_v48, %v900_v6  ;;  %v912_v6 = vrot.slane %v12197_v22, 1  ;;  %v923_v22 = vrot.slane %v6816_v27, 1 }
  0x8d   :  { %v7052_v12 = vpop.permute.xlu2 %811  ;;  %v7056_v35 = vpop.permute.xlu1 %791 }
  0x8e   :  { %12184 = vst [vmem:[#allocation33_spill] sm:$0xff] %v7052_v12  ;;  %v7060_v25 = vpop.permute.xlu0 %789  ;;  %v915_v12 = vrot.slane %v12194_v45, 1  ;;  %v7093_v45 = vsel %vm841_vm1, %v911_v63, %v912_v6  ;;  %v12208_v6 = vld [vmem:[#allocation40_spill] sm:$0xff] }
  0x8f   :  { %12187 = vst [vmem:[#allocation20_spill] sm:$0xff] %v7056_v35  ;;  %v914_v35 = vrot.slane %v12193_v9, 1 }
  0x90   :  { %12190 = vst [vmem:[#allocation25_spill] sm:$0xff] %v7060_v25  ;;  %v12199_v25 = vld [vmem:[#allocation29_spill] sm:$0xff] }
  0x91   :  { %v908_v47 = vrot.slane %v12199_v25, 1  ;;  %v7090_v33 = vsel %vm841_vm1, %v914_v35, %v915_v12  ;;  %12203 = vst [vmem:[#allocation29_spill] sm:$0xff] %v7093_v45  ;;  %v12207_v35 = vld [vmem:[#allocation34_spill] sm:$0xff] }
  0x92   :  { %12202 = vst [vmem:[#allocation31_spill] sm:$0xff] %v7090_v33  ;;  %v920_v63 = vrot.slane %v12207_v35, 1 }
  0x93   :  { %980 = vrot.lane.b32.xlu2 %v7063_v10, %s6281_s19  ;;  %978 = vrot.lane.b32.xlu1 %v7066_v19, %s6281_s19  ;;  %v12211_v19 = vld [vmem:[#allocation41_spill] sm:$0xff] }
  0x94   :  { %976 = vrot.lane.b32.xlu0 %v7069_v18, %s6281_s19  ;;  %v918_v10 = vrot.slane %v12211_v19, 1  ;;  %v933_v19 = vrot.slane %v6873_v31, 1 }
  0x95   :  { %v7079_v49 = vpop.permute.xlu2 %817  ;;  %v7083_v48 = vpop.permute.xlu1 %797 }
  0x96   :  { %12195 = vst [vmem:[#allocation39_spill] sm:$0xff] %v7079_v49  ;;  %v7087_v60 = vpop.permute.xlu0 %795  ;;  %v7096_v49 = vsel %vm841_vm1, %v908_v47, %v909_v24  ;;  %v921_v47 = vrot.slane %v12208_v6, 1  ;;  %v932_v6 = vrot.slane %v6862_v62, 1 }
  0x97   :  { %12198 = vst [vmem:[#allocation42_spill] sm:$0xff] %v7083_v48  ;;  %v924_v48 = vrot.slane %v12205_v56, 1 }
  0x98   :  { %12201 = vst [vmem:[#allocation27_spill] sm:$0xff] %v7087_v60  ;;  %v12210_v60 = vld [vmem:[#allocation37_spill] sm:$0xff]  ;;  %v7120_v56 = vsel %vm841_vm1, %v920_v63, %v921_v47  ;;  %v12218_v47 = vld [vmem:[#allocation48_spill] sm:$0xff]  ;;  %v7144_v46 = vsel %vm841_vm1, %v932_v6, %v933_v19  ;;  %v935_v6 = vrot.slane %v6853_v14, 1  ;;  %v936_v19 = vrot.slane %v6870_v1, 1 }
  0x99   :  { %12204 = vst [vmem:[#allocation32_spill] sm:$0xff] %v7096_v49  ;;  %v7117_v59 = vsel %vm841_vm1, %v923_v22, %v924_v48  ;;  %v12217_v22 = vld [vmem:[#allocation44_spill] sm:$0xff] }
  0x9a   :  { %12213 = vst [vmem:[#allocation37_spill] sm:$0xff] %v7117_v59  ;;  %v929_v63 = vrot.slane %v12217_v22, 1 }
  0x9b   :  { %986 = vrot.lane.b32.xlu2 %v7090_v33, %s6281_s19  ;;  %984 = vrot.lane.b32.xlu1 %v7093_v45, %s6281_s19  ;;  %v917_v33 = vrot.slane %v12210_v60, 1  ;;  %12214 = vst [vmem:[#allocation41_spill] sm:$0xff] %v7120_v56 }
  0x9c   :  { %982 = vrot.lane.b32.xlu0 %v7096_v49, %s6281_s19 }
  0x9d   :  { %v7106_v12 = vpop.permute.xlu2 %823  ;;  %v7110_v24 = vpop.permute.xlu1 %803 }
  0x9e   :  { %12206 = vst [vmem:[#allocation50_spill] sm:$0xff] %v7106_v12  ;;  %v7114_v45 = vpop.permute.xlu0 %801  ;;  %v7123_v12 = vsel %vm841_vm1, %v917_v33, %v918_v10  ;;  %v930_v10 = vrot.slane %v12218_v47, 1 }
  0x9f   :  { %12209 = vst [vmem:[#allocation34_spill] sm:$0xff] %v7110_v24  ;;  %v12220_v24 = vld [vmem:[#allocation46_spill] sm:$0xff] }
  0xa0   :  { %12212 = vst [vmem:[#allocation40_spill] sm:$0xff] %v7114_v45  ;;  %v926_v45 = vrot.slane %v12220_v24, 1  ;;  %v7147_v31 = vsel %vm841_vm1, %v929_v63, %v930_v10 }
  0xa1   :  { %12215 = vst [vmem:[#allocation67_spill] sm:$0xff] %v7123_v12 }
  0xa2   :  { %12223 = vst [vmem:[#allocation46_spill] sm:$0xff] %v7144_v46 }
  0xa3   :  { %992 = vrot.lane.b32.xlu2 %v7117_v59, %s6281_s19  ;;  %990 = vrot.lane.b32.xlu1 %v7120_v56, %s6281_s19  ;;  %v12221_v59 = vld [vmem:[#allocation49_spill] sm:$0xff] }
  0xa4   :  { %988 = vrot.lane.b32.xlu0 %v7123_v12, %s6281_s19  ;;  %v927_v49 = vrot.slane %v12221_v59, 1  ;;  %12224 = vst [vmem:[#allocation49_spill] sm:$0xff] %v7147_v31  ;;  %v12303_v12 = vld [vmem:[#allocation51_spill] sm:$0xff] }
  0xa5   :  { %v7133_v48 = vpop.permute.xlu2 %829  ;;  %v7137_v33 = vpop.permute.xlu1 %809 }
  0xa6   :  { %12216 = vst [vmem:[#allocation68_spill] sm:$0xff] %v7133_v48  ;;  %v7141_v56 = vpop.permute.xlu0 %807  ;;  %v7150_v48 = vsel %vm841_vm1, %v926_v45, %v927_v49  ;;  %v7167_v49 = vsel %vm841_vm1, %v935_v6, %v936_v19  ;;  %v7172_v45 = vld [vmem:[%s11810_s0 + $0x18] sm:$0xff] }
  0xa7   :  { %12219 = vst [vmem:[#allocation44_spill] sm:$0xff] %v7137_v33  ;;  %v7189_v19 = vld [vmem:[%s11810_s0 + $0x3c] sm:$0xff] }
  0xa8   :  { %12222 = vst [vmem:[#allocation48_spill] sm:$0xff] %v7141_v56 }
  0xa9   :  { %12225 = vst [vmem:[#allocation69_spill] sm:$0xff] %v7150_v48 }
  0xaa   :  { %12229 = vst [vmem:[#allocation73_spill] sm:$0xff] %v7167_v49 }
  0xab   :  { %998 = vrot.lane.b32.xlu2 %v7144_v46, %s6281_s19  ;;  %996 = vrot.lane.b32.xlu1 %v7147_v31, %s6281_s19 }
  0xac   :  { %994 = vrot.lane.b32.xlu0 %v7150_v48, %s6281_s19 }
  0xad   :  { %v7158_v59 = vpop.permute.xlu2 %835  ;;  %v7160_v47 = vpop.permute.xlu1 %815 }
  0xae   :  { %12226 = vst [vmem:[#allocation70_spill] sm:$0xff] %v7158_v59  ;;  %v7164_v63 = vpop.permute.xlu0 %813  ;;  %v7203_v59 = vld [vmem:[%s11810_s0 + $0x24] sm:$0xff] }
  0xaf   :  { %12227 = vst [vmem:[#allocation71_spill] sm:$0xff] %v7160_v47 }
  0xb0   :  { %12228 = vst [vmem:[#allocation72_spill] sm:$0xff] %v7164_v63 }
  0xb3   :  { %1014 = vrot.lane.b32.xlu2 %v7172_v45, %s6282_s21  ;;  %1012 = vrot.lane.b32.xlu1 %v6397_v38, %s6282_s21  ;;  %v7196_v38 = vld [vmem:[%s11810_s0 + $0x30] sm:$0xff] }
  0xb4   :  { %1000 = vrot.lane.b32.xlu0 %v7167_v49, %s6281_s19 }
  0xb5   :  { %v7180_v1 = vpop.permute.xlu2 %938  ;;  %v7182_v10 = vpop.permute.xlu1 %821 }
  0xb6   :  { %12230 = vst [vmem:[#allocation74_spill] sm:$0xff] %v7182_v10  ;;  %v7184_v6 = vpop.permute.xlu0 %819 }
  0xb7   :  { %12231 = vst [vmem:[#allocation75_spill] sm:$0xff] %v7184_v6 }
  0xbb   :  { %1020 = vrot.lane.b32.xlu2 %v7189_v19, %s6282_s21  ;;  %1018 = vrot.lane.b32.xlu1 %v7196_v38, %s6282_s21 }
  0xbc   :  { %1016 = vrot.lane.b32.xlu0 %v7203_v59, %s6282_s21 }
  0xbd   :  { %v7207_v56 = vpop.permute.xlu2 %944  ;;  %v7209_v49 = vpop.permute.xlu1 %827 }
  0xbe   :  { %12232 = vst [vmem:[#allocation76_spill] sm:$0xff] %v7209_v49  ;;  %v7211_v46 = vpop.permute.xlu0 %825  ;;  %v12267_v49 = vld [vmem:[#allocation7_spill] sm:$0xff] }
  0xbf   :  { %12233 = vst [vmem:[#allocation77_spill] sm:$0xff] %v7211_v46  ;;  %v12271_v46 = vld [vmem:[#allocation17_spill] sm:$0xff] }
  0xc3   :  { %1026 = vrot.lane.b32.xlu2 %v6410_v44, %s6282_s21  ;;  %1024 = vrot.lane.b32.xlu1 %v6433_v58, %s6282_s21 }
  0xc4   :  { %1022 = vrot.lane.b32.xlu0 %v6448_v7, %s6282_s21 }
  0xc5   :  { %v7219_v10 = vpop.permute.xlu2 %950  ;;  %v7221_v6 = vpop.permute.xlu1 %833 }
  0xc6   :  { %12234 = vst [vmem:[#allocation78_spill] sm:$0xff] %v7219_v10  ;;  %v7223_v31 = vpop.permute.xlu0 %831  ;;  %v12282_v10 = vld [vmem:[#allocation30_spill] sm:$0xff] }
  0xc7   :  { %12235 = vst [vmem:[#allocation79_spill] sm:$0xff] %v7221_v6  ;;  %v7317_v6 = vld [vmem:[%s11810_s0 + $0x198] sm:$0xff] }
  0xc8   :  { %12236 = vst [vmem:[#allocation80_spill] sm:$0xff] %v7223_v31  ;;  %v12262_v31 = vld [vmem:[#allocation11_spill] sm:$0xff] }
  0xcb   :  { %1032 = vrot.lane.b32.xlu2 %v6470_v26, %s6282_s21  ;;  %1030 = vrot.lane.b32.xlu1 %v6485_v37, %s6282_s21 }
  0xcc   :  { %1028 = vrot.lane.b32.xlu0 %v6501_v51, %s6282_s21 }
  0xcd   :  { %v7231_v44 = vpop.permute.xlu2 %956  ;;  %v7233_v58 = vpop.permute.xlu1 %839 }
  0xce   :  { %12237 = vst [vmem:[#allocation81_spill] sm:$0xff] %v7231_v44  ;;  %v7235_v7 = vpop.permute.xlu0 %837 }
  0xcf   :  { %12238 = vst [vmem:[#allocation82_spill] sm:$0xff] %v7233_v58  ;;  %v7252_v58 = vld [vmem:[%s11810_s0 + $0xc0] sm:$0xff] }
  0xd0   :  { %12239 = vst [vmem:[#allocation83_spill] sm:$0xff] %v7235_v7 }
  0xd1   :  { %12241 = vst [vmem:[#allocation85_spill] sm:$0xff] %v7252_v58 }
  0xd3   :  { %1038 = vrot.lane.b32.xlu2 %v6524_v11, %s6282_s21  ;;  %1036 = vrot.lane.b32.xlu1 %v6531_v17, %s6282_s21 }
  0xd4   :  { %1034 = vrot.lane.b32.xlu0 %v6555_v41, %s6282_s21 }
  0xd5   :  { %v7243_v26 = vpop.permute.xlu2 %962  ;;  %v7245_v37 = vpop.permute.xlu1 %942 }
  0xd6   :  { %12240 = vst [vmem:[#allocation84_spill] sm:$0xff] %v7243_v26  ;;  %v7247_v51 = vpop.permute.xlu0 %940 }
  0xdb   :  { %1044 = vrot.lane.b32.xlu2 %v6565_v54, %s6282_s21  ;;  %1042 = vrot.lane.b32.xlu1 %v7252_v58, %s6282_s21 }
  0xdc   :  { %1040 = vrot.lane.b32.xlu0 %v6607_v55, %s6282_s21 }
  0xdd   :  { %v7260_v11 = vpop.permute.xlu2 %968  ;;  %v7262_v17 = vpop.permute.xlu1 %948 }
  0xde   :  { %12242 = vst [vmem:[#allocation86_spill] sm:$0xff] %v7260_v11  ;;  %v7264_v41 = vpop.permute.xlu0 %946  ;;  %v12260_v11 = vld [vmem:[#allocation10_spill] sm:$0xff] }
  0xdf   :  { %12243 = vst [vmem:[#allocation87_spill] sm:$0xff] %v7262_v17 }
  0xe0   :  { %12244 = vst [vmem:[#allocation88_spill] sm:$0xff] %v7264_v41 }
  0xe3   :  { %1050 = vrot.lane.b32.xlu2 %v12185_v36, %s6282_s21  ;;  %1048 = vrot.lane.b32.xlu1 %v12188_v4, %s6282_s21 }
  0xe4   :  { %1046 = vrot.lane.b32.xlu0 %v6653_v40, %s6282_s21 }
  0xe5   :  { %v7272_v54 = vpop.permute.xlu2 %974  ;;  %v7274_v7 = vpop.permute.xlu1 %954 }
  0xe6   :  { %12245 = vst [vmem:[#allocation89_spill] sm:$0xff] %v7272_v54  ;;  %v7276_v55 = vpop.permute.xlu0 %952  ;;  %v12283_v54 = vld [vmem:[#allocation21_spill] sm:$0xff] }
  0xe7   :  { %12246 = vst [vmem:[#allocation90_spill] sm:$0xff] %v7274_v7  ;;  %v12278_v7 = vld [vmem:[#allocation15_spill] sm:$0xff] }
  0xe8   :  { %12247 = vst [vmem:[#allocation91_spill] sm:$0xff] %v7276_v55 }
  0xeb   :  { %1056 = vrot.lane.b32.xlu2 %v12196_v0, %s6282_s21  ;;  %1054 = vrot.lane.b32.xlu1 %v12199_v25, %s6282_s21 }
  0xec   :  { %1052 = vrot.lane.b32.xlu0 %v6710_v43, %s6282_s21 }
  0xed   :  { %v7284_v36 = vpop.permute.xlu2 %980  ;;  %v7286_v4 = vpop.permute.xlu1 %960 }
  0xee   :  { %12248 = vst [vmem:[#allocation92_spill] sm:$0xff] %v7284_v36  ;;  %v7288_v40 = vpop.permute.xlu0 %958  ;;  %v12277_v36 = vld [vmem:[#allocation24_spill] sm:$0xff] }
  0xef   :  { %12249 = vst [vmem:[#allocation93_spill] sm:$0xff] %v7286_v4  ;;  %v12272_v4 = vld [vmem:[#allocation12_spill] sm:$0xff] }
  0xf0   :  { %12250 = vst [vmem:[#allocation94_spill] sm:$0xff] %v7288_v40 }
  0xf3   :  { %1062 = vrot.lane.b32.xlu2 %v12207_v35, %s6282_s21  ;;  %1060 = vrot.lane.b32.xlu1 %v12210_v60, %s6282_s21 }
  0xf4   :  { %1058 = vrot.lane.b32.xlu0 %v12193_v9, %s6282_s21 }
  0xf5   :  { %v7296_v0 = vpop.permute.xlu2 %986  ;;  %v7298_v25 = vpop.permute.xlu1 %966 }
  0xf6   :  { %12251 = vst [vmem:[#allocation95_spill] sm:$0xff] %v7296_v0  ;;  %v7300_v43 = vpop.permute.xlu0 %964 }
  0xf7   :  { %12252 = vst [vmem:[#allocation96_spill] sm:$0xff] %v7298_v25 }
  0xf8   :  { %12253 = vst [vmem:[#allocation97_spill] sm:$0xff] %v7300_v43  ;;  %v12266_v43 = vld [vmem:[#allocation9_spill] sm:$0xff] }
  0xfb   :  { %1068 = vrot.lane.b32.xlu2 %v12217_v22, %s6282_s21  ;;  %1066 = vrot.lane.b32.xlu1 %v12220_v24, %s6282_s21 }
  0xfc   :  { %1064 = vrot.lane.b32.xlu0 %v6816_v27, %s6282_s21 }
  0xfd   :  { %v7308_v35 = vpop.permute.xlu2 %992  ;;  %v7310_v60 = vpop.permute.xlu1 %972 }
  0xfe   :  { %12254 = vst [vmem:[#allocation98_spill] sm:$0xff] %v7308_v35  ;;  %v7312_v9 = vpop.permute.xlu0 %970  ;;  %v12261_v35 = vld [vmem:[#allocation8_spill] sm:$0xff] }
  0xff   :  { %12255 = vst [vmem:[#allocation99_spill] sm:$0xff] %v7310_v60 }
 0x100   :  { %12256 = vst [vmem:[#allocation100_spill] sm:$0xff] %v7312_v9 }
 0x103   :  { %1074 = vrot.lane.b32.xlu2 %v7317_v6, %s6282_s21  ;;  %1072 = vrot.lane.b32.xlu1 %v6853_v14, %s6282_s21 }
 0x104   :  { %1070 = vrot.lane.b32.xlu0 %v6862_v62, %s6282_s21 }
 0x105   :  { %v7325_v27 = vpop.permute.xlu2 %998  ;;  %v7327_v24 = vpop.permute.xlu1 %978 }
 0x106   :  { %12257 = vst [vmem:[#allocation101_spill] sm:$0xff] %v7325_v27  ;;  %v7329_v22 = vpop.permute.xlu0 %976  ;;  %v12265_v27 = vld [vmem:[#allocation14_spill] sm:$0xff] }
 0x107   :  { %12258 = vst [vmem:[#allocation102_spill] sm:$0xff] %v7327_v24  ;;  %v12279_v24 = vld [vmem:[#allocation16_spill] sm:$0xff] }
 0x108   :  { %12259 = vst [vmem:[#allocation103_spill] sm:$0xff] %v7329_v22 }
 0x10b   :  { %1110 = vrot.lane.b32.xlu2 %v12260_v11, %s6283_s10  ;;  %1108 = vrot.lane.b32.xlu1 %v12261_v35, %s6283_s10 }
 0x10c   :  { %1106 = vrot.lane.b32.xlu0 %v12262_v31, %s6283_s10 }
 0x10d   :  { %v7337_v14 = vpop.permute.xlu2 %1014  ;;  %v7339_v25 = vpop.permute.xlu1 %984 }
 0x10e   :  { %12263 = vst [vmem:[#allocation10_spill] sm:$0xff] %v7339_v25  ;;  %v7341_v62 = vpop.permute.xlu0 %982  ;;  %v12273_v25 = vld [vmem:[#allocation13_spill] sm:$0xff] }
 0x10f   :  { %12264 = vst [vmem:[#allocation8_spill] sm:$0xff] %v7341_v62 }
 0x113   :  { %1116 = vrot.lane.b32.xlu2 %v12265_v27, %s6283_s10  ;;  %1114 = vrot.lane.b32.xlu1 %v12266_v43, %s6283_s10 }
 0x114   :  { %1112 = vrot.lane.b32.xlu0 %v12267_v49, %s6283_s10 }
 0x115   :  { %v7349_v26 = vpop.permute.xlu2 %1020  ;;  %v7351_v0 = vpop.permute.xlu1 %990 }
 0x116   :  { %12268 = vst [vmem:[#allocation11_spill] sm:$0xff] %v7349_v26  ;;  %v7353_v31 = vpop.permute.xlu0 %988  ;;  %v12287_v26 = vld [vmem:[#allocation38_spill] sm:$0xff] }
 0x117   :  { %12269 = vst [vmem:[#allocation14_spill] sm:$0xff] %v7351_v0  ;;  %v78_v0 = vld [vmem:[%s11810_s0 + $0xc8] sm:$0x1] }
 0x118   :  { %12270 = vst [vmem:[#allocation9_spill] sm:$0xff] %v7353_v31  ;;  %v1078_v31 = vunpack.c.l.b16 %v78_v0  ;;  %v1083_v0 = vshrl.u32 %v7252_v58, 16 }
 0x11b   :  { %1122 = vrot.lane.b32.xlu2 %v12271_v46, %s6283_s10  ;;  %1120 = vrot.lane.b32.xlu1 %v12272_v4, %s6283_s10 }
 0x11c   :  { %1118 = vrot.lane.b32.xlu0 %v12273_v25, %s6283_s10 }
 0x11d   :  { %v7361_v40 = vpop.permute.xlu2 %1026  ;;  %v7363_v62 = vpop.permute.xlu1 %996 }
 0x11e   :  { %12274 = vst [vmem:[#allocation7_spill] sm:$0xff] %v7361_v40  ;;  %v7365_v44 = vpop.permute.xlu0 %994 }
 0x11f   :  { %12275 = vst [vmem:[#allocation17_spill] sm:$0xff] %v7363_v62  ;;  %v7380_v62 = vpack.c.b16 %v1078_v31, %v1078_v31 }
 0x120   :  { %12276 = vst [vmem:[#allocation12_spill] sm:$0xff] %v7365_v44  ;;  %v1085_v44 = vshll.u32 %v7252_v58, 16 }
 0x121   :  { %v1090_v47 = vshll.u32 %v7380_v62, 16 }
 0x122   :  { %v1087_v22 = vrot.slane %v1085_v44, 1 }
 0x123   :  { %1128 = vrot.lane.b32.xlu2 %v12277_v36, %s6283_s10  ;;  %1126 = vrot.lane.b32.xlu1 %v12278_v7, %s6283_s10 }
 0x124   :  { %1124 = vrot.lane.b32.xlu0 %v12279_v24, %s6283_s10  ;;  %v1088_v17 = vor.u32 %v1087_v22, %v1083_v0 }
 0x125   :  { %v7376_v48 = vpop.permute.xlu2 %1032  ;;  %v7378_v40 = vpop.permute.xlu1 %1012 }
 0x126   :  { %12280 = vst [vmem:[#allocation13_spill] sm:$0xff] %v7376_v48  ;;  %v7383_v55 = vpop.permute.xlu0 %1000  ;;  %v12284_v48 = vld [vmem:[#allocation22_spill] sm:$0xff] }
 0x127   :  { %12281 = vst [vmem:[#allocation24_spill] sm:$0xff] %v7383_v55  ;;  %v1092_v55 = vrot.slane %v1090_v47, 1  ;;  %v12292_v47 = vld [vmem:[#allocation47_spill] sm:$0xff] }
 0x129   :  { %v7400_v44 = vsel %vm392_vm0, %v1088_v17, %v1092_v55  ;;  %v12293_v17 = vld [vmem:[#allocation35_spill] sm:$0xff]  ;;  %v12294_v55 = vld [vmem:[#allocation36_spill] sm:$0xff] }
 0x12a   :  { %12286 = vst [vmem:[#allocation16_spill] sm:$0xff] %v7400_v44 }
 0x12b   :  { %1134 = vrot.lane.b32.xlu2 %v12282_v10, %s6283_s10  ;;  %1132 = vrot.lane.b32.xlu1 %v12283_v54, %s6283_s10  ;;  %v12288_v10 = vld [vmem:[#allocation28_spill] sm:$0xff] }
 0x12c   :  { %1130 = vrot.lane.b32.xlu0 %v12284_v48, %s6283_s10 }
 0x12d   :  { %v7393_v31 = vpop.permute.xlu2 %1038  ;;  %v7395_v63 = vpop.permute.xlu1 %1018 }
 0x12e   :  { %12285 = vst [vmem:[#allocation15_spill] sm:$0xff] %v7393_v31  ;;  %v7397_v60 = vpop.permute.xlu0 %1016 }
 0x133   :  { %1140 = vrot.lane.b32.xlu2 %v12287_v26, %s6283_s10  ;;  %1138 = vrot.lane.b32.xlu1 %v12288_v10, %s6283_s10 }
 0x134   :  { %1136 = vrot.lane.b32.xlu0 %v7400_v44, %s6283_s10 }
 0x135   :  { %v7408_v54 = vpop.permute.xlu2 %1044  ;;  %v7410_v31 = vpop.permute.xlu1 %1024 }
 0x136   :  { %12289 = vst [vmem:[#allocation38_spill] sm:$0xff] %v7408_v54  ;;  %v7412_v22 = vpop.permute.xlu0 %1022 }
 0x137   :  { %12290 = vst [vmem:[#allocation28_spill] sm:$0xff] %v7410_v31  ;;  %v12298_v31 = vld [vmem:[#allocation43_spill] sm:$0xff] }
 0x138   :  { %12291 = vst [vmem:[#allocation104_spill] sm:$0xff] %v7412_v22  ;;  %v12299_v22 = vld [vmem:[#allocation45_spill] sm:$0xff] }
 0x13b   :  { %1146 = vrot.lane.b32.xlu2 %v12292_v47, %s6283_s10  ;;  %1144 = vrot.lane.b32.xlu1 %v12293_v17, %s6283_s10 }
 0x13c   :  { %1142 = vrot.lane.b32.xlu0 %v12294_v55, %s6283_s10 }
 0x13d   :  { %v7420_v0 = vpop.permute.xlu2 %1050  ;;  %v7422_v10 = vpop.permute.xlu1 %1030 }
 0x13e   :  { %12295 = vst [vmem:[#allocation47_spill] sm:$0xff] %v7420_v0  ;;  %v7424_v44 = vpop.permute.xlu0 %1028  ;;  %v132_v0 = vld [vmem:[%s11810_s0 + $0x1a0] sm:$0x1] }
 0x13f   :  { %12296 = vst [vmem:[#allocation35_spill] sm:$0xff] %v7422_v10 }
 0x140   :  { %12297 = vst [vmem:[#allocation36_spill] sm:$0xff] %v7424_v44  ;;  %v1079_v44 = vunpack.c.l.b16 %v132_v0  ;;  %v1095_v0 = vshrl.u32 %v7317_v6, 16 }
 0x143   :  { %1152 = vrot.lane.b32.xlu2 %v6856_v20, %s6283_s10  ;;  %1150 = vrot.lane.b32.xlu1 %v12298_v31, %s6283_s10 }
 0x144   :  { %1148 = vrot.lane.b32.xlu0 %v12299_v22, %s6283_s10 }
 0x145   :  { %v7432_v48 = vpop.permute.xlu2 %1056  ;;  %v7434_v41 = vpop.permute.xlu1 %1036 }
 0x146   :  { %12300 = vst [vmem:[#allocation43_spill] sm:$0xff] %v7432_v48  ;;  %v7439_v10 = vpop.permute.xlu0 %1034  ;;  %v7449_v48 = vpack.c.b16 %v1079_v44, %v1079_v44 }
 0x147   :  { %12301 = vst [vmem:[#allocation45_spill] sm:$0xff] %v7434_v41  ;;  %v1097_v41 = vshll.u32 %v7317_v6, 16 }
 0x148   :  { %12302 = vst [vmem:[#allocation105_spill] sm:$0xff] %v7439_v10 }
 0x149   :  { %12305 = vst [vmem:[#allocation107_spill] sm:$0xff] %v7449_v48  ;;  %v1099_v10 = vrot.slane %v1097_v41, 1 }
 0x14b   :  { %1158 = vrot.lane.b32.xlu2 %v6885_v52, %s6283_s10  ;;  %1156 = vrot.lane.b32.xlu1 %v12303_v12, %s6283_s10  ;;  %v1102_v52 = vshll.u32 %v7449_v48, 16 }
 0x14c   :  { %1154 = vrot.lane.b32.xlu0 %v6844_v23, %s6283_s10 }
 0x14d   :  { %v7447_v54 = vpop.permute.xlu2 %1062  ;;  %v7452_v9 = vpop.permute.xlu1 %1042 }
 0x14e   :  { %12304 = vst [vmem:[#allocation106_spill] sm:$0xff] %v7447_v54  ;;  %v7454_v33 = vpop.permute.xlu0 %1040  ;;  %v1100_v54 = vor.u32 %v1099_v10, %v1095_v0 }
 0x14f   :  { %12306 = vst [vmem:[#allocation108_spill] sm:$0xff] %v7452_v9  ;;  %v1104_v9 = vrot.slane %v1102_v52, 1 }
 0x150   :  { %12307 = vst [vmem:[#allocation109_spill] sm:$0xff] %v7454_v33 }
 0x151   :  { %v7471_v6 = vsel %vm392_vm0, %v1100_v54, %v1104_v9 }
 0x152   :  { %12309 = vst [vmem:[#allocation111_spill] sm:$0xff] %v7471_v6 }
 0x153   :  { %1164 = vrot.lane.b32.xlu2 %v6902_v53, %s6283_s10  ;;  %1162 = vrot.lane.b32.xlu1 %v6877_v28, %s6283_s10 }
 0x154   :  { %1160 = vrot.lane.b32.xlu0 %v6880_v57, %s6283_s10 }
 0x155   :  { %v7464_v44 = vpop.permute.xlu2 %1068  ;;  %v7466_v12 = vpop.permute.xlu1 %1048 }
 0x156   :  { %12308 = vst [vmem:[#allocation110_spill] sm:$0xff] %v7464_v44  ;;  %v7468_v33 = vpop.permute.xlu0 %1046 }
 0x15b   :  { %1176 = vrot.lane.b32.xlu2 %v6922_v29, %s6284_s15  ;;  %1168 = vrot.lane.b32.xlu1 %v7471_v6, %s6283_s10 }
 0x15c   :  { %1166 = vrot.lane.b32.xlu0 %v6899_v50, %s6283_s10 }
 0x15d   :  { %v7479_v41 = vpop.permute.xlu2 %1074  ;;  %v7481_v52 = vpop.permute.xlu1 %1054 }
 0x15e   :  { %12310 = vst [vmem:[#allocation112_spill] sm:$0xff] %v7479_v41  ;;  %v7483_v10 = vpop.permute.xlu0 %1052 }
 0x15f   :  { %12311 = vst [vmem:[#allocation113_spill] sm:$0xff] %v7481_v52  ;;  %v12324_v52 = vld [vmem:[#allocation19_spill] sm:$0xff] }
 0x160   :  { %12312 = vst [vmem:[#allocation114_spill] sm:$0xff] %v7483_v10 }
 0x163   :  { %1182 = vrot.lane.b32.xlu2 %v6945_v42, %s6284_s15  ;;  %1180 = vrot.lane.b32.xlu1 %v6916_v15, %s6284_s15 }
 0x164   :  { %1178 = vrot.lane.b32.xlu0 %v6919_v13, %s6284_s15 }
 0x165   :  { %v7491_v29 = vpop.permute.xlu2 %1110  ;;  %v7493_v54 = vpop.permute.xlu1 %1060 }
 0x166   :  { %12313 = vst [vmem:[#allocation115_spill] sm:$0xff] %v7493_v54  ;;  %v7495_v9 = vpop.permute.xlu0 %1058 }
 0x167   :  { %12314 = vst [vmem:[#allocation116_spill] sm:$0xff] %v7495_v9 }
 0x16b   :  { %1188 = vrot.lane.b32.xlu2 %v6968_v21, %s6284_s15  ;;  %1186 = vrot.lane.b32.xlu1 %v6939_v39, %s6284_s15 }
 0x16c   :  { %1184 = vrot.lane.b32.xlu0 %v6942_v8, %s6284_s15 }
 0x16d   :  { %v7503_v0 = vpop.permute.xlu2 %1116  ;;  %v7505_v41 = vpop.permute.xlu1 %1066 }
 0x16e   :  { %12315 = vst [vmem:[#allocation117_spill] sm:$0xff] %v7505_v41  ;;  %v7507_v44 = vpop.permute.xlu0 %1064  ;;  %v1170_v41 = vrot.slane %v7252_v58, 1 }
 0x16f   :  { %12316 = vst [vmem:[#allocation118_spill] sm:$0xff] %v7507_v44  ;;  %v1171_v44 = vrot.slane %v7380_v62, 1 }
 0x173   :  { %1194 = vrot.lane.b32.xlu2 %v6991_v30, %s6284_s15  ;;  %1192 = vrot.lane.b32.xlu1 %v6962_v61, %s6284_s15 }
 0x174   :  { %1190 = vrot.lane.b32.xlu0 %v6965_v5, %s6284_s15 }
 0x175   :  { %v7515_v54 = vpop.permute.xlu2 %1122  ;;  %v7517_v6 = vpop.permute.xlu1 %1072 }
 0x176   :  { %12317 = vst [vmem:[#allocation119_spill] sm:$0xff] %v7515_v54  ;;  %v7519_v9 = vpop.permute.xlu0 %1070 }
 0x177   :  { %12318 = vst [vmem:[#allocation120_spill] sm:$0xff] %v7517_v6 }
 0x178   :  { %12319 = vst [vmem:[#allocation121_spill] sm:$0xff] %v7519_v9  ;;  %v7536_v9 = vsel %vm841_vm1, %v1170_v41, %v1171_v44 }
 0x179   :  { %12321 = vst [vmem:[#allocation123_spill] sm:$0xff] %v7536_v9 }
 0x17b   :  { %1200 = vrot.lane.b32.xlu2 %v7018_v32, %s6284_s15  ;;  %1198 = vrot.lane.b32.xlu1 %v6985_v3, %s6284_s15 }
 0x17c   :  { %1196 = vrot.lane.b32.xlu0 %v6988_v16, %s6284_s15 }
 0x17d   :  { %v7529_v48 = vpop.permute.xlu2 %1128  ;;  %v7531_v50 = vpop.permute.xlu1 %1108 }
 0x17e   :  { %12320 = vst [vmem:[#allocation122_spill] sm:$0xff] %v7529_v48  ;;  %v7533_v6 = vpop.permute.xlu0 %1106 }
 0x183   :  { %1206 = vrot.lane.b32.xlu2 %v7536_v9, %s6284_s15  ;;  %1204 = vrot.lane.b32.xlu1 %v7012_v2, %s6284_s15  ;;  %v7645_v2 = vld [vmem:[%s11810_s0 + $0x48] sm:$0xff] }
 0x184   :  { %1202 = vrot.lane.b32.xlu0 %v7015_v34, %s6284_s15 }
 0x185   :  { %v7544_v62 = vpop.permute.xlu2 %1134  ;;  %v7546_v53 = vpop.permute.xlu1 %1114 }
 0x186   :  { %12322 = vst [vmem:[#allocation124_spill] sm:$0xff] %v7544_v62  ;;  %v7548_v48 = vpop.permute.xlu0 %1112 }
 0x18b   :  { %1414 = vrot.lane.b32.xlu2 %v6919_v13, %s6285_s16  ;;  %1344 = vrot.lane.b32.xlu1 %v12261_v35, %s6286_s17  ;;  %v12325_v13 = vld [vmem:[#allocation66_spill] sm:$0xff] }
 0x18c   :  { %1250 = vrot.lane.b32.xlu0 %v7172_v45, %s6287_s18 }
 0x18d   :  { %v7556_v44 = vpop.permute.xlu2 %1140  ;;  %v7558_v41 = vpop.permute.xlu1 %1120 }
 0x18e   :  { %12323 = vst [vmem:[#allocation125_spill] sm:$0xff] %v7558_v41  ;;  %v7560_v62 = vpop.permute.xlu0 %1118 }
 0x193   :  { %1212 = vrot.lane.b32.xlu2 %v7069_v18, %s6284_s15  ;;  %1210 = vrot.lane.b32.xlu1 %v12324_v52, %s6284_s15 }
 0x194   :  { %1208 = vrot.lane.b32.xlu0 %v12325_v13, %s6284_s15 }
 0x195   :  { %v7568_v35 = vpop.permute.xlu2 %1146  ;;  %v7570_v54 = vpop.permute.xlu1 %1126 }
 0x196   :  { %12326 = vst [vmem:[#allocation19_spill] sm:$0xff] %v7568_v35  ;;  %v7572_v28 = vpop.permute.xlu0 %1124 }
 0x197   :  { %12327 = vst [vmem:[#allocation66_spill] sm:$0xff] %v7570_v54  ;;  %v12332_v54 = vld [vmem:[#allocation23_spill] sm:$0xff] }
 0x198   :  { %12328 = vst [vmem:[#allocation126_spill] sm:$0xff] %v7572_v28 }
 0x19b   :  { %1416 = vrot.lane.b32.xlu2 %v6916_v15, %s6285_s16  ;;  %1346 = vrot.lane.b32.xlu1 %v12260_v11, %s6286_s17  ;;  %v12333_v15 = vld [vmem:[#allocation26_spill] sm:$0xff] }
 0x19c   :  { %1252 = vrot.lane.b32.xlu0 %v7203_v59, %s6287_s18 }
 0x19d   :  { %v7580_v9 = vpop.permute.xlu2 %1152  ;;  %v7582_v10 = vpop.permute.xlu1 %1132 }
 0x19e   :  { %12329 = vst [vmem:[#allocation127_spill] sm:$0xff] %v7580_v9  ;;  %v7584_v13 = vpop.permute.xlu0 %1130  ;;  %v12336_v9 = vld [vmem:[#allocation32_spill] sm:$0xff] }
 0x19f   :  { %12330 = vst [vmem:[#allocation128_spill] sm:$0xff] %v7582_v10 }
 0x1a0   :  { %12331 = vst [vmem:[#allocation129_spill] sm:$0xff] %v7584_v13 }
 0x1a3   :  { %1254 = vrot.lane.b32.xlu2 %v7196_v38, %s6287_s18  ;;  %1216 = vrot.lane.b32.xlu1 %v12332_v54, %s6284_s15 }
 0x1a4   :  { %1214 = vrot.lane.b32.xlu0 %v12333_v15, %s6284_s15 }
 0x1a5   :  { %v7592_v28 = vpop.permute.xlu2 %1158  ;;  %v7594_v11 = vpop.permute.xlu1 %1138 }
 0x1a6   :  { %12334 = vst [vmem:[#allocation23_spill] sm:$0xff] %v7592_v28  ;;  %v7596_v35 = vpop.permute.xlu0 %1136 }
 0x1a7   :  { %12335 = vst [vmem:[#allocation26_spill] sm:$0xff] %v7596_v35  ;;  %v12339_v35 = vld [vmem:[#allocation29_spill] sm:$0xff] }
 0x1ab   :  { %1218 = vrot.lane.b32.xlu2 %v12336_v9, %s6284_s15  ;;  %1418 = vrot.lane.b32.xlu1 %v6945_v42, %s6285_s16 }
 0x1ac   :  { %1348 = vrot.lane.b32.xlu0 %v12267_v49, %s6286_s17 }
 0x1ad   :  { %v7604_v10 = vpop.permute.xlu2 %1164  ;;  %v7606_v13 = vpop.permute.xlu1 %1144 }
 0x1ae   :  { %12337 = vst [vmem:[#allocation32_spill] sm:$0xff] %v7604_v10  ;;  %v7608_v57 = vpop.permute.xlu0 %1142  ;;  %v7625_v10 = vld [vmem:[%s11810_s0 + $0xf0] sm:$0xff] }
 0x1af   :  { %12338 = vst [vmem:[#allocation130_spill] sm:$0xff] %v7606_v13  ;;  %v6172_v13 = vld [vmem:[%s11811_s1 + $0x28] sm:$0xff] }
 0x1b3   :  { %1350 = vrot.lane.b32.xlu2 %v12266_v43, %s6286_s17  ;;  %1256 = vrot.lane.b32.xlu1 %v7189_v19, %s6287_s18  ;;  %v12342_v43 = vld [vmem:[#allocation31_spill] sm:$0xff] }
 0x1b4   :  { %1220 = vrot.lane.b32.xlu0 %v12339_v35, %s6284_s15 }
 0x1b5   :  { %v7616_v28 = vpop.permute.xlu2 %1176  ;;  %v7618_v42 = vpop.permute.xlu1 %1150 }
 0x1b6   :  { %12340 = vst [vmem:[#allocation29_spill] sm:$0xff] %v7618_v42  ;;  %v7620_v49 = vpop.permute.xlu0 %1148 }
 0x1b7   :  { %12341 = vst [vmem:[#allocation131_spill] sm:$0xff] %v7620_v49  ;;  %v6174_v49 = vld [vmem:[%s11811_s1 + $0x38] sm:$0xff] }
 0x1b8   :  { %2128 = vmatpush.bf16.msra.mxu0 %v6174_v49  ;;  %6183 = vmatpush.bf16.msra.mxu2 %v6174_v49  ;;  %v6173_v49 = vld [vmem:[%s11811_s1 + $0x30] sm:$0xff] }
 0x1bb   :  { %1282 = vrot.lane.b32.xlu2 %v7625_v10, %s6287_s18  ;;  %1222 = vrot.lane.b32.xlu1 %v12342_v43, %s6284_s15 }
 0x1bc   :  { %1420 = vrot.lane.b32.xlu0 %v6942_v8, %s6285_s16  ;;  %2129 = vmatpush.bf16.msra.mxu0 %v6173_v49 }
 0x1bd   :  { %v7633_v41 = vpop.permute.xlu2 %1182  ;;  %v7635_v58 = vpop.permute.xlu1 %1156  ;;  %6184 = vmatpush.bf16.msra.mxu2 %v6173_v49  ;;  %v6171_v49 = vld [vmem:[%s11811_s1 + $0x20] sm:$0xff] }
 0x1be   :  { %12343 = vst [vmem:[#allocation31_spill] sm:$0xff] %v7635_v58  ;;  %v7637_v42 = vpop.permute.xlu0 %1154 }
 0x1bf   :  { %12344 = vst [vmem:[#allocation132_spill] sm:$0xff] %v7637_v42 }
 0x1c0   :  { %2130 = vmatpush.bf16.msra.mxu0 %v6172_v13 }
 0x1c1   :  { %6185 = vmatpush.bf16.msra.mxu2 %v6172_v13 }
 0x1c3   :  { %1258 = vrot.lane.b32.xlu2 %v7645_v2, %s6287_s18  ;;  %1446 = vrot.lane.b32.xlu1 %v12324_v52, %s6285_s16 }
 0x1c4   :  { %1376 = vrot.lane.b32.xlu0 %v12287_v26, %s6286_s17  ;;  %v7668_v26 = vld [vmem:[%s11810_s0 + $0xfc] sm:$0xff]  ;;  %2131 = vmatpush.bf16.msra.mxu0 %v6171_v49 }
 0x1c5   :  { %v7653_v8 = vpop.permute.xlu2 %1188  ;;  %v7655_v58 = vpop.permute.xlu1 %1162  ;;  %6186 = vmatpush.bf16.msra.mxu2 %v6171_v49  ;;  %v6169_v49 = vld [vmem:[%s11811_s1 + $0x10] sm:$0xff] }
 0x1c6   :  { %12345 = vst [vmem:[#allocation133_spill] sm:$0xff] %v7655_v58  ;;  %v7660_v42 = vpop.permute.xlu0 %1160 }
 0x1c7   :  { %12346 = vst [vmem:[#allocation134_spill] sm:$0xff] %v7660_v42 }
 0x1cb   :  { %1284 = vrot.lane.b32.xlu2 %v7668_v26, %s6287_s18  ;;  %1422 = vrot.lane.b32.xlu1 %v6939_v39, %s6285_s16  ;;  %v6170_v39 = vld [vmem:[%s11811_s1 + $0x18] sm:$0xff] }
 0x1cc   :  { %1352 = vrot.lane.b32.xlu0 %v12265_v27, %s6286_s17  ;;  %v7691_v27 = vld [vmem:[%s11810_s0 + $0x54] sm:$0xff]  ;;  %2132 = vmatpush.bf16.msra.mxu0 %v6170_v39 }
 0x1cd   :  { %v7676_v52 = vpop.permute.xlu2 %1194  ;;  %v7678_v58 = vpop.permute.xlu1 %1168  ;;  %6187 = vmatpush.bf16.msra.mxu2 %v6170_v39 }
 0x1ce   :  { %12347 = vst [vmem:[#allocation135_spill] sm:$0xff] %v7676_v52  ;;  %v7683_v42 = vpop.permute.xlu0 %1166 }
 0x1cf   :  { %12348 = vst [vmem:[#allocation136_spill] sm:$0xff] %v7678_v58 }
 0x1d0   :  { %12349 = vst [vmem:[#allocation137_spill] sm:$0xff] %v7683_v42  ;;  %2133 = vmatpush.bf16.msra.mxu0 %v6169_v49 }
 0x1d1   :  { %6188 = vmatpush.bf16.msra.mxu2 %v6169_v49  ;;  %v6167_v49 = vld [vmem:[%s11811_s1] sm:$0xff] }
 0x1d3   :  { %1260 = vrot.lane.b32.xlu2 %v7691_v27, %s6287_s18  ;;  %1448 = vrot.lane.b32.xlu1 %v7069_v18, %s6285_s16  ;;  %v6168_v18 = vld [vmem:[%s11811_s1 + $0x8] sm:$0xff] }
 0x1d4   :  { %1378 = vrot.lane.b32.xlu0 %v12294_v55, %s6286_s17  ;;  %v7714_v55 = vld [vmem:[%s11810_s0 + $0x108] sm:$0xff]  ;;  %2134 = vmatpush.bf16.msra.mxu0 %v6168_v18 }
 0x1d5   :  { %v7699_v13 = vpop.permute.xlu2 %1200  ;;  %v7701_v58 = vpop.permute.xlu1 %1180  ;;  %6189 = vmatpush.bf16.msra.mxu2 %v6168_v18 }
 0x1d6   :  { %12350 = vst [vmem:[#allocation138_spill] sm:$0xff] %v7699_v13  ;;  %v7706_v42 = vpop.permute.xlu0 %1178 }
 0x1d8   :  { %2135 = vmatpush.bf16.msra.mxu0 %v6167_v49 }
 0x1d9   :  { %6190 = vmatpush.bf16.msra.mxu2 %v6167_v49  ;;  %v7749_v49 = vld [vmem:[%s11810_s0 + $0x114] sm:$0xff] }
 0x1da   :  { %12354 = vst [vmem:[#allocation142_spill] sm:$0xff] %v7749_v49 }
 0x1db   :  { %1286 = vrot.lane.b32.xlu2 %v7714_v55, %s6287_s18  ;;  %1424 = vrot.lane.b32.xlu1 %v6968_v21, %s6285_s16  ;;  %v7734_v21 = vld [vmem:[%s11810_s0 + $0x60] sm:$0xff] }
 0x1dc   :  { %1354 = vrot.lane.b32.xlu0 %v12273_v25, %s6286_s17  ;;  %12352 = vst [vmem:[#allocation140_spill] sm:$0xff] %v7734_v21 }
 0x1dd   :  { %v7722_v39 = vpop.permute.xlu2 %1206  ;;  %v7724_v13 = vpop.permute.xlu1 %1186 }
 0x1de   :  { %12351 = vst [vmem:[#allocation139_spill] sm:$0xff] %v7722_v39  ;;  %v7729_v52 = vpop.permute.xlu0 %1184 }
 0x1e3   :  { %1262 = vrot.lane.b32.xlu2 %v7734_v21, %s6287_s18  ;;  %1450 = vrot.lane.b32.xlu1 %v12333_v15, %s6285_s16  ;;  %v7766_v21 = vld [vmem:[%s11810_s0 + $0x6c] sm:$0xff] }
 0x1e4   :  { %1380 = vrot.lane.b32.xlu0 %v12293_v17, %s6286_s17  ;;  %12357 = vst [vmem:[#allocation145_spill] sm:$0xff] %v7766_v21 }
 0x1e5   :  { %v1415_v25 = vpop.permute.xlu2 %1414  ;;  %v7742_v18 = vpop.permute.xlu1 %1192 }
 0x1e6   :  { %12353 = vst [vmem:[#allocation141_spill] sm:$0xff] %v7742_v18  ;;  %v7744_v39 = vpop.permute.xlu0 %1190 }
 0x1eb   :  { %1288 = vrot.lane.b32.xlu2 %v7749_v49, %s6287_s18  ;;  %1426 = vrot.lane.b32.xlu1 %v6965_v5, %s6285_s16  ;;  %v12360_v49 = vld [vmem:[#allocation62_spill] sm:$0xff] }
 0x1ec   :  { %1356 = vrot.lane.b32.xlu0 %v12272_v4, %s6286_s17 }
 0x1ed   :  { %v7757_v17 = vpop.permute.xlu2 %1212  ;;  %v7759_v15 = vpop.permute.xlu1 %1198 }
 0x1ee   :  { %12355 = vst [vmem:[#allocation143_spill] sm:$0xff] %v7759_v15  ;;  %v7761_v18 = vpop.permute.xlu0 %1196 }
 0x1ef   :  { %12356 = vst [vmem:[#allocation144_spill] sm:$0xff] %v7761_v18  ;;  %v6230_v18 = vld [vmem:[%s11810_s0] sm:$0xff] }
 0x1f3   :  { %1264 = vrot.lane.b32.xlu2 %v7766_v21, %s6287_s18  ;;  %1452 = vrot.lane.b32.xlu1 %v12332_v54, %s6285_s16  ;;  %v1480_v21 = vsel %vm1478_vm2, %v6230_v18, %v12360_v49  ;;  %v7786_v54 = vld [vmem:[%s11810_s0 + $0x120] sm:$0xff] }
 0x1f4   :  { %1382 = vrot.lane.b32.xlu0 %v12292_v47, %s6286_s17  ;;  %v1545_v47 = vsel %vm1543_vm3, %v1480_v21, %v7180_v1 }
 0x1f5   :  { %v1417_v5 = vpop.permute.xlu2 %1416  ;;  %v7774_v4 = vpop.permute.xlu1 %1204 }
 0x1f6   :  { %12358 = vst [vmem:[#allocation146_spill] sm:$0xff] %v7774_v4  ;;  %v7776_v15 = vpop.permute.xlu0 %1202  ;;  %v1610_v4 = vsel %vm1608_vm4, %v1545_v47, %v7378_v40 }
 0x1f7   :  { %12359 = vst [vmem:[#allocation147_spill] sm:$0xff] %v7776_v15  ;;  %v1675_v49 = vsel %vm1673_vm6, %v1610_v4, %v7533_v6  ;;  %v12361_v4 = vld [vmem:[#allocation18_spill] sm:$0xff] }
 0x1f8   :  { %v1740_v1 = vsel %vm1738_vm5, %v1675_v49, %v7616_v28 }
 0x1fb   :  { %1290 = vrot.lane.b32.xlu2 %v7786_v54, %s6287_s18  ;;  %1428 = vrot.lane.b32.xlu1 %v6962_v61, %s6285_s16 }
 0x1fc   :  { %1358 = vrot.lane.b32.xlu0 %v12271_v46, %s6286_s17  ;;  %v7809_v46 = vld [vmem:[%s11810_s0 + $0x78] sm:$0xff] }
 0x1fd   :  { %v1255_v18 = vpop.permute.xlu2 %1254  ;;  %v1345_v15 = vpop.permute.xlu1 %1344 }
 0x1fe   :  { %v1251_v21 = vpop.permute.xlu0 %1250 }
 0x1ff   :  { %v1805_v61 = vsel %vm1803_vm7, %v1740_v1, %v1251_v21 }
 0x200   :  { %v1870_v40 = vsel %vm1868_vm8, %v1805_v61, %v1345_v15  ;;  %v6233_v15 = vld [vmem:[%s11810_s0 + $0xc] sm:$0xff] }
 0x201   :  { %v1935_v47 = vsel %vm1933_vm9, %v1870_v40, %v1415_v25  ;;  %v1482_v49 = vsel %vm1478_vm2, %v6233_v15, %v12361_v4 }
 0x202   :  { %6035 = vmatmul.msk.bf16.vlgmr.msra.gmra.mxu0 %vm1998_vm10, %v1935_v47 }
 0x203   :  { %1266 = vrot.lane.b32.xlu2 %v7809_v46, %s6287_s18  ;;  %1454 = vrot.lane.b32.xlu1 %v12336_v9, %s6285_s16  ;;  %v7831_v9 = vld [vmem:[%s11810_s0 + $0x12c] sm:$0xff] }
 0x204   :  { %1384 = vrot.lane.b32.xlu0 %v12299_v22, %s6286_s17  ;;  %v1547_v22 = vsel %vm1543_vm3, %v1482_v49, %v7247_v51 }
 0x205   :  { %v7817_v28 = vpop.permute.xlu2 %1218  ;;  %v7819_v6 = vpop.permute.xlu1 %1210  ;;  %v1612_v1 = vsel %vm1608_vm4, %v1547_v22, %v7337_v14 }
 0x206   :  { %v7821_v25 = vpop.permute.xlu0 %1208  ;;  %v1677_v61 = vsel %vm1673_vm6, %v1612_v1, %v7531_v50  ;;  %v7874_v1 = vld [vmem:[%s11810_s0 + $0x138] sm:$0xff] }
 0x207   :  { %v1742_v47 = vsel %vm1738_vm5, %v1677_v61, %v7706_v42 }
 0x20b   :  { %1292 = vrot.lane.b32.xlu2 %v7831_v9, %s6287_s18  ;;  %1430 = vrot.lane.b32.xlu1 %v6991_v30, %s6285_s16 }
 0x20c   :  { %1360 = vrot.lane.b32.xlu0 %v12279_v24, %s6286_s17  ;;  %v7854_v24 = vld [vmem:[%s11810_s0 + $0x84] sm:$0xff] }
 0x20d   :  { %v1351_v21 = vpop.permute.xlu2 %1350  ;;  %v1347_v40 = vpop.permute.xlu1 %1346 }
 0x20e   :  { %v1253_v15 = vpop.permute.xlu0 %1252 }
 0x20f   :  { %v1807_v51 = vsel %vm1803_vm7, %v1742_v47, %v1253_v15 }
 0x210   :  { %v1872_v4 = vsel %vm1868_vm8, %v1807_v51, %v1347_v40 }
 0x211   :  { %v1937_v30 = vsel %vm1933_vm9, %v1872_v4, %v1417_v5  ;;  %v12362_v5 = vld [vmem:[#allocation61_spill] sm:$0xff] }
 0x212   :  { %6036 = vmatmul.msk.bf16.gmra.mxu0 %vm1998_vm10, %v1937_v30  ;;  %v1484_v49 = vsel %vm1478_vm2, %v7172_v45, %v12362_v5 }
 0x213   :  { %1268 = vrot.lane.b32.xlu2 %v7854_v24, %s6287_s18  ;;  %1456 = vrot.lane.b32.xlu1 %v12339_v35, %s6285_s16  ;;  %v1549_v22 = vsel %vm1543_vm3, %v1484_v49, %v7245_v37 }
 0x214   :  { %1386 = vrot.lane.b32.xlu0 %v12298_v31, %s6286_s17  ;;  %v1614_v31 = vsel %vm1608_vm4, %v1549_v22, %v7397_v60 }
 0x215   :  { %v1283_v50 = vpop.permute.xlu2 %1282  ;;  %v7862_v14 = vpop.permute.xlu1 %1216  ;;  %v1679_v45 = vsel %vm1673_vm6, %v1614_v31, %v7491_v29 }
 0x216   :  { %v7864_v42 = vpop.permute.xlu0 %1214  ;;  %v1744_v35 = vsel %vm1738_vm5, %v1679_v45, %v7701_v58  ;;  %v12365_v45 = vld [vmem:[#allocation100_spill] sm:$0xff] }
 0x217   :  { %v1809_v40 = vsel %vm1803_vm7, %v1744_v35, %v1255_v18  ;;  %v12363_v18 = vld [vmem:[#allocation65_spill] sm:$0xff]  ;;  %v7947_v35 = vld [vmem:[%s11810_s0 + $0x9c] sm:$0xff] }
 0x218   :  { %v1486_v51 = vsel %vm1478_vm2, %v7203_v59, %v12363_v18 }
 0x219   :  { %v1551_v4 = vsel %vm1543_vm3, %v1486_v51, %v7207_v56 }
 0x21a   :  { %v1616_v30 = vsel %vm1608_vm4, %v1551_v4, %v7395_v63 }
 0x21b   :  { %1294 = vrot.lane.b32.xlu2 %v7874_v1, %s6287_s18  ;;  %1432 = vrot.lane.b32.xlu1 %v6988_v16, %s6285_s16  ;;  %v7895_v16 = vld [vmem:[%s11810_s0 + $0x90] sm:$0xff] }
 0x21c   :  { %1362 = vrot.lane.b32.xlu0 %v12278_v7, %s6286_s17 }
 0x21d   :  { %v1259_v37 = vpop.permute.xlu2 %1258  ;;  %v1419_v61 = vpop.permute.xlu1 %1418 }
 0x21e   :  { %v1349_v47 = vpop.permute.xlu0 %1348 }
 0x21f   :  { %v1874_v15 = vsel %vm1868_vm8, %v1809_v40, %v1349_v47  ;;  %v12367_v40 = vld [vmem:[#allocation67_spill] sm:$0xff] }
 0x220   :  { %v1939_v60 = vsel %vm1933_vm9, %v1874_v15, %v1419_v61 }
 0x222   :  { %6037 = vmatmul.msk.bf16.gmra.mxu0 %vm1998_vm10, %v1939_v60 }
 0x223   :  { %1270 = vrot.lane.b32.xlu2 %v7895_v16, %s6287_s18  ;;  %1458 = vrot.lane.b32.xlu1 %v12342_v43, %s6285_s16  ;;  %v7917_v43 = vld [vmem:[%s11810_s0 + $0x144] sm:$0xff] }
 0x224   :  { %1388 = vrot.lane.b32.xlu0 %v6856_v20, %s6286_s17  ;;  %v1681_v20 = vsel %vm1673_vm6, %v1616_v30, %v7548_v48  ;;  %v6239_v48 = vld [vmem:[%s11810_s0 + $0xd8] sm:$0xff] }
 0x225   :  { %v7903_v58 = vpop.permute.xlu2 %1284  ;;  %v1257_v7 = vpop.permute.xlu1 %1256  ;;  %v1746_v56 = vsel %vm1738_vm5, %v1681_v20, %v7633_v41  ;;  %v12368_v20 = vld [vmem:[#allocation57_spill] sm:$0xff] }
 0x226   :  { %v7905_v29 = vpop.permute.xlu0 %1220  ;;  %v1811_v63 = vsel %vm1803_vm7, %v1746_v56, %v1257_v7 }
 0x227   :  { %v1876_v22 = vsel %vm1868_vm8, %v1811_v63, %v1351_v21  ;;  %v12366_v21 = vld [vmem:[#allocation38_spill] sm:$0xff] }
 0x22b   :  { %1296 = vrot.lane.b32.xlu2 %v7917_v43, %s6287_s18  ;;  %1434 = vrot.lane.b32.xlu1 %v6985_v3, %s6285_s16  ;;  %v12364_v3 = vld [vmem:[#allocation44_spill] sm:$0xff] }
 0x22c   :  { %1364 = vrot.lane.b32.xlu0 %v12277_v36, %s6286_s17  ;;  %v1512_v31 = vsel %vm1478_vm2, %v6239_v48, %v12364_v3 }
 0x22d   :  { %v7929_v59 = vpop.permute.xlu2 %1260  ;;  %v7932_v5 = vpop.permute.xlu1 %1222  ;;  %v1577_v36 = vsel %vm1543_vm3, %v1512_v31, %v12365_v45 }
 0x22e   :  { %v1421_v49 = vpop.permute.xlu0 %1420  ;;  %v1642_v61 = vsel %vm1608_vm4, %v1577_v36, %v12366_v21  ;;  %v12373_v21 = vld [vmem:[#allocation99_spill] sm:$0xff] }
 0x22f   :  { %v1941_v41 = vsel %vm1933_vm9, %v1876_v22, %v1421_v49  ;;  %v1707_v47 = vsel %vm1673_vm6, %v1642_v61, %v7594_v11  ;;  %v1488_v11 = vsel %vm1478_vm2, %v7196_v38, %v12368_v20  ;;  %v12371_v49 = vld [vmem:[#allocation22_spill] sm:$0xff] }
 0x230   :  { %v1772_v60 = vsel %vm1738_vm5, %v1707_v47, %v7821_v25  ;;  %v12370_v25 = vld [vmem:[#allocation11_spill] sm:$0xff]  ;;  %v12376_v20 = vld [vmem:[#allocation58_spill] sm:$0xff] }
 0x231   :  { %v1837_v18 = vsel %vm1803_vm7, %v1772_v60, %v1283_v50  ;;  %v8008_v60 = vld [vmem:[%s11810_s0 + $0x150] sm:$0xff] }
 0x232   :  { %6038 = vmatmul.msk.bf16.gmra.mxu0 %vm1998_vm10, %v1941_v41 }
 0x233   :  { %1272 = vrot.lane.b32.xlu2 %v7947_v35, %s6287_s18  ;;  %1460 = vrot.lane.b32.xlu1 %v12367_v40, %s6285_s16 }
 0x234   :  { %1390 = vrot.lane.b32.xlu0 %v6844_v23, %s6286_s17  ;;  %v12369_v23 = vld [vmem:[#allocation88_spill] sm:$0xff] }
 0x235   :  { %v7959_v15 = vpop.permute.xlu2 %1286  ;;  %v1447_v7 = vpop.permute.xlu1 %1446  ;;  %v1553_v56 = vsel %vm1543_vm3, %v1488_v11, %v12369_v23  ;;  %v1490_v11 = vsel %vm1478_vm2, %v7189_v19, %v12376_v20  ;;  %v12377_v23 = vld [vmem:[#allocation87_spill] sm:$0xff]  ;;  %v8037_v19 = vld [vmem:[%s11810_s0 + $0xa8] sm:$0xff] }
 0x236   :  { %v1377_v51 = vpop.permute.xlu0 %1376  ;;  %v1618_v50 = vsel %vm1608_vm4, %v1553_v56, %v12370_v25  ;;  %v1555_v56 = vsel %vm1543_vm3, %v1490_v11, %v12377_v23  ;;  %v12379_v25 = vld [vmem:[#allocation21_spill] sm:$0xff] }
 0x237   :  { %v1902_v4 = vsel %vm1868_vm8, %v1837_v18, %v1377_v51  ;;  %v1683_v63 = vsel %vm1673_vm6, %v1618_v50, %v7546_v53  ;;  %v6241_v53 = vld [vmem:[%s11810_s0 + $0xe4] sm:$0xff] }
 0x238   :  { %v1967_v30 = vsel %vm1933_vm9, %v1902_v4, %v1447_v7  ;;  %v1748_v22 = vsel %vm1738_vm5, %v1683_v63, %v7729_v52  ;;  %v12374_v52 = vld [vmem:[#allocation41_spill] sm:$0xff] }
 0x239   :  { %6051 = vmatmul.msk.bf16.vlgmr.msra.gmra.mxu2 %vm1998_vm10, %v1967_v30  ;;  %v1813_v3 = vsel %vm1803_vm7, %v1748_v22, %v1259_v37 }
 0x23b   :  { %1224 = vrot.lane.b32.xlu2 %v12367_v40, %s6284_s15  ;;  %1436 = vrot.lane.b32.xlu1 %v7018_v32, %s6285_s16  ;;  %v12372_v32 = vld [vmem:[#allocation33_spill] sm:$0xff]  ;;  %v12375_v40 = vld [vmem:[#allocation51_spill] sm:$0xff] }
 0x23c   :  { %1366 = vrot.lane.b32.xlu0 %v12371_v49, %s6286_s17  ;;  %v1514_v36 = vsel %vm1478_vm2, %v6241_v53, %v12372_v32  ;;  %v8062_v32 = vld [vmem:[%s11810_s0 + $0x15c] sm:$0xff] }
 0x23d   :  { %v7982_v38 = vpop.permute.xlu2 %1262  ;;  %v1423_v48 = vpop.permute.xlu1 %1422  ;;  %v1579_v61 = vsel %vm1543_vm3, %v1514_v36, %v12373_v21 }
 0x23e   :  { %v1353_v31 = vpop.permute.xlu0 %1352  ;;  %v1644_v37 = vsel %vm1608_vm4, %v1579_v61, %v7468_v33 }
 0x23f   :  { %v1878_v41 = vsel %vm1868_vm8, %v1813_v3, %v1353_v31  ;;  %v1709_v47 = vsel %vm1673_vm6, %v1644_v37, %v7556_v44  ;;  %v12380_v31 = vld [vmem:[#allocation72_spill] sm:$0xff] }
 0x240   :  { %v1943_v45 = vsel %vm1933_vm9, %v1878_v41, %v1423_v48  ;;  %v1774_v18 = vsel %vm1738_vm5, %v1709_v47, %v7819_v6  ;;  %v12378_v6 = vld [vmem:[#allocation104_spill] sm:$0xff]  ;;  %v1516_v41 = vsel %vm1478_vm2, %v7625_v10, %v12380_v31 }
 0x241   :  { %v1839_v51 = vsel %vm1803_vm7, %v1774_v18, %v7903_v58  ;;  %v1620_v58 = vsel %vm1608_vm4, %v1555_v56, %v12378_v6  ;;  %v12383_v18 = vld [vmem:[#allocation25_spill] sm:$0xff] }
 0x242   :  { %6039 = vmatmul.msk.bf16.gmra.mxu0 %vm1998_vm10, %v1943_v45  ;;  %v1685_v50 = vsel %vm1673_vm6, %v1620_v58, %v7503_v0  ;;  %v12381_v45 = vld [vmem:[#allocation89_spill] sm:$0xff] }
 0x243   :  { %1462 = vrot.lane.b32.xlu2 %v12374_v52, %s6285_s16  ;;  %1392 = vrot.lane.b32.xlu1 %v12375_v40, %s6286_s17  ;;  %v1581_v53 = vsel %vm1543_vm3, %v1516_v41, %v12381_v45 }
 0x244   :  { %1298 = vrot.lane.b32.xlu0 %v8008_v60, %s6287_s18 }
 0x245   :  { %v8012_v7 = vpop.permute.xlu2 %1288  ;;  %v1449_v33 = vpop.permute.xlu1 %1448 }
 0x246   :  { %v1379_v4 = vpop.permute.xlu0 %1378 }
 0x247   :  { %v1904_v44 = vsel %vm1868_vm8, %v1839_v51, %v1379_v4  ;;  %v12386_v51 = vld [vmem:[#allocation28_spill] sm:$0xff]  ;;  %v8091_v4 = vld [vmem:[%s11810_s0 + $0xb4] sm:$0xff] }
 0x248   :  { %v1969_v30 = vsel %vm1933_vm9, %v1904_v44, %v1449_v33  ;;  %v12387_v44 = vld [vmem:[#allocation37_spill] sm:$0xff] }
 0x249   :  { %6052 = vmatmul.msk.bf16.gmra.mxu2 %vm1998_vm10, %v1969_v30 }
 0x24b   :  { %1438 = vrot.lane.b32.xlu2 %v7015_v34, %s6285_s16  ;;  %1368 = vrot.lane.b32.xlu1 %v12379_v25, %s6286_s17  ;;  %v1750_v34 = vsel %vm1738_vm5, %v1685_v50, %v7724_v13  ;;  %v12382_v13 = vld [vmem:[#allocation54_spill] sm:$0xff]  ;;  %v12388_v25 = vld [vmem:[#allocation71_spill] sm:$0xff]  ;;  %v6288_v50 = vmov 0.0  }
 0x24c   :  { %1274 = vrot.lane.b32.xlu0 %v8037_v19, %s6287_s18  ;;  %v1815_v22 = vsel %vm1803_vm7, %v1750_v34, %v7929_v59  ;;  %v1646_v59 = vsel %vm1608_vm4, %v1581_v53, %v7466_v12  ;;  %2721 = vst [vmem:[#allocation2 + $0x18] sm:$0xff] %v6288_v50  ;;  %v12389_v34 = vld [vmem:[#allocation103_spill] sm:$0xff] }
 0x24d   :  { %v8041_v63 = vpop.permute.xlu2 %1264  ;;  %v1425_v49 = vpop.permute.xlu1 %1424  ;;  %v1711_v10 = vsel %vm1673_vm6, %v1646_v59, %v7608_v57  ;;  %v1492_v57 = vsel %vm1478_vm2, %v7645_v2, %v12383_v18  ;;  %2722 = vst [vmem:[#allocation2 + $0x20] sm:$0xff] %v6288_v50  ;;  %v12399_v18 = vld [vmem:[#allocation53_spill] sm:$0xff] }
 0x24e   :  { %v1355_v48 = vpop.permute.xlu0 %1354  ;;  %v1776_v21 = vsel %vm1738_vm5, %v1711_v10, %v7757_v17  ;;  %v12385_v17 = vld [vmem:[#allocation30_spill] sm:$0xff]  ;;  %2718 = vst [vmem:[#allocation2] sm:$0xff] %v6288_v50  ;;  %v12393_v10 = vld [vmem:[#allocation20_spill] sm:$0xff] }
 0x24f   :  { %v1880_v0 = vsel %vm1868_vm8, %v1815_v22, %v1355_v48  ;;  %v1841_v61 = vsel %vm1803_vm7, %v1776_v21, %v7959_v15  ;;  %v12391_v22 = vld [vmem:[#allocation130_spill] sm:$0xff]  ;;  %2720 = vst [vmem:[#allocation2 + $0x10] sm:$0x3] %v6288_v50 }
 0x250   :  { %v1945_v3 = vsel %vm1933_vm9, %v1880_v0, %v1425_v49  ;;  %v12392_v0 = vld [vmem:[#allocation63_spill] sm:$0xff]  ;;  %2723 = vst [vmem:[#allocation2 + $0x28] sm:$0x3] %v6288_v50 }
 0x251   :  { %2724 = vst [vmem:[#allocation2 + $0x30] sm:$0xff] %v6288_v50 }
 0x252   :  { %6040 = vmatmul.msk.bf16.gmra.mxu0 %vm1998_vm10, %v1945_v3  ;;  %2725 = vst [vmem:[#allocation2 + $0x38] sm:$0xff] %v6288_v50 }
 0x253   :  { %1394 = vrot.lane.b32.xlu2 %v12382_v13, %s6286_s17  ;;  %1300 = vrot.lane.b32.xlu1 %v8062_v32, %s6287_s18  ;;  %2726 = vst [vmem:[#allocation2 + $0x40] sm:$0x3] %v6288_v50 }
 0x254   :  { %1226 = vrot.lane.b32.xlu0 %v12374_v52, %s6284_s15  ;;  %v12384_v52 = vld [vmem:[#allocation78_spill] sm:$0xff]  ;;  %2727 = vst [vmem:[#allocation2 + $0x48] sm:$0xff] %v6288_v50 }
 0x255   :  { %v8070_v36 = vpop.permute.xlu2 %1290  ;;  %v1451_v12 = vpop.permute.xlu1 %1450  ;;  %v1557_v33 = vsel %vm1543_vm3, %v1492_v57, %v12384_v52  ;;  %2728 = vst [vmem:[#allocation2 + $0x50] sm:$0xff] %v6288_v50 }
 0x256   :  { %v1381_v37 = vpop.permute.xlu0 %1380  ;;  %v1622_v15 = vsel %vm1608_vm4, %v1557_v33, %v12386_v51  ;;  %2729 = vst [vmem:[#allocation2 + $0x58] sm:$0x3] %v6288_v50 }
 0x257   :  { %v1906_v40 = vsel %vm1868_vm8, %v1841_v61, %v1381_v37  ;;  %v1687_v2 = vsel %vm1673_vm6, %v1622_v15, %v7560_v62  ;;  %v1518_v62 = vsel %vm1478_vm2, %v7668_v26, %v12388_v25  ;;  %v12396_v61 = vld [vmem:[#allocation7_spill] sm:$0xff]  ;;  %2730 = vst [vmem:[#allocation2 + $0x60] sm:$0xff] %v6288_v50 }
 0x258   :  { %v1971_v47 = vsel %vm1933_vm9, %v1906_v40, %v1451_v12  ;;  %v1752_v20 = vsel %vm1738_vm5, %v1687_v2, %v7653_v8  ;;  %v1583_v49 = vsel %vm1543_vm3, %v1518_v62, %v12389_v34  ;;  %v8117_v8 = vld [vmem:[%s11810_s0 + $0x168] sm:$0xff]  ;;  %v12395_v12 = vld [vmem:[#allocation85_spill] sm:$0xff]  ;;  %2731 = vst [vmem:[#allocation2 + $0x68] sm:$0xff] %v6288_v50  ;;  %v12403_v25 = vld [vmem:[#allocation123_spill] sm:$0xff] }
 0x259   :  { %6053 = vmatmul.msk.bf16.gmra.mxu2 %vm1998_vm10, %v1971_v47  ;;  %v1817_v23 = vsel %vm1803_vm7, %v1752_v20, %v7982_v38  ;;  %v12390_v38 = vld [vmem:[#allocation47_spill] sm:$0xff]  ;;  %v12397_v40 = vld [vmem:[#allocation69_spill] sm:$0xff]  ;;  %2732 = vst [vmem:[#allocation2 + $0x70] sm:$0x3] %v6288_v50  ;;  %v12405_v34 = vld [vmem:[#allocation16_spill] sm:$0xff] }
 0x25a   :  { %v1648_v26 = vsel %vm1608_vm4, %v1583_v49, %v12390_v38  ;;  %2733 = vst [vmem:[#allocation2 + $0x78] sm:$0xff] %v6288_v50 }
 0x25b   :  { %1370 = vrot.lane.b32.xlu2 %v12385_v17, %s6286_s17  ;;  %1276 = vrot.lane.b32.xlu1 %v8091_v4, %s6287_s18  ;;  %v1713_v48 = vsel %vm1673_vm6, %v1648_v26, %v12391_v22  ;;  %v81_v17 = vld [vmem:[%s11810_s0 + $0xd4] sm:$0x1]  ;;  %2734 = vst [vmem:[#allocation2 + $0x80] sm:$0xff] %v6288_v50 }
 0x25c   :  { %1464 = vrot.lane.b32.xlu0 %v12387_v44, %s6285_s16  ;;  %v1778_v31 = vsel %vm1738_vm5, %v1713_v48, %v7864_v42  ;;  %v1494_v42 = vsel %vm1478_vm2, %v7691_v27, %v12393_v10  ;;  %v12398_v27 = vld [vmem:[#allocation125_spill] sm:$0xff]  ;;  %v1316_v20 = vunpack.c.l.b16 %v81_v17  ;;  %2735 = vst [vmem:[#allocation2 + $0x88] sm:$0x3] %v6288_v50  ;;  %v12407_v10 = vld [vmem:[#allocation140_spill] sm:$0xff] }
 0x25d   :  { %v8099_v30 = vpop.permute.xlu2 %1266  ;;  %v1427_v11 = vpop.permute.xlu1 %1426  ;;  %v1843_v45 = vsel %vm1803_vm7, %v1778_v31, %v8012_v7  ;;  %v12394_v7 = vld [vmem:[#allocation91_spill] sm:$0xff]  ;;  %2736 = vst [vmem:[#allocation2 + $0x90] sm:$0xff] %v6288_v50 }
 0x25e   :  { %v1357_v56 = vpop.permute.xlu0 %1356  ;;  %v1559_v21 = vsel %vm1543_vm3, %v1494_v42, %v12394_v7  ;;  %2737 = vst [vmem:[#allocation2 + $0x98] sm:$0xff] %v6288_v50  ;;  %v1318_v49 = vpack.c.b16 %v1316_v20, %v1316_v20  ;;  %v12408_v42 = vld [vmem:[#allocation90_spill] sm:$0xff] }
 0x25f   :  { %v1882_v6 = vsel %vm1868_vm8, %v1817_v23, %v1357_v56  ;;  %v1624_v37 = vsel %vm1608_vm4, %v1559_v21, %v12396_v61  ;;  %v12401_v23 = vld [vmem:[#allocation102_spill] sm:$0xff]  ;;  %2738 = vst [vmem:[#allocation2 + $0xa0] sm:$0x3] %v6288_v50  ;;  %v12409_v21 = vld [vmem:[#allocation49_spill] sm:$0xff] }
 0x260   :  { %v1947_v58 = vsel %vm1933_vm9, %v1882_v6, %v1427_v11  ;;  %v1689_v47 = vsel %vm1673_vm6, %v1624_v37, %v12398_v27  ;;  %v12400_v11 = vld [vmem:[#allocation39_spill] sm:$0xff]  ;;  %v12402_v6 = vld [vmem:[#allocation114_spill] sm:$0xff]  ;;  %2739 = vst [vmem:[#allocation2 + $0xa8] sm:$0xff] %v6288_v50  ;;  %v12411_v37 = vld [vmem:[#allocation52_spill] sm:$0xff]  ;;  %v1409_v27 = vrot.slane %v1318_v49, 1 }
 0x261   :  { %v1754_v52 = vsel %vm1738_vm5, %v1689_v47, %v7744_v39  ;;  %v8181_v39 = vld [vmem:[%s11810_s0 + $0xcc] sm:$0xff]  ;;  %2740 = vst [vmem:[#allocation2 + $0xb0] sm:$0xff] %v6288_v50  ;;  %v12412_v47 = vld [vmem:[#allocation119_spill] sm:$0xff] }
 0x262   :  { %6041 = vmatmul.msk.bf16.gmra.mxu0 %vm1998_vm10, %v1947_v58  ;;  %v1819_v51 = vsel %vm1803_vm7, %v1754_v52, %v8041_v63  ;;  %v1520_v63 = vsel %vm1478_vm2, %v7714_v55, %v12400_v11  ;;  %v12404_v55 = vld [vmem:[#allocation19_spill] sm:$0xff]  ;;  %v1323_v38 = vshll.u32 %v8181_v39, 16  ;;  %2741 = vst [vmem:[#allocation2 + $0xb8] sm:$0x3] %v6288_v50  ;;  %v8238_v52 = vld [vmem:[%s11810_s0 + $0x174] sm:$0xff] }
 0x263   :  { %1302 = vrot.lane.b32.xlu2 %v8117_v8, %s6287_s18  ;;  %1228 = vrot.lane.b32.xlu1 %v12387_v44, %s6284_s15  ;;  %v1585_v56 = vsel %vm1543_vm3, %v1520_v63, %v12401_v23  ;;  %2742 = vst [vmem:[#allocation2 + $0xc0] sm:$0xff] %v6288_v50 }
 0x264   :  { %1440 = vrot.lane.b32.xlu0 %v12392_v0, %s6285_s16  ;;  %v1650_v58 = vsel %vm1608_vm4, %v1585_v56, %v12402_v6  ;;  %2743 = vst [vmem:[#allocation2 + $0xc8] sm:$0xff] %v6288_v50 }
 0x265   :  { %v8131_v3 = vpop.permute.xlu2 %1292  ;;  %v1453_v41 = vpop.permute.xlu1 %1452  ;;  %v1715_v62 = vsel %vm1673_vm6, %v1650_v58, %v12404_v55  ;;  %2744 = vst [vmem:[#allocation2 + $0xd0] sm:$0x3] %v6288_v50 }
 0x266   :  { %v1383_v53 = vpop.permute.xlu0 %1382  ;;  %v1780_v26 = vsel %vm1738_vm5, %v1715_v62, %v7862_v14  ;;  %v1321_v14 = vshrl.u32 %v8181_v39, 16  ;;  %2745 = vst [vmem:[#allocation2 + $0xd8] sm:$0xff] %v6288_v50  ;;  %v12416_v62 = vld [vmem:[#allocation92_spill] sm:$0xff] }
 0x267   :  { %v1908_v13 = vsel %vm1868_vm8, %v1843_v45, %v1383_v53  ;;  %v1845_v48 = vsel %vm1803_vm7, %v1780_v26, %v8070_v36  ;;  %v1325_v53 = vrot.slane %v1323_v38, 1  ;;  %2746 = vst [vmem:[#allocation2 + $0xe0] sm:$0xff] %v6288_v50  ;;  %v12418_v26 = vld [vmem:[#allocation131_spill] sm:$0xff] }
 0x268   :  { %v1973_v59 = vsel %vm1933_vm9, %v1908_v13, %v1453_v41  ;;  %v1328_v13 = vshll.u32 %v1318_v49, 16  ;;  %2747 = vst [vmem:[#allocation2 + $0xe8] sm:$0x3] %v6288_v50  ;;  %v12417_v49 = vld [vmem:[#allocation113_spill] sm:$0xff] }
 0x269   :  { %6054 = vmatmul.msk.bf16.gmra.mxu2 %vm1998_vm10, %v1973_v59  ;;  %v12406_v59 = vld [vmem:[#allocation59_spill] sm:$0xff]  ;;  %2748 = vst [vmem:[#allocation2 + $0xf0] sm:$0xff] %v6288_v50 }
 0x26a   :  { %v1496_v36 = vsel %vm1478_vm2, %v12407_v10, %v12406_v59  ;;  %v1330_v17 = vrot.slane %v1328_v13, 1  ;;  %2749 = vst [vmem:[#allocation2 + $0xf8] sm:$0xff] %v6288_v50  ;;  %v12420_v13 = vld [vmem:[#allocation145_spill] sm:$0xff] }
 0x26b   :  { %1278 = vrot.lane.b32.xlu2 %v12395_v12, %s6287_s18  ;;  %1466 = vrot.lane.b32.xlu1 %v12397_v40, %s6285_s16  ;;  %v1561_v7 = vsel %vm1543_vm3, %v1496_v36, %v12408_v42  ;;  %v12410_v12 = vld [vmem:[#allocation36_spill] sm:$0xff]  ;;  %2750 = vst [vmem:[#allocation2 + $0x100] sm:$0x3] %v6288_v50 }
 0x26c   :  { %1396 = vrot.lane.b32.xlu0 %v12399_v18, %s6286_s17  ;;  %v1626_v61 = vsel %vm1608_vm4, %v1561_v7, %v12410_v12  ;;  %2751 = vst [vmem:[#allocation2 + $0x108] sm:$0xff] %v6288_v50  ;;  %v12422_v42 = vld [vmem:[#allocation56_spill] sm:$0xff]  ;;  %v12423_v7 = vld [vmem:[#allocation35_spill] sm:$0xff] }
 0x26d   :  { %v8162_v57 = vpop.permute.xlu2 %1268  ;;  %v1429_v33 = vpop.permute.xlu1 %1428  ;;  %v1691_v18 = vsel %vm1673_vm6, %v1626_v61, %v12412_v47  ;;  %2752 = vst [vmem:[#allocation2 + $0x110] sm:$0xff] %v6288_v50  ;;  %v8307_v61 = vld [vmem:[%s11810_s0 + $0x180] sm:$0xff] }
 0x26e   :  { %v1359_v15 = vpop.permute.xlu0 %1358  ;;  %2753 = vst [vmem:[#allocation2 + $0x118] sm:$0x3] %v6288_v50 }
 0x26f   :  { %v1884_v2 = vsel %vm1868_vm8, %v1819_v51, %v1359_v15  ;;  %v12413_v51 = vld [vmem:[#allocation141_spill] sm:$0xff]  ;;  %2754 = vst [vmem:[#allocation2 + $0x120] sm:$0xff] %v6288_v50 }
 0x270   :  { %v1949_v44 = vsel %vm1933_vm9, %v1884_v2, %v1429_v33  ;;  %v1326_v33 = vor.u32 %v1325_v53, %v1321_v14  ;;  %v1756_v15 = vsel %vm1738_vm5, %v1691_v18, %v12413_v51  ;;  %2755 = vst [vmem:[#allocation2 + $0x128] sm:$0xff] %v6288_v50 }
 0x271   :  { %2756 = vst [vmem:[#allocation2 + $0x130] sm:$0x3] %v6288_v50 }
 0x272   :  { %6042 = vmatmul.msk.bf16.gmra.mxu0 %vm1998_vm10, %v1949_v44  ;;  %v1821_v44 = vsel %vm1803_vm7, %v1756_v15, %v8099_v30  ;;  %v1331_v58 = vsel %vm392_vm0, %v1326_v33, %v1330_v17  ;;  %v12414_v30 = vld [vmem:[#allocation75_spill] sm:$0xff]  ;;  %2757 = vst [vmem:[#allocation2 + $0x138] sm:$0xff] %v6288_v50 }
 0x273   :  { %1230 = vrot.lane.b32.xlu2 %v12397_v40, %s6284_s15  ;;  %1442 = vrot.lane.b32.xlu1 %v12403_v25, %s6285_s16  ;;  %v1408_v40 = vrot.slane %v8181_v39, 1  ;;  %v12415_v25 = vld [vmem:[#allocation142_spill] sm:$0xff]  ;;  %2758 = vst [vmem:[#allocation2 + $0x140] sm:$0xff] %v6288_v50 }
 0x274   :  { %1372 = vrot.lane.b32.xlu0 %v12405_v34, %s6286_s17  ;;  %v1522_v55 = vsel %vm1478_vm2, %v12415_v25, %v12414_v30  ;;  %2759 = vst [vmem:[#allocation2 + $0x148] sm:$0x3] %v6288_v50 }
 0x275   :  { %v1455_v22 = vpop.permute.xlu1 %1454  ;;  %v8209_v0 = vpop.permute.xlu2 %1294  ;;  %v1410_v23 = vsel %vm841_vm1, %v1408_v40, %v1409_v27  ;;  %v1587_v34 = vsel %vm1543_vm3, %v1522_v55, %v12416_v62  ;;  %2760 = vst [vmem:[#allocation2 + $0x150] sm:$0xff] %v6288_v50  ;;  %v12425_v27 = vld [vmem:[#allocation135_spill] sm:$0xff] }
 0x276   :  { %v1385_v31 = vpop.permute.xlu0 %1384  ;;  %v1652_v38 = vsel %vm1608_vm4, %v1587_v34, %v12417_v49  ;;  %2761 = vst [vmem:[#allocation2 + $0x158] sm:$0xff] %v6288_v50 }
 0x277   :  { %v1910_v41 = vsel %vm1868_vm8, %v1845_v48, %v1385_v31  ;;  %2762 = vst [vmem:[#allocation2 + $0x160] sm:$0x3] %v6288_v50 }
 0x278   :  { %v1975_v45 = vsel %vm1933_vm9, %v1910_v41, %v1455_v22  ;;  %v1717_v22 = vsel %vm1673_vm6, %v1652_v38, %v12418_v26  ;;  %2763 = vst [vmem:[#allocation2 + $0x168] sm:$0xff] %v6288_v50 }
 0x279   :  { %6055 = vmatmul.msk.bf16.gmra.mxu2 %vm1998_vm10, %v1975_v45  ;;  %v1782_v48 = vsel %vm1738_vm5, %v1717_v22, %v7817_v28  ;;  %v12419_v28 = vld [vmem:[#allocation27_spill] sm:$0xff]  ;;  %2764 = vst [vmem:[#allocation2 + $0x170] sm:$0xff] %v6288_v50 }
 0x27a   :  { %v1847_v41 = vsel %vm1803_vm7, %v1782_v48, %v8131_v3  ;;  %v1498_v59 = vsel %vm1478_vm2, %v12420_v13, %v12419_v28  ;;  %v12421_v3 = vld [vmem:[#allocation81_spill] sm:$0xff]  ;;  %2765 = vst [vmem:[#allocation2 + $0x178] sm:$0x3] %v6288_v50  ;;  %v135_v48 = vld [vmem:[%s11810_s0 + $0x1ac] sm:$0x1]  ;;  %v12435_v28 = vld [vmem:[#allocation66_spill] sm:$0xff] }
 0x27b   :  { %1468 = vrot.lane.b32.xlu2 %v12409_v21, %s6285_s16  ;;  %1398 = vrot.lane.b32.xlu1 %v12411_v37, %s6286_s17  ;;  %v1563_v10 = vsel %vm1543_vm3, %v1498_v59, %v12421_v3  ;;  %v12424_v37 = vld [vmem:[#allocation126_spill] sm:$0xff]  ;;  %2766 = vst [vmem:[#allocation2 + $0x180] sm:$0xff] %v6288_v50  ;;  %v12436_v59 = vld [vmem:[#allocation55_spill] sm:$0xff]  ;;  %v12437_v3 = vld [vmem:[#allocation144_spill] sm:$0xff] }
 0x27c   :  { %1304 = vrot.lane.b32.xlu0 %v8238_v52, %s6287_s18  ;;  %v1628_v12 = vsel %vm1608_vm4, %v1563_v10, %v12423_v7  ;;  %2767 = vst [vmem:[#allocation2 + $0x188] sm:$0xff] %v6288_v50  ;;  %v6250_v7 = vld [vmem:[%s11810_s0 + $0x198] sm:$0xff] }
 0x27d   :  { %v1431_v2 = vpop.permute.xlu1 %1430  ;;  %v8254_v56 = vpop.permute.xlu2 %1270  ;;  %v1693_v40 = vsel %vm1673_vm6, %v1628_v12, %v12424_v37  ;;  %2768 = vst [vmem:[#allocation2 + $0x190] sm:$0x3] %v6288_v50  ;;  %v1173_v12 = vrot.slane %v6250_v7, 1  ;;  %v12438_v37 = vld [vmem:[#allocation107_spill] sm:$0xff] }
 0x27e   :  { %v1361_v20 = vpop.permute.xlu0 %1360  ;;  %v1758_v47 = vsel %vm1738_vm5, %v1693_v40, %v12425_v27  ;;  %2771 = vst [vmem:[#allocation2 + $0x1a8] sm:$0x3] %v6288_v50  ;;  %v1174_v40 = vrot.slane %v12438_v37, 1  ;;  %v8396_v27 = vld [vmem:[%s11810_s0 + $0x1a4] sm:$0xff] }
 0x27f   :  { %v1886_v11 = vsel %vm1868_vm8, %v1821_v44, %v1361_v20  ;;  %v8250_v63 = vpop.f32.mrf.mxu0  ;;  %v1823_v33 = vsel %vm1803_vm7, %v1758_v47, %v8162_v57  ;;  %v12427_v57 = vld [vmem:[#allocation8_spill] sm:$0xff]  ;;  %2774 = vst [vmem:[#allocation2 + $0x1c0] sm:$0x3] %v6288_v50  ;;  %v1411_v37 = vrot.slane %v8396_v27, 1 }
 0x280   :  { %v1951_v6 = vsel %vm1933_vm9, %v1886_v11, %v1431_v2  ;;  %v12426_v2 = vld [vmem:[#allocation74_spill] sm:$0xff]  ;;  %v8339_v11 = vld [vmem:[%s11810_s0 + $0x18c] sm:$0xff]  ;;  %2775 = vst [vmem:[#allocation2 + $0x1c8] sm:$0xff] %v6288_v50 }
 0x281   :  { %v1524_v44 = vsel %vm1478_vm2, %v7786_v54, %v12426_v2  ;;  %2776 = vst [vmem:[#allocation2 + $0x1d0] sm:$0xff] %v6288_v50  ;;  %v1335_v2 = vshll.u32 %v8396_v27, 16 }
 0x282   :  { %6043 = vmatmul.msk.bf16.gmra.mxu0 %vm1998_vm10, %v1951_v6  ;;  %v1589_v20 = vsel %vm1543_vm3, %v1524_v44, %v12427_v57  ;;  %v12429_v6 = vld [vmem:[#allocation46_spill] sm:$0xff]  ;;  %2777 = vst [vmem:[#allocation2 + $0x1d8] sm:$0x3] %v6288_v50 }
 0x283   :  { %1444 = vrot.lane.b32.xlu2 %v1410_v23, %s6285_s16  ;;  %1374 = vrot.lane.b32.xlu1 %v1331_v58, %s6286_s17  ;;  %v12428_v23 = vld [vmem:[#allocation43_spill] sm:$0xff]  ;;  %v12430_v58 = vld [vmem:[#allocation29_spill] sm:$0xff]  ;;  %2778 = vst [vmem:[#allocation2 + $0x1e0] sm:$0xff] %v6288_v50  ;;  %v12439_v44 = vld [vmem:[#allocation50_spill] sm:$0xff] }
 0x284   :  { %1280 = vrot.lane.b32.xlu0 %v8181_v39, %s6287_s18  ;;  %v1654_v54 = vsel %vm1608_vm4, %v1589_v20, %v12428_v23  ;;  %2779 = vst [vmem:[#allocation2 + $0x1e8] sm:$0xff] %v6288_v50  ;;  %v1526_v57 = vsel %vm1478_vm2, %v7831_v9, %v12439_v44  ;;  %v1175_v20 = vsel %vm841_vm1, %v1173_v12, %v1174_v40  ;;  %v1333_v23 = vshrl.u32 %v8396_v27, 16  ;;  %v12441_v9 = vld [vmem:[#allocation116_spill] sm:$0xff] }
 0x285   :  { %v1457_v31 = vpop.permute.xlu1 %1456  ;;  %v8297_v36 = vpop.permute.xlu2 %1296  ;;  %v1719_v30 = vsel %vm1673_vm6, %v1654_v54, %v12430_v58  ;;  %2780 = vst [vmem:[#allocation2 + $0x1f0] sm:$0x3] %v6288_v50  ;;  %v1337_v54 = vrot.slane %v1335_v2, 1  ;;  %v12440_v58 = vld [vmem:[#allocation10_spill] sm:$0xff] }
 0x286   :  { %v1387_v45 = vpop.permute.xlu0 %1386  ;;  %v1784_v55 = vsel %vm1738_vm5, %v1719_v30, %v7905_v29  ;;  %2781 = vst [vmem:[#allocation2 + $0x1f8] sm:$0xff] %v6288_v50  ;;  %v1591_v30 = vsel %vm1543_vm3, %v1526_v57, %v12440_v58 }
 0x287   :  { %v1912_v14 = vsel %vm1868_vm8, %v1847_v41, %v1387_v45  ;;  %v8285_v53 = vpop.f32.mrf.mxu0  ;;  %v1849_v34 = vsel %vm1803_vm7, %v1784_v55, %v8209_v0  ;;  %v12432_v0 = vld [vmem:[#allocation94_spill] sm:$0xff]  ;;  %v12433_v45 = vld [vmem:[#allocation73_spill] sm:$0xff]  ;;  %2782 = vst [vmem:[#allocation2 + $0x200] sm:$0xff] %v6288_v50  ;;  %v1656_v55 = vsel %vm1608_vm4, %v1591_v30, %v12441_v9 }
 0x288   :  { %v1977_v39 = vsel %vm1933_vm9, %v1912_v14, %v1457_v31  ;;  %v12431_v31 = vld [vmem:[#allocation42_spill] sm:$0xff]  ;;  %v12434_v14 = vld [vmem:[#allocation13_spill] sm:$0xff]  ;;  %2783 = vst [vmem:[#allocation2 + $0x208] sm:$0x3] %v6288_v50 }
 0x289   :  { %6056 = vmatmul.msk.bf16.gmra.mxu2 %vm1998_vm10, %v1977_v39  ;;  %v1500_v29 = vsel %vm1478_vm2, %v7809_v46, %v12431_v31  ;;  %v1317_v46 = vunpack.c.l.b16 %v135_v48  ;;  %2784 = vst [vmem:[#allocation2 + $0x210] sm:$0xff] %v6288_v50 }
 0x28a   :  { %v1565_v41 = vsel %vm1543_vm3, %v1500_v29, %v12432_v0  ;;  %2785 = vst [vmem:[#allocation2 + $0x218] sm:$0xff] %v6288_v50 }
 0x28b   :  { %1400 = vrot.lane.b32.xlu2 %v12422_v42, %s6286_s17  ;;  %1306 = vrot.lane.b32.xlu1 %v8307_v61, %s6287_s18  ;;  %v1630_v39 = vsel %vm1608_vm4, %v1565_v41, %v12434_v14  ;;  %2786 = vst [vmem:[#allocation2 + $0x220] sm:$0x3] %v6288_v50 }
 0x28c   :  { %1232 = vrot.lane.b32.xlu0 %v12409_v21, %s6284_s15  ;;  %v1695_v13 = vsel %vm1673_vm6, %v1630_v39, %v12435_v28  ;;  %2787 = vst [vmem:[#allocation2 + $0x228] sm:$0xff] %v6288_v50 }
 0x28d   :  { %v1433_v18 = vpop.permute.xlu1 %1432  ;;  %v8350_v25 = vpop.permute.xlu2 %1272  ;;  %v1760_v10 = vsel %vm1738_vm5, %v1695_v13, %v12437_v3  ;;  %2788 = vst [vmem:[#allocation2 + $0x230] sm:$0xff] %v6288_v50 }
 0x28e   :  { %v1363_v17 = vpop.permute.xlu0 %1362  ;;  %v1825_v47 = vsel %vm1803_vm7, %v1760_v10, %v8254_v56  ;;  %2789 = vst [vmem:[#allocation2 + $0x238] sm:$0x3] %v6288_v50 }
 0x28f   :  { %v1888_v51 = vsel %vm1868_vm8, %v1823_v33, %v1363_v17  ;;  %v8324_v15 = vpop.f32.mrf.mxu0  ;;  %2790 = vst [vmem:[#allocation2 + $0x240] sm:$0xff] %v6288_v50 }
 0x290   :  { %v1953_v21 = vsel %vm1933_vm9, %v1888_v51, %v1433_v18  ;;  %2791 = vst [vmem:[#allocation2 + $0x248] sm:$0xff] %v6288_v50 }
 0x291   :  { %2792 = vst [vmem:[#allocation2 + $0x250] sm:$0x3] %v6288_v50 }
 0x292   :  { %6044 = vmatmul.msk.bf16.gmra.mxu0 %vm1998_vm10, %v1953_v21  ;;  %v8407_v21 = vpack.c.b16 %v1317_v46, %v1317_v46  ;;  %v12444_v46 = vld [vmem:[#allocation60_spill] sm:$0xff]  ;;  %2793 = vst [vmem:[#allocation2 + $0x258] sm:$0xff] %v6288_v50 }
 0x293   :  { %1308 = vrot.lane.b32.xlu2 %v8339_v11, %s6287_s18  ;;  %1234 = vrot.lane.b32.xlu1 %v12429_v6, %s6284_s15  ;;  %v1502_v28 = vsel %vm1478_vm2, %v7854_v24, %v12444_v46  ;;  %v12447_v24 = vld [vmem:[#allocation122_spill] sm:$0xff]  ;;  %2794 = vst [vmem:[#allocation2 + $0x260] sm:$0xff] %v6288_v50 }
 0x294   :  { %1470 = vrot.lane.b32.xlu0 %v12429_v6, %s6285_s16  ;;  %v1340_v6 = vshll.u32 %v8407_v21, 16  ;;  %v1412_v40 = vrot.slane %v8407_v21, 1  ;;  %2795 = vst [vmem:[#allocation2 + $0x268] sm:$0x3] %v6288_v50  ;;  %v12449_v21 = vld [vmem:[#allocation77_spill] sm:$0xff] }
 0x295   :  { %v1459_v62 = vpop.permute.xlu1 %1458  ;;  %v8401_v18 = vpop.permute.xlu2 %1224  ;;  %2796 = vst [vmem:[#allocation2 + $0x270] sm:$0xff] %v6288_v50  ;;  %v1528_v57 = vsel %vm1478_vm2, %v7874_v1, %v12449_v21 }
 0x296   :  { %v1389_v49 = vpop.permute.xlu0 %1388  ;;  %2797 = vst [vmem:[#allocation2 + $0x278] sm:$0xff] %v6288_v50 }
 0x297   :  { %v1914_v38 = vsel %vm1868_vm8, %v1849_v34, %v1389_v49  ;;  %v8360_v26 = vpop.f32.mrf.mxu0  ;;  %v1338_v34 = vor.u32 %v1337_v54, %v1333_v23  ;;  %v1342_v49 = vrot.slane %v1340_v6, 1  ;;  %2798 = vst [vmem:[#allocation2 + $0x280] sm:$0x3] %v6288_v50  ;;  %v12451_v23 = vld [vmem:[#allocation115_spill] sm:$0xff]  ;;  %v12452_v6 = vld [vmem:[#allocation132_spill] sm:$0xff] }
 0x298   :  { %v1979_v22 = vsel %vm1933_vm9, %v1914_v38, %v1459_v62  ;;  %v12442_v62 = vld [vmem:[#allocation111_spill] sm:$0xff]  ;;  %2799 = vst [vmem:[#allocation2 + $0x288] sm:$0xff] %v6288_v50 }
 0x299   :  { %6057 = vmatmul.msk.bf16.gmra.mxu2 %vm1998_vm10, %v1979_v22  ;;  %v12443_v38 = vld [vmem:[#allocation127_spill] sm:$0xff]  ;;  %v1343_v14 = vsel %vm392_vm0, %v1338_v34, %v1342_v49  ;;  %2800 = vst [vmem:[#allocation2 + $0x290] sm:$0xff] %v6288_v50 }
 0x29a   :  { %v1721_v22 = vsel %vm1673_vm6, %v1656_v55, %v12443_v38  ;;  %2801 = vst [vmem:[#allocation2 + $0x298] sm:$0x3] %v6288_v50  ;;  %v12453_v38 = vld [vmem:[#allocation40_spill] sm:$0xff] }
 0x29b   :  { %1236 = vrot.lane.b32.xlu2 %v12433_v45, %s6284_s15  ;;  %1472 = vrot.lane.b32.xlu1 %v12433_v45, %s6285_s16  ;;  %v1786_v48 = vsel %vm1738_vm5, %v1721_v22, %v7932_v5  ;;  %2802 = vst [vmem:[#allocation2 + $0x2a0] sm:$0xff] %v6288_v50  ;;  %v1504_v22 = vsel %vm1478_vm2, %v7895_v16, %v12453_v38 }
 0x29c   :  { %1402 = vrot.lane.b32.xlu0 %v12436_v59, %s6286_s17  ;;  %v1851_v29 = vsel %vm1803_vm7, %v1786_v48, %v8297_v36  ;;  %v12445_v36 = vld [vmem:[#allocation93_spill] sm:$0xff]  ;;  %2803 = vst [vmem:[#allocation2 + $0x2a8] sm:$0xff] %v6288_v50 }
 0x29d   :  { %v1435_v42 = vpop.permute.xlu1 %1434  ;;  %v1463_v5 = vpop.permute.xlu2 %1462  ;;  %v1567_v13 = vsel %vm1543_vm3, %v1502_v28, %v12445_v36  ;;  %v12446_v59 = vld [vmem:[#allocation105_spill] sm:$0xff]  ;;  %2804 = vst [vmem:[#allocation2 + $0x2b0] sm:$0x3] %v6288_v50 }
 0x29e   :  { %v1365_v33 = vpop.permute.xlu0 %1364  ;;  %v1632_v3 = vsel %vm1608_vm4, %v1567_v13, %v12446_v59  ;;  %2805 = vst [vmem:[#allocation2 + $0x2b8] sm:$0xff] %v6288_v50 }
 0x29f   :  { %v1890_v17 = vsel %vm1868_vm8, %v1825_v47, %v1365_v33  ;;  %v8405_v51 = vpop.f32.mrf.mxu0  ;;  %v1697_v10 = vsel %vm1673_vm6, %v1632_v3, %v12447_v24  ;;  %2806 = vst [vmem:[#allocation2 + $0x2c0] sm:$0xff] %v6288_v50  ;;  %v12459_v24 = vld [vmem:[#allocation76_spill] sm:$0xff] }
 0x2a0   :  { %v1955_v56 = vsel %vm1933_vm9, %v1890_v17, %v1435_v42  ;;  %v12448_v42 = vld [vmem:[#allocation143_spill] sm:$0xff]  ;;  %2807 = vst [vmem:[#allocation2 + $0x2c8] sm:$0x3] %v6288_v50 }
 0x2a1   :  { %2808 = vst [vmem:[#allocation2 + $0x2d0] sm:$0xff] %v6288_v50 }
 0x2a2   :  { %6045 = vmatmul.msk.bf16.gmra.mxu0 %vm1998_vm10, %v1955_v56  ;;  %v12450_v56 = vld [vmem:[#allocation95_spill] sm:$0xff]  ;;  %2809 = vst [vmem:[#allocation2 + $0x2d8] sm:$0xff] %v6288_v50 }
 0x2a3   :  { %1474 = vrot.lane.b32.xlu2 %v1175_v20, %s6285_s16  ;;  %1404 = vrot.lane.b32.xlu1 %v12442_v62, %s6286_s17  ;;  %2810 = vst [vmem:[#allocation2 + $0x2e0] sm:$0x3] %v6288_v50 }
 0x2a4   :  { %1310 = vrot.lane.b32.xlu0 %v6250_v7, %s6287_s18  ;;  %v1762_v7 = vsel %vm1738_vm5, %v1697_v10, %v12448_v42  ;;  %2811 = vst [vmem:[#allocation2 + $0x2e8] sm:$0xff] %v6288_v50  ;;  %v1530_v10 = vsel %vm1478_vm2, %v7917_v43, %v12459_v24 }
 0x2a5   :  { %v1461_v31 = vpop.permute.xlu1 %1460  ;;  %v1827_v47 = vsel %vm1803_vm7, %v1762_v7, %v8350_v25  ;;  %v1439_v25 = vpop.permute.xlu2 %1438  ;;  %2812 = vst [vmem:[#allocation2 + $0x2f0] sm:$0xff] %v6288_v50  ;;  %v12461_v7 = vld [vmem:[#allocation9_spill] sm:$0xff] }
 0x2a6   :  { %v1391_v0 = vpop.permute.xlu0 %1390  ;;  %2813 = vst [vmem:[#allocation2 + $0x2f8] sm:$0x3] %v6288_v50 }
 0x2a7   :  { %v1916_v41 = vsel %vm1868_vm8, %v1851_v29, %v1391_v0  ;;  %v8441_v45 = vpop.f32.mrf.mxu0  ;;  %2814 = vst [vmem:[#allocation2 + $0x300] sm:$0xff] %v6288_v50 }
 0x2a8   :  { %v1981_v39 = vsel %vm1933_vm9, %v1916_v41, %v1461_v31  ;;  %v12455_v31 = vld [vmem:[#allocation45_spill] sm:$0xff]  ;;  %2815 = vst [vmem:[#allocation2 + $0x308] sm:$0xff] %v6288_v50 }
 0x2a9   :  { %6058 = vmatmul.msk.bf16.gmra.mxu2 %vm1998_vm10, %v1981_v39  ;;  %v12458_v39 = vld [vmem:[#allocation138_spill] sm:$0xff]  ;;  %2816 = vst [vmem:[#allocation2 + $0x310] sm:$0x3] %v6288_v50 }
 0x2aa   :  { %2817 = vst [vmem:[#allocation2 + $0x318] sm:$0xff] %v6288_v50 }
 0x2ab   :  { %1406 = vrot.lane.b32.xlu2 %v1343_v14, %s6286_s17  ;;  %1312 = vrot.lane.b32.xlu1 %v8396_v27, %s6287_s18  ;;  %v1413_v27 = vsel %vm841_vm1, %v1411_v37, %v1412_v40  ;;  %v12457_v14 = vld [vmem:[#allocation129_spill] sm:$0xff]  ;;  %2818 = vst [vmem:[#allocation2 + $0x320] sm:$0xff] %v6288_v50  ;;  %v12462_v40 = vld [vmem:[#allocation106_spill] sm:$0xff]  ;;  %s6293_s17 = smov [#allocation4]  }
 0x2ac   :  { %1238 = vrot.lane.b32.xlu0 %v1175_v20, %s6284_s15  ;;  %v1593_v20 = vsel %vm1543_vm3, %v1528_v57, %v12450_v56  ;;  %2819 = vst [vmem:[#allocation2 + $0x328] sm:$0x3] %v6288_v50  ;;  %s5847_s15 = sshll.u32 %s11817_s7, 4  ;;  %s5845_s1 = sshll.u32 %s6293_s17, 4  ;;  %s5848_s15 = int_to_ptr.hbm [resolvable:$true] %s5847_s15  ;;  %s5846_s1 = int_to_ptr.vmem [resolvable:$true] %s5845_s1 }
 0x2ad   :  { %v1437_v12 = vpop.permute.xlu1 %1436  ;;  %v1658_v54 = vsel %vm1608_vm4, %v1593_v20, %v12451_v23  ;;  %v1395_v0 = vpop.permute.xlu2 %1394  ;;  %2820 = vst [vmem:[#allocation2 + $0x330] sm:$0xff] %v6288_v50  ;;  %v12465_v20 = vld [vmem:[#allocation34_spill] sm:$0xff] }
 0x2ae   :  { %v1367_v33 = vpop.permute.xlu0 %1366  ;;  %v1723_v1 = vsel %vm1673_vm6, %v1658_v54, %v12452_v6  ;;  %2821 = vst [vmem:[#allocation2 + $0x338] sm:$0xff] %v6288_v50  ;;  %v1506_v23 = vsel %vm1478_vm2, %v7947_v35, %v12465_v20  ;;  %v12469_v35 = vld [vmem:[#allocation147_spill] sm:$0xff] }
 0x2af   :  { %v1892_v17 = vsel %vm1868_vm8, %v1827_v47, %v1367_v33  ;;  %v8474_v2 = vpop.f32.mrf.mxu0  ;;  %v1788_v30 = vsel %vm1738_vm5, %v1723_v1, %v8401_v18  ;;  %v12454_v18 = vld [vmem:[#allocation84_spill] sm:$0xff]  ;;  %2822 = vst [vmem:[#allocation2 + $0x340] sm:$0x3] %v6288_v50  ;;  %v12466_v1 = vld [vmem:[#allocation97_spill] sm:$0xff] }
 0x2b0   :  { %v1957_v44 = vsel %vm1933_vm9, %v1892_v17, %v1437_v12  ;;  %v1569_v48 = vsel %vm1543_vm3, %v1504_v22, %v12454_v18  ;;  %v1595_v12 = vsel %vm1543_vm3, %v1530_v10, %v12461_v7  ;;  %2825 = vst [vmem:[#allocation2 + $0x358] sm:$0x3] %v6288_v50 }
 0x2b1   :  { %v1634_v29 = vsel %vm1608_vm4, %v1569_v48, %v12455_v31  ;;  %v1660_v47 = vsel %vm1608_vm4, %v1595_v12, %v12462_v40 }
 0x2b2   :  { %6046 = vmatmul.msk.bf16.gmra.mxu0 %vm1998_vm10, %v1957_v44  ;;  %v1699_v16 = vsel %vm1673_vm6, %v1634_v29, %v12457_v14  ;;  %v12463_v44 = vld [vmem:[#allocation31_spill] sm:$0xff]  ;;  %v12470_v14 = vld [vmem:[#allocation68_spill] sm:$0xff] }
 0x2b3   :  { %v1764_v46 = vsel %vm1738_vm5, %v1699_v16, %v12458_v39  ;;  %v1725_v43 = vsel %vm1673_vm6, %v1660_v47, %v12463_v44  ;;  %v1532_v16 = vsel %vm1478_vm2, %v8008_v60, %v12470_v14  ;;  %v12474_v44 = vld [vmem:[#allocation64_spill] sm:$0xff] }
 0x2b4   :  { %1476 = vrot.lane.b32.xlu0 %v1413_v27, %s6285_s16 }
 0x2b5   :  { %v1393_v58 = vpop.permute.xlu1 %1392  ;;  %v1371_v33 = vpop.permute.xlu2 %1370 }
 0x2b6   :  { %v1299_v9 = vpop.permute.xlu0 %1298 }
 0x2b7   :  { %v1853_v55 = vsel %vm1803_vm7, %v1788_v30, %v1299_v9  ;;  %v8500_v62 = vpop.f32.mrf.mxu0 }
 0x2b8   :  { %v1918_v34 = vsel %vm1868_vm8, %v1853_v55, %v1393_v58  ;;  %v1571_v58 = vsel %vm1543_vm3, %v1506_v23, %v12466_v1  ;;  %v12467_v55 = vld [vmem:[#allocation15_spill] sm:$0xff]  ;;  %v12477_v23 = vld [vmem:[#allocation124_spill] sm:$0xff] }
 0x2b9   :  { %v1983_v49 = vsel %vm1933_vm9, %v1918_v34, %v1463_v5  ;;  %v1636_v50 = vsel %vm1608_vm4, %v1571_v58, %v12467_v55  ;;  %v12478_v58 = vld [vmem:[#allocation146_spill] sm:$0xff] }
 0x2ba   :  { %6059 = vmatmul.msk.bf16.gmra.mxu2 %vm1998_vm10, %v1983_v49  ;;  %v12468_v49 = vld [vmem:[#allocation128_spill] sm:$0xff] }
 0x2bb   :  { %v1701_v38 = vsel %vm1673_vm6, %v1636_v50, %v12468_v49 }
 0x2bc   :  { %v8517_v41 = vpop.f32.mrf.mxu2  ;;  %v1766_v22 = vsel %vm1738_vm5, %v1701_v38, %v12469_v35  ;;  %v12479_v35 = vld [vmem:[#allocation80_spill] sm:$0xff] }
 0x2bd   :  { %12456 = vst [vmem:[#allocation62_spill] sm:$0xff] %v8517_v41  ;;  %v1369_v5 = vpop.permute.xlu1 %1368  ;;  %v1303_v34 = vpop.permute.xlu2 %1302 }
 0x2be   :  { %v1275_v28 = vpop.permute.xlu0 %1274 }
 0x2bf   :  { %v1829_v36 = vsel %vm1803_vm7, %v1764_v46, %v1275_v28  ;;  %v8527_v13 = vpop.f32.mrf.mxu0  ;;  %v12471_v46 = vld [vmem:[#allocation14_spill] sm:$0xff] }
 0x2c0   :  { %v1894_v59 = vsel %vm1868_vm8, %v1829_v36, %v1369_v5  ;;  %v1597_v28 = vsel %vm1543_vm3, %v1532_v16, %v12471_v46  ;;  %v12472_v36 = vld [vmem:[#allocation118_spill] sm:$0xff] }
 0x2c1   :  { %v1959_v3 = vsel %vm1933_vm9, %v1894_v59, %v1439_v25  ;;  %v1662_v59 = vsel %vm1608_vm4, %v1597_v28, %v12472_v36  ;;  %v12482_v16 = vld [vmem:[#allocation134_spill] sm:$0xff] }
 0x2c2   :  { %6047 = vmatmul.msk.bf16.gmra.mxu0 %vm1998_vm10, %v1959_v3  ;;  %v12473_v3 = vld [vmem:[#allocation23_spill] sm:$0xff] }
 0x2c3   :  { %v1727_v24 = vsel %vm1673_vm6, %v1662_v59, %v12473_v3 }
 0x2c4   :  { %v8540_v42 = vpop.f32.mrf.mxu2 }
 0x2c5   :  { %12460 = vst [vmem:[#allocation18_spill] sm:$0xff] %v8540_v42  ;;  %v1301_v37 = vpop.permute.xlu1 %1300  ;;  %v1279_v10 = vpop.permute.xlu2 %1278 }
 0x2c6   :  { %v1227_v17 = vpop.permute.xlu0 %1226 }
 0x2c7   :  { %v8551_v27 = vpop.f32.mrf.mxu0  ;;  %v1790_v21 = vsel %vm1738_vm5, %v1725_v43, %v1227_v17  ;;  %v1508_v43 = vsel %vm1478_vm2, %v8037_v19, %v12474_v44 }
 0x2c8   :  { %v1855_v57 = vsel %vm1803_vm7, %v1790_v21, %v1301_v37  ;;  %v12475_v21 = vld [vmem:[#allocation96_spill] sm:$0xff] }
 0x2c9   :  { %v1920_v6 = vsel %vm1868_vm8, %v1855_v57, %v1395_v0  ;;  %v1573_v57 = vsel %vm1543_vm3, %v1508_v43, %v12475_v21  ;;  %v12486_v43 = vld [vmem:[#allocation26_spill] sm:$0xff] }
 0x2cc   :  { %v8558_v25 = vpop.f32.mrf.mxu2 }
 0x2cd   :  { %12464 = vst [vmem:[#allocation61_spill] sm:$0xff] %v8558_v25  ;;  %v1277_v56 = vpop.permute.xlu1 %1276 }
 0x2ce   :  { %v1465_v54 = vpop.permute.xlu0 %1464  ;;  %v1831_v18 = vsel %vm1803_vm7, %v1766_v22, %v1277_v56  ;;  %v12476_v56 = vld [vmem:[#allocation109_spill] sm:$0xff]  ;;  %v1534_v22 = vsel %vm1478_vm2, %v8062_v32, %v12479_v35  ;;  %v12490_v35 = vld [vmem:[#allocation110_spill] sm:$0xff] }
 0x2cf   :  { %v8566_v30 = vpop.f32.mrf.mxu0  ;;  %v1985_v9 = vsel %vm1933_vm9, %v1920_v6, %v1465_v54  ;;  %v1896_v29 = vsel %vm1868_vm8, %v1831_v18, %v1371_v33  ;;  %v1638_v20 = vsel %vm1608_vm4, %v1573_v57, %v12476_v56  ;;  %v1231_v6 = vpop.permute.xlu2 %1230  ;;  %v12480_v18 = vld [vmem:[#allocation98_spill] sm:$0xff]  ;;  %v12487_v56 = vld [vmem:[#allocation139_spill] sm:$0xff] }
 0x2d0   :  { %6060 = vmatmul.msk.bf16.gmra.mxu2 %vm1998_vm10, %v1985_v9  ;;  %v1703_v54 = vsel %vm1673_vm6, %v1638_v20, %v12477_v23 }
 0x2d1   :  { %v1768_v9 = vsel %vm1738_vm5, %v1703_v54, %v12478_v58 }
 0x2d2   :  { %v1833_v19 = vsel %vm1803_vm7, %v1768_v9, %v1279_v10 }
 0x2d4   :  { %v8577_v48 = vpop.f32.mrf.mxu2 }
 0x2d5   :  { %v1229_v31 = vpop.permute.xlu1 %1228 }
 0x2d6   :  { %v1441_v0 = vpop.permute.xlu0 %1440  ;;  %v1792_v7 = vsel %vm1738_vm5, %v1727_v24, %v1229_v31  ;;  %v1599_v31 = vsel %vm1543_vm3, %v1534_v22, %v12480_v18 }
 0x2d7   :  { %v1961_v5 = vsel %vm1933_vm9, %v1896_v29, %v1441_v0  ;;  %v8584_v39 = vpop.f32.mrf.mxu0  ;;  %v1857_v37 = vsel %vm1803_vm7, %v1792_v7, %v1303_v34  ;;  %v12481_v29 = vld [vmem:[#allocation117_spill] sm:$0xff]  ;;  %v1469_v36 = vpop.permute.xlu2 %1468  ;;  %v12483_v7 = vld [vmem:[#allocation48_spill] sm:$0xff] }
 0x2d8   :  { %6048 = vmatmul.msk.bf16.gmra.mxu0 %vm1998_vm10, %v1961_v5  ;;  %v1664_v0 = vsel %vm1608_vm4, %v1599_v31, %v12481_v29  ;;  %v12491_v31 = vld [vmem:[#allocation133_spill] sm:$0xff] }
 0x2d9   :  { %v1729_v5 = vsel %vm1673_vm6, %v1664_v0, %v12482_v16 }
 0x2da   :  { %v1794_v28 = vsel %vm1738_vm5, %v1729_v5, %v1231_v6 }
 0x2dc   :  { %v8594_v12 = vpop.f32.mrf.mxu2 }
 0x2dd   :  { %v1467_v60 = vpop.permute.xlu1 %1466 }
 0x2de   :  { %v1397_v40 = vpop.permute.xlu0 %1396 }
 0x2df   :  { %v1922_v47 = vsel %vm1868_vm8, %v1857_v37, %v1397_v40  ;;  %v8598_v33 = vpop.f32.mrf.mxu0  ;;  %v12484_v37 = vld [vmem:[#allocation86_spill] sm:$0xff]  ;;  %v1445_v6 = vpop.permute.xlu2 %1444 }
 0x2e0   :  { %v1987_v17 = vsel %vm1933_vm9, %v1922_v47, %v1467_v60  ;;  %v1510_v60 = vsel %vm1478_vm2, %v8091_v4, %v12483_v7  ;;  %v12485_v47 = vld [vmem:[#allocation108_spill] sm:$0xff]  ;;  %v12492_v7 = vld [vmem:[#allocation70_spill] sm:$0xff] }
 0x2e1   :  { %6061 = vmatmul.msk.bf16.gmra.mxu2 %vm1998_vm10, %v1987_v17  ;;  %v1575_v40 = vsel %vm1543_vm3, %v1510_v60, %v12484_v37  ;;  %v1538_v60 = vsel %vm1478_vm2, %v8238_v52, %v12492_v7 }
 0x2e2   :  { %v1640_v17 = vsel %vm1608_vm4, %v1575_v40, %v12485_v47  ;;  %v12493_v40 = vld [vmem:[#allocation17_spill] sm:$0xff] }
 0x2e3   :  { %v1705_v21 = vsel %vm1673_vm6, %v1640_v17, %v12486_v43  ;;  %v1603_v47 = vsel %vm1543_vm3, %v1538_v60, %v12493_v40  ;;  %v12494_v17 = vld [vmem:[#allocation121_spill] sm:$0xff] }
 0x2e4   :  { %v8611_v1 = vpop.f32.mrf.mxu2  ;;  %v1770_v20 = vsel %vm1738_vm5, %v1705_v21, %v12487_v56  ;;  %v1668_v43 = vsel %vm1608_vm4, %v1603_v47, %v12494_v17  ;;  %v12495_v21 = vld [vmem:[#allocation32_spill] sm:$0xff] }
 0x2e5   :  { %v1443_v55 = vpop.permute.xlu1 %1442 }
 0x2e6   :  { %v1373_v50 = vpop.permute.xlu0 %1372 }
 0x2e7   :  { %v1898_v34 = vsel %vm1868_vm8, %v1833_v19, %v1373_v50  ;;  %v8617_v49 = vpop.f32.mrf.mxu0 }
 0x2e8   :  { %v1963_v38 = vsel %vm1933_vm9, %v1898_v34, %v1443_v55  ;;  %v12488_v55 = vld [vmem:[#allocation79_spill] sm:$0xff]  ;;  %v12489_v34 = vld [vmem:[#allocation12_spill] sm:$0xff] }
 0x2e9   :  { %6049 = vmatmul.msk.bf16.gmra.mxu0 %vm1998_vm10, %v1963_v38  ;;  %v1536_v19 = vsel %vm1478_vm2, %v8117_v8, %v12488_v55 }
 0x2ea   :  { %v1601_v38 = vsel %vm1543_vm3, %v1536_v19, %v12489_v34  ;;  %v12496_v34 = vld [vmem:[#allocation83_spill] sm:$0xff] }
 0x2eb   :  { %v1666_v22 = vsel %vm1608_vm4, %v1601_v38, %v12490_v35  ;;  %v1540_v38 = vsel %vm1478_vm2, %v8307_v61, %v12496_v34 }
 0x2ec   :  { %v8628_v14 = vpop.f32.mrf.mxu2  ;;  %v1731_v29 = vsel %vm1673_vm6, %v1666_v22, %v12491_v31 }
 0x2ed   :  { %v1399_v46 = vpop.permute.xlu1 %1398 }
 0x2ee   :  { %v1305_v59 = vpop.permute.xlu0 %1304 }
 0x2ef   :  { %v1859_v3 = vsel %vm1803_vm7, %v1794_v28, %v1305_v59  ;;  %v8634_v24 = vpop.f32.mrf.mxu0  ;;  %v1401_v28 = vpop.permute.xlu2 %1400 }
 0x2f0   :  { %v1924_v32 = vsel %vm1868_vm8, %v1859_v3, %v1399_v46 }
 0x2f1   :  { %v1989_v10 = vsel %vm1933_vm9, %v1924_v32, %v1469_v36 }
 0x2f2   :  { %6062 = vmatmul.msk.bf16.gmra.mxu2 %vm1998_vm10, %v1989_v10 }
 0x2f4   :  { %v8646_v44 = vpop.f32.mrf.mxu2 }
 0x2f5   :  { %v1375_v57 = vpop.permute.xlu1 %1374 }
 0x2f6   :  { %v1281_v23 = vpop.permute.xlu0 %1280 }
 0x2f7   :  { %v1835_v4 = vsel %vm1803_vm7, %v1770_v20, %v1281_v23  ;;  %v8653_v54 = vpop.f32.mrf.mxu0 }
 0x2f8   :  { %v1900_v58 = vsel %vm1868_vm8, %v1835_v4, %v1375_v57  ;;  %v1733_v57 = vsel %vm1673_vm6, %v1668_v43, %v12495_v21  ;;  %v1309_v4 = vpop.permute.xlu2 %1308  ;;  %v12502_v43 = vld [vmem:[#allocation82_spill] sm:$0xff] }
 0x2f9   :  { %v1965_v9 = vsel %vm1933_vm9, %v1900_v58, %v1445_v6  ;;  %v1542_v21 = vsel %vm1478_vm2, %v8339_v11, %v12502_v43  ;;  %vm4833_vm2 = vcmask 457728  }
 0x2fa   :  { %6050 = vmatmul.msk.bf16.gmra.mxu0 %vm1998_vm10, %v1965_v9 }
 0x2fc   :  { %v8661_v50 = vpop.f32.mrf.mxu2 }
 0x2fd   :  { %v1307_v16 = vpop.permute.xlu1 %1306 }
 0x2fe   :  { %v1233_v18 = vpop.permute.xlu0 %1232 }
 0x2ff   :  { %v8669_v0 = vpop.f32.mrf.mxu0  ;;  %v1796_v5 = vsel %vm1738_vm5, %v1731_v29, %v1233_v18  ;;  %v12497_v18 = vld [vmem:[#allocation101_spill] sm:$0xff]  ;;  %v12498_v29 = vld [vmem:[#allocation120_spill] sm:$0xff] }
 0x300   :  { %v1861_v46 = vsel %vm1803_vm7, %v1796_v5, %v1307_v16  ;;  %v1237_v35 = vpop.permute.xlu2 %1236  ;;  %v1605_v31 = vsel %vm1543_vm3, %v1540_v38, %v12497_v18 }
 0x301   :  { %v1926_v36 = vsel %vm1868_vm8, %v1861_v46, %v1401_v28  ;;  %v1670_v16 = vsel %vm1608_vm4, %v1605_v31, %v12498_v29  ;;  %v12499_v46 = vld [vmem:[#allocation137_spill] sm:$0xff] }
 0x302   :  { %v1735_v28 = vsel %vm1673_vm6, %v1670_v16, %v12499_v46 }
 0x304   :  { %v8673_v8 = vpop.f32.mrf.mxu2 }
 0x305   :  { %v1235_v10 = vpop.permute.xlu1 %1234 }
 0x306   :  { %v1471_v59 = vpop.permute.xlu0 %1470  ;;  %v1798_v20 = vsel %vm1738_vm5, %v1733_v57, %v1235_v10  ;;  %v12503_v57 = vld [vmem:[#allocation24_spill] sm:$0xff] }
 0x307   :  { %v1991_v3 = vsel %vm1933_vm9, %v1926_v36, %v1471_v59  ;;  %v8677_v32 = vpop.f32.mrf.mxu0  ;;  %v1863_v6 = vsel %vm1803_vm7, %v1798_v20, %v1309_v4  ;;  %v1800_v59 = vsel %vm1738_vm5, %v1735_v28, %v1237_v35  ;;  %v1607_v20 = vsel %vm1543_vm3, %v1542_v21, %v12503_v57  ;;  %v12504_v4 = vld [vmem:[#allocation112_spill] sm:$0xff] }
 0x308   :  { %6063 = vmatmul.msk.bf16.gmra.mxu2 %vm1998_vm10, %v1991_v3  ;;  %v1475_v7 = vpop.permute.xlu2 %1474  ;;  %v2367_v28 = vmul.f32 %v8285_v53, %v8285_v53  ;;  %v2370_v57 = vmul.f32 %v8405_v51, %v8405_v51 }
 0x30c   :  { %v8683_v37 = vpop.f32.mrf.mxu2 }
 0x30d   :  { %v1473_v58 = vpop.permute.xlu1 %1472 }
 0x30e   :  { %v1403_v23 = vpop.permute.xlu0 %1402 }
 0x30f   :  { %v8691_v56 = vpop.f32.mrf.mxu0  ;;  %v1928_v52 = vsel %vm1868_vm8, %v1863_v6, %v1403_v23  ;;  %v1672_v6 = vsel %vm1608_vm4, %v1607_v20, %v12504_v4  ;;  %vm4898_vm4 = vcmask 523264  }
 0x310   :  { %v1993_v55 = vsel %vm1933_vm9, %v1928_v52, %v1473_v58  ;;  %v12505_v52 = vld [vmem:[#allocation136_spill] sm:$0xff]  ;;  %v1407_v18 = vpop.permute.xlu2 %1406 }
 0x311   :  { %v1737_v58 = vsel %vm1673_vm6, %v1672_v6, %v12505_v52  ;;  %v2371_v6 = vmul.f32 %v8441_v45, %v8441_v45 }
 0x314   :  { %v8696_v9 = vpop.f32.mrf.mxu2 }
 0x315   :  { %v1405_v61 = vpop.permute.xlu1 %1404 }
 0x316   :  { %v1311_v5 = vpop.permute.xlu0 %1310 }
 0x317   :  { %v8699_v19 = vpop.f32.mrf.mxu0  ;;  %v1865_v3 = vsel %vm1803_vm7, %v1800_v59, %v1311_v5 }
 0x318   :  { %6064 = vmatmul.msk.bf16.gmra.mxu2 %vm1998_vm10, %v1993_v55  ;;  %v1930_v10 = vsel %vm1868_vm8, %v1865_v3, %v1405_v61  ;;  %v2366_v3 = vmul.f32 %v8250_v63, %v8250_v63  ;;  %v2297_v61 = vadd.f32 %v8285_v53, %v8250_v63 }
 0x319   :  { %v1995_v40 = vsel %vm1933_vm9, %v1930_v10, %v1475_v7  ;;  %v2368_v10 = vmul.f32 %v8324_v15, %v8324_v15 }
 0x31a   :  { %v2298_v7 = vadd.f32 %v2297_v61, %v8324_v15 }
 0x31c   :  { %v8705_v22 = vpop.f32.mrf.mxu2  ;;  %v2299_v21 = vadd.f32 %v2298_v7, %v8360_v26  ;;  %v2375_v7 = vmul.f32 %v8551_v27, %v8551_v27 }
 0x31d   :  { %v1313_v38 = vpop.permute.xlu1 %1312 }
 0x31e   :  { %v1239_v17 = vpop.permute.xlu0 %1238  ;;  %v2300_v20 = vadd.f32 %v2299_v21, %v8405_v51  ;;  %v2376_v21 = vmul.f32 %v8566_v30, %v8566_v30 }
 0x31f   :  { %v8713_v36 = vpop.f32.mrf.mxu0  ;;  %v1802_v34 = vsel %vm1738_vm5, %v1737_v58, %v1239_v17  ;;  %v2369_v17 = vmul.f32 %v8360_v26, %v8360_v26  ;;  %vm4963_vm5 = vcmask 588800  }
 0x320   :  { %12500 = vst [vmem:[#allocation65_spill] sm:$0xff] %v8713_v36  ;;  %v1867_v35 = vsel %vm1803_vm7, %v1802_v34, %v1313_v38  ;;  %v2301_v34 = vadd.f32 %v2300_v20, %v8441_v45  ;;  %v2372_v38 = vmul.f32 %v8474_v2, %v8474_v2 }
 0x321   :  { %v1932_v31 = vsel %vm1868_vm8, %v1867_v35, %v1407_v18 }
 0x322   :  { %v2302_v18 = vadd.f32 %v2301_v34, %v8474_v2 }
 0x324   :  { %v8718_v60 = vpop.f32.mrf.mxu2 }
 0x326   :  { %v1477_v11 = vpop.permute.xlu0 %1476 }
 0x327   :  { %v8721_v47 = vpop.f32.mrf.mxu0  ;;  %v1997_v29 = vsel %vm1933_vm9, %v1932_v31, %v1477_v11  ;;  %v2373_v31 = vmul.f32 %v8500_v62, %v8500_v62 }
 0x328   :  { %12501 = vst [vmem:[#allocation44_spill] sm:$0xff] %v8721_v47  ;;  %6065 = vmatmul.msk.bf16.gmra.mxu2 %vm1998_vm10, %v1995_v40  ;;  %v2430_v40 = vadd.f32 %v2367_v28, %v2366_v3  ;;  %v2303_v28 = vadd.f32 %v2302_v18, %v8500_v62  ;;  %v2374_v3 = vmul.f32 %v8527_v13, %v8527_v13 }
 0x32a   :  { %v2431_v43 = vadd.f32 %v2430_v40, %v2368_v10  ;;  %v2304_v61 = vadd.f32 %v2303_v28, %v8527_v13 }
 0x32c   :  { %v8729_v23 = vpop.f32.mrf.mxu2  ;;  %v2432_v4 = vadd.f32 %v2431_v43, %v2369_v17  ;;  %v2305_v43 = vadd.f32 %v2304_v61, %v8551_v27  ;;  %v2380_v61 = vmul.f32 %v8634_v24, %v8634_v24 }
 0x32e   :  { %v2433_v58 = vadd.f32 %v2432_v4, %v2370_v57  ;;  %v2306_v4 = vadd.f32 %v2305_v43, %v8566_v30  ;;  %v2381_v43 = vmul.f32 %v8653_v54, %v8653_v54 }
 0x32f   :  { %v8735_v55 = vpop.f32.mrf.mxu0 }
 0x330   :  { %12506 = vst [vmem:[#allocation100_spill] sm:$0xff] %v8735_v55  ;;  %v2434_v11 = vadd.f32 %v2433_v58, %v2371_v6  ;;  %v2377_v6 = vmul.f32 %v8584_v39, %v8584_v39  ;;  %v2307_v34 = vadd.f32 %v2306_v4, %v8584_v39  ;;  %v2382_v4 = vmul.f32 %v8669_v0, %v8669_v0 }
 0x334   :  { %v8741_v16 = vpop.f32.mrf.mxu2 }
 0x337   :  { %v8744_v5 = vpop.f32.mrf.mxu0 }
 0x338   :  { %6066 = vmatmul.msk.bf16.gmra.mxu2 %vm1998_vm10, %v1997_v29  ;;  %12507 = vst [vmem:[#allocation38_spill] sm:$0xff] %v8744_v5  ;;  %v2435_v29 = vadd.f32 %v2434_v11, %v2372_v38  ;;  %v2378_v38 = vmul.f32 %v8598_v33, %v8598_v33  ;;  %v2308_v11 = vadd.f32 %v2307_v34, %v8598_v33 }
 0x339   :  { %v2383_v34 = vmul.f32 %v8677_v32, %v8677_v32 }
 0x33a   :  { %v2436_v10 = vadd.f32 %v2435_v29, %v2373_v31  ;;  %v2379_v31 = vmul.f32 %v8617_v49, %v8617_v49 }
 0x33c   :  { %v2437_v17 = vadd.f32 %v2436_v10, %v2374_v3  ;;  %v2309_v3 = vadd.f32 %v2308_v11, %v8617_v49  ;;  %v2384_v11 = vmul.f32 %v8691_v56, %v8691_v56 }
 0x33d   :  { %v8746_v46 = vpop.f32.mrf.mxu2 }
 0x33e   :  { %v2438_v20 = vadd.f32 %v2437_v17, %v2375_v7  ;;  %v2310_v17 = vadd.f32 %v2309_v3, %v8634_v24 }
 0x33f   :  { %v8750_v59 = vpop.f32.mrf.mxu0 }
 0x340   :  { %12508 = vst [vmem:[#allocation67_spill] sm:$0xff] %v8750_v59  ;;  %v2439_v58 = vadd.f32 %v2438_v20, %v2376_v21  ;;  %v2311_v20 = vadd.f32 %v2310_v17, %v8653_v54 }
 0x342   :  { %v2440_v18 = vadd.f32 %v2439_v58, %v2377_v6  ;;  %v2312_v58 = vadd.f32 %v2311_v20, %v8669_v0 }
 0x344   :  { %v2441_v28 = vadd.f32 %v2440_v18, %v2378_v38  ;;  %v2313_v18 = vadd.f32 %v2312_v58, %v8677_v32 }
 0x345   :  { %v8767_v52 = vpop.f32.mrf.mxu2 }
 0x346   :  { %v2442_v7 = vadd.f32 %v2441_v28, %v2379_v31  ;;  %v2314_v3 = vadd.f32 %v2313_v18, %v8691_v56 }
 0x347   :  { %v8772_v35 = vpop.f32.mrf.mxu0 }
 0x348   :  { %12509 = vst [vmem:[#allocation57_spill] sm:$0xff] %v8772_v35  ;;  %v2443_v21 = vadd.f32 %v2442_v7, %v2380_v61  ;;  %v2385_v61 = vmul.f32 %v8699_v19, %v8699_v19 }
 0x34a   :  { %v2444_v6 = vadd.f32 %v2443_v21, %v2381_v43  ;;  %v2315_v43 = vadd.f32 %v2314_v3, %v8699_v19  ;;  %v2386_v21 = vmul.f32 %v8713_v36, %v8713_v36 }
 0x34c   :  { %v2445_v38 = vadd.f32 %v2444_v6, %v2382_v4  ;;  %v2316_v4 = vadd.f32 %v2315_v43, %v8713_v36  ;;  %v2387_v6 = vmul.f32 %v8721_v47, %v8721_v47 }
 0x34e   :  { %v2446_v28 = vadd.f32 %v2445_v38, %v2383_v34  ;;  %v2317_v34 = vadd.f32 %v2316_v4, %v8721_v47  ;;  %v2388_v38 = vmul.f32 %v8735_v55, %v8735_v55 }
 0x350   :  { %v2447_v17 = vadd.f32 %v2446_v28, %v2384_v11  ;;  %v2318_v11 = vadd.f32 %v2317_v34, %v8735_v55  ;;  %v2389_v28 = vmul.f32 %v8744_v5, %v8744_v5 }
 0x352   :  { %v2448_v20 = vadd.f32 %v2447_v17, %v2385_v61  ;;  %v2319_v43 = vadd.f32 %v2318_v11, %v8744_v5 }
 0x353   :  { %v8783_v40 = vpop.f32.mrf.mxu2 }
 0x354   :  { %v2449_v58 = vadd.f32 %v2448_v20, %v2386_v21  ;;  %v2390_v21 = vmul.f32 %v8750_v59, %v8750_v59  ;;  %v2320_v4 = vadd.f32 %v2319_v43, %v8750_v59 }
 0x355   :  { %v8788_v57 = vpop.f32.mrf.mxu0 }
 0x356   :  { %12510 = vst [vmem:[#allocation88_spill] sm:$0xff] %v8788_v57  ;;  %v2450_v18 = vadd.f32 %v2449_v58, %v2387_v6  ;;  %v2391_v6 = vmul.f32 %v8772_v35, %v8772_v35  ;;  %v2321_v34 = vadd.f32 %v2320_v4, %v8772_v35  ;;  %v2392_v55 = vmul.f32 %v8788_v57, %v8788_v57 }
 0x358   :  { %v2451_v17 = vadd.f32 %v2450_v18, %v2388_v38  ;;  %v2322_v38 = vadd.f32 %v2321_v34, %v8788_v57 }
 0x35a   :  { %v2452_v20 = vadd.f32 %v2451_v17, %v2389_v28 }
 0x35b   :  { %v8799_v29 = vpop.f32.mrf.mxu2 }
 0x35c   :  { %v2453_v58 = vadd.f32 %v2452_v20, %v2390_v21 }
 0x35d   :  { %v8804_v10 = vpop.f32.mrf.mxu0 }
 0x35e   :  { %12511 = vst [vmem:[#allocation11_spill] sm:$0xff] %v8804_v10  ;;  %v2454_v47 = vadd.f32 %v2453_v58, %v2391_v6  ;;  %v2393_v18 = vmul.f32 %v8804_v10, %v8804_v10  ;;  %v2323_v17 = vadd.f32 %v2322_v38, %v8804_v10 }
 0x360   :  { %v2455_v28 = vadd.f32 %v2454_v47, %v2392_v55 }
 0x362   :  { %v2456_v20 = vadd.f32 %v2455_v28, %v2393_v18  ;;  %v2398_v28 = vmul.f32 %v8517_v41, %v8517_v41 }
 0x364   :  { %v8818_v31 = vpop.f32.mrf.mxu2 }
 0x366   :  { %v8823_v7 = vpop.f32.mrf.mxu0 }
 0x367   :  { %12512 = vst [vmem:[#allocation22_spill] sm:$0xff] %v8823_v7  ;;  %v2394_v43 = vmul.f32 %v8823_v7, %v8823_v7  ;;  %v2324_v4 = vadd.f32 %v2323_v17, %v8823_v7 }
 0x369   :  { %v2457_v58 = vadd.f32 %v2456_v20, %v2394_v43 }
 0x36c   :  { %v8839_v61 = vpop.f32.mrf.mxu2 }
 0x36e   :  { %v8837_v3 = vpop.f32.mrf.mxu0 }
 0x36f   :  { %12513 = vst [vmem:[#allocation33_spill] sm:$0xff] %v8837_v3  ;;  %v2395_v6 = vmul.f32 %v8837_v3, %v8837_v3  ;;  %v2325_v34 = vadd.f32 %v2324_v4, %v8837_v3  ;;  %v2399_v4 = vmul.f32 %v8540_v42, %v8540_v42 }
 0x371   :  { %v2458_v47 = vadd.f32 %v2457_v58, %v2395_v6 }
 0x375   :  { %v8858_v21 = vpop.f32.mrf.mxu2 }
 0x377   :  { %v8853_v11 = vpop.f32.mrf.mxu0 }
 0x378   :  { %12514 = vst [vmem:[#allocation99_spill] sm:$0xff] %v8853_v11  ;;  %v2396_v57 = vmul.f32 %v8853_v11, %v8853_v11  ;;  %v2326_v55 = vadd.f32 %v2325_v34, %v8853_v11 }
 0x37a   :  { %v2459_v10 = vadd.f32 %v2458_v47, %v2396_v57  ;;  %v2400_v57 = vmul.f32 %v8558_v25, %v8558_v25 }
 0x37d   :  { %v8875_v20 = vpop.f32.mrf.mxu2 }
 0x37e   :  { %12516 = vst [vmem:[#allocation51_spill] sm:$0xff] %v8875_v20 }
 0x37f   :  { %v8867_v38 = vpop.f32.mrf.mxu0 }
 0x380   :  { %12515 = vst [vmem:[#allocation41_spill] sm:$0xff] %v8867_v38  ;;  %v2327_v35 = vadd.f32 %v2326_v55, %v8867_v38  ;;  %v2397_v18 = vmul.f32 %v8867_v38, %v8867_v38  ;;  %v2401_v55 = vmul.f32 %v8577_v48, %v8577_v48 }
 0x382   :  { %v2328_v17 = vadd.f32 %v2327_v35, %v8517_v41  ;;  %v2460_v43 = vadd.f32 %v2459_v10, %v2397_v18  ;;  %v2402_v18 = vmul.f32 %v8594_v12, %v8594_v12 }
 0x384   :  { %v2329_v6 = vadd.f32 %v2328_v17, %v8540_v42  ;;  %v2461_v58 = vadd.f32 %v2460_v43, %v2398_v28  ;;  %v2403_v28 = vmul.f32 %v8611_v1, %v8611_v1 }
 0x386   :  { %v2330_v34 = vadd.f32 %v2329_v6, %v8558_v25  ;;  %v2462_v47 = vadd.f32 %v2461_v58, %v2399_v4  ;;  %v2404_v6 = vmul.f32 %v8628_v14, %v8628_v14 }
 0x388   :  { %v2331_v35 = vadd.f32 %v2330_v34, %v8577_v48  ;;  %v2463_v10 = vadd.f32 %v2462_v47, %v2400_v57  ;;  %v2405_v34 = vmul.f32 %v8646_v44, %v8646_v44 }
 0x38a   :  { %v2332_v41 = vadd.f32 %v2331_v35, %v8594_v12  ;;  %v2464_v38 = vadd.f32 %v2463_v10, %v2401_v55  ;;  %v2406_v35 = vmul.f32 %v8661_v50, %v8661_v50 }
 0x38b   :  { %v8889_v17 = vpop.f32.mrf.mxu2 }
 0x38c   :  { %12517 = vst [vmem:[#allocation58_spill] sm:$0xff] %v8889_v17  ;;  %v2333_v43 = vadd.f32 %v2332_v41, %v8611_v1  ;;  %v2465_v4 = vadd.f32 %v2464_v38, %v2402_v18  ;;  %v2407_v38 = vmul.f32 %v8673_v8, %v8673_v8 }
 0x38e   :  { %v2334_v58 = vadd.f32 %v2333_v43, %v8628_v14  ;;  %v2466_v57 = vadd.f32 %v2465_v4, %v2403_v28  ;;  %v2408_v43 = vmul.f32 %v8683_v37, %v8683_v37 }
 0x390   :  { %v2335_v47 = vadd.f32 %v2334_v58, %v8646_v44  ;;  %v2467_v55 = vadd.f32 %v2466_v57, %v2404_v6  ;;  %v2409_v58 = vmul.f32 %v8696_v9, %v8696_v9 }
 0x392   :  { %v2336_v10 = vadd.f32 %v2335_v47, %v8661_v50  ;;  %v2468_v25 = vadd.f32 %v2467_v55, %v2405_v34  ;;  %v2410_v47 = vmul.f32 %v8705_v22, %v8705_v22 }
 0x393   :  { %v8903_v41 = vpop.f32.mrf.mxu2 }
 0x394   :  { %12518 = vst [vmem:[#allocation87_spill] sm:$0xff] %v8903_v41  ;;  %v2337_v18 = vadd.f32 %v2336_v10, %v8673_v8  ;;  %v2469_v28 = vadd.f32 %v2468_v25, %v2406_v35  ;;  %v2411_v25 = vmul.f32 %v8718_v60, %v8718_v60 }
 0x396   :  { %v2338_v4 = vadd.f32 %v2337_v18, %v8683_v37  ;;  %v2470_v6 = vadd.f32 %v2469_v28, %v2407_v38  ;;  %v2412_v18 = vmul.f32 %v8729_v23, %v8729_v23 }
 0x398   :  { %v2339_v57 = vadd.f32 %v2338_v4, %v8696_v9  ;;  %v2471_v34 = vadd.f32 %v2470_v6, %v2408_v43  ;;  %v2413_v4 = vmul.f32 %v8741_v16, %v8741_v16 }
 0x39a   :  { %v2472_v55 = vadd.f32 %v2471_v34, %v2409_v58  ;;  %v2340_v42 = vadd.f32 %v2339_v57, %v8705_v22  ;;  %v2414_v57 = vmul.f32 %v8746_v46, %v8746_v46 }
 0x39b   :  { %v8917_v10 = vpop.f32.mrf.mxu2 }
 0x39c   :  { %12519 = vst [vmem:[#allocation104_spill] sm:$0xff] %v8917_v10  ;;  %v2341_v35 = vadd.f32 %v2340_v42, %v8718_v60  ;;  %v2473_v38 = vadd.f32 %v2472_v55, %v2410_v47  ;;  %v2415_v47 = vmul.f32 %v8767_v52, %v8767_v52 }
 0x39e   :  { %v2342_v28 = vadd.f32 %v2341_v35, %v8729_v23  ;;  %v2474_v43 = vadd.f32 %v2473_v38, %v2411_v25  ;;  %v2416_v35 = vmul.f32 %v8783_v40, %v8783_v40 }
 0x3a0   :  { %v2343_v6 = vadd.f32 %v2342_v28, %v8741_v16  ;;  %v2475_v58 = vadd.f32 %v2474_v43, %v2412_v18  ;;  %v2417_v28 = vmul.f32 %v8799_v29, %v8799_v29 }
 0x3a2   :  { %v2344_v34 = vadd.f32 %v2343_v6, %v8746_v46  ;;  %v2476_v11 = vadd.f32 %v2475_v58, %v2413_v4  ;;  %v2418_v6 = vmul.f32 %v8818_v31, %v8818_v31 }
 0x3a3   :  { %v8931_v42 = vpop.f32.mrf.mxu2 }
 0x3a4   :  { %12520 = vst [vmem:[#allocation21_spill] sm:$0xff] %v8931_v42  ;;  %v2345_v55 = vadd.f32 %v2344_v34, %v8767_v52  ;;  %v2477_v25 = vadd.f32 %v2476_v11, %v2414_v57  ;;  %v2419_v11 = vmul.f32 %v8839_v61, %v8839_v61 }
 0x3a6   :  { %v2346_v38 = vadd.f32 %v2345_v55, %v8783_v40  ;;  %v2478_v18 = vadd.f32 %v2477_v25, %v2415_v47  ;;  %v2420_v55 = vmul.f32 %v8858_v21, %v8858_v21 }
 0x3a8   :  { %v2347_v43 = vadd.f32 %v2346_v38, %v8799_v29  ;;  %v2479_v4 = vadd.f32 %v2478_v18, %v2416_v35  ;;  %v2421_v38 = vmul.f32 %v8875_v20, %v8875_v20 }
 0x3aa   :  { %v2348_v58 = vadd.f32 %v2347_v43, %v8818_v31  ;;  %v2480_v3 = vadd.f32 %v2479_v4, %v2417_v28  ;;  %v2422_v4 = vmul.f32 %v8889_v17, %v8889_v17 }
 0x3ab   :  { %v8945_v34 = vpop.f32.mrf.mxu2 }
 0x3ac   :  { %12521 = vst [vmem:[#allocation72_spill] sm:$0xff] %v8945_v34  ;;  %v2349_v57 = vadd.f32 %v2348_v58, %v8839_v61  ;;  %v2481_v47 = vadd.f32 %v2480_v3, %v2418_v6 }
 0x3ae   :  { %v2350_v25 = vadd.f32 %v2349_v57, %v8858_v21  ;;  %v2482_v35 = vadd.f32 %v2481_v47, %v2419_v11  ;;  %v2423_v11 = vmul.f32 %v8903_v41, %v8903_v41 }
 0x3b0   :  { %v2351_v18 = vadd.f32 %v2350_v25, %v8875_v20  ;;  %v2483_v28 = vadd.f32 %v2482_v35, %v2420_v55  ;;  %v2424_v55 = vmul.f32 %v8917_v10, %v8917_v10 }
 0x3b2   :  { %v2352_v43 = vadd.f32 %v2351_v18, %v8889_v17  ;;  %v2484_v7 = vadd.f32 %v2483_v28, %v2421_v38  ;;  %v2425_v38 = vmul.f32 %v8931_v42, %v8931_v42  ;;  %v2426_v28 = vmul.f32 %v8945_v34, %v8945_v34 }
 0x3b3   :  { %v8959_v58 = vpop.f32.mrf.mxu2 }
 0x3b4   :  { %12522 = vst [vmem:[#allocation89_spill] sm:$0xff] %v8959_v58  ;;  %v2485_v3 = vadd.f32 %v2484_v7, %v2422_v4  ;;  %v2353_v6 = vadd.f32 %v2352_v43, %v8903_v41 }
 0x3b6   :  { %v2486_v57 = vadd.f32 %v2485_v3, %v2423_v11  ;;  %v2354_v47 = vadd.f32 %v2353_v6, %v8917_v10  ;;  %v2427_v6 = vmul.f32 %v8959_v58, %v8959_v58 }
 0x3b8   :  { %v2487_v25 = vadd.f32 %v2486_v57, %v2424_v55  ;;  %v2355_v35 = vadd.f32 %v2354_v47, %v8931_v42 }
 0x3ba   :  { %v2488_v18 = vadd.f32 %v2487_v25, %v2425_v38  ;;  %v2356_v7 = vadd.f32 %v2355_v35, %v8945_v34 }
 0x3bb   :  { %v8973_v43 = vpop.f32.mrf.mxu2 }
 0x3bc   :  { %12523 = vst [vmem:[#allocation54_spill] sm:$0xff] %v8973_v43  ;;  %v2489_v4 = vadd.f32 %v2488_v18, %v2426_v28  ;;  %v2357_v3 = vadd.f32 %v2356_v7, %v8959_v58  ;;  %v2428_v47 = vmul.f32 %v8973_v43, %v8973_v43 }
 0x3be   :  { %v2490_v11 = vadd.f32 %v2489_v4, %v2427_v6  ;;  %v2358_v57 = vadd.f32 %v2357_v3, %v8973_v43 }
 0x3c0   :  { %v2491_v25 = vadd.f32 %v2490_v11, %v2428_v47 }
 0x3c3   :  { %v2294_v55 = vpop.f32.mrf.mxu2 }
 0x3c4   :  { %v2359_v35 = vadd.f32 %v2358_v57, %v2294_v55  ;;  %v2429_v38 = vmul.f32 %v2294_v55, %v2294_v55 }
 0x3c6   :  { %v2360_v59 = vrot.slane %v2359_v35, 4  ;;  %v2492_v5 = vadd.f32 %v2491_v25, %v2429_v38  ;;  %v2893_v25 = vld [vmem:[#allocation2 + $0x10] sm:$0x3] }
 0x3c8   :  { %v2361_v36 = vadd.f32 %v2360_v59, %v2359_v35  ;;  %v2493_v34 = vrot.slane %v2492_v5, 4  ;;  %v6251_v59 = vld [vmem:[#allocation2 + $0x18] sm:$0xff] }
 0x3c9   :  { %v2999_v35 = vpack.c.bf16 %v6251_v59, %v6251_v59 }
 0x3ca   :  { %v2362_v18 = vrot.slane %v2361_v36, 2  ;;  %v2494_v28 = vadd.f32 %v2493_v34, %v2492_v5  ;;  %v3001_v5 = vpack.c.bf16 %v2893_v25, %v2893_v25 }
 0x3cc   :  { %v2363_v7 = vadd.f32 %v2362_v18, %v2361_v36  ;;  %v2495_v42 = vrot.slane %v2494_v28, 2  ;;  %v3171_v36 = vunpack.c.l.b16 %v2999_v35  ;;  %v3299_v18 = vunpack.c.l.b16 %v3001_v5 }
 0x3ce   :  { %v2364_v10 = vrot.slane %v2363_v7, 1  ;;  %v2496_v58 = vadd.f32 %v2495_v42, %v2494_v28  ;;  %v8981_v42 = vpack.c.b16 %v3171_v36, %v3171_v36 }
 0x3d0   :  { %v2365_v4 = vadd.f32 %v2364_v10, %v2363_v7  ;;  %v2497_v6 = vrot.slane %v2496_v58, 1  ;;  %12524 = vst [vmem:[#allocation25_spill] sm:$0xff] %v8981_v42  ;;  %v3364_v28 = vshrl.u32 %v8981_v42, 16 }
 0x3d2   :  { %v2498_v3 = vadd.f32 %v2497_v6, %v2496_v58  ;;  %v2499_v41 = vmul.f32 0.001953125, %v2365_v4  ;;  %v8983_v58 = vpack.c.b16 %v3299_v18, %v3299_v18  ;;  %v2504_v4 = vld [vmem:[%s11812_s2] sm:$0x1]  ;;  %s6289_s2 = smov 48  }
 0x3d4   :  { %v2500_v17 = vmul.f32 0.001953125, %v2498_v3  ;;  %v2501_v43 = vmul.f32 %v2499_v41, %v2499_v41  ;;  %12525 = vst [vmem:[#allocation78_spill] sm:$0xff] %v8983_v58 }
 0x3d6   :  { %v2502_v20 = vsub.f32 %v2500_v17, %v2501_v43  ;;  %v3371_v43 = vshll.u32 %v8983_v58, 16  ;;  %v12544_v58 = vld [vmem:[#allocation38_spill] sm:$0xff] }
 0x3d8   :  { %v2503_v11 = vmax.f32 %v2502_v20, 0.0  ;;  %v3366_v20 = vshll.u32 %v8981_v42, 16  ;;  %v3373_v3 = vrot.slane %v3371_v43, 1  ;;  %v12545_v42 = vld [vmem:[#allocation67_spill] sm:$0xff] }
 0x3da   :  { %v2505_v57 = vadd.f32 1e-05, %v2503_v11  ;;  %v3368_v7 = vrot.slane %v3366_v20, 1 }
 0x3dc   :  { %6214 = vrsqrt.f32 %v2505_v57  ;;  %vm2512_vm12 = vweird.f32 %v2505_v57  ;;  %v3369_v11 = vor.u32 %v3368_v7, %v3364_v28 }
 0x3de   :  { %v3374_v35 = vsel %vm392_vm0, %v3369_v11, %v3373_v3  ;;  %v12528_v3 = vld [vmem:[#allocation87_spill] sm:$0xff]  ;;  %v12529_v11 = vld [vmem:[#allocation104_spill] sm:$0xff] }
 0x3df   :  { %3747 = vrot.lane.b32.xlu1 %v3374_v35, %s6281_s19  ;;  %v12532_v35 = vld [vmem:[#allocation89_spill] sm:$0xff] }
 0x3e2   :  { %v6215_v47 = vpop.eup %6214 }
 0x3e3   :  { %v2507_v38 = vmul.f32 %v6215_v47, %v2505_v57  ;;  %vm2513_vm11 = vweird.f32 %v6215_v47 }
 0x3e4   :  { %vm2514_vm13 = vmor %vm2512_vm12, %vm2513_vm11 }
 0x3e5   :  { %v2508_v34 = vmul.f32 %v6215_v47, %v2507_v38  ;;  %v2517_v38 = vld [vmem:[%s11813_s3] sm:$0x1]  ;;  %s6290_s3 = smov 40  }
 0x3e7   :  { %v2509_v10 = vmul.f32 0.5, %v2508_v34 }
 0x3e9   :  { %v2510_v17 = vsub.f32 1.5, %v2509_v10 }
 0x3eb   :  { %v2511_v6 = vmul.f32 %v6215_v47, %v2510_v17 }
 0x3ed   :  { %v2515_v25 = vsel %vm2514_vm13, %v6215_v47, %v2511_v6  ;;  %v12527_v6 = vld [vmem:[#allocation58_spill] sm:$0xff] }
 0x3ee   :  { %v2516_v59 = vmul.f32 %v2515_v25, %v2504_v4  ;;  %v12526_v4 = vld [vmem:[#allocation51_spill] sm:$0xff]  ;;  %v12530_v25 = vld [vmem:[#allocation21_spill] sm:$0xff] }
 0x3f0   :  { %v2518_v5 = vmul.f32 %v2516_v59, %v2499_v41  ;;  %v8996_v36 = vperm.slane %v2516_v59, 0  ;;  %v12531_v59 = vld [vmem:[#allocation72_spill] sm:$0xff] }
 0x3f2   :  { %v2519_v34 = vsub.f32 %v2517_v38, %v2518_v5  ;;  %v2586_v18 = vmul.f32 %v8996_v36, %v2294_v55  ;;  %v2523_v28 = vmul.f32 %v8996_v36, %v8250_v63  ;;  %v2524_v20 = vmul.f32 %v8996_v36, %v8285_v53  ;;  %v12533_v38 = vld [vmem:[#allocation54_spill] sm:$0xff] }
 0x3f3   :  { %v2525_v41 = vmul.f32 %v8996_v36, %v8324_v15  ;;  %v2526_v17 = vmul.f32 %v8996_v36, %v8360_v26  ;;  %v2527_v55 = vmul.f32 %v8996_v36, %v8405_v51  ;;  %v2528_v43 = vmul.f32 %v8996_v36, %v8441_v45 }
 0x3f4   :  { %v8999_v57 = vperm.slane %v2519_v34, 0  ;;  %v2529_v7 = vmul.f32 %v8996_v36, %v8474_v2  ;;  %v9018_v63 = vmul.f32 %v8996_v36, %v8500_v62  ;;  %v9022_v53 = vmul.f32 %v8996_v36, %v8527_v13 }
 0x3f5   :  { %v9026_v15 = vmul.f32 %v8996_v36, %v8551_v27  ;;  %v9030_v26 = vmul.f32 %v8996_v36, %v8566_v30  ;;  %v9034_v51 = vmul.f32 %v8996_v36, %v8584_v39  ;;  %v9038_v45 = vmul.f32 %v8996_v36, %v8598_v33 }
 0x3f6   :  { %v2653_v10 = vadd.f32 %v8999_v57, %v2586_v18  ;;  %v9042_v2 = vmul.f32 %v8996_v36, %v8617_v49  ;;  %v9046_v62 = vmul.f32 %v8996_v36, %v8634_v24  ;;  %v9050_v13 = vmul.f32 %v8996_v36, %v8653_v54 }
 0x3f7   :  { %v9054_v27 = vmul.f32 %v8996_v36, %v8669_v0  ;;  %v9058_v30 = vmul.f32 %v8996_v36, %v8677_v32  ;;  %v9062_v39 = vmul.f32 %v8996_v36, %v8691_v56  ;;  %v9066_v33 = vmul.f32 %v8996_v36, %v8699_v19 }
 0x3f8   :  { %v2717_v47 = vmax.f32 %v2653_v10, 0.0  ;;  %v2558_v49 = vmul.f32 %v8996_v36, %v8577_v48  ;;  %v2559_v24 = vmul.f32 %v8996_v36, %v8594_v12  ;;  %v2560_v54 = vmul.f32 %v8996_v36, %v8611_v1 }
 0x3f9   :  { %v2561_v0 = vmul.f32 %v8996_v36, %v8628_v14  ;;  %v2562_v32 = vmul.f32 %v8996_v36, %v8646_v44  ;;  %v2563_v56 = vmul.f32 %v8996_v36, %v8661_v50  ;;  %v2564_v19 = vmul.f32 %v8996_v36, %v8673_v8 }
 0x3fa   :  { %2890 = vst [vmem:[#allocation2 + $0x339] sm:$0xff] %v2717_v47  ;;  %v2565_v48 = vmul.f32 %v8996_v36, %v8683_v37  ;;  %v2566_v12 = vmul.f32 %v8996_v36, %v8696_v9  ;;  %v2567_v1 = vmul.f32 %v8996_v36, %v8705_v22  ;;  %v2568_v14 = vmul.f32 %v8996_v36, %v8718_v60 }
 0x3fb   :  { %v2569_v44 = vmul.f32 %v8996_v36, %v8729_v23  ;;  %v2570_v50 = vmul.f32 %v8996_v36, %v8741_v16  ;;  %v2571_v8 = vmul.f32 %v8996_v36, %v8746_v46  ;;  %v2572_v37 = vmul.f32 %v8996_v36, %v8767_v52 }
 0x3fc   :  { %v2573_v9 = vmul.f32 %v8996_v36, %v8783_v40  ;;  %v2574_v22 = vmul.f32 %v8996_v36, %v8799_v29  ;;  %v2575_v60 = vmul.f32 %v8996_v36, %v8818_v31  ;;  %v2576_v23 = vmul.f32 %v8996_v36, %v8839_v61 }
 0x3fd   :  { %v2577_v16 = vmul.f32 %v8996_v36, %v8858_v21  ;;  %v2578_v46 = vmul.f32 %v8996_v36, %v12526_v4  ;;  %v2579_v52 = vmul.f32 %v8996_v36, %v12527_v6  ;;  %v2580_v40 = vmul.f32 %v8996_v36, %v12528_v3 }
 0x3fe   :  { %v2581_v29 = vmul.f32 %v8996_v36, %v12529_v11  ;;  %v2582_v31 = vmul.f32 %v8996_v36, %v12530_v25  ;;  %v2583_v61 = vmul.f32 %v8996_v36, %v12531_v59  ;;  %v2584_v21 = vmul.f32 %v8996_v36, %v12532_v35 }
 0x3ff   :  { %v2585_v5 = vmul.f32 %v8996_v36, %v12533_v38  ;;  %v9125_v34 = vadd.f32 %v8999_v57, %v2523_v28  ;;  %v9128_v18 = vadd.f32 %v8999_v57, %v2524_v20  ;;  %v2592_v10 = vadd.f32 %v8999_v57, %v2525_v41 }
 0x400   :  { %v2593_v47 = vadd.f32 %v8999_v57, %v2526_v17  ;;  %v2594_v4 = vadd.f32 %v8999_v57, %v2527_v55  ;;  %v2595_v6 = vadd.f32 %v8999_v57, %v2528_v43  ;;  %v9135_v3 = vadd.f32 %v8999_v57, %v2529_v7 }
 0x401   :  { %v9138_v11 = vadd.f32 %v8999_v57, %v2558_v49  ;;  %v9141_v28 = vadd.f32 %v8999_v57, %v2559_v24  ;;  %v9144_v20 = vadd.f32 %v8999_v57, %v2560_v54  ;;  %v9147_v41 = vadd.f32 %v8999_v57, %v2561_v0 }
 0x402   :  { %v9150_v17 = vadd.f32 %v8999_v57, %v2562_v32  ;;  %v9153_v55 = vadd.f32 %v8999_v57, %v2563_v56  ;;  %v9156_v43 = vadd.f32 %v8999_v57, %v2564_v19  ;;  %v9159_v7 = vadd.f32 %v8999_v57, %v2565_v48 }
 0x403   :  { %v9162_v49 = vadd.f32 %v8999_v57, %v2566_v12  ;;  %v9165_v24 = vadd.f32 %v8999_v57, %v2567_v1  ;;  %v9168_v54 = vadd.f32 %v8999_v57, %v2568_v14  ;;  %v9171_v0 = vadd.f32 %v8999_v57, %v2569_v44 }
 0x404   :  { %v9174_v32 = vadd.f32 %v8999_v57, %v2570_v50  ;;  %v9177_v56 = vadd.f32 %v8999_v57, %v2571_v8  ;;  %v9180_v19 = vadd.f32 %v8999_v57, %v2572_v37  ;;  %v9183_v48 = vadd.f32 %v8999_v57, %v2573_v9 }
 0x405   :  { %v9186_v12 = vadd.f32 %v8999_v57, %v2574_v22  ;;  %v9189_v1 = vadd.f32 %v8999_v57, %v2575_v60  ;;  %v9192_v14 = vadd.f32 %v8999_v57, %v2576_v23  ;;  %v9195_v44 = vadd.f32 %v8999_v57, %v2577_v16 }
 0x406   :  { %v9198_v50 = vadd.f32 %v8999_v57, %v2578_v46  ;;  %v9201_v8 = vadd.f32 %v8999_v57, %v2579_v52  ;;  %v9204_v37 = vadd.f32 %v8999_v57, %v2580_v40  ;;  %v9207_v9 = vadd.f32 %v8999_v57, %v2581_v29  ;;  %v12541_v52 = vld [vmem:[#allocation65_spill] sm:$0xff] }
 0x407   :  { %v9210_v22 = vadd.f32 %v8999_v57, %v2582_v31  ;;  %v9213_v60 = vadd.f32 %v8999_v57, %v2583_v61  ;;  %v9216_v23 = vadd.f32 %v8999_v57, %v2584_v21  ;;  %v9219_v16 = vadd.f32 %v8999_v57, %v2585_v5  ;;  %v12542_v31 = vld [vmem:[#allocation44_spill] sm:$0xff] }
 0x408   :  { %12534 = vst [vmem:[#allocation30_spill] sm:$0xff] %v9201_v8  ;;  %v2658_v46 = vmax.f32 %v2594_v4, 0.0  ;;  %v2543_v40 = vmul.f32 %v8996_v36, %v12541_v52  ;;  %v2597_v29 = vadd.f32 %v8999_v57, %v9018_v63  ;;  %v2659_v25 = vmax.f32 %v2595_v6, 0.0  ;;  %v12543_v61 = vld [vmem:[#allocation100_spill] sm:$0xff]  ;;  %v12546_v6 = vld [vmem:[#allocation57_spill] sm:$0xff] }
 0x409   :  { %12535 = vst [vmem:[#allocation28_spill] sm:$0xff] %v9204_v37  ;;  %v2656_v59 = vmax.f32 %v2592_v10, 0.0  ;;  %v2544_v35 = vmul.f32 %v8996_v36, %v12542_v31  ;;  %v2545_v38 = vmul.f32 %v8996_v36, %v12543_v61  ;;  %v2654_v21 = vmax.f32 %v9125_v34, 0.0  ;;  %v12547_v61 = vld [vmem:[#allocation88_spill] sm:$0xff]  ;;  %v12548_v34 = vld [vmem:[#allocation11_spill] sm:$0xff] }
 0x40a   :  { %12536 = vst [vmem:[#allocation37_spill] sm:$0xff] %v9207_v9  ;;  %v2657_v5 = vmax.f32 %v2593_v47, 0.0  ;;  %v2546_v4 = vmul.f32 %v8996_v36, %v12544_v58  ;;  %v2547_v52 = vmul.f32 %v8996_v36, %v12545_v42  ;;  %v2598_v63 = vadd.f32 %v8999_v57, %v9022_v53  ;;  %v12555_v9 = vld [vmem:[#allocation61_spill] sm:$0xff] }
 0x40b   :  { %12537 = vst [vmem:[#allocation71_spill] sm:$0xff] %v9210_v22  ;;  %v2655_v10 = vmax.f32 %v9128_v18, 0.0  ;;  %v2548_v31 = vmul.f32 %v8996_v36, %v12546_v6  ;;  %v2550_v47 = vmul.f32 %v8996_v36, %v12548_v34  ;;  %v2660_v58 = vmax.f32 %v9135_v3, 0.0  ;;  %v12551_v6 = vld [vmem:[#allocation99_spill] sm:$0xff]  ;;  %v12553_v22 = vld [vmem:[#allocation62_spill] sm:$0xff] }
 0x40c   :  { %12538 = vst [vmem:[#allocation103_spill] sm:$0xff] %v9213_v60  ;;  %v2599_v18 = vadd.f32 %v8999_v57, %v9026_v15  ;;  %v12552_v60 = vld [vmem:[#allocation41_spill] sm:$0xff]  ;;  %v2555_v3 = vmul.f32 %v8996_v36, %v12553_v22  ;;  %v2557_v15 = vmul.f32 %v8996_v36, %v12555_v9  ;;  %v2603_v22 = vadd.f32 %v8999_v57, %v9042_v2 }
 0x40d   :  { %12539 = vst [vmem:[#allocation47_spill] sm:$0xff] %v9216_v23  ;;  %v12550_v23 = vld [vmem:[#allocation33_spill] sm:$0xff]  ;;  %v2554_v34 = vmul.f32 %v8996_v36, %v12552_v60  ;;  %v2602_v60 = vadd.f32 %v8999_v57, %v9038_v45  ;;  %v9282_v45 = vadd.f32 %v8999_v57, %v9062_v39  ;;  %v9301_v37 = vadd.f32 %v8999_v57, %v2547_v52 }
 0x40e   :  { %12540 = vst [vmem:[#allocation130_spill] sm:$0xff] %v9219_v16  ;;  %v12549_v16 = vld [vmem:[#allocation22_spill] sm:$0xff]  ;;  %v2552_v53 = vmul.f32 %v8996_v36, %v12550_v23  ;;  %v2663_v9 = vmax.f32 %v2599_v18, 0.0  ;;  %v9295_v18 = vadd.f32 %v8999_v57, %v2545_v38  ;;  %v2667_v8 = vmax.f32 %v2603_v22, 0.0 }
 0x40f   :  { %2831 = vst [vmem:[#allocation2 + $0x49] sm:$0xff] %v2658_v46  ;;  %v2549_v46 = vmul.f32 %v8996_v36, %v12547_v61  ;;  %v2551_v42 = vmul.f32 %v8996_v36, %v12549_v16  ;;  %v2553_v61 = vmul.f32 %v8996_v36, %v12551_v6  ;;  %v2600_v16 = vadd.f32 %v8999_v57, %v9030_v26 }
 0x410   :  { %2832 = vst [vmem:[#allocation2 + $0x51] sm:$0xff] %v2659_v25  ;;  %v2661_v25 = vmax.f32 %v2597_v29, 0.0  ;;  %v2601_v29 = vadd.f32 %v8999_v57, %v9034_v51  ;;  %v2604_v26 = vadd.f32 %v8999_v57, %v9046_v62  ;;  %v9278_v51 = vadd.f32 %v8999_v57, %v9058_v30 }
 0x411   :  { %2829 = vst [vmem:[#allocation2 + $0x31] sm:$0xff] %v2656_v59  ;;  %v12554_v59 = vld [vmem:[#allocation18_spill] sm:$0xff]  ;;  %v9286_v62 = vadd.f32 %v8999_v57, %v9066_v33  ;;  %v9292_v30 = vadd.f32 %v8999_v57, %v2544_v35  ;;  %v9298_v33 = vadd.f32 %v8999_v57, %v2546_v4  ;;  %v9304_v35 = vadd.f32 %v8999_v57, %v2548_v31 }
 0x412   :  { %2830 = vst [vmem:[#allocation2 + $0x39] sm:$0xff] %v2657_v5  ;;  %v2556_v23 = vmul.f32 %v8996_v36, %v12554_v59  ;;  %v2662_v5 = vmax.f32 %v2598_v63, 0.0  ;;  %v9274_v36 = vadd.f32 %v8999_v57, %v9054_v27  ;;  %v2665_v59 = vmax.f32 %v2601_v29, 0.0 }
 0x413   :  { %2827 = vst [vmem:[#allocation2 + $0x19] sm:$0xff] %v2654_v21  ;;  %v2605_v21 = vadd.f32 %v8999_v57, %v9050_v13  ;;  %v9289_v13 = vadd.f32 %v8999_v57, %v2543_v40  ;;  %v2666_v40 = vmax.f32 %v2602_v60, 0.0  ;;  %v9307_v29 = vadd.f32 %v8999_v57, %v2549_v46 }
 0x414   :  { %2828 = vst [vmem:[#allocation2 + $0x21] sm:$0xff] %v2655_v10  ;;  %v9310_v38 = vadd.f32 %v8999_v57, %v2550_v47  ;;  %v2668_v4 = vmax.f32 %v2604_v26, 0.0  ;;  %v9320_v31 = vadd.f32 %v8999_v57, %v2552_v53  ;;  %v9323_v46 = vadd.f32 %v8999_v57, %v2553_v61 }
 0x415   :  { %2833 = vst [vmem:[#allocation2 + $0x61] sm:$0xff] %v2660_v58  ;;  %v2664_v58 = vmax.f32 %v2600_v16, 0.0  ;;  %v2669_v22 = vmax.f32 %v2605_v21, 0.0  ;;  %v2670_v47 = vmax.f32 %v9274_v36, 0.0  ;;  %v2671_v26 = vmax.f32 %v9278_v51, 0.0 }
 0x416   :  { %v2900_v2 = vld [vmem:[#allocation2 + $0x48] sm:$0xff]  ;;  %2834 = vst [vmem:[#allocation2 + $0x69] sm:$0xff] %v2661_v25  ;;  %v9336_v61 = vadd.f32 %v8999_v57, %v2556_v23  ;;  %v9339_v36 = vadd.f32 %v8999_v57, %v2557_v15  ;;  %v2672_v51 = vmax.f32 %v9282_v45, 0.0  ;;  %v2676_v23 = vmax.f32 %v9295_v18, 0.0 }
 0x417   :  { %v2901_v27 = vld [vmem:[#allocation2 + $0x50] sm:$0xff]  ;;  %v2902_v63 = vld [vmem:[#allocation2 + $0x58] sm:$0x3]  ;;  %v3008_v10 = vpack.c.bf16 %v2900_v2, %v2900_v2  ;;  %2835 = vst [vmem:[#allocation2 + $0x79] sm:$0xff] %v2662_v5  ;;  %v9313_v5 = vadd.f32 %v8999_v57, %v2551_v42  ;;  %v9328_v42 = vadd.f32 %v8999_v57, %v2554_v34  ;;  %v2673_v34 = vmax.f32 %v9286_v62, 0.0 }
 0x418   :  { %v3009_v6 = vpack.c.bf16 %v2901_v27, %v2901_v27  ;;  %v3010_v39 = vpack.c.bf16 %v2902_v63, %v2902_v63  ;;  %2836 = vst [vmem:[#allocation2 + $0x81] sm:$0xff] %v2663_v9  ;;  %v2897_v9 = vld [vmem:[#allocation2 + $0x30] sm:$0xff]  ;;  %v9331_v27 = vadd.f32 %v8999_v57, %v2555_v3  ;;  %v2677_v45 = vmax.f32 %v9298_v33, 0.0 }
 0x419   :  { %v3177_v25 = vunpack.c.l.b16 %v3008_v10  ;;  %2837 = vst [vmem:[#allocation2 + $0x91] sm:$0xff] %v2664_v58  ;;  %v2898_v63 = vld [vmem:[#allocation2 + $0x38] sm:$0xff]  ;;  %v2899_v10 = vld [vmem:[#allocation2 + $0x40] sm:$0x3]  ;;  %v2680_v18 = vmax.f32 %v9307_v29, 0.0  ;;  %v2684_v33 = vmax.f32 %v9323_v46, 0.0 }
 0x41a   :  { %v3178_v2 = vunpack.c.l.b16 %v3009_v6  ;;  %v3302_v16 = vunpack.c.l.b16 %v3010_v39  ;;  %2838 = vst [vmem:[#allocation2 + $0x99] sm:$0xff] %v2665_v59  ;;  %v2674_v6 = vmax.f32 %v9289_v13, 0.0  ;;  %v3005_v39 = vpack.c.bf16 %v2897_v9, %v2897_v9 }
 0x41b   :  { %2839 = vst [vmem:[#allocation2 + $0xa9] sm:$0xff] %v2666_v40  ;;  %v3006_v59 = vpack.c.bf16 %v2898_v63, %v2898_v63  ;;  %v2678_v40 = vmax.f32 %v9301_v37, 0.0  ;;  %v2683_v37 = vmax.f32 %v9320_v31, 0.0  ;;  %v2686_v29 = vmax.f32 %v9331_v27, 0.0 }
 0x41c   :  { %v9315_v52 = vpack.c.b16 %v3178_v2, %v3177_v25  ;;  %v9317_v60 = vpack.c.b16 %v3302_v16, %v3302_v16  ;;  %2840 = vst [vmem:[#allocation2 + $0xb1] sm:$0xff] %v2667_v8  ;;  %v2675_v8 = vmax.f32 %v9292_v30, 0.0  ;;  %v3007_v25 = vpack.c.bf16 %v2899_v10, %v2899_v10 }
 0x41d   :  { %2841 = vst [vmem:[#allocation2 + $0xc1] sm:$0xff] %v2668_v4  ;;  %v3175_v62 = vunpack.c.l.b16 %v3005_v39  ;;  %v2679_v2 = vmax.f32 %v9304_v35, 0.0  ;;  %v3176_v13 = vunpack.c.l.b16 %v3006_v59  ;;  %v2681_v4 = vmax.f32 %v9310_v38, 0.0  ;;  %v12564_v59 = vld [vmem:[#allocation130_spill] sm:$0xff] }
 0x41e   :  { %v3402_v21 = vshll.u32 %v9315_v52, 16  ;;  %v3407_v53 = vshll.u32 %v9317_v60, 16  ;;  %v3400_v3 = vshrl.u32 %v9315_v52, 16  ;;  %2842 = vst [vmem:[#allocation2 + $0xc9] sm:$0xff] %v2669_v22  ;;  %v3301_v16 = vunpack.c.l.b16 %v3007_v25 }
 0x41f   :  { %2843 = vst [vmem:[#allocation2 + $0xd9] sm:$0xff] %v2670_v47  ;;  %v2682_v22 = vmax.f32 %v9313_v5, 0.0  ;;  %v9360_v35 = vpack.c.b16 %v3176_v13, %v3175_v62  ;;  %v2687_v38 = vmax.f32 %v9336_v61, 0.0  ;;  %v2688_v5 = vmax.f32 %v9339_v36, 0.0  ;;  %v12561_v62 = vld [vmem:[#allocation71_spill] sm:$0xff] }
 0x420   :  { %v3404_v58 = vrot.slane %v3402_v21, 1  ;;  %v3409_v15 = vrot.slane %v3407_v53, 1  ;;  %2844 = vst [vmem:[#allocation2 + $0xe1] sm:$0xff] %v2671_v26  ;;  %v9362_v47 = vpack.c.b16 %v3301_v16, %v3301_v16  ;;  %v2685_v26 = vmax.f32 %v9328_v42, 0.0  ;;  %v2894_v16 = vld [vmem:[#allocation2 + $0x18] sm:$0xff]  ;;  %v2895_v13 = vld [vmem:[#allocation2 + $0x20] sm:$0xff] }
 0x421   :  { %2845 = vst [vmem:[#allocation2 + $0xf1] sm:$0xff] %v2672_v51  ;;  %v2689_v9 = vmax.f32 %v9138_v11, 0.0  ;;  %v2690_v31 = vmax.f32 %v9141_v28, 0.0  ;;  %v3390_v46 = vshll.u32 %v9360_v35, 16  ;;  %v2691_v53 = vmax.f32 %v9144_v20, 0.0 }
 0x422   :  { %v3405_v57 = vor.u32 %v3404_v58, %v3400_v3  ;;  %2846 = vst [vmem:[#allocation2 + $0xf9] sm:$0xff] %v2673_v34  ;;  %v3395_v21 = vshll.u32 %v9362_v47, 16  ;;  %v2692_v42 = vmax.f32 %v9147_v41, 0.0  ;;  %v2693_v27 = vmax.f32 %v9150_v17, 0.0  ;;  %v2908_v51 = vld [vmem:[#allocation2 + $0x88] sm:$0x3] }
 0x423   :  { %2847 = vst [vmem:[#allocation2 + $0x109] sm:$0xff] %v2674_v6  ;;  %v2694_v63 = vmax.f32 %v9153_v55, 0.0  ;;  %v3388_v34 = vshrl.u32 %v9360_v35, 16  ;;  %v3392_v3 = vrot.slane %v3390_v46, 1  ;;  %v3016_v61 = vpack.c.bf16 %v2908_v51, %v2908_v51  ;;  %v2905_v20 = vld [vmem:[#allocation2 + $0x70] sm:$0x3] }
 0x424   :  { %v9351_v30 = vsel %vm392_vm0, %v3405_v57, %v3409_v15  ;;  %2848 = vst [vmem:[#allocation2 + $0x111] sm:$0xff] %v2675_v8  ;;  %v3397_v57 = vrot.slane %v3395_v21, 1  ;;  %v3002_v21 = vpack.c.bf16 %v2894_v16, %v2894_v16  ;;  %v2910_v15 = vld [vmem:[#allocation2 + $0x98] sm:$0xff]  ;;  %v2911_v8 = vld [vmem:[#allocation2 + $0xa0] sm:$0x3] }
 0x425   :  { %12556 = vst [vmem:[#allocation63_spill] sm:$0xff] %v9351_v30  ;;  %3753 = vrot.lane.b32.xlu1 %v9351_v30, %s6281_s19  ;;  %v3393_v25 = vor.u32 %v3392_v3, %v3388_v34  ;;  %v12559_v34 = vld [vmem:[#allocation28_spill] sm:$0xff]  ;;  %v3019_v58 = vpack.c.bf16 %v2911_v8, %v2911_v8 }
 0x426   :  { %2849 = vst [vmem:[#allocation2 + $0x121] sm:$0xff] %v2676_v23  ;;  %v2909_v23 = vld [vmem:[#allocation2 + $0x90] sm:$0xff] }
 0x427   :  { %2850 = vst [vmem:[#allocation2 + $0x129] sm:$0xff] %v2677_v45  ;;  %v9393_v46 = vsel %vm392_vm0, %v3393_v25, %v3397_v57  ;;  %v12560_v45 = vld [vmem:[#allocation37_spill] sm:$0xff]  ;;  %v2896_v25 = vld [vmem:[#allocation2 + $0x28] sm:$0x3]  ;;  %v12563_v57 = vld [vmem:[#allocation47_spill] sm:$0xff]  ;;  %v3017_v6 = vpack.c.bf16 %v2909_v23, %v2909_v23 }
 0x428   :  { %2851 = vst [vmem:[#allocation2 + $0x139] sm:$0xff] %v2678_v40  ;;  %3751 = vrot.lane.b32.xlu0 %v9393_v46, %s6281_s19  ;;  %v3003_v40 = vpack.c.bf16 %v2895_v13, %v2895_v13  ;;  %v3004_v3 = vpack.c.bf16 %v2896_v25, %v2896_v25  ;;  %v2903_v25 = vld [vmem:[#allocation2 + $0x60] sm:$0xff] }
 0x429   :  { %2852 = vst [vmem:[#allocation2 + $0x141] sm:$0xff] %v2679_v2  ;;  %v2906_v2 = vld [vmem:[#allocation2 + $0x78] sm:$0xff]  ;;  %v3183_v10 = vunpack.c.l.b16 %v3017_v6  ;;  %v2904_v6 = vld [vmem:[#allocation2 + $0x68] sm:$0xff] }
 0x42a   :  { %2853 = vst [vmem:[#allocation2 + $0x151] sm:$0xff] %v2680_v18  ;;  %v12558_v18 = vld [vmem:[#allocation30_spill] sm:$0xff]  ;;  %v3300_v16 = vunpack.c.l.b16 %v3004_v3  ;;  %v3014_v13 = vpack.c.bf16 %v2906_v2, %v2906_v2  ;;  %v3304_v2 = vunpack.c.l.b16 %v3016_v61 }
 0x42b   :  { %2854 = vst [vmem:[#allocation2 + $0x159] sm:$0xff] %v2681_v4  ;;  %v12562_v4 = vld [vmem:[#allocation103_spill] sm:$0xff] }
 0x42c   :  { %12557 = vst [vmem:[#allocation20_spill] sm:$0xff] %v9393_v46  ;;  %v9434_v3 = vpack.c.b16 %v3304_v2, %v3304_v2 }
 0x42d   :  { %2855 = vst [vmem:[#allocation2 + $0x169] sm:$0xff] %v2682_v22  ;;  %v3173_v22 = vunpack.c.l.b16 %v3002_v21 }
 0x42e   :  { %2856 = vst [vmem:[#allocation2 + $0x171] sm:$0xff] %v2683_v37  ;;  %v3018_v37 = vpack.c.bf16 %v2910_v15, %v2910_v15  ;;  %v9412_v15 = vpack.c.b16 %v3300_v16, %v3300_v16  ;;  %v2919_v16 = vld [vmem:[#allocation2 + $0xe0] sm:$0xff] }
 0x42f   :  { %2857 = vst [vmem:[#allocation2 + $0x181] sm:$0xff] %v2684_v33  ;;  %v2907_v33 = vld [vmem:[#allocation2 + $0x80] sm:$0xff]  ;;  %v3027_v2 = vpack.c.bf16 %v2919_v16, %v2919_v16 }
 0x430   :  { %2858 = vst [vmem:[#allocation2 + $0x189] sm:$0xff] %v2685_v26  ;;  %v3174_v26 = vunpack.c.l.b16 %v3003_v40  ;;  %v3184_v39 = vunpack.c.l.b16 %v3018_v37  ;;  %v3015_v23 = vpack.c.bf16 %v2907_v33, %v2907_v33  ;;  %v3383_v51 = vshll.u32 %v9412_v15, 16  ;;  %v2918_v37 = vld [vmem:[#allocation2 + $0xd8] sm:$0xff] }
 0x431   :  { %2859 = vst [vmem:[#allocation2 + $0x1c9] sm:$0xff] %v2686_v29  ;;  %v3305_v29 = vunpack.c.l.b16 %v3019_v58  ;;  %v3011_v58 = vpack.c.bf16 %v2903_v25, %v2903_v25  ;;  %v3013_v25 = vpack.c.bf16 %v2905_v20, %v2905_v20  ;;  %v2917_v20 = vld [vmem:[#allocation2 + $0xd0] sm:$0x3] }
 0x432   :  { %2860 = vst [vmem:[#allocation2 + $0x1d1] sm:$0xff] %v2687_v38  ;;  %v9410_v8 = vpack.c.b16 %v3174_v26, %v3173_v22  ;;  %v3181_v38 = vunpack.c.l.b16 %v3014_v13  ;;  %v9416_v40 = vpack.c.b16 %v3184_v39, %v3183_v10  ;;  %v3385_v21 = vrot.slane %v3383_v51, 1 }
 0x433   :  { %2861 = vst [vmem:[#allocation2 + $0x1e1] sm:$0xff] %v2688_v5  ;;  %v9418_v36 = vpack.c.b16 %v3305_v29, %v3305_v29  ;;  %v3182_v5 = vunpack.c.l.b16 %v3015_v23  ;;  %v3012_v22 = vpack.c.bf16 %v2904_v6, %v2904_v6  ;;  %v12565_v13 = vmax.f32 %v9156_v43, 0.0  ;;  %v2915_v6 = vld [vmem:[#allocation2 + $0xc0] sm:$0xff] }
 0x434   :  { %2862 = vst [vmem:[#allocation2 + $0x1e9] sm:$0xff] %v2689_v9  ;;  %v3376_v11 = vshrl.u32 %v9410_v8, 16  ;;  %v3378_v9 = vshll.u32 %v9410_v8, 16  ;;  %v3436_v28 = vshrl.u32 %v9416_v40, 16  ;;  %v3179_v29 = vunpack.c.l.b16 %v3011_v58 }
 0x435   :  { %2863 = vst [vmem:[#allocation2 + $0x1f9] sm:$0xff] %v2690_v31  ;;  %v3438_v31 = vshll.u32 %v9416_v40, 16  ;;  %v3443_v10 = vshll.u32 %v9418_v36, 16  ;;  %v9430_v39 = vpack.c.b16 %v3182_v5, %v3181_v38  ;;  %v12566_v23 = vmax.f32 %v9159_v7, 0.0  ;;  %v2920_v38 = vld [vmem:[#allocation2 + $0xe8] sm:$0x3] }
 0x436   :  { %2864 = vst [vmem:[#allocation2 + $0x201] sm:$0xff] %v2691_v53  ;;  %v3380_v53 = vrot.slane %v3378_v9, 1  ;;  %v3180_v61 = vunpack.c.l.b16 %v3012_v22  ;;  %v3026_v5 = vpack.c.bf16 %v2918_v37, %v2918_v37  ;;  %v12567_v9 = vmax.f32 %v9162_v49, 0.0 }
 0x437   :  { %2865 = vst [vmem:[#allocation2 + $0x211] sm:$0xff] %v2692_v42  ;;  %v3440_v41 = vrot.slane %v3438_v31, 1  ;;  %v3445_v42 = vrot.slane %v3443_v10, 1  ;;  %v3424_v33 = vshrl.u32 %v9430_v39, 16  ;;  %v3426_v26 = vshll.u32 %v9430_v39, 16  ;;  %v2916_v31 = vld [vmem:[#allocation2 + $0xc8] sm:$0xff] }
 0x438   :  { %2866 = vst [vmem:[#allocation2 + $0x219] sm:$0xff] %v2693_v27  ;;  %v3381_v17 = vor.u32 %v3380_v53, %v3376_v11  ;;  %v3431_v27 = vshll.u32 %v9434_v3, 16  ;;  %v3303_v51 = vunpack.c.l.b16 %v3013_v25  ;;  %v12569_v58 = vmax.f32 %v9165_v24, 0.0 }
 0x439   :  { %2867 = vst [vmem:[#allocation2 + $0x229] sm:$0xff] %v2694_v63  ;;  %v3441_v55 = vor.u32 %v3440_v41, %v3436_v28  ;;  %v3428_v63 = vrot.slane %v3426_v26, 1  ;;  %v9457_v10 = vpack.c.b16 %v3180_v61, %v3179_v29  ;;  %v3189_v49 = vunpack.c.l.b16 %v3026_v5  ;;  %v2912_v41 = vld [vmem:[#allocation2 + $0xa8] sm:$0xff]  ;;  %v2913_v29 = vld [vmem:[#allocation2 + $0xb0] sm:$0xff] }
 0x43a   :  { %2868 = vst [vmem:[#allocation2 + $0x231] sm:$0xff] %v12565_v13  ;;  %v9448_v43 = vsel %vm392_vm0, %v3381_v17, %v3385_v21  ;;  %v3433_v11 = vrot.slane %v3431_v27, 1  ;;  %v12571_v53 = vmax.f32 %v9168_v54, 0.0  ;;  %v9463_v21 = vpack.c.b16 %v3303_v51, %v3303_v51 }
 0x43b   :  { %2869 = vst [vmem:[#allocation2 + $0x241] sm:$0xff] %v12566_v23  ;;  %3749 = vrot.lane.b32.xlu2 %v9448_v43, %s6281_s19  ;;  %v9455_v7 = vsel %vm392_vm0, %v3441_v55, %v3445_v42  ;;  %v3429_v28 = vor.u32 %v3428_v63, %v3424_v33  ;;  %v3028_v24 = vpack.c.bf16 %v2920_v38, %v2920_v38  ;;  %v3190_v22 = vunpack.c.l.b16 %v3027_v2  ;;  %v2914_v38 = vld [vmem:[#allocation2 + $0xb8] sm:$0x3] }
 0x43c   :  { %2870 = vst [vmem:[#allocation2 + $0x249] sm:$0xff] %v12567_v9  ;;  %3759 = vrot.lane.b32.xlu1 %v9455_v7, %s6281_s19  ;;  %v3023_v37 = vpack.c.bf16 %v2915_v6, %v2915_v6  ;;  %v12572_v42 = vmax.f32 %v9171_v0, 0.0  ;;  %v3412_v26 = vshrl.u32 %v9457_v10, 16  ;;  %v3414_v54 = vshll.u32 %v9457_v10, 16 }
 0x43d   :  { %12568 = vst [vmem:[#allocation91_spill] sm:$0xff] %v9448_v43  ;;  %v9468_v33 = vsel %vm392_vm0, %v3429_v28, %v3433_v11  ;;  %v3024_v16 = vpack.c.bf16 %v2916_v31, %v2916_v31  ;;  %v12574_v13 = vmax.f32 %v9174_v32, 0.0  ;;  %v3419_v17 = vshll.u32 %v9463_v21, 16 }
 0x43e   :  { %2871 = vst [vmem:[#allocation2 + $0x259] sm:$0xff] %v12569_v58  ;;  %3757 = vrot.lane.b32.xlu0 %v9468_v33, %s6281_s19  ;;  %v9477_v27 = vpack.c.b16 %v3190_v22, %v3189_v49  ;;  %v3308_v0 = vunpack.c.l.b16 %v3028_v24  ;;  %v3025_v25 = vpack.c.bf16 %v2917_v20, %v2917_v20  ;;  %v12575_v23 = vmax.f32 %v9177_v56, 0.0  ;;  %v2927_v22 = vld [vmem:[#allocation2 + $0x120] sm:$0xff] }
 0x43f   :  { %12570 = vst [vmem:[#allocation85_spill] sm:$0xff] %v9455_v7  ;;  %v3416_v55 = vrot.slane %v3414_v54, 1  ;;  %v3187_v63 = vunpack.c.l.b16 %v3023_v37  ;;  %v3188_v61 = vunpack.c.l.b16 %v3024_v16  ;;  %v3020_v5 = vpack.c.bf16 %v2912_v41, %v2912_v41  ;;  %v2928_v37 = vld [vmem:[#allocation2 + $0x128] sm:$0xff]  ;;  %v2929_v54 = vld [vmem:[#allocation2 + $0x130] sm:$0x3] }
 0x440   :  { %2872 = vst [vmem:[#allocation2 + $0x261] sm:$0xff] %v12571_v53  ;;  %v12576_v32 = vmax.f32 %v9180_v19, 0.0  ;;  %v3421_v6 = vrot.slane %v3419_v17, 1  ;;  %v9483_v9 = vpack.c.b16 %v3308_v0, %v3308_v0  ;;  %v3472_v11 = vshrl.u32 %v9477_v27, 16 }
 0x441   :  { %2873 = vst [vmem:[#allocation2 + $0x271] sm:$0xff] %v12572_v42  ;;  %v3474_v51 = vshll.u32 %v9477_v27, 16  ;;  %v12577_v2 = vmax.f32 %v9183_v48, 0.0  ;;  %v3417_v56 = vor.u32 %v3416_v55, %v3412_v26  ;;  %v9489_v31 = vpack.c.b16 %v3188_v61, %v3187_v63 }
 0x442   :  { %12573 = vst [vmem:[#allocation7_spill] sm:$0xff] %v9468_v33  ;;  %v3307_v58 = vunpack.c.l.b16 %v3025_v25  ;;  %v3021_v28 = vpack.c.bf16 %v2913_v29, %v2913_v29  ;;  %v12578_v49 = vmax.f32 %v9186_v12, 0.0  ;;  %v3479_v20 = vshll.u32 %v9483_v9, 16 }
 0x443   :  { %2874 = vst [vmem:[#allocation2 + $0x279] sm:$0xff] %v12574_v13  ;;  %v3476_v19 = vrot.slane %v3474_v51, 1  ;;  %v3022_v53 = vpack.c.bf16 %v2914_v38, %v2914_v38  ;;  %v3185_v24 = vunpack.c.l.b16 %v3020_v5  ;;  %v12579_v41 = vmax.f32 %v9189_v1, 0.0 }
 0x444   :  { %2875 = vst [vmem:[#allocation2 + $0x289] sm:$0xff] %v12575_v23  ;;  %v9497_v48 = vsel %vm392_vm0, %v3417_v56, %v3421_v6  ;;  %v9499_v42 = vpack.c.b16 %v3307_v58, %v3307_v58  ;;  %v3460_v26 = vshrl.u32 %v9489_v31, 16  ;;  %v3462_v12 = vshll.u32 %v9489_v31, 16  ;;  %v2924_v6 = vld [vmem:[#allocation2 + $0x108] sm:$0xff]  ;;  %v2926_v58 = vld [vmem:[#allocation2 + $0x118] sm:$0x3] }
 0x445   :  { %2876 = vst [vmem:[#allocation2 + $0x291] sm:$0xff] %v12576_v32  ;;  %v12581_v16 = vmax.f32 %v9192_v14, 0.0  ;;  %3755 = vrot.lane.b32.xlu2 %v9497_v48, %s6281_s19  ;;  %v3477_v13 = vor.u32 %v3476_v19, %v3472_v11  ;;  %v3481_v17 = vrot.slane %v3479_v20, 1  ;;  %v3186_v1 = vunpack.c.l.b16 %v3021_v28  ;;  %v2925_v11 = vld [vmem:[#allocation2 + $0x110] sm:$0xff] }
 0x446   :  { %2877 = vst [vmem:[#allocation2 + $0x2a1] sm:$0xff] %v12577_v2  ;;  %v3306_v0 = vunpack.c.l.b16 %v3022_v53  ;;  %v12582_v25 = vmax.f32 %v9195_v44, 0.0  ;;  %v3464_v29 = vrot.slane %v3462_v12, 1  ;;  %v3467_v23 = vshll.u32 %v9499_v42, 16 }
 0x447   :  { %2878 = vst [vmem:[#allocation2 + $0x2a9] sm:$0xff] %v12578_v49  ;;  %v3035_v55 = vpack.c.bf16 %v2927_v22, %v2927_v22  ;;  %v3036_v63 = vpack.c.bf16 %v2928_v37, %v2928_v37  ;;  %v12583_v61 = vmax.f32 %v9198_v50, 0.0  ;;  %v9513_v14 = vsel %vm392_vm0, %v3477_v13, %v3481_v17  ;;  %v2922_v13 = vld [vmem:[#allocation2 + $0xf8] sm:$0xff]  ;;  %v2923_v17 = vld [vmem:[#allocation2 + $0x100] sm:$0x3] }
 0x448   :  { %2879 = vst [vmem:[#allocation2 + $0x2b9] sm:$0xff] %v12579_v41  ;;  %v9515_v38 = vpack.c.b16 %v3186_v1, %v3185_v24  ;;  %v9517_v5 = vpack.c.b16 %v3306_v0, %v3306_v0  ;;  %v3037_v32 = vpack.c.bf16 %v2929_v54, %v2929_v54  ;;  %v12586_v44 = vmax.f32 %v12558_v18, 0.0  ;;  %3765 = vrot.lane.b32.xlu1 %v9513_v14, %s6281_s19 }
 0x449   :  { %12580 = vst [vmem:[#allocation69_spill] sm:$0xff] %v9497_v48  ;;  %v3465_v51 = vor.u32 %v3464_v29, %v3460_v26  ;;  %v3469_v2 = vrot.slane %v3467_v23, 1  ;;  %v3195_v50 = vunpack.c.l.b16 %v3035_v55  ;;  %v3196_v56 = vunpack.c.l.b16 %v3036_v63  ;;  %v2921_v26 = vld [vmem:[#allocation2 + $0xf0] sm:$0xff] }
 0x44a   :  { %2880 = vst [vmem:[#allocation2 + $0x2c1] sm:$0xff] %v12581_v16  ;;  %v12587_v28 = vmax.f32 %v12559_v34, 0.0  ;;  %v3448_v49 = vshrl.u32 %v9515_v38, 16  ;;  %v3450_v19 = vshll.u32 %v9515_v38, 16  ;;  %v3455_v20 = vshll.u32 %v9517_v5, 16  ;;  %v2969_v48 = vld [vmem:[#allocation2 + $0x270] sm:$0xff] }
 0x44b   :  { %2881 = vst [vmem:[#allocation2 + $0x2d1] sm:$0xff] %v12582_v25  ;;  %v3311_v53 = vunpack.c.l.b16 %v3037_v32  ;;  %v12588_v18 = vmax.f32 %v12560_v45, 0.0  ;;  %v9531_v24 = vsel %vm392_vm0, %v3465_v51, %v3469_v2  ;;  %v9533_v22 = vpack.c.b16 %v3196_v56, %v3195_v50  ;;  %v2936_v2 = vld [vmem:[#allocation2 + $0x168] sm:$0xff]  ;;  %v2937_v50 = vld [vmem:[#allocation2 + $0x170] sm:$0xff]  ;;  %v2970_v43 = vld [vmem:[#allocation2 + $0x278] sm:$0xff] }
 0x44c   :  { %2882 = vst [vmem:[#allocation2 + $0x2d9] sm:$0xff] %v12583_v61  ;;  %v3032_v37 = vpack.c.bf16 %v2924_v6, %v2924_v6  ;;  %v3033_v41 = vpack.c.bf16 %v2925_v11, %v2925_v11  ;;  %v12591_v34 = vmax.f32 %v12561_v62, 0.0  ;;  %3763 = vrot.lane.b32.xlu0 %v9531_v24, %s6281_s19  ;;  %v3452_v12 = vrot.slane %v3450_v19, 1 }
 0x44d   :  { %12584 = vst [vmem:[#allocation125_spill] sm:$0xff] %v9513_v14  ;;  %v3457_v54 = vrot.slane %v3455_v20, 1  ;;  %v9539_v16 = vpack.c.b16 %v3311_v53, %v3311_v53  ;;  %v3034_v45 = vpack.c.bf16 %v2926_v58, %v2926_v58  ;;  %v12592_v1 = vmax.f32 %v12562_v4, 0.0 }
 0x44e   :  { %12585 = vst [vmem:[#allocation53_spill] sm:$0xff] %v9515_v38  ;;  %v3508_v0 = vshrl.u32 %v9533_v22, 16  ;;  %v3510_v25 = vshll.u32 %v9533_v22, 16  ;;  %v3193_v29 = vunpack.c.l.b16 %v3032_v37  ;;  %v3194_v62 = vunpack.c.l.b16 %v3033_v41 }
 0x44f   :  { %2883 = vst [vmem:[#allocation2 + $0x2e9] sm:$0xff] %v12586_v44  ;;  %v12593_v23 = vmax.f32 %v12563_v57, 0.0  ;;  %v3453_v55 = vor.u32 %v3452_v12, %v3448_v49  ;;  %v3515_v63 = vshll.u32 %v9539_v16, 16  ;;  %v3310_v61 = vunpack.c.l.b16 %v3034_v45  ;;  %v2938_v49 = vld [vmem:[#allocation2 + $0x178] sm:$0x3] }
 0x450   :  { %2884 = vst [vmem:[#allocation2 + $0x2f1] sm:$0xff] %v12587_v28  ;;  %v3029_v32 = vpack.c.bf16 %v2921_v26, %v2921_v26  ;;  %v12594_v6 = vmax.f32 %v12564_v59, 0.0  ;;  %v3512_v11 = vrot.slane %v3510_v25, 1  ;;  %v9550_v4 = vpack.c.b16 %v3194_v62, %v3193_v29  ;;  %v2935_v62 = vld [vmem:[#allocation2 + $0x160] sm:$0x3] }
 0x451   :  { %2885 = vst [vmem:[#allocation2 + $0x301] sm:$0xff] %v12588_v18  ;;  %v3030_v44 = vpack.c.bf16 %v2922_v13, %v2922_v13  ;;  %v3031_v51 = vpack.c.bf16 %v2923_v17, %v2923_v17  ;;  %v9553_v56 = vsel %vm392_vm0, %v3453_v55, %v3457_v54  ;;  %v3517_v57 = vrot.slane %v3515_v63, 1  ;;  %v2933_v13 = vld [vmem:[#allocation2 + $0x150] sm:$0xff]  ;;  %v2934_v17 = vld [vmem:[#allocation2 + $0x158] sm:$0xff] }
 0x452   :  { %12589 = vst [vmem:[#allocation39_spill] sm:$0xff] %v9531_v24  ;;  %v9555_v58 = vpack.c.b16 %v3310_v61, %v3310_v61  ;;  %v3191_v28 = vunpack.c.l.b16 %v3029_v32  ;;  %3761 = vrot.lane.b32.xlu2 %v9553_v56, %s6281_s19  ;;  %v3513_v59 = vor.u32 %v3512_v11, %v3508_v0  ;;  %v3496_v19 = vshrl.u32 %v9550_v4, 16  ;;  %v2960_v24 = vld [vmem:[#allocation2 + $0x228] sm:$0xff] }
 0x453   :  { %12590 = vst [vmem:[#allocation102_spill] sm:$0xff] %v9533_v22  ;;  %v3498_v20 = vshll.u32 %v9550_v4, 16  ;;  %v3192_v53 = vunpack.c.l.b16 %v3030_v44  ;;  %v3309_v37 = vunpack.c.l.b16 %v3031_v51  ;;  %v3044_v41 = vpack.c.bf16 %v2936_v2, %v2936_v2 }
 0x454   :  { %2886 = vst [vmem:[#allocation2 + $0x309] sm:$0xff] %v12591_v34  ;;  %v3503_v18 = vshll.u32 %v9555_v58, 16  ;;  %v3045_v26 = vpack.c.bf16 %v2937_v50, %v2937_v50  ;;  %v9563_v34 = vsel %vm392_vm0, %v3513_v59, %v3517_v57  ;;  %v3046_v45 = vpack.c.bf16 %v2938_v49, %v2938_v49  ;;  %v2931_v49 = vld [vmem:[#allocation2 + $0x140] sm:$0xff]  ;;  %v2932_v59 = vld [vmem:[#allocation2 + $0x148] sm:$0x3] }
 0x455   :  { %2887 = vst [vmem:[#allocation2 + $0x319] sm:$0xff] %v12592_v1  ;;  %v3500_v12 = vrot.slane %v3498_v20, 1  ;;  %v9565_v54 = vpack.c.b16 %v3192_v53, %v3191_v28  ;;  %3771 = vrot.lane.b32.xlu1 %v9563_v34, %s6281_s19  ;;  %v9569_v0 = vpack.c.b16 %v3309_v37, %v3309_v37  ;;  %v3201_v25 = vunpack.c.l.b16 %v3044_v41  ;;  %v2930_v28 = vld [vmem:[#allocation2 + $0x138] sm:$0xff] }
 0x456   :  { %2888 = vst [vmem:[#allocation2 + $0x321] sm:$0xff] %v12593_v23  ;;  %v3505_v1 = vrot.slane %v3503_v18, 1  ;;  %v3202_v29 = vunpack.c.l.b16 %v3045_v26  ;;  %v3314_v61 = vunpack.c.l.b16 %v3046_v45  ;;  %v3041_v11 = vpack.c.bf16 %v2933_v13, %v2933_v13 }
 0x457   :  { %2889 = vst [vmem:[#allocation2 + $0x331] sm:$0xff] %v12594_v6  ;;  %v3501_v23 = vor.u32 %v3500_v12, %v3496_v19  ;;  %v3484_v55 = vshrl.u32 %v9565_v54, 16  ;;  %v3486_v63 = vshll.u32 %v9565_v54, 16  ;;  %v3491_v32 = vshll.u32 %v9569_v0, 16 }
 0x458   :  { %12595 = vst [vmem:[#allocation114_spill] sm:$0xff] %v9550_v4  ;;  %v9574_v6 = vpack.c.b16 %v3202_v29, %v3201_v25  ;;  %v3042_v44 = vpack.c.bf16 %v2934_v17, %v2934_v17  ;;  %v9579_v50 = vpack.c.b16 %v3314_v61, %v3314_v61  ;;  %v3043_v57 = vpack.c.bf16 %v2935_v62, %v2935_v62  ;;  %v2951_v25 = vld [vmem:[#allocation2 + $0x1e0] sm:$0xff]  ;;  %v2952_v61 = vld [vmem:[#allocation2 + $0x1e8] sm:$0xff] }
 0x459   :  { %12596 = vst [vmem:[#allocation123_spill] sm:$0xff] %v9553_v56  ;;  %v9577_v51 = vsel %vm392_vm0, %v3501_v23, %v3505_v1  ;;  %v3488_v2 = vrot.slane %v3486_v63, 1  ;;  %v3493_v19 = vrot.slane %v3491_v32, 1  ;;  %v3199_v18 = vunpack.c.l.b16 %v3041_v11 }
 0x45a   :  { %12597 = vst [vmem:[#allocation19_spill] sm:$0xff] %v9563_v34  ;;  %3769 = vrot.lane.b32.xlu0 %v9577_v51, %s6281_s19  ;;  %v3544_v20 = vshrl.u32 %v9574_v6, 16  ;;  %v3546_v53 = vshll.u32 %v9574_v6, 16  ;;  %v3551_v41 = vshll.u32 %v9579_v50, 16  ;;  %v3200_v26 = vunpack.c.l.b16 %v3042_v44 }
 0x45b   :  { %12598 = vst [vmem:[#allocation16_spill] sm:$0xff] %v9574_v6  ;;  %v3489_v37 = vor.u32 %v3488_v2, %v3484_v55  ;;  %v3313_v12 = vunpack.c.l.b16 %v3043_v57  ;;  %v3038_v13 = vpack.c.bf16 %v2930_v28, %v2930_v28  ;;  %v3039_v17 = vpack.c.bf16 %v2931_v49, %v2931_v49  ;;  %v2953_v2 = vld [vmem:[#allocation2 + $0x1f0] sm:$0x3] }
 0x45c   :  { %12599 = vst [vmem:[#allocation59_spill] sm:$0xff] %v9577_v51  ;;  %v3548_v45 = vrot.slane %v3546_v53, 1  ;;  %v3040_v1 = vpack.c.bf16 %v2932_v59, %v2932_v59  ;;  %v3553_v62 = vrot.slane %v3551_v41, 1  ;;  %v9589_v23 = vpack.c.b16 %v3200_v26, %v3199_v18  ;;  %v2949_v41 = vld [vmem:[#allocation2 + $0x1d0] sm:$0xff] }
 0x45d   :  { %v9587_v29 = vsel %vm392_vm0, %v3489_v37, %v3493_v19  ;;  %v9591_v63 = vpack.c.b16 %v3313_v12, %v3313_v12  ;;  %v3197_v32 = vunpack.c.l.b16 %v3038_v13  ;;  %v3198_v11 = vunpack.c.l.b16 %v3039_v17  ;;  %v2950_v17 = vld [vmem:[#allocation2 + $0x1d8] sm:$0x3] }
 0x45e   :  { %12600 = vst [vmem:[#allocation140_spill] sm:$0xff] %v9587_v29  ;;  %3767 = vrot.lane.b32.xlu2 %v9587_v29, %s6281_s19  ;;  %v3549_v55 = vor.u32 %v3548_v45, %v3544_v20  ;;  %v3312_v44 = vunpack.c.l.b16 %v3040_v1  ;;  %v3532_v57 = vshrl.u32 %v9589_v23, 16  ;;  %v3534_v28 = vshll.u32 %v9589_v23, 16  ;;  %v2948_v20 = vld [vmem:[#allocation2 + $0x1c8] sm:$0xff] }
 0x45f   :  { %12601 = vst [vmem:[#allocation90_spill] sm:$0xff] %v9589_v23  ;;  %v3539_v49 = vshll.u32 %v9591_v63, 16  ;;  %v3059_v59 = vpack.c.bf16 %v2951_v25, %v2951_v25  ;;  %v9601_v53 = vpack.c.b16 %v3198_v11, %v3197_v32  ;;  %v3060_v37 = vpack.c.bf16 %v2952_v61, %v2952_v61 }
 0x460   :  { %v9599_v19 = vsel %vm392_vm0, %v3549_v55, %v3553_v62  ;;  %v9603_v18 = vpack.c.b16 %v3312_v44, %v3312_v44  ;;  %v3536_v26 = vrot.slane %v3534_v28, 1  ;;  %v3061_v45 = vpack.c.bf16 %v2953_v2, %v2953_v2 }
 0x461   :  { %12602 = vst [vmem:[#allocation49_spill] sm:$0xff] %v9599_v19  ;;  %3777 = vrot.lane.b32.xlu1 %v9599_v19, %s6281_s19  ;;  %v3541_v12 = vrot.slane %v3539_v49, 1  ;;  %v3207_v13 = vunpack.c.l.b16 %v3059_v59  ;;  %v3520_v1 = vshrl.u32 %v9601_v53, 16  ;;  %v3522_v25 = vshll.u32 %v9601_v53, 16  ;;  %v2947_v49 = vld [vmem:[#allocation2 + $0x1c0] sm:$0x3] }
 0x462   :  { %12603 = vst [vmem:[#allocation36_spill] sm:$0xff] %v9601_v53  ;;  %v3527_v62 = vshll.u32 %v9603_v18, 16  ;;  %v3208_v55 = vunpack.c.l.b16 %v3060_v37  ;;  %v3537_v32 = vor.u32 %v3536_v26, %v3532_v57  ;;  %v3317_v11 = vunpack.c.l.b16 %v3061_v45 }
 0x463   :  { %v3056_v61 = vpack.c.bf16 %v2948_v20, %v2948_v20  ;;  %v3057_v44 = vpack.c.bf16 %v2949_v41, %v2949_v41  ;;  %v3524_v34 = vrot.slane %v3522_v25, 1  ;;  %v3058_v28 = vpack.c.bf16 %v2950_v17, %v2950_v17  ;;  %v2961_v25 = vld [vmem:[#allocation2 + $0x230] sm:$0xff] }
 0x464   :  { %v3529_v51 = vrot.slane %v3527_v62, 1  ;;  %v9610_v29 = vpack.c.b16 %v3208_v55, %v3207_v13  ;;  %v9613_v2 = vsel %vm392_vm0, %v3537_v32, %v3541_v12  ;;  %v9615_v59 = vpack.c.b16 %v3317_v11, %v3317_v11  ;;  %v6252_v12 = vld [vmem:[#allocation2] sm:$0xff] }
 0x465   :  { %12604 = vst [vmem:[#allocation52_spill] sm:$0xff] %v9613_v2  ;;  %v3205_v19 = vunpack.c.l.b16 %v3056_v61  ;;  %v3206_v14 = vunpack.c.l.b16 %v3057_v44  ;;  %3775 = vrot.lane.b32.xlu0 %v9613_v2, %s6281_s19  ;;  %v3525_v57 = vor.u32 %v3524_v34, %v3520_v1  ;;  %v3316_v41 = vunpack.c.l.b16 %v3058_v28  ;;  %v2962_v34 = vld [vmem:[#allocation2 + $0x238] sm:$0x3] }
 0x466   :  { %v3580_v37 = vshrl.u32 %v9610_v29, 16  ;;  %v3582_v20 = vshll.u32 %v9610_v29, 16  ;;  %v3587_v26 = vshll.u32 %v9615_v59, 16  ;;  %v3053_v13 = vpack.c.bf16 %v6252_v12, %v6252_v12  ;;  %v2958_v2 = vld [vmem:[#allocation2 + $0x218] sm:$0xff] }
 0x467   :  { %v9622_v45 = vpack.c.b16 %v3206_v14, %v3205_v19  ;;  %v3055_v17 = vpack.c.bf16 %v2947_v49, %v2947_v49  ;;  %v9625_v62 = vsel %vm392_vm0, %v3525_v57, %v3529_v51  ;;  %v9627_v32 = vpack.c.b16 %v3316_v41, %v3316_v41 }
 0x468   :  { %12606 = vst [vmem:[#allocation141_spill] sm:$0xff] %v9625_v62  ;;  %v3584_v55 = vrot.slane %v3582_v20, 1  ;;  %v3068_v1 = vpack.c.bf16 %v2960_v24, %v2960_v24  ;;  %3773 = vrot.lane.b32.xlu2 %v9625_v62, %s6281_s19  ;;  %v3589_v11 = vrot.slane %v3587_v26, 1  ;;  %v3203_v19 = vunpack.c.l.b16 %v3053_v13  ;;  %v2957_v24 = vld [vmem:[#allocation2 + $0x210] sm:$0xff]  ;;  %v2959_v13 = vld [vmem:[#allocation2 + $0x220] sm:$0x3] }
 0x469   :  { %12605 = vst [vmem:[#allocation119_spill] sm:$0xff] %v9622_v45  ;;  %v3568_v61 = vshrl.u32 %v9622_v45, 16  ;;  %v3570_v14 = vshll.u32 %v9622_v45, 16  ;;  %v3575_v28 = vshll.u32 %v9627_v32, 16  ;;  %v3315_v49 = vunpack.c.l.b16 %v3055_v17  ;;  %v2965_v45 = vld [vmem:[#allocation2 + $0x250] sm:$0x3] }
 0x46a   :  { %12607 = vst [vmem:[#allocation75_spill] sm:$0xff] %v9627_v32  ;;  %v3585_v44 = vor.u32 %v3584_v55, %v3580_v37  ;;  %v3069_v51 = vpack.c.bf16 %v2961_v25, %v2961_v25  ;;  %v9634_v20 = vpack.c.b16 %v3203_v19, %v3203_v19  ;;  %v3070_v41 = vpack.c.bf16 %v2962_v34, %v2962_v34 }
 0x46b   :  { %v3572_v57 = vrot.slane %v3570_v14, 1  ;;  %v3213_v12 = vunpack.c.l.b16 %v3068_v1  ;;  %v3577_v26 = vrot.slane %v3575_v28, 1  ;;  %v9639_v56 = vpack.c.b16 %v3315_v49, %v3315_v49 }
 0x46c   :  { %v9637_v62 = vsel %vm392_vm0, %v3585_v44, %v3589_v11  ;;  %v3214_v7 = vunpack.c.l.b16 %v3069_v51  ;;  %v3556_v17 = vshrl.u32 %v9634_v20, 16  ;;  %v3558_v25 = vshll.u32 %v9634_v20, 16  ;;  %v2954_v51 = vld [vmem:[#allocation2 + $0x1f8] sm:$0xff] }
 0x46d   :  { %12608 = vst [vmem:[#allocation142_spill] sm:$0xff] %v9637_v62  ;;  %3783 = vrot.lane.b32.xlu1 %v9637_v62, %s6281_s19  ;;  %v3573_v37 = vor.u32 %v3572_v57, %v3568_v61  ;;  %v3320_v55 = vunpack.c.l.b16 %v3070_v41  ;;  %v3563_v34 = vshll.u32 %v9639_v56, 16  ;;  %v3065_v11 = vpack.c.bf16 %v2957_v24, %v2957_v24  ;;  %v2955_v61 = vld [vmem:[#allocation2 + $0x200] sm:$0xff]  ;;  %v2956_v57 = vld [vmem:[#allocation2 + $0x208] sm:$0x3] }
 0x46e   :  { %v9646_v1 = vpack.c.b16 %v3214_v7, %v3213_v12  ;;  %v3066_v14 = vpack.c.bf16 %v2958_v2, %v2958_v2  ;;  %v3560_v44 = vrot.slane %v3558_v25, 1  ;;  %v3067_v49 = vpack.c.bf16 %v2959_v13, %v2959_v13 }
 0x46f   :  { %v9649_v19 = vsel %vm392_vm0, %v3573_v37, %v3577_v26  ;;  %v9651_v28 = vpack.c.b16 %v3320_v55, %v3320_v55  ;;  %v3565_v41 = vrot.slane %v3563_v34, 1  ;;  %v3211_v12 = vunpack.c.l.b16 %v3065_v11 }
 0x470   :  { %12609 = vst [vmem:[#allocation92_spill] sm:$0xff] %v9646_v1  ;;  %3781 = vrot.lane.b32.xlu0 %v9649_v19, %s6281_s19  ;;  %v3616_v62 = vshrl.u32 %v9646_v1, 16  ;;  %v3618_v7 = vshll.u32 %v9646_v1, 16  ;;  %v3561_v2 = vor.u32 %v3560_v44, %v3556_v17  ;;  %v3212_v26 = vunpack.c.l.b16 %v3066_v14 }
 0x471   :  { %12610 = vst [vmem:[#allocation113_spill] sm:$0xff] %v9649_v19  ;;  %v3623_v24 = vshll.u32 %v9651_v28, 16  ;;  %v3319_v37 = vunpack.c.l.b16 %v3067_v49  ;;  %v3062_v55 = vpack.c.bf16 %v2954_v51, %v2954_v51  ;;  %v3063_v13 = vpack.c.bf16 %v2955_v61, %v2955_v61  ;;  %v2971_v49 = vld [vmem:[#allocation2 + $0x280] sm:$0x3] }
 0x472   :  { %12611 = vst [vmem:[#allocation131_spill] sm:$0xff] %v9651_v28  ;;  %v3620_v25 = vrot.slane %v3618_v7, 1  ;;  %v3064_v33 = vpack.c.bf16 %v2956_v57, %v2956_v57  ;;  %v3566_v30 = vsel %vm392_vm0, %v3561_v2, %v3565_v41  ;;  %v9659_v19 = vpack.c.b16 %v3212_v26, %v3211_v12 }
 0x473   :  { %v3625_v46 = vrot.slane %v3623_v24, 1  ;;  %v9661_v34 = vpack.c.b16 %v3319_v37, %v3319_v37  ;;  %3779 = vrot.lane.b32.xlu2 %v3566_v30, %s6281_s19  ;;  %v3209_v11 = vunpack.c.l.b16 %v3062_v55  ;;  %v3210_v44 = vunpack.c.l.b16 %v3063_v13  ;;  %v2967_v24 = vld [vmem:[#allocation2 + $0x260] sm:$0xff]  ;;  %v2968_v55 = vld [vmem:[#allocation2 + $0x268] sm:$0x3] }
 0x474   :  { %12612 = vst [vmem:[#allocation27_spill] sm:$0xff] %v9659_v19  ;;  %v3621_v17 = vor.u32 %v3620_v25, %v3616_v62  ;;  %v3318_v14 = vunpack.c.l.b16 %v3064_v33  ;;  %v3604_v51 = vshrl.u32 %v9659_v19, 16  ;;  %v3606_v61 = vshll.u32 %v9659_v19, 16  ;;  %v2966_v62 = vld [vmem:[#allocation2 + $0x258] sm:$0xff] }
 0x475   :  { %12613 = vst [vmem:[#allocation145_spill] sm:$0xff] %v9661_v34  ;;  %v3611_v57 = vshll.u32 %v9661_v34, 16  ;;  %v3077_v41 = vpack.c.bf16 %v2969_v48, %v2969_v48  ;;  %v9670_v12 = vpack.c.b16 %v3210_v44, %v3209_v11  ;;  %v3078_v30 = vpack.c.bf16 %v2970_v43, %v2970_v43 }
 0x476   :  { %v9668_v7 = vsel %vm392_vm0, %v3621_v17, %v3625_v46  ;;  %v9672_v2 = vpack.c.b16 %v3318_v14, %v3318_v14  ;;  %v3608_v33 = vrot.slane %v3606_v61, 1  ;;  %v3079_v37 = vpack.c.bf16 %v2971_v49, %v2971_v49  ;;  %v2964_v49 = vld [vmem:[#allocation2 + $0x248] sm:$0xff] }
 0x477   :  { %12614 = vst [vmem:[#allocation81_spill] sm:$0xff] %v9668_v7  ;;  %3789 = vrot.lane.b32.xlu1 %v9668_v7, %s6281_s19  ;;  %v3613_v26 = vrot.slane %v3611_v57, 1  ;;  %v3219_v25 = vunpack.c.l.b16 %v3077_v41  ;;  %v3592_v48 = vshrl.u32 %v9670_v12, 16  ;;  %v3594_v46 = vshll.u32 %v9670_v12, 16  ;;  %v2963_v57 = vld [vmem:[#allocation2 + $0x240] sm:$0xff] }
 0x478   :  { %12615 = vst [vmem:[#allocation56_spill] sm:$0xff] %v9670_v12  ;;  %v3599_v13 = vshll.u32 %v9672_v2, 16  ;;  %v3220_v17 = vunpack.c.l.b16 %v3078_v30  ;;  %v3609_v11 = vor.u32 %v3608_v33, %v3604_v51  ;;  %v3323_v44 = vunpack.c.l.b16 %v3079_v37 }
 0x479   :  { %v3074_v43 = vpack.c.bf16 %v2966_v62, %v2966_v62  ;;  %v3075_v14 = vpack.c.bf16 %v2967_v24, %v2967_v24  ;;  %v3596_v34 = vrot.slane %v3594_v46, 1  ;;  %v3076_v61 = vpack.c.bf16 %v2968_v55, %v2968_v55 }
 0x47a   :  { %v3601_v19 = vrot.slane %v3599_v13, 1  ;;  %v9679_v28 = vpack.c.b16 %v3220_v17, %v3219_v25  ;;  %v9682_v41 = vsel %vm392_vm0, %v3609_v11, %v3613_v26  ;;  %v9684_v7 = vpack.c.b16 %v3323_v44, %v3323_v44  ;;  %v2978_v11 = vld [vmem:[#allocation2 + $0x2b8] sm:$0xff] }
 0x47b   :  { %12617 = vst [vmem:[#allocation126_spill] sm:$0xff] %v9682_v41  ;;  %v3217_v1 = vunpack.c.l.b16 %v3074_v43  ;;  %v3218_v32 = vunpack.c.l.b16 %v3075_v14  ;;  %3787 = vrot.lane.b32.xlu0 %v9682_v41, %s6281_s19  ;;  %v3597_v51 = vor.u32 %v3596_v34, %v3592_v48  ;;  %v3322_v24 = vunpack.c.l.b16 %v3076_v61  ;;  %v2979_v34 = vld [vmem:[#allocation2 + $0x2c0] sm:$0xff]  ;;  %v2980_v48 = vld [vmem:[#allocation2 + $0x2c8] sm:$0x3] }
 0x47c   :  { %12616 = vst [vmem:[#allocation35_spill] sm:$0xff] %v9679_v28  ;;  %v3652_v30 = vshrl.u32 %v9679_v28, 16  ;;  %v3654_v62 = vshll.u32 %v9679_v28, 16  ;;  %v3659_v33 = vshll.u32 %v9684_v7, 16  ;;  %v3071_v26 = vpack.c.bf16 %v2963_v57, %v2963_v57 }
 0x47d   :  { %12618 = vst [vmem:[#allocation135_spill] sm:$0xff] %v9684_v7  ;;  %v9691_v37 = vpack.c.b16 %v3218_v32, %v3217_v1  ;;  %v3072_v25 = vpack.c.bf16 %v2964_v49, %v2964_v49  ;;  %v9694_v55 = vsel %vm392_vm0, %v3597_v51, %v3601_v19  ;;  %v9696_v13 = vpack.c.b16 %v3322_v24, %v3322_v24  ;;  %v2975_v24 = vld [vmem:[#allocation2 + $0x2a0] sm:$0xff] }
 0x47e   :  { %12620 = vst [vmem:[#allocation8_spill] sm:$0xff] %v9694_v55  ;;  %v3656_v46 = vrot.slane %v3654_v62, 1  ;;  %v3073_v17 = vpack.c.bf16 %v2965_v45, %v2965_v45  ;;  %3785 = vrot.lane.b32.xlu2 %v9694_v55, %s6281_s19  ;;  %v3661_v44 = vrot.slane %v3659_v33, 1  ;;  %v3215_v1 = vunpack.c.l.b16 %v3071_v26 }
 0x47f   :  { %12619 = vst [vmem:[#allocation74_spill] sm:$0xff] %v9691_v37  ;;  %v3640_v43 = vshrl.u32 %v9691_v37, 16  ;;  %v3642_v32 = vshll.u32 %v9691_v37, 16  ;;  %v3647_v19 = vshll.u32 %v9696_v13, 16  ;;  %v3216_v61 = vunpack.c.l.b16 %v3072_v25  ;;  %v2976_v37 = vld [vmem:[#allocation2 + $0x2a8] sm:$0xff] }
 0x480   :  { %12621 = vst [vmem:[#allocation43_spill] sm:$0xff] %v9696_v13  ;;  %v3657_v14 = vor.u32 %v3656_v46, %v3652_v30  ;;  %v3321_v57 = vunpack.c.l.b16 %v3073_v17  ;;  %v3086_v51 = vpack.c.bf16 %v2978_v11, %v2978_v11  ;;  %v3087_v45 = vpack.c.bf16 %v2979_v34, %v2979_v34  ;;  %v2977_v17 = vld [vmem:[#allocation2 + $0x2b0] sm:$0x3] }
 0x481   :  { %v3644_v49 = vrot.slane %v3642_v32, 1  ;;  %v3088_v62 = vpack.c.bf16 %v2980_v48, %v2980_v48  ;;  %v3649_v55 = vrot.slane %v3647_v19, 1  ;;  %v9706_v33 = vpack.c.b16 %v3216_v61, %v3215_v1  ;;  %v2973_v61 = vld [vmem:[#allocation2 + $0x290] sm:$0xff] }
 0x482   :  { %v9704_v41 = vsel %vm392_vm0, %v3657_v14, %v3661_v44  ;;  %v9708_v7 = vpack.c.b16 %v3321_v57, %v3321_v57  ;;  %v3225_v26 = vunpack.c.l.b16 %v3086_v51  ;;  %v3226_v25 = vunpack.c.l.b16 %v3087_v45 }
 0x483   :  { %12622 = vst [vmem:[#allocation46_spill] sm:$0xff] %v9704_v41  ;;  %3795 = vrot.lane.b32.xlu1 %v9704_v41, %s6281_s19  ;;  %v3645_v30 = vor.u32 %v3644_v49, %v3640_v43  ;;  %v3326_v46 = vunpack.c.l.b16 %v3088_v62  ;;  %v3628_v11 = vshrl.u32 %v9706_v33, 16  ;;  %v3630_v34 = vshll.u32 %v9706_v33, 16  ;;  %v2972_v43 = vld [vmem:[#allocation2 + $0x288] sm:$0xff]  ;;  %v2974_v62 = vld [vmem:[#allocation2 + $0x298] sm:$0x3] }
 0x484   :  { %12623 = vst [vmem:[#allocation29_spill] sm:$0xff] %v9706_v33  ;;  %v3635_v48 = vshll.u32 %v9708_v7, 16  ;;  %v3083_v44 = vpack.c.bf16 %v2975_v24, %v2975_v24  ;;  %v9718_v1 = vpack.c.b16 %v3226_v25, %v3225_v26  ;;  %v3084_v19 = vpack.c.bf16 %v2976_v37, %v2976_v37 }
 0x485   :  { %12624 = vst [vmem:[#allocation42_spill] sm:$0xff] %v9708_v7  ;;  %v9716_v32 = vsel %vm392_vm0, %v3645_v30, %v3649_v55  ;;  %v9720_v14 = vpack.c.b16 %v3326_v46, %v3326_v46  ;;  %v3632_v57 = vrot.slane %v3630_v34, 1  ;;  %v3085_v51 = vpack.c.bf16 %v2977_v17, %v2977_v17  ;;  %v2988_v17 = vld [vmem:[#allocation2 + $0x308] sm:$0xff] }
 0x486   :  { %12625 = vst [vmem:[#allocation94_spill] sm:$0xff] %v9716_v32  ;;  %3793 = vrot.lane.b32.xlu0 %v9716_v32, %s6281_s19  ;;  %v3637_v49 = vrot.slane %v3635_v48, 1  ;;  %v3223_v45 = vunpack.c.l.b16 %v3083_v44  ;;  %v3688_v24 = vshrl.u32 %v9718_v1, 16  ;;  %v3690_v55 = vshll.u32 %v9718_v1, 16  ;;  %v2987_v48 = vld [vmem:[#allocation2 + $0x300] sm:$0xff] }
 0x487   :  { %12626 = vst [vmem:[#allocation73_spill] sm:$0xff] %v9718_v1  ;;  %v3695_v30 = vshll.u32 %v9720_v14, 16  ;;  %v3224_v26 = vunpack.c.l.b16 %v3084_v19  ;;  %v3633_v25 = vor.u32 %v3632_v57, %v3628_v11  ;;  %v3325_v46 = vunpack.c.l.b16 %v3085_v51 }
 0x488   :  { %12627 = vst [vmem:[#allocation13_spill] sm:$0xff] %v9720_v14  ;;  %v3080_v37 = vpack.c.bf16 %v2972_v43, %v2972_v43  ;;  %v3081_v41 = vpack.c.bf16 %v2973_v61, %v2973_v61  ;;  %v3692_v13 = vrot.slane %v3690_v55, 1  ;;  %v3082_v34 = vpack.c.bf16 %v2974_v62, %v2974_v62  ;;  %v2989_v14 = vld [vmem:[#allocation2 + $0x310] sm:$0x3] }
 0x489   :  { %v3697_v28 = vrot.slane %v3695_v30, 1  ;;  %v9727_v7 = vpack.c.b16 %v3224_v26, %v3223_v45  ;;  %v9730_v44 = vsel %vm392_vm0, %v3633_v25, %v3637_v49  ;;  %v9732_v32 = vpack.c.b16 %v3325_v46, %v3325_v46  ;;  %v2984_v26 = vld [vmem:[#allocation2 + $0x2e8] sm:$0xff] }
 0x48a   :  { %12629 = vst [vmem:[#allocation55_spill] sm:$0xff] %v9730_v44  ;;  %v3221_v1 = vunpack.c.l.b16 %v3080_v37  ;;  %v3222_v33 = vunpack.c.l.b16 %v3081_v41  ;;  %3791 = vrot.lane.b32.xlu2 %v9730_v44, %s6281_s19  ;;  %v3693_v11 = vor.u32 %v3692_v13, %v3688_v24  ;;  %v3324_v61 = vunpack.c.l.b16 %v3082_v34  ;;  %v2985_v13 = vld [vmem:[#allocation2 + $0x2f0] sm:$0xff]  ;;  %v2986_v24 = vld [vmem:[#allocation2 + $0x2f8] sm:$0x3] }
 0x48b   :  { %12628 = vst [vmem:[#allocation66_spill] sm:$0xff] %v9727_v7  ;;  %v3676_v19 = vshrl.u32 %v9727_v7, 16  ;;  %v3678_v43 = vshll.u32 %v9727_v7, 16  ;;  %v3683_v57 = vshll.u32 %v9732_v32, 16  ;;  %v3095_v49 = vpack.c.bf16 %v2987_v48, %v2987_v48  ;;  %v2982_v7 = vld [vmem:[#allocation2 + $0x2d8] sm:$0xff] }
 0x48c   :  { %12630 = vst [vmem:[#allocation144_spill] sm:$0xff] %v9732_v32  ;;  %v9739_v51 = vpack.c.b16 %v3222_v33, %v3221_v1  ;;  %v3096_v45 = vpack.c.bf16 %v2988_v17, %v2988_v17  ;;  %v9742_v62 = vsel %vm392_vm0, %v3693_v11, %v3697_v28  ;;  %v9744_v55 = vpack.c.b16 %v3324_v61, %v3324_v61  ;;  %v2981_v61 = vld [vmem:[#allocation2 + $0x2d0] sm:$0xff] }
 0x48d   :  { %12632 = vst [vmem:[#allocation50_spill] sm:$0xff] %v9742_v62  ;;  %v3680_v41 = vrot.slane %v3678_v43, 1  ;;  %v3097_v30 = vpack.c.bf16 %v2989_v14, %v2989_v14  ;;  %3801 = vrot.lane.b32.xlu1 %v9742_v62, %s6281_s19  ;;  %v3685_v25 = vrot.slane %v3683_v57, 1  ;;  %v3231_v1 = vunpack.c.l.b16 %v3095_v49 }
 0x48e   :  { %12631 = vst [vmem:[#allocation107_spill] sm:$0xff] %v9739_v51  ;;  %v3664_v46 = vshrl.u32 %v9739_v51, 16  ;;  %v3666_v33 = vshll.u32 %v9739_v51, 16  ;;  %v3671_v28 = vshll.u32 %v9744_v55, 16  ;;  %v3232_v34 = vunpack.c.l.b16 %v3096_v45 }
 0x48f   :  { %v3681_v37 = vor.u32 %v3680_v41, %v3676_v19  ;;  %v3329_v48 = vunpack.c.l.b16 %v3097_v30  ;;  %v3092_v11 = vpack.c.bf16 %v2984_v26, %v2984_v26  ;;  %v3093_v14 = vpack.c.bf16 %v2985_v13, %v2985_v13  ;;  %v2983_v30 = vld [vmem:[#allocation2 + $0x2e0] sm:$0x3] }
 0x490   :  { %v3668_v17 = vrot.slane %v3666_v33, 1  ;;  %v3094_v43 = vpack.c.bf16 %v2986_v24, %v2986_v24  ;;  %v3673_v62 = vrot.slane %v3671_v28, 1  ;;  %v9754_v57 = vpack.c.b16 %v3232_v34, %v3231_v1 }
 0x491   :  { %v9752_v44 = vsel %vm392_vm0, %v3681_v37, %v3685_v25  ;;  %v9756_v32 = vpack.c.b16 %v3329_v48, %v3329_v48  ;;  %v3229_v49 = vunpack.c.l.b16 %v3092_v11  ;;  %v3230_v45 = vunpack.c.l.b16 %v3093_v14 }
 0x492   :  { %12633 = vst [vmem:[#allocation10_spill] sm:$0xff] %v9752_v44  ;;  %3799 = vrot.lane.b32.xlu0 %v9752_v44, %s6281_s19  ;;  %v3669_v19 = vor.u32 %v3668_v17, %v3664_v46  ;;  %v3328_v41 = vunpack.c.l.b16 %v3094_v43  ;;  %v3726_v26 = vshll.u32 %v9754_v57, 16  ;;  %v3089_v24 = vpack.c.bf16 %v2981_v61, %v2981_v61  ;;  %v2992_v44 = vld [vmem:[#allocation2 + $0x328] sm:$0x3] }
 0x493   :  { %12634 = vst [vmem:[#allocation116_spill] sm:$0xff] %v9754_v57  ;;  %v3731_v13 = vshll.u32 %v9756_v32, 16  ;;  %v9765_v33 = vpack.c.b16 %v3230_v45, %v3229_v49  ;;  %v3090_v37 = vpack.c.bf16 %v2982_v7, %v2982_v7  ;;  %v3724_v46 = vshrl.u32 %v9754_v57, 16 }
 0x494   :  { %v9763_v25 = vsel %vm392_vm0, %v3669_v19, %v3673_v62  ;;  %v9767_v1 = vpack.c.b16 %v3328_v41, %v3328_v41  ;;  %v3728_v28 = vrot.slane %v3726_v26, 1  ;;  %v3091_v34 = vpack.c.bf16 %v2983_v30, %v2983_v30  ;;  %v2990_v19 = vld [vmem:[#allocation2 + $0x318] sm:$0xff]  ;;  %v2991_v41 = vld [vmem:[#allocation2 + $0x320] sm:$0xff] }
 0x495   :  { %12635 = vst [vmem:[#allocation111_spill] sm:$0xff] %v9763_v25  ;;  %3797 = vrot.lane.b32.xlu2 %v9763_v25, %s6281_s19  ;;  %v3227_v48 = vunpack.c.l.b16 %v3089_v24  ;;  %v3714_v17 = vshll.u32 %v9765_v33, 16  ;;  %v3228_v14 = vunpack.c.l.b16 %v3090_v37  ;;  %v3733_v43 = vrot.slane %v3731_v13, 1  ;;  %v12642_v25 = vld [vmem:[#allocation78_spill] sm:$0xff] }
 0x496   :  { %12636 = vst [vmem:[#allocation127_spill] sm:$0xff] %v9765_v33  ;;  %v3719_v11 = vshll.u32 %v9767_v1, 16  ;;  %v3729_v62 = vor.u32 %v3728_v28, %v3724_v46  ;;  %v3327_v61 = vunpack.c.l.b16 %v3091_v34  ;;  %v3712_v49 = vshrl.u32 %v9765_v33, 16 }
 0x497   :  { %12637 = vst [vmem:[#allocation60_spill] sm:$0xff] %v9767_v1  ;;  %v3716_v7 = vrot.slane %v3714_v17, 1  ;;  %v9775_v45 = vpack.c.b16 %v3228_v14, %v3227_v48  ;;  %v3098_v46 = vpack.c.bf16 %v2990_v19, %v2990_v19  ;;  %v3099_v34 = vpack.c.bf16 %v2991_v41, %v2991_v41  ;;  %v12641_v41 = vld [vmem:[#allocation25_spill] sm:$0xff] }
 0x498   :  { %v9778_v26 = vsel %vm392_vm0, %v3729_v62, %v3733_v43  ;;  %v9780_v30 = vpack.c.b16 %v3327_v61, %v3327_v61  ;;  %v3721_v37 = vrot.slane %v3719_v11, 1  ;;  %v3100_v48 = vpack.c.bf16 %v2992_v44, %v2992_v44 }
 0x499   :  { %12638 = vst [vmem:[#allocation93_spill] sm:$0xff] %v9775_v45  ;;  %3807 = vrot.lane.b32.xlu1 %v9778_v26, %s6281_s19  ;;  %v3717_v24 = vor.u32 %v3716_v7, %v3712_v49  ;;  %v3702_v13 = vshll.u32 %v9775_v45, 16  ;;  %v3700_v14 = vshrl.u32 %v9775_v45, 16  ;;  %v3233_v43 = vunpack.c.l.b16 %v3098_v46 }
 0x49a   :  { %12639 = vst [vmem:[#allocation105_spill] sm:$0xff] %v9778_v26  ;;  %v3707_v28 = vshll.u32 %v9780_v30, 16  ;;  %v3814_v61 = vrot.slane %v9410_v8, 1  ;;  %v3815_v11 = vrot.slane %v9412_v15, 1  ;;  %v3234_v49 = vunpack.c.l.b16 %v3099_v34 }
 0x49b   :  { %v9787_v17 = vsel %vm392_vm0, %v3717_v24, %v3721_v37  ;;  %v3704_v62 = vrot.slane %v3702_v13, 1  ;;  %v3330_v19 = vunpack.c.l.b16 %v3100_v48  ;;  %v3811_v44 = vrot.slane %v12641_v41, 1 }
 0x49c   :  { %12640 = vst [vmem:[#allocation122_spill] sm:$0xff] %v9787_v17  ;;  %3805 = vrot.lane.b32.xlu0 %v9787_v17, %s6281_s19  ;;  %v3709_v26 = vrot.slane %v3707_v28, 1  ;;  %v3812_v24 = vrot.slane %v12642_v25, 1  ;;  %v9796_v37 = vpack.c.b16 %v3234_v49, %v3233_v43  ;;  %v9806_v15 = vsel %vm841_vm1, %v3814_v61, %v3815_v11  ;;  %v9809_v28 = vpop.permute.xlu2 %3749 }
 0x49d   :  { %v3705_v7 = vor.u32 %v3704_v62, %v3700_v14  ;;  %v9798_v1 = vpack.c.b16 %v3330_v19, %v3330_v19  ;;  %v3823_v62 = vrot.slane %v9457_v10, 1  ;;  %v3824_v43 = vrot.slane %v9463_v21, 1 }
 0x49e   :  { %12643 = vst [vmem:[#allocation143_spill] sm:$0xff] %v9796_v37  ;;  %v3738_v46 = vshll.u32 %v9796_v37, 16  ;;  %v3813_v34 = vsel %vm841_vm1, %v3811_v44, %v3812_v24  ;;  %v3820_v49 = vrot.slane %v9315_v52, 1  ;;  %v3821_v19 = vrot.slane %v9317_v60, 1 }
 0x49f   :  { %v9801_v13 = vsel %vm392_vm0, %v3705_v7, %v3709_v26  ;;  %v3743_v25 = vshll.u32 %v9798_v1, 16  ;;  %v3736_v26 = vshrl.u32 %v9796_v37, 16  ;;  %v9824_v7 = vpop.permute.xlu1 %3747  ;;  %v9829_v44 = vsel %vm841_vm1, %v3823_v62, %v3824_v43 }
 0x4a0   :  { %12644 = vst [vmem:[#allocation77_spill] sm:$0xff] %v9801_v13  ;;  %3803 = vrot.lane.b32.xlu2 %v9801_v13, %s6281_s19  ;;  %v3740_v48 = vrot.slane %v3738_v46, 1  ;;  %v9836_v24 = vsel %vm841_vm1, %v3820_v49, %v3821_v19  ;;  %v3817_v46 = vrot.slane %v9360_v35, 1  ;;  %v3818_v60 = vrot.slane %v9362_v47, 1 }
 0x4a1   :  { %3909 = vrot.lane.b32.xlu1 %v9806_v15, %s6283_s10  ;;  %v3745_v61 = vrot.slane %v3743_v25, 1  ;;  %v3833_v25 = vrot.slane %v9517_v5, 1  ;;  %v3826_v43 = vrot.slane %v9430_v39, 1  ;;  %v3842_v49 = vrot.slane %v9569_v0, 1 }
 0x4a2   :  { %v3741_v14 = vor.u32 %v3740_v48, %v3736_v26  ;;  %v9845_v26 = vsel %vm841_vm1, %v3817_v46, %v3818_v60  ;;  %v3829_v48 = vrot.slane %v9416_v40, 1  ;;  %v9869_v46 = vpop.permute.xlu0 %3751  ;;  %v3860_v17 = vrot.slane %v9639_v56, 1 }
 0x4a3   :  { %v3857_v56 = vrot.slane %v9579_v50, 1  ;;  %v3868_v50 = vrot.slane %v9670_v12, 1 }
 0x4a4   :  { %3907 = vrot.lane.b32.xlu0 %v3813_v34, %s6283_s10  ;;  %v9820_v11 = vsel %vm392_vm0, %v3741_v14, %v3745_v61  ;;  %v9833_v21 = vpop.permute.xlu2 %3755  ;;  %v3832_v34 = vrot.slane %v9515_v38, 1  ;;  %v3830_v14 = vrot.slane %v9418_v36, 1  ;;  %v3827_v61 = vrot.slane %v9434_v3, 1 }
 0x4a5   :  { %12645 = vst [vmem:[#allocation95_spill] sm:$0xff] %v9820_v11  ;;  %v3841_v36 = vrot.slane %v9565_v54, 1 }
 0x4a6   :  { %v9852_v62 = vsel %vm841_vm1, %v3832_v34, %v3833_v25  ;;  %v9859_v5 = vsel %vm841_vm1, %v3829_v48, %v3830_v14  ;;  %v9872_v60 = vsel %vm841_vm1, %v3826_v43, %v3827_v61  ;;  %v3838_v34 = vrot.slane %v9477_v27, 1 }
 0x4a7   :  { %v9856_v47 = vpop.permute.xlu1 %3753  ;;  %v3839_v25 = vrot.slane %v9483_v9, 1  ;;  %v9879_v3 = vsel %vm841_vm1, %v3841_v36, %v3842_v49  ;;  %v3835_v48 = vrot.slane %v9489_v31, 1  ;;  %v3836_v14 = vrot.slane %v9499_v42, 1 }
 0x4a8   :  { %3809 = vrot.lane.b32.xlu2 %v9820_v11, %s6281_s19  ;;  %v3850_v9 = vrot.slane %v9601_v53, 1  ;;  %v3851_v61 = vrot.slane %v9603_v18, 1  ;;  %v3848_v42 = vrot.slane %v9539_v16, 1  ;;  %v3859_v18 = vrot.slane %v9634_v20, 1 }
 0x4a9   :  { %3915 = vrot.lane.b32.xlu1 %v9829_v44, %s6283_s10  ;;  %v9884_v0 = vsel %vm841_vm1, %v3838_v34, %v3839_v25  ;;  %v9899_v34 = vsel %vm841_vm1, %v3835_v48, %v3836_v14  ;;  %v3847_v25 = vrot.slane %v9533_v22, 1  ;;  %v3844_v14 = vrot.slane %v9550_v4, 1  ;;  %v12670_v22 = vld [vmem:[#allocation135_spill] sm:$0xff] }
 0x4aa   :  { %v9906_v11 = vsel %vm841_vm1, %v3850_v9, %v3851_v61  ;;  %v3845_v16 = vrot.slane %v9555_v58, 1  ;;  %v3861_v9 = vsel %vm841_vm1, %v3859_v18, %v3860_v17  ;;  %v3853_v17 = vrot.slane %v9589_v23, 1 }
 0x4ab   :  { %12649 = vst [vmem:[#allocation84_spill] sm:$0xff] %v9906_v11  ;;  %v9913_v48 = vsel %vm841_vm1, %v3847_v25, %v3848_v42  ;;  %v3854_v18 = vrot.slane %v9591_v63, 1 }
 0x4ac   :  { %3913 = vrot.lane.b32.xlu0 %v9836_v24, %s6283_s10  ;;  %v9867_v19 = vpop.permute.xlu2 %3761  ;;  %12650 = vst [vmem:[#allocation45_spill] sm:$0xff] %v9913_v48  ;;  %v9923_v61 = vsel %vm841_vm1, %v3844_v14, %v3845_v16  ;;  %v3869_v14 = vrot.slane %v9672_v2, 1 }
 0x4ad   :  { %12646 = vst [vmem:[#allocation115_spill] sm:$0xff] %v9867_v19  ;;  %v9944_v16 = vsel %vm841_vm1, %v3853_v17, %v3854_v18  ;;  %v12658_v18 = vld [vmem:[#allocation119_spill] sm:$0xff] }
 0x4ae   :  { %12655 = vst [vmem:[#allocation106_spill] sm:$0xff] %v9944_v16  ;;  %v9953_v63 = vsel %vm841_vm1, %v3868_v50, %v3869_v14  ;;  %v12661_v14 = vld [vmem:[#allocation42_spill] sm:$0xff] }
 0x4af   :  { %v9888_v43 = vpop.permute.xlu1 %3759 }
 0x4b0   :  { %3911 = vrot.lane.b32.xlu2 %v9845_v26, %s6283_s10  ;;  %12647 = vst [vmem:[#allocation132_spill] sm:$0xff] %v9888_v43  ;;  %v9896_v49 = vpop.permute.xlu0 %3757  ;;  %v12677_v43 = vld [vmem:[#allocation13_spill] sm:$0xff] }
 0x4b1   :  { %3921 = vrot.lane.b32.xlu1 %v9852_v62, %s6283_s10 }
 0x4b4   :  { %3919 = vrot.lane.b32.xlu0 %v9859_v5, %s6283_s10 }
 0x4b8   :  { %3917 = vrot.lane.b32.xlu2 %v9872_v60, %s6283_s10  ;;  %v9894_v36 = vpop.permute.xlu2 %3767 }
 0x4b9   :  { %3927 = vrot.lane.b32.xlu1 %v9879_v3, %s6283_s10  ;;  %12648 = vst [vmem:[#allocation40_spill] sm:$0xff] %v9894_v36  ;;  %v3856_v36 = vrot.slane %v9574_v6, 1  ;;  %v12659_v6 = vld [vmem:[#allocation75_spill] sm:$0xff] }
 0x4ba   :  { %v9919_v13 = vpop.permute.xlu1 %3765 }
 0x4bb   :  { %12651 = vst [vmem:[#allocation129_spill] sm:$0xff] %v9919_v13  ;;  %v9935_v42 = vsel %vm841_vm1, %v3856_v36, %v3857_v56  ;;  %v3878_v13 = vrot.slane %v12661_v14, 1  ;;  %v12666_v14 = vld [vmem:[#allocation145_spill] sm:$0xff] }
 0x4bc   :  { %3925 = vrot.lane.b32.xlu0 %v9884_v0, %s6283_s10  ;;  %12654 = vst [vmem:[#allocation9_spill] sm:$0xff] %v9935_v42 }
 0x4be   :  { %v9931_v58 = vpop.permute.xlu0 %3763 }
 0x4bf   :  { %12653 = vst [vmem:[#allocation76_spill] sm:$0xff] %v9931_v58 }
 0x4c0   :  { %3923 = vrot.lane.b32.xlu2 %v9899_v34, %s6283_s10 }
 0x4c1   :  { %3933 = vrot.lane.b32.xlu1 %v9906_v11, %s6283_s10  ;;  %v3872_v11 = vrot.slane %v12666_v14, 1 }
 0x4c2   :  { %v9929_v25 = vpop.permute.xlu2 %3773 }
 0x4c3   :  { %12652 = vst [vmem:[#allocation138_spill] sm:$0xff] %v9929_v25  ;;  %v3865_v25 = vrot.slane %v9610_v29, 1 }
 0x4c4   :  { %3931 = vrot.lane.b32.xlu0 %v9913_v48, %s6283_s10  ;;  %v3884_v48 = vrot.slane %v12670_v22, 1  ;;  %v3895_v22 = vrot.slane %v9775_v45, 1  ;;  %v12680_v45 = vld [vmem:[#allocation66_spill] sm:$0xff] }
 0x4c7   :  { %v9948_v36 = vpop.permute.xlu1 %3771 }
 0x4c8   :  { %3929 = vrot.lane.b32.xlu2 %v9923_v61, %s6283_s10  ;;  %12656 = vst [vmem:[#allocation31_spill] sm:$0xff] %v9948_v36  ;;  %v3863_v36 = vrot.slane %v12659_v6, 1 }
 0x4c9   :  { %3939 = vrot.lane.b32.xlu1 %v3861_v9, %s6283_s10  ;;  %v3866_v9 = vrot.slane %v9615_v59, 1  ;;  %v3862_v59 = vrot.slane %v12658_v18, 1 }
 0x4cb   :  { %v9962_v17 = vsel %vm841_vm1, %v3865_v25, %v3866_v9  ;;  %v9971_v23 = vsel %vm841_vm1, %v3862_v59, %v3863_v36  ;;  %v12665_v36 = vld [vmem:[#allocation27_spill] sm:$0xff] }
 0x4cc   :  { %3937 = vrot.lane.b32.xlu0 %v9935_v42, %s6283_s10  ;;  %v9959_v2 = vpop.permute.xlu0 %3769  ;;  %v12660_v42 = vld [vmem:[#allocation29_spill] sm:$0xff]  ;;  %v3871_v59 = vrot.slane %v12665_v36, 1 }
 0x4cd   :  { %v9957_v56 = vpop.permute.xlu2 %3779  ;;  %12657 = vst [vmem:[#allocation34_spill] sm:$0xff] %v9959_v2  ;;  %v3877_v50 = vrot.slane %v12660_v42, 1  ;;  %v12663_v2 = vld [vmem:[#allocation131_spill] sm:$0xff] }
 0x4ce   :  { %v3875_v53 = vrot.slane %v12663_v2, 1 }
 0x4cf   :  { %v9978_v25 = vsel %vm841_vm1, %v3877_v50, %v3878_v13  ;;  %v3886_v13 = vrot.slane %v9739_v51, 1  ;;  %v3887_v50 = vrot.slane %v9744_v55, 1 }
 0x4d0   :  { %3935 = vrot.lane.b32.xlu2 %v9944_v16, %s6283_s10  ;;  %v12662_v16 = vld [vmem:[#allocation92_spill] sm:$0xff] }
 0x4d1   :  { %3945 = vrot.lane.b32.xlu1 %v9953_v63, %s6283_s10  ;;  %v3874_v58 = vrot.slane %v12662_v16, 1  ;;  %v10005_v14 = vsel %vm841_vm1, %v3886_v13, %v3887_v50  ;;  %v3896_v13 = vrot.slane %v9780_v30, 1 }
 0x4d2   :  { %12671 = vst [vmem:[#allocation147_spill] sm:$0xff] %v10005_v14 }
 0x4d3   :  { %v9982_v6 = vpop.permute.xlu1 %3777  ;;  %v9985_v9 = vsel %vm841_vm1, %v3874_v58, %v3875_v53  ;;  %v12669_v53 = vld [vmem:[#allocation35_spill] sm:$0xff] }
 0x4d4   :  { %3943 = vrot.lane.b32.xlu0 %v9962_v17, %s6283_s10  ;;  %12664 = vst [vmem:[#allocation97_spill] sm:$0xff] %v9982_v6  ;;  %v9998_v6 = vsel %vm841_vm1, %v3871_v59, %v3872_v11  ;;  %v3883_v58 = vrot.slane %v12669_v53, 1  ;;  %v12674_v11 = vld [vmem:[#allocation43_spill] sm:$0xff] }
 0x4d5   :  { %v3881_v59 = vrot.slane %v12674_v11, 1  ;;  %v3893_v11 = vrot.slane %v12677_v43, 1  ;;  %v3904_v43 = vrot.slane %v9796_v37, 1 }
 0x4d6   :  { %v10010_v55 = vsel %vm841_vm1, %v3883_v58, %v3884_v48  ;;  %v12676_v58 = vld [vmem:[#allocation73_spill] sm:$0xff] }
 0x4d7   :  { %v9995_v19 = vpop.permute.xlu0 %3775  ;;  %12672 = vst [vmem:[#allocation68_spill] sm:$0xff] %v10010_v55 }
 0x4d8   :  { %3941 = vrot.lane.b32.xlu2 %v9971_v23, %s6283_s10  ;;  %v9991_v2 = vpop.permute.xlu2 %3785  ;;  %12668 = vst [vmem:[#allocation128_spill] sm:$0xff] %v9995_v19  ;;  %v12673_v19 = vld [vmem:[#allocation74_spill] sm:$0xff] }
 0x4d9   :  { %3951 = vrot.lane.b32.xlu1 %v9978_v25, %s6283_s10  ;;  %12667 = vst [vmem:[#allocation15_spill] sm:$0xff] %v9991_v2  ;;  %v3880_v51 = vrot.slane %v12673_v19, 1 }
 0x4db   :  { %v10025_v48 = vsel %vm841_vm1, %v3880_v51, %v3881_v59  ;;  %v12681_v51 = vld [vmem:[#allocation144_spill] sm:$0xff] }
 0x4dc   :  { %3949 = vrot.lane.b32.xlu0 %v9985_v9, %s6283_s10  ;;  %v3890_v59 = vrot.slane %v12681_v51, 1 }
 0x4df   :  { %v10014_v2 = vpop.permute.xlu1 %3783 }
 0x4e0   :  { %3947 = vrot.lane.b32.xlu2 %v9998_v6, %s6283_s10 }
 0x4e1   :  { %3957 = vrot.lane.b32.xlu1 %v10005_v14, %s6283_s10  ;;  %v3892_v14 = vrot.slane %v12676_v58, 1  ;;  %v3905_v58 = vrot.slane %v9798_v1, 1 }
 0x4e2   :  { %v10022_v53 = vpop.permute.xlu0 %3781 }
 0x4e3   :  { %v10037_v30 = vsel %vm841_vm1, %v3892_v14, %v3893_v11  ;;  %v3902_v14 = vrot.slane %v9756_v32, 1  ;;  %v10057_v51 = vsel %vm841_vm1, %v3904_v43, %v3905_v58 }
 0x4e4   :  { %3955 = vrot.lane.b32.xlu0 %v10010_v55, %s6283_s10  ;;  %v10020_v50 = vpop.permute.xlu2 %3791  ;;  %v10032_v55 = vsel %vm841_vm1, %v3895_v22, %v3896_v13  ;;  %12679 = vst [vmem:[#allocation23_spill] sm:$0xff] %v10037_v30  ;;  %v3901_v13 = vrot.slane %v9754_v57, 1 }
 0x4e5   :  { %12675 = vst [vmem:[#allocation14_spill] sm:$0xff] %v10020_v50  ;;  %v3889_v50 = vrot.slane %v12680_v45, 1 }
 0x4e6   :  { %12678 = vst [vmem:[#allocation118_spill] sm:$0xff] %v10032_v55  ;;  %v10064_v1 = vsel %vm841_vm1, %v3901_v13, %v3902_v14 }
 0x4e7   :  { %v10048_v22 = vsel %vm841_vm1, %v3889_v50, %v3890_v59  ;;  %12685 = vst [vmem:[#allocation124_spill] sm:$0xff] %v10057_v51  ;;  %v3898_v50 = vrot.slane %v9765_v33, 1  ;;  %v12688_v59 = vld [vmem:[#allocation60_spill] sm:$0xff] }
 0x4e8   :  { %3953 = vrot.lane.b32.xlu2 %v10025_v48, %s6283_s10  ;;  %12683 = vst [vmem:[#allocation96_spill] sm:$0xff] %v10048_v22  ;;  %v3899_v32 = vrot.slane %v12688_v59, 1 }
 0x4e9   :  { %3963 = vrot.lane.b32.xlu1 %v10032_v55, %s6283_s10  ;;  %v10045_v4 = vpop.permute.xlu1 %3789  ;;  %12687 = vst [vmem:[#allocation80_spill] sm:$0xff] %v10064_v1 }
 0x4ea   :  { %12682 = vst [vmem:[#allocation64_spill] sm:$0xff] %v10045_v4 }
 0x4ec   :  { %3961 = vrot.lane.b32.xlu0 %v10037_v30, %s6283_s10 }
 0x4ed   :  { %v10059_v37 = vpop.permute.xlu0 %3787 }
 0x4ee   :  { %12686 = vst [vmem:[#allocation146_spill] sm:$0xff] %v10059_v37 }
 0x4ef   :  { %v10054_v11 = vpop.permute.xlu2 %3797 }
 0x4f0   :  { %3959 = vrot.lane.b32.xlu2 %v10048_v22, %s6283_s10  ;;  %12684 = vst [vmem:[#allocation109_spill] sm:$0xff] %v10054_v11  ;;  %v10071_v11 = vsel %vm841_vm1, %v3898_v50, %v3899_v32 }
 0x4f1   :  { %3969 = vrot.lane.b32.xlu1 %v10057_v51, %s6283_s10  ;;  %12689 = vst [vmem:[#allocation98_spill] sm:$0xff] %v10071_v11  ;;  %v12698_v51 = vld [vmem:[#allocation91_spill] sm:$0xff] }
 0x4f4   :  { %3967 = vrot.lane.b32.xlu0 %v10064_v1, %s6283_s10 }
 0x4f5   :  { %v10073_v58 = vpop.permute.xlu1 %3795 }
 0x4f6   :  { %12690 = vst [vmem:[#allocation117_spill] sm:$0xff] %v10073_v58 }
 0x4f8   :  { %3965 = vrot.lane.b32.xlu2 %v10071_v11, %s6283_s10  ;;  %v10081_v13 = vpop.permute.xlu0 %3793  ;;  %s6291_s10 = smov 64   ;;  %v12704_v11 = vld [vmem:[#allocation63_spill] sm:$0xff] }
 0x4f9   :  { %3985 = vrot.lane.b32.xlu1 %v9315_v52, %s6287_s18  ;;  %12692 = vst [vmem:[#allocation48_spill] sm:$0xff] %v10081_v13 }
 0x4fa   :  { %v10079_v43 = vpop.permute.xlu2 %3803 }
 0x4fb   :  { %12691 = vst [vmem:[#allocation134_spill] sm:$0xff] %v10079_v43 }
 0x4fc   :  { %3983 = vrot.lane.b32.xlu0 %v9360_v35, %s6287_s18 }
 0x4ff   :  { %v10089_v14 = vpop.permute.xlu1 %3801 }
 0x500   :  { %3981 = vrot.lane.b32.xlu2 %v9410_v8, %s6287_s18  ;;  %12693 = vst [vmem:[#allocation86_spill] sm:$0xff] %v10089_v14 }
 0x501   :  { %3991 = vrot.lane.b32.xlu1 %v9416_v40, %s6287_s18 }
 0x502   :  { %v10091_v50 = vpop.permute.xlu2 %3809 }
 0x503   :  { %12694 = vst [vmem:[#allocation108_spill] sm:$0xff] %v10091_v50 }
 0x504   :  { %3989 = vrot.lane.b32.xlu0 %v9430_v39, %s6287_s18  ;;  %v10095_v59 = vpop.permute.xlu0 %3799 }
 0x505   :  { %12695 = vst [vmem:[#allocation26_spill] sm:$0xff] %v10095_v59 }
 0x508   :  { %3987 = vrot.lane.b32.xlu2 %v9457_v10, %s6287_s18 }
 0x509   :  { %3997 = vrot.lane.b32.xlu1 %v9477_v27, %s6287_s18 }
 0x50a   :  { %v10101_v32 = vpop.permute.xlu2 %3911 }
 0x50b   :  { %v10103_v43 = vpop.permute.xlu1 %3807 }
 0x50c   :  { %12696 = vst [vmem:[#allocation139_spill] sm:$0xff] %v10103_v43  ;;  %3995 = vrot.lane.b32.xlu0 %v9489_v31, %s6287_s18 }
 0x50e   :  { %v10107_v14 = vpop.permute.xlu0 %3805 }
 0x50f   :  { %12697 = vst [vmem:[#allocation79_spill] sm:$0xff] %v10107_v14 }
 0x510   :  { %3993 = vrot.lane.b32.xlu2 %v9515_v38, %s6287_s18 }
 0x511   :  { %4219 = vrot.lane.b32.xlu1 %v9360_v35, %s6289_s2 }
 0x512   :  { %v10113_v50 = vpop.permute.xlu2 %3917 }
 0x513   :  { %v10115_v59 = vpop.permute.xlu1 %3909 }
 0x514   :  { %4145 = vrot.lane.b32.xlu0 %v9806_v15, %s6290_s3  ;;  %v12700_v15 = vld [vmem:[#allocation20_spill] sm:$0xff] }
 0x516   :  { %v10119_v43 = vpop.permute.xlu0 %3907 }
 0x518   :  { %4075 = vrot.lane.b32.xlu2 %v12698_v51, %s6285_s16 }
 0x519   :  { %3999 = vrot.lane.b32.xlu1 %v9565_v54, %s6287_s18 }
 0x51a   :  { %v10125_v14 = vpop.permute.xlu2 %3923 }
 0x51b   :  { %12699 = vst [vmem:[#allocation12_spill] sm:$0xff] %v10125_v14  ;;  %v10127_v57 = vpop.permute.xlu1 %3915  ;;  %v6175_v14 = vld [vmem:[%s11814_s4] sm:$0xff] }
 0x51c   :  { %4383 = vrot.lane.b32.xlu0 %v9845_v26, %s6291_s10 }
 0x51e   :  { %v10131_v1 = vpop.permute.xlu0 %3913 }
 0x520   :  { %4313 = vrot.lane.b32.xlu2 %v12700_v15, %s6292_s8 }
 0x521   :  { %4221 = vrot.lane.b32.xlu1 %v9315_v52, %s6289_s2 }
 0x522   :  { %v10137_v51 = vpop.permute.xlu2 %3929 }
 0x523   :  { %12701 = vst [vmem:[#allocation110_spill] sm:$0xff] %v10137_v51  ;;  %v10139_v58 = vpop.permute.xlu1 %3921 }
 0x524   :  { %12702 = vst [vmem:[#allocation133_spill] sm:$0xff] %v10139_v58  ;;  %4147 = vrot.lane.b32.xlu0 %v9845_v26, %s6290_s3  ;;  %v12708_v26 = vld [vmem:[#allocation69_spill] sm:$0xff] }
 0x526   :  { %v10143_v33 = vpop.permute.xlu0 %3919 }
 0x527   :  { %12703 = vst [vmem:[#allocation70_spill] sm:$0xff] %v10143_v33 }
 0x528   :  { %4077 = vrot.lane.b32.xlu2 %v12700_v15, %s6285_s16 }
 0x529   :  { %4079 = vrot.lane.b32.xlu1 %v12704_v11, %s6285_s16 }
 0x52a   :  { %v10149_v13 = vpop.permute.xlu2 %3935 }
 0x52b   :  { %12705 = vst [vmem:[#allocation17_spill] sm:$0xff] %v10149_v13  ;;  %v10151_v55 = vpop.permute.xlu1 %3927 }
 0x52c   :  { %12706 = vst [vmem:[#allocation121_spill] sm:$0xff] %v10151_v55  ;;  %4385 = vrot.lane.b32.xlu0 %v9836_v24, %s6291_s10 }
 0x52e   :  { %v10155_v51 = vpop.permute.xlu0 %3925 }
 0x52f   :  { %12707 = vst [vmem:[#allocation32_spill] sm:$0xff] %v10155_v51 }
 0x530   :  { %4315 = vrot.lane.b32.xlu2 %v12704_v11, %s6292_s8 }
 0x531   :  { %4317 = vrot.lane.b32.xlu1 %v12708_v26, %s6292_s8 }
 0x532   :  { %v10161_v30 = vpop.permute.xlu2 %3941 }
 0x533   :  { %v10163_v15 = vpop.permute.xlu1 %3933 }
 0x534   :  { %12709 = vst [vmem:[#allocation83_spill] sm:$0xff] %v10163_v15  ;;  %4223 = vrot.lane.b32.xlu0 %v9457_v10, %s6289_s2 }
 0x536   :  { %v10167_v13 = vpop.permute.xlu0 %3931 }
 0x537   :  { %12710 = vst [vmem:[#allocation101_spill] sm:$0xff] %v10167_v13  ;;  %v12715_v13 = vld [vmem:[#allocation7_spill] sm:$0xff] }
 0x538   :  { %4149 = vrot.lane.b32.xlu2 %v9836_v24, %s6290_s3 }
 0x539   :  { %4151 = vrot.lane.b32.xlu1 %v9829_v44, %s6290_s3 }
 0x53a   :  { %v10173_v55 = vpop.permute.xlu2 %3947 }
 0x53b   :  { %12711 = vst [vmem:[#allocation120_spill] sm:$0xff] %v10173_v55  ;;  %v10175_v11 = vpop.permute.xlu1 %3939 }
 0x53c   :  { %4081 = vrot.lane.b32.xlu0 %v12708_v26, %s6285_s16 }
 0x53e   :  { %v10179_v51 = vpop.permute.xlu0 %3937 }
 0x53f   :  { %12712 = vst [vmem:[#allocation137_spill] sm:$0xff] %v10179_v51  ;;  %v12718_v51 = vld [vmem:[#allocation113_spill] sm:$0xff] }
 0x540   :  { %4387 = vrot.lane.b32.xlu2 %v9829_v44, %s6291_s10 }
 0x541   :  { %4389 = vrot.lane.b32.xlu1 %v9872_v60, %s6291_s10 }
 0x542   :  { %v10185_v15 = vpop.permute.xlu2 %3953 }
 0x543   :  { %12713 = vst [vmem:[#allocation82_spill] sm:$0xff] %v10185_v15  ;;  %v10187_v24 = vpop.permute.xlu1 %3945 }
 0x544   :  { %12714 = vst [vmem:[#allocation24_spill] sm:$0xff] %v10187_v24  ;;  %4319 = vrot.lane.b32.xlu0 %v12715_v13, %s6292_s8 }
 0x546   :  { %v10191_v4 = vpop.permute.xlu0 %3943 }
 0x548   :  { %4225 = vrot.lane.b32.xlu2 %v9430_v39, %s6289_s2 }
 0x549   :  { %4177 = vrot.lane.b32.xlu1 %v9971_v23, %s6290_s3  ;;  %v6182_v23 = vld [vmem:[%s11814_s4 + $0x38] sm:$0xff] }
 0x54a   :  { %v10197_v26 = vpop.permute.xlu2 %3959  ;;  %5092 = vmatpush.bf16.msra.mxu1 %v6182_v23  ;;  %6191 = vmatpush.bf16.msra.mxu3 %v6182_v23 }
 0x54b   :  { %12716 = vst [vmem:[#allocation112_spill] sm:$0xff] %v10197_v26  ;;  %v10199_v44 = vpop.permute.xlu1 %3951  ;;  %v12722_v26 = vld [vmem:[#allocation142_spill] sm:$0xff] }
 0x54c   :  { %12717 = vst [vmem:[#allocation136_spill] sm:$0xff] %v10199_v44  ;;  %4107 = vrot.lane.b32.xlu0 %v12718_v51, %s6285_s16  ;;  %v6180_v44 = vld [vmem:[%s11814_s4 + $0x28] sm:$0xff] }
 0x54e   :  { %v10203_v15 = vpop.permute.xlu0 %3949 }
 0x54f   :  { %12719 = vst [vmem:[#allocation51_spill] sm:$0xff] %v10203_v15  ;;  %v6179_v15 = vld [vmem:[%s11814_s4 + $0x20] sm:$0xff] }
 0x550   :  { %4013 = vrot.lane.b32.xlu2 %v12658_v18, %s6287_s18 }
 0x551   :  { %4415 = vrot.lane.b32.xlu1 %v9962_v17, %s6291_s10 }
 0x552   :  { %v10209_v45 = vpop.permute.xlu2 %3965 }
 0x553   :  { %12720 = vst [vmem:[#allocation58_spill] sm:$0xff] %v10209_v45  ;;  %v10211_v22 = vpop.permute.xlu1 %3957  ;;  %v6181_v45 = vld [vmem:[%s11814_s4 + $0x30] sm:$0xff] }
 0x554   :  { %12721 = vst [vmem:[#allocation87_spill] sm:$0xff] %v10211_v22  ;;  %4345 = vrot.lane.b32.xlu0 %v12722_v26, %s6292_s8  ;;  %5093 = vmatpush.bf16.msra.mxu1 %v6181_v45 }
 0x555   :  { %6192 = vmatpush.bf16.msra.mxu3 %v6181_v45 }
 0x556   :  { %v10218_v51 = vpop.permute.xlu0 %3955 }
 0x557   :  { %12723 = vst [vmem:[#allocation104_spill] sm:$0xff] %v10218_v51 }
 0x558   :  { %4251 = vrot.lane.b32.xlu2 %v9610_v29, %s6289_s2  ;;  %5094 = vmatpush.bf16.msra.mxu1 %v6180_v44 }
 0x559   :  { %4227 = vrot.lane.b32.xlu1 %v9416_v40, %s6289_s2  ;;  %6193 = vmatpush.bf16.msra.mxu3 %v6180_v44  ;;  %v12728_v44 = vld [vmem:[#allocation85_spill] sm:$0xff] }
 0x55a   :  { %v3982_v22 = vpop.permute.xlu2 %3981 }
 0x55b   :  { %v10230_v23 = vpop.permute.xlu1 %3963 }
 0x55c   :  { %12724 = vst [vmem:[#allocation21_spill] sm:$0xff] %v10230_v23  ;;  %4153 = vrot.lane.b32.xlu0 %v9872_v60, %s6290_s3  ;;  %5095 = vmatpush.bf16.msra.mxu1 %v6179_v15  ;;  %v6178_v60 = vld [vmem:[%s11814_s4 + $0x18] sm:$0xff] }
 0x55d   :  { %6194 = vmatpush.bf16.msra.mxu3 %v6179_v15  ;;  %v6177_v15 = vld [vmem:[%s11814_s4 + $0x10] sm:$0xff] }
 0x55e   :  { %v10234_v51 = vpop.permute.xlu0 %3961 }
 0x55f   :  { %12725 = vst [vmem:[#allocation72_spill] sm:$0xff] %v10234_v51  ;;  %v6176_v51 = vld [vmem:[%s11814_s4 + $0x8] sm:$0xff] }
 0x560   :  { %4083 = vrot.lane.b32.xlu2 %v12715_v13, %s6285_s16  ;;  %5096 = vmatpush.bf16.msra.mxu1 %v6178_v60 }
 0x561   :  { %4015 = vrot.lane.b32.xlu1 %v9610_v29, %s6287_s18  ;;  %6195 = vmatpush.bf16.msra.mxu3 %v6178_v60 }
 0x562   :  { %v10243_v45 = vpop.permute.xlu2 %3987 }
 0x563   :  { %v10245_v23 = vpop.permute.xlu1 %3969 }
 0x564   :  { %12726 = vst [vmem:[#allocation89_spill] sm:$0xff] %v10245_v23  ;;  %4391 = vrot.lane.b32.xlu0 %v9859_v5, %s6291_s10  ;;  %5097 = vmatpush.bf16.msra.mxu1 %v6177_v15 }
 0x565   :  { %6196 = vmatpush.bf16.msra.mxu3 %v6177_v15 }
 0x566   :  { %v10252_v13 = vpop.permute.xlu0 %3967 }
 0x567   :  { %12727 = vst [vmem:[#allocation54_spill] sm:$0xff] %v10252_v13 }
 0x568   :  { %4321 = vrot.lane.b32.xlu2 %v12728_v44, %s6292_s8  ;;  %5098 = vmatpush.bf16.msra.mxu1 %v6176_v51 }
 0x569   :  { %4253 = vrot.lane.b32.xlu1 %v9670_v12, %s6289_s2  ;;  %6197 = vmatpush.bf16.msra.mxu3 %v6176_v51  ;;  %v12730_v51 = vld [vmem:[#allocation8_spill] sm:$0xff] }
 0x56a   :  { %v10261_v23 = vpop.permute.xlu2 %3993 }
 0x56b   :  { %12729 = vst [vmem:[#allocation65_spill] sm:$0xff] %v10261_v23  ;;  %v10266_v13 = vpop.permute.xlu1 %3985  ;;  %v4448_v23 = vsel %vm1543_vm3, %v12641_v41, %v9824_v7  ;;  %v12734_v41 = vld [vmem:[#allocation126_spill] sm:$0xff] }
 0x56c   :  { %4179 = vrot.lane.b32.xlu0 %v9962_v17, %s6290_s3  ;;  %5099 = vmatpush.bf16.msra.mxu1 %v6175_v14 }
 0x56d   :  { %6198 = vmatpush.bf16.msra.mxu3 %v6175_v14 }
 0x56e   :  { %v3984_v60 = vpop.permute.xlu0 %3983 }
 0x570   :  { %4109 = vrot.lane.b32.xlu2 %v12722_v26, %s6285_s16  ;;  %v12731_v26 = vld [vmem:[#allocation123_spill] sm:$0xff] }
 0x571   :  { %4085 = vrot.lane.b32.xlu1 %v12728_v44, %s6285_s16 }
 0x572   :  { %v4076_v55 = vpop.permute.xlu2 %4075 }
 0x573   :  { %v10277_v15 = vpop.permute.xlu1 %3991 }
 0x574   :  { %4417 = vrot.lane.b32.xlu0 %v9953_v63, %s6291_s10 }
 0x576   :  { %v10281_v17 = vpop.permute.xlu0 %3989 }
 0x578   :  { %4347 = vrot.lane.b32.xlu2 %v12730_v51, %s6292_s8 }
 0x579   :  { %4323 = vrot.lane.b32.xlu1 %v12731_v26, %s6292_s8 }
 0x57a   :  { %v4314_v37 = vpop.permute.xlu2 %4313 }
 0x57b   :  { %v10287_v58 = vpop.permute.xlu1 %3997 }
 0x57c   :  { %12732 = vst [vmem:[#allocation44_spill] sm:$0xff] %v10287_v58  ;;  %4229 = vrot.lane.b32.xlu0 %v9515_v38, %s6289_s2  ;;  %v4512_v58 = vsel %vm1673_vm6, %v4448_v23, %v10119_v43 }
 0x57e   :  { %v10291_v14 = vpop.permute.xlu0 %3995 }
 0x57f   :  { %12733 = vst [vmem:[#allocation100_spill] sm:$0xff] %v10291_v14  ;;  %v4576_v14 = vsel %vm1803_vm7, %v4512_v58, %v3982_v22 }
 0x580   :  { %4155 = vrot.lane.b32.xlu2 %v9859_v5, %s6290_s3  ;;  %v4640_v5 = vsel %vm1933_vm9, %v4576_v14, %v4076_v55  ;;  %v12735_v14 = vld [vmem:[#allocation39_spill] sm:$0xff] }
 0x581   :  { %4111 = vrot.lane.b32.xlu1 %v12730_v51, %s6285_s16 }
 0x582   :  { %v4078_v44 = vpop.permute.xlu2 %4077 }
 0x583   :  { %v4220_v24 = vpop.permute.xlu1 %4219 }
 0x584   :  { %4017 = vrot.lane.b32.xlu0 %v9670_v12, %s6287_s18 }
 0x586   :  { %v4146_v38 = vpop.permute.xlu0 %4145 }
 0x587   :  { %v4705_v51 = vsel %vm4703_vm14, %v4640_v5, %v4146_v38  ;;  %v4452_v5 = vsel %vm1543_vm3, %v9360_v35, %v9869_v46 }
 0x588   :  { %4393 = vrot.lane.b32.xlu2 %v9852_v62, %s6291_s10  ;;  %v4770_v12 = vsel %vm4768_vm15, %v4705_v51, %v4220_v24  ;;  %v4450_v24 = vsel %vm1543_vm3, %v9410_v8, %v9809_v28 }
 0x589   :  { %4349 = vrot.lane.b32.xlu1 %v12734_v41, %s6292_s8  ;;  %v4835_v22 = vsel %vm4833_vm2, %v4770_v12, %v4314_v37  ;;  %v4514_v12 = vsel %vm1673_vm6, %v4450_v24, %v10115_v59  ;;  %v12736_v24 = vld [vmem:[#allocation81_spill] sm:$0xff] }
 0x58a   :  { %v4316_v7 = vpop.permute.xlu2 %4315  ;;  %v4578_v37 = vsel %vm1803_vm7, %v4514_v12, %v3984_v60 }
 0x58b   :  { %v10312_v33 = vpop.permute.xlu1 %3999  ;;  %v4642_v23 = vsel %vm1933_vm9, %v4578_v37, %v4078_v44 }
 0x58c   :  { %4255 = vrot.lane.b32.xlu0 %v12665_v36, %s6289_s2 }
 0x58e   :  { %v4384_v55 = vpop.permute.xlu0 %4383 }
 0x58f   :  { %v4900_v38 = vsel %vm4898_vm4, %v4835_v22, %v4384_v55  ;;  %v4516_v55 = vsel %vm1673_vm6, %v4452_v5, %v10101_v32  ;;  %v12737_v5 = vld [vmem:[#allocation125_spill] sm:$0xff] }
 0x590   :  { %4181 = vrot.lane.b32.xlu2 %v9953_v63, %s6290_s3  ;;  %6099 = vmatmul.msk.bf16.vlgmr.msra.gmra.mxu1 %vm4963_vm5, %v4900_v38 }
 0x591   :  { %4157 = vrot.lane.b32.xlu1 %v9852_v62, %s6290_s3 }
 0x592   :  { %v4150_v58 = vpop.permute.xlu2 %4149 }
 0x593   :  { %v4222_v43 = vpop.permute.xlu1 %4221 }
 0x594   :  { %4087 = vrot.lane.b32.xlu0 %v12731_v26, %s6285_s16 }
 0x596   :  { %v4148_v63 = vpop.permute.xlu0 %4147 }
 0x597   :  { %v4707_v62 = vsel %vm4703_vm14, %v4642_v23, %v4148_v63 }
 0x598   :  { %4419 = vrot.lane.b32.xlu2 %v9998_v6, %s6291_s10  ;;  %v4772_v28 = vsel %vm4768_vm15, %v4707_v62, %v4222_v43 }
 0x599   :  { %4395 = vrot.lane.b32.xlu1 %v9899_v34, %s6291_s10  ;;  %v4837_v60 = vsel %vm4833_vm2, %v4772_v28, %v4316_v7  ;;  %v4580_v7 = vsel %vm1803_vm7, %v4516_v55, %v10266_v13 }
 0x59a   :  { %v4388_v8 = vpop.permute.xlu2 %4387 }
 0x59b   :  { %v4080_v26 = vpop.permute.xlu1 %4079 }
 0x59c   :  { %4325 = vrot.lane.b32.xlu0 %v12735_v14, %s6292_s8  ;;  %v4644_v38 = vsel %vm1933_vm9, %v4580_v7, %v4080_v26 }
 0x59e   :  { %v4386_v59 = vpop.permute.xlu0 %4385 }
 0x59f   :  { %v4902_v44 = vsel %vm4898_vm4, %v4837_v60, %v4386_v59 }
 0x5a0   :  { %4231 = vrot.lane.b32.xlu2 %v9489_v31, %s6289_s2  ;;  %6100 = vmatmul.msk.bf16.gmra.mxu1 %vm4963_vm5, %v4902_v44 }
 0x5a1   :  { %4183 = vrot.lane.b32.xlu1 %v9998_v6, %s6290_s3  ;;  %v4709_v6 = vsel %vm4703_vm14, %v4644_v38, %v4150_v58  ;;  %v4454_v58 = vsel %vm1543_vm3, %v9315_v52, %v9856_v47 }
 0x5a2   :  { %v4226_v51 = vpop.permute.xlu2 %4225  ;;  %v4518_v63 = vsel %vm1673_vm6, %v4454_v58, %v10131_v1 }
 0x5a3   :  { %v4318_v22 = vpop.permute.xlu1 %4317  ;;  %v4582_v62 = vsel %vm1803_vm7, %v4518_v63, %v10243_v45  ;;  %v4482_v63 = vsel %vm1543_vm3, %v12658_v18, %v10022_v53  ;;  %v12740_v18 = vld [vmem:[#allocation94_spill] sm:$0xff] }
 0x5a4   :  { %4113 = vrot.lane.b32.xlu0 %v12734_v41, %s6285_s16 }
 0x5a6   :  { %v4224_v43 = vpop.permute.xlu0 %4223 }
 0x5a7   :  { %v4774_v35 = vsel %vm4768_vm15, %v4709_v6, %v4224_v43 }
 0x5a8   :  { %4019 = vrot.lane.b32.xlu2 %v12665_v36, %s6287_s18  ;;  %v4839_v13 = vsel %vm4833_vm2, %v4774_v35, %v4318_v22 }
 0x5a9   :  { %4421 = vrot.lane.b32.xlu1 %v9985_v9, %s6291_s10  ;;  %v4904_v12 = vsel %vm4898_vm4, %v4839_v13, %v4388_v8 }
 0x5aa   :  { %v4014_v46 = vpop.permute.xlu2 %4013 }
 0x5ab   :  { %v4152_v32 = vpop.permute.xlu1 %4151 }
 0x5ac   :  { %4351 = vrot.lane.b32.xlu0 %v12736_v24, %s6292_s8 }
 0x5ae   :  { %v4082_v41 = vpop.permute.xlu0 %4081 }
 0x5af   :  { %v4646_v8 = vsel %vm1933_vm9, %v4582_v62, %v4082_v41  ;;  %v4546_v62 = vsel %vm1673_vm6, %v4482_v63, %v10161_v30 }
 0x5b0   :  { %4257 = vrot.lane.b32.xlu2 %v12662_v16, %s6289_s2  ;;  %6101 = vmatmul.msk.bf16.gmra.mxu1 %vm4963_vm5, %v4904_v12  ;;  %v4711_v26 = vsel %vm4703_vm14, %v4646_v8, %v4152_v32  ;;  %v12739_v12 = vld [vmem:[#allocation140_spill] sm:$0xff] }
 0x5b1   :  { %4233 = vrot.lane.b32.xlu1 %v9477_v27, %s6289_s2  ;;  %v4776_v47 = vsel %vm4768_vm15, %v4711_v26, %v4226_v51 }
 0x5b2   :  { %v4252_v37 = vpop.permute.xlu2 %4251 }
 0x5b3   :  { %v4390_v23 = vpop.permute.xlu1 %4389 }
 0x5b4   :  { %4159 = vrot.lane.b32.xlu0 %v9899_v34, %s6290_s3  ;;  %v4480_v34 = vsel %vm1543_vm3, %v9634_v20, %v9957_v56 }
 0x5b5   :  { %v4544_v59 = vsel %vm1673_vm6, %v4480_v34, %v10175_v11 }
 0x5b6   :  { %v4320_v28 = vpop.permute.xlu0 %4319  ;;  %v4608_v60 = vsel %vm1803_vm7, %v4544_v59, %v4014_v46  ;;  %v4458_v59 = vsel %vm1543_vm3, %v9430_v39, %v9896_v49 }
 0x5b7   :  { %v4841_v45 = vsel %vm4833_vm2, %v4776_v47, %v4320_v28 }
 0x5b8   :  { %4089 = vrot.lane.b32.xlu2 %v12735_v14, %s6285_s16  ;;  %v4906_v44 = vsel %vm4898_vm4, %v4841_v45, %v4390_v23 }
 0x5b9   :  { %4021 = vrot.lane.b32.xlu1 %v12662_v16, %s6287_s18 }
 0x5ba   :  { %v4084_v52 = vpop.permute.xlu2 %4083 }
 0x5bb   :  { %v4178_v1 = vpop.permute.xlu1 %4177 }
 0x5bc   :  { %4397 = vrot.lane.b32.xlu0 %v9884_v0, %s6291_s10 }
 0x5be   :  { %v4108_v14 = vpop.permute.xlu0 %4107 }
 0x5bf   :  { %v4672_v51 = vsel %vm1933_vm9, %v4608_v60, %v4108_v14  ;;  %v4522_v14 = vsel %vm1673_vm6, %v4458_v59, %v10113_v50 }
 0x5c0   :  { %4327 = vrot.lane.b32.xlu2 %v12737_v5, %s6292_s8  ;;  %6102 = vmatmul.msk.bf16.gmra.mxu1 %vm4963_vm5, %v4906_v44  ;;  %v4737_v20 = vsel %vm4703_vm14, %v4672_v51, %v4178_v1  ;;  %v4586_v60 = vsel %vm1803_vm7, %v4522_v14, %v10277_v15 }
 0x5c1   :  { %4259 = vrot.lane.b32.xlu1 %v12660_v42, %s6289_s2  ;;  %v4802_v22 = vsel %vm4768_vm15, %v4737_v20, %v4252_v37  ;;  %v12741_v20 = vld [vmem:[#allocation59_spill] sm:$0xff] }
 0x5c2   :  { %v4322_v55 = vpop.permute.xlu2 %4321 }
 0x5c3   :  { %v4416_v56 = vpop.permute.xlu1 %4415 }
 0x5c4   :  { %4185 = vrot.lane.b32.xlu0 %v9985_v9, %s6290_s3  ;;  %v4456_v9 = vsel %vm1543_vm3, %v9457_v10, %v9833_v21 }
 0x5c5   :  { %v4520_v35 = vsel %vm1673_vm6, %v4456_v9, %v10127_v57 }
 0x5c6   :  { %v4346_v11 = vpop.permute.xlu0 %4345  ;;  %v4584_v46 = vsel %vm1803_vm7, %v4520_v35, %v10281_v17 }
 0x5c7   :  { %v4867_v7 = vsel %vm4833_vm2, %v4802_v22, %v4346_v11  ;;  %v4648_v13 = vsel %vm1933_vm9, %v4584_v46, %v4084_v52 }
 0x5c8   :  { %4115 = vrot.lane.b32.xlu2 %v12736_v24, %s6285_s16  ;;  %v4932_v38 = vsel %vm4898_vm4, %v4867_v7, %v4416_v56  ;;  %v12738_v24 = vld [vmem:[#allocation55_spill] sm:$0xff]  ;;  %v4484_v56 = vsel %vm1543_vm3, %v9610_v29, %v10014_v2  ;;  %v12742_v7 = vld [vmem:[#allocation114_spill] sm:$0xff] }
 0x5c9   :  { %6115 = vmatmul.msk.bf16.vlgmr.msra.gmra.mxu3 %vm4963_vm5, %v4932_v38  ;;  %4091 = vrot.lane.b32.xlu1 %v12737_v5, %s6285_s16  ;;  %v4548_v22 = vsel %vm1673_vm6, %v4484_v56, %v10191_v4  ;;  %v12756_v56 = vld [vmem:[#allocation115_spill] sm:$0xff] }
 0x5ca   :  { %v4110_v43 = vpop.permute.xlu2 %4109 }
 0x5cb   :  { %v4228_v6 = vpop.permute.xlu1 %4227 }
 0x5cc   :  { %4423 = vrot.lane.b32.xlu0 %v9978_v25, %s6291_s10 }
 0x5ce   :  { %v4154_v32 = vpop.permute.xlu0 %4153 }
 0x5cf   :  { %v4713_v41 = vsel %vm4703_vm14, %v4648_v13, %v4154_v32 }
 0x5d0   :  { %4353 = vrot.lane.b32.xlu2 %v12738_v24, %s6292_s8  ;;  %v4778_v21 = vsel %vm4768_vm15, %v4713_v41, %v4228_v6  ;;  %v12745_v41 = vld [vmem:[#allocation132_spill] sm:$0xff] }
 0x5d1   :  { %4329 = vrot.lane.b32.xlu1 %v12739_v12, %s6292_s8  ;;  %v4843_v17 = vsel %vm4833_vm2, %v4778_v21, %v4322_v55 }
 0x5d2   :  { %v4348_v10 = vpop.permute.xlu2 %4347 }
 0x5d3   :  { %v4016_v58 = vpop.permute.xlu1 %4015 }
 0x5d4   :  { %4235 = vrot.lane.b32.xlu0 %v9565_v54, %s6289_s2  ;;  %v4610_v28 = vsel %vm1803_vm7, %v4546_v62, %v4016_v58 }
 0x5d5   :  { %v4674_v26 = vsel %vm1933_vm9, %v4610_v28, %v4110_v43 }
 0x5d6   :  { %v4392_v57 = vpop.permute.xlu0 %4391 }
 0x5d7   :  { %v4908_v37 = vsel %vm4898_vm4, %v4843_v17, %v4392_v57  ;;  %v12747_v57 = vld [vmem:[#allocation65_spill] sm:$0xff] }
 0x5d8   :  { %4161 = vrot.lane.b32.xlu2 %v9884_v0, %s6290_s3  ;;  %6103 = vmatmul.msk.bf16.gmra.mxu1 %vm4963_vm5, %v4908_v37  ;;  %v12748_v37 = vld [vmem:[#allocation35_spill] sm:$0xff] }
 0x5d9   :  { %4117 = vrot.lane.b32.xlu1 %v12738_v24, %s6285_s16  ;;  %v12744_v24 = vld [vmem:[#allocation46_spill] sm:$0xff] }
 0x5da   :  { %v4156_v23 = vpop.permute.xlu2 %4155 }
 0x5db   :  { %v4254_v8 = vpop.permute.xlu1 %4253 }
 0x5dc   :  { %4023 = vrot.lane.b32.xlu0 %v12660_v42, %s6287_s18 }
 0x5de   :  { %v4180_v0 = vpop.permute.xlu0 %4179 }
 0x5df   :  { %v4739_v52 = vsel %vm4703_vm14, %v4674_v26, %v4180_v0 }
 0x5e0   :  { %4399 = vrot.lane.b32.xlu2 %v9879_v3, %s6291_s10  ;;  %v4804_v30 = vsel %vm4768_vm15, %v4739_v52, %v4254_v8 }
 0x5e1   :  { %4355 = vrot.lane.b32.xlu1 %v12740_v18, %s6292_s8  ;;  %v4869_v45 = vsel %vm4833_vm2, %v4804_v30, %v4348_v10  ;;  %v12746_v10 = vld [vmem:[#allocation70_spill] sm:$0xff]  ;;  %v12751_v30 = vld [vmem:[#allocation15_spill] sm:$0xff] }
 0x5e2   :  { %v4394_v53 = vpop.permute.xlu2 %4393 }
 0x5e3   :  { %v4086_v47 = vpop.permute.xlu1 %4085 }
 0x5e4   :  { %4261 = vrot.lane.b32.xlu0 %v12673_v19, %s6289_s2  ;;  %v4650_v5 = vsel %vm1933_vm9, %v4586_v60, %v4086_v47  ;;  %v12752_v47 = vld [vmem:[#allocation56_spill] sm:$0xff]  ;;  %v12754_v60 = vld [vmem:[#allocation102_spill] sm:$0xff] }
 0x5e5   :  { %v4715_v49 = vsel %vm4703_vm14, %v4650_v5, %v4156_v23 }
 0x5e6   :  { %v4418_v1 = vpop.permute.xlu0 %4417 }
 0x5e7   :  { %v4934_v34 = vsel %vm4898_vm4, %v4869_v45, %v4418_v1  ;;  %v4486_v1 = vsel %vm1543_vm3, %v12752_v47, %v12751_v30  ;;  %v12753_v45 = vld [vmem:[#allocation24_spill] sm:$0xff] }
 0x5e8   :  { %4187 = vrot.lane.b32.xlu2 %v9978_v25, %s6290_s3  ;;  %6116 = vmatmul.msk.bf16.gmra.mxu3 %vm4963_vm5, %v4934_v34  ;;  %v4550_v34 = vsel %vm1673_vm6, %v4486_v1, %v12753_v45  ;;  %v12767_v47 = vld [vmem:[#allocation76_spill] sm:$0xff] }
 0x5e9   :  { %4163 = vrot.lane.b32.xlu1 %v9879_v3, %s6290_s3  ;;  %v4464_v1 = vsel %vm1543_vm3, %v9489_v31, %v12767_v47  ;;  %v12768_v45 = vld [vmem:[#allocation12_spill] sm:$0xff]  ;;  %v12771_v31 = vld [vmem:[#allocation10_spill] sm:$0xff] }
 0x5ea   :  { %v4182_v44 = vpop.permute.xlu2 %4181 }
 0x5eb   :  { %v4324_v51 = vpop.permute.xlu1 %4323 }
 0x5ec   :  { %4093 = vrot.lane.b32.xlu0 %v12739_v12, %s6285_s16  ;;  %v4460_v12 = vsel %vm1543_vm3, %v9416_v40, %v12745_v41 }
 0x5ed   :  { %v4524_v21 = vsel %vm1673_vm6, %v4460_v12, %v12746_v10  ;;  %v12762_v10 = vld [vmem:[#allocation84_spill] sm:$0xff] }
 0x5ee   :  { %v4230_v39 = vpop.permute.xlu0 %4229  ;;  %v4588_v17 = vsel %vm1803_vm7, %v4524_v21, %v12747_v57  ;;  %v12763_v21 = vld [vmem:[#allocation146_spill] sm:$0xff] }
 0x5ef   :  { %v4780_v25 = vsel %vm4768_vm15, %v4715_v49, %v4230_v39 }
 0x5f0   :  { %4425 = vrot.lane.b32.xlu2 %v10025_v48, %s6291_s10  ;;  %v4845_v3 = vsel %vm4833_vm2, %v4780_v25, %v4324_v51 }
 0x5f1   :  { %v4910_v50 = vsel %vm4898_vm4, %v4845_v3, %v4394_v53  ;;  %4401 = vrot.lane.b32.xlu1 %v9923_v61, %s6291_s10  ;;  %v12750_v53 = vld [vmem:[#allocation19_spill] sm:$0xff] }
 0x5f2   :  { %v4420_v15 = vpop.permute.xlu2 %4419  ;;  %6104 = vmatmul.msk.bf16.gmra.mxu1 %vm4963_vm5, %v4910_v50 }
 0x5f3   :  { %v4112_v55 = vpop.permute.xlu1 %4111 }
 0x5f4   :  { %4331 = vrot.lane.b32.xlu0 %v12741_v20, %s6292_s8 }
 0x5f6   :  { %v4018_v11 = vpop.permute.xlu0 %4017 }
 0x5f7   :  { %v4612_v38 = vsel %vm1803_vm7, %v4548_v22, %v4018_v11  ;;  %v12757_v11 = vld [vmem:[#allocation53_spill] sm:$0xff] }
 0x5f8   :  { %4237 = vrot.lane.b32.xlu2 %v12742_v7, %s6289_s2  ;;  %v4676_v6 = vsel %vm1933_vm9, %v4612_v38, %v4112_v55  ;;  %v4462_v22 = vsel %vm1543_vm3, %v12757_v11, %v12756_v56  ;;  %v12758_v38 = vld [vmem:[#allocation111_spill] sm:$0xff]  ;;  %v12773_v11 = vld [vmem:[#allocation64_spill] sm:$0xff] }
 0x5f9   :  { %4189 = vrot.lane.b32.xlu1 %v10025_v48, %s6290_s3  ;;  %v4741_v2 = vsel %vm4703_vm14, %v4676_v6, %v4182_v44  ;;  %v12743_v48 = vld [vmem:[#allocation68_spill] sm:$0xff] }
 0x5fa   :  { %v4232_v43 = vpop.permute.xlu2 %4231 }
 0x5fb   :  { %v4350_v9 = vpop.permute.xlu1 %4349 }
 0x5fc   :  { %4119 = vrot.lane.b32.xlu0 %v12740_v18, %s6285_s16 }
 0x5fe   :  { %v4256_v29 = vpop.permute.xlu0 %4255 }
 0x5ff   :  { %v4806_v4 = vsel %vm4768_vm15, %v4741_v2, %v4256_v29 }
 0x600   :  { %4025 = vrot.lane.b32.xlu2 %v12673_v19, %s6287_s18  ;;  %v4871_v35 = vsel %vm4833_vm2, %v4806_v4, %v4350_v9  ;;  %v12760_v9 = vld [vmem:[#allocation100_spill] sm:$0xff] }
 0x601   :  { %v4936_v46 = vsel %vm4898_vm4, %v4871_v35, %v4420_v15  ;;  %4427 = vrot.lane.b32.xlu1 %v12743_v48, %s6291_s10  ;;  %v12755_v15 = vld [vmem:[#allocation147_spill] sm:$0xff] }
 0x602   :  { %v4020_v32 = vpop.permute.xlu2 %4019  ;;  %6117 = vmatmul.msk.bf16.gmra.mxu3 %vm4963_vm5, %v4936_v46  ;;  %v12761_v35 = vld [vmem:[#allocation107_spill] sm:$0xff] }
 0x603   :  { %v4158_v13 = vpop.permute.xlu1 %4157  ;;  %v4614_v14 = vsel %vm1803_vm7, %v4550_v34, %v4020_v32  ;;  %v4528_v34 = vsel %vm1673_vm6, %v4464_v1, %v12768_v45  ;;  %v12783_v1 = vld [vmem:[#allocation14_spill] sm:$0xff] }
 0x604   :  { %4357 = vrot.lane.b32.xlu0 %v12744_v24, %s6292_s8  ;;  %v4492_v45 = vsel %vm1543_vm3, %v12660_v42, %v12783_v1  ;;  %v12786_v42 = vld [vmem:[#allocation49_spill] sm:$0xff] }
 0x606   :  { %v4088_v58 = vpop.permute.xlu0 %4087 }
 0x607   :  { %v4652_v63 = vsel %vm1933_vm9, %v4588_v17, %v4088_v58  ;;  %v4488_v58 = vsel %vm1543_vm3, %v12665_v36, %v12763_v21  ;;  %v12764_v17 = vld [vmem:[#allocation120_spill] sm:$0xff] }
 0x608   :  { %4263 = vrot.lane.b32.xlu2 %v12748_v37, %s6289_s2  ;;  %v4717_v62 = vsel %vm4703_vm14, %v4652_v63, %v4158_v13  ;;  %v4552_v63 = vsel %vm1673_vm6, %v4488_v58, %v12764_v17  ;;  %v12778_v58 = vld [vmem:[#allocation129_spill] sm:$0xff]  ;;  %v12779_v17 = vld [vmem:[#allocation32_spill] sm:$0xff] }
 0x609   :  { %4165 = vrot.lane.b32.xlu1 %v9923_v61, %s6290_s3  ;;  %v4782_v28 = vsel %vm4768_vm15, %v4717_v62, %v4232_v43  ;;  %v12749_v61 = vld [vmem:[#allocation45_spill] sm:$0xff] }
 0x60a   :  { %v4258_v23 = vpop.permute.xlu2 %4257  ;;  %v12759_v43 = vld [vmem:[#allocation133_spill] sm:$0xff] }
 0x60b   :  { %v4396_v8 = vpop.permute.xlu1 %4395  ;;  %v4526_v6 = vsel %vm1673_vm6, %v4462_v22, %v12759_v43  ;;  %v4490_v22 = vsel %vm1543_vm3, %v12662_v16, %v12773_v11  ;;  %v12774_v43 = vld [vmem:[#allocation51_spill] sm:$0xff]  ;;  %v2940_v11 = vld [vmem:[#allocation2 + $0x188] sm:$0xff] }
 0x60c   :  { %4095 = vrot.lane.b32.xlu0 %v12741_v20, %s6285_s16  ;;  %v4590_v29 = vsel %vm1803_vm7, %v4526_v6, %v12760_v9  ;;  %v4554_v6 = vsel %vm1673_vm6, %v4490_v22, %v12774_v43 }
 0x60e   :  { %v4326_v40 = vpop.permute.xlu0 %4325 }
 0x60f   :  { %v4847_v0 = vsel %vm4833_vm2, %v4782_v28, %v4326_v40 }
 0x610   :  { %4001 = vrot.lane.b32.xlu2 %v12742_v7, %s6287_s18  ;;  %v4912_v26 = vsel %vm4898_vm4, %v4847_v0, %v4396_v8  ;;  %v12765_v8 = vld [vmem:[#allocation141_spill] sm:$0xff]  ;;  %v12766_v0 = vld [vmem:[#allocation36_spill] sm:$0xff] }
 0x611   :  { %6105 = vmatmul.msk.bf16.gmra.mxu1 %vm4963_vm5, %v4912_v26  ;;  %4403 = vrot.lane.b32.xlu1 %v12749_v61, %s6291_s10 }
 0x612   :  { %v4090_v52 = vpop.permute.xlu2 %4089 }
 0x613   :  { %v4184_v18 = vpop.permute.xlu1 %4183  ;;  %v4654_v4 = vsel %vm1933_vm9, %v4590_v29, %v4090_v52  ;;  %v12775_v29 = vld [vmem:[#allocation106_spill] sm:$0xff] }
 0x614   :  { %4333 = vrot.lane.b32.xlu0 %v12750_v53, %s6292_s8 }
 0x616   :  { %v4114_v59 = vpop.permute.xlu0 %4113 }
 0x617   :  { %v4678_v44 = vsel %vm1933_vm9, %v4614_v14, %v4114_v59  ;;  %v12769_v59 = vld [vmem:[#allocation96_spill] sm:$0xff] }
 0x618   :  { %4239 = vrot.lane.b32.xlu2 %v12754_v60, %s6289_s2  ;;  %v4743_v51 = vsel %vm4703_vm14, %v4678_v44, %v4184_v18  ;;  %v12770_v14 = vld [vmem:[#allocation44_spill] sm:$0xff] }
 0x619   :  { %4191 = vrot.lane.b32.xlu1 %v12743_v48, %s6290_s3  ;;  %v4808_v25 = vsel %vm4768_vm15, %v4743_v51, %v4258_v23  ;;  %v4592_v44 = vsel %vm1803_vm7, %v4528_v34, %v12770_v14  ;;  %v12784_v34 = vld [vmem:[#allocation136_spill] sm:$0xff] }
 0x61a   :  { %v4328_v5 = vpop.permute.xlu2 %4327 }
 0x61b   :  { %v4422_v39 = vpop.permute.xlu1 %4421 }
 0x61c   :  { %4121 = vrot.lane.b32.xlu0 %v12744_v24, %s6285_s16 }
 0x61e   :  { %v4352_v49 = vpop.permute.xlu0 %4351 }
 0x61f   :  { %v4873_v3 = vsel %vm4833_vm2, %v4808_v25, %v4352_v49 }
 0x620   :  { %4027 = vrot.lane.b32.xlu2 %v12748_v37, %s6287_s18  ;;  %v4938_v50 = vsel %vm4898_vm4, %v4873_v3, %v4422_v39 }
 0x621   :  { %6118 = vmatmul.msk.bf16.gmra.mxu3 %vm4963_vm5, %v4938_v50  ;;  %4429 = vrot.lane.b32.xlu1 %v12755_v15, %s6291_s10  ;;  %v12772_v50 = vld [vmem:[#allocation66_spill] sm:$0xff] }
 0x622   :  { %v4116_v55 = vpop.permute.xlu2 %4115 }
 0x623   :  { %v4234_v20 = vpop.permute.xlu1 %4233 }
 0x624   :  { %4359 = vrot.lane.b32.xlu0 %v12758_v38, %s6292_s8 }
 0x626   :  { %v4160_v2 = vpop.permute.xlu0 %4159 }
 0x627   :  { %v4719_v46 = vsel %vm4703_vm14, %v4654_v4, %v4160_v2 }
 0x628   :  { %4265 = vrot.lane.b32.xlu2 %v12761_v35, %s6289_s2  ;;  %v4784_v32 = vsel %vm4768_vm15, %v4719_v46, %v4234_v20 }
 0x629   :  { %4167 = vrot.lane.b32.xlu1 %v12749_v61, %s6290_s3  ;;  %v4849_v41 = vsel %vm4833_vm2, %v4784_v32, %v4328_v5 }
 0x62a   :  { %v4354_v48 = vpop.permute.xlu2 %4353 }
 0x62b   :  { %v4022_v13 = vpop.permute.xlu1 %4021 }
 0x62c   :  { %4097 = vrot.lane.b32.xlu0 %v12750_v53, %s6285_s16  ;;  %v4616_v62 = vsel %vm1803_vm7, %v4552_v63, %v4022_v13 }
 0x62d   :  { %v4680_v28 = vsel %vm1933_vm9, %v4616_v62, %v4116_v55 }
 0x62e   :  { %v4398_v24 = vpop.permute.xlu0 %4397 }
 0x62f   :  { %v4914_v12 = vsel %vm4898_vm4, %v4849_v41, %v4398_v24  ;;  %v12777_v24 = vld [vmem:[#allocation90_spill] sm:$0xff] }
 0x630   :  { %4003 = vrot.lane.b32.xlu2 %v12754_v60, %s6287_s18  ;;  %6106 = vmatmul.msk.bf16.gmra.mxu1 %vm4963_vm5, %v4914_v12 }
 0x631   :  { %4405 = vrot.lane.b32.xlu1 %v12762_v10, %s6291_s10 }
 0x632   :  { %v4162_v57 = vpop.permute.xlu2 %4161 }
 0x633   :  { %v4260_v23 = vpop.permute.xlu1 %4259 }
 0x634   :  { %4335 = vrot.lane.b32.xlu0 %v12765_v8, %s6292_s8 }
 0x636   :  { %v4186_v40 = vpop.permute.xlu0 %4185 }
 0x637   :  { %v4745_v26 = vsel %vm4703_vm14, %v4680_v28, %v4186_v40  ;;  %v12780_v40 = vld [vmem:[#allocation23_spill] sm:$0xff] }
 0x638   :  { %4241 = vrot.lane.b32.xlu2 %v12766_v0, %s6289_s2  ;;  %v4810_v61 = vsel %vm4768_vm15, %v4745_v26, %v4260_v23 }
 0x639   :  { %4193 = vrot.lane.b32.xlu1 %v12755_v15, %s6290_s3  ;;  %v4875_v53 = vsel %vm4833_vm2, %v4810_v61, %v4354_v48  ;;  %v12776_v48 = vld [vmem:[#allocation52_spill] sm:$0xff] }
 0x63a   :  { %v4400_v36 = vpop.permute.xlu2 %4399 }
 0x63b   :  { %v4092_v52 = vpop.permute.xlu1 %4091 }
 0x63c   :  { %4123 = vrot.lane.b32.xlu0 %v12758_v38, %s6285_s16  ;;  %v4656_v51 = vsel %vm1933_vm9, %v4592_v44, %v4092_v52 }
 0x63d   :  { %v4721_v25 = vsel %vm4703_vm14, %v4656_v51, %v4162_v57  ;;  %v4466_v57 = vsel %vm1543_vm3, %v9477_v27, %v12778_v58  ;;  %v12781_v27 = vld [vmem:[#allocation50_spill] sm:$0xff]  ;;  %v12785_v51 = vld [vmem:[#allocation9_spill] sm:$0xff] }
 0x63e   :  { %v4424_v18 = vpop.permute.xlu0 %4423  ;;  %v4530_v63 = vsel %vm1673_vm6, %v4466_v57, %v12779_v17  ;;  %v12791_v17 = vld [vmem:[#allocation77_spill] sm:$0xff] }
 0x63f   :  { %v4940_v30 = vsel %vm4898_vm4, %v4875_v53, %v4424_v18  ;;  %v4594_v62 = vsel %vm1803_vm7, %v4530_v63, %v10312_v33  ;;  %v12782_v18 = vld [vmem:[#allocation73_spill] sm:$0xff] }
 0x640   :  { %4029 = vrot.lane.b32.xlu2 %v12761_v35, %s6287_s18  ;;  %6119 = vmatmul.msk.bf16.gmra.mxu3 %vm4963_vm5, %v4940_v30 }
 0x641   :  { %4431 = vrot.lane.b32.xlu1 %v12769_v59, %s6291_s10 }
 0x642   :  { %v4188_v5 = vpop.permute.xlu2 %4187 }
 0x643   :  { %v4330_v39 = vpop.permute.xlu1 %4329 }
 0x644   :  { %4361 = vrot.lane.b32.xlu0 %v12771_v31, %s6292_s8 }
 0x646   :  { %v4236_v49 = vpop.permute.xlu0 %4235 }
 0x647   :  { %v4786_v3 = vsel %vm4768_vm15, %v4721_v25, %v4236_v49 }
 0x648   :  { %4267 = vrot.lane.b32.xlu2 %v12772_v50, %s6289_s2  ;;  %v4851_v15 = vsel %vm4833_vm2, %v4786_v3, %v4330_v39 }
 0x649   :  { %v4916_v55 = vsel %vm4898_vm4, %v4851_v15, %v4400_v36  ;;  %4169 = vrot.lane.b32.xlu1 %v12762_v10, %s6290_s3 }
 0x64a   :  { %v4426_v20 = vpop.permute.xlu2 %4425  ;;  %6107 = vmatmul.msk.bf16.gmra.mxu1 %vm4963_vm5, %v4916_v55  ;;  %v12787_v55 = vld [vmem:[#allocation16_spill] sm:$0xff] }
 0x64b   :  { %v4118_v56 = vpop.permute.xlu1 %4117 }
 0x64c   :  { %4099 = vrot.lane.b32.xlu0 %v12765_v8, %s6285_s16 }
 0x64e   :  { %v4024_v38 = vpop.permute.xlu0 %4023 }
 0x64f   :  { %v4618_v9 = vsel %vm1803_vm7, %v4554_v6, %v4024_v38  ;;  %v3048_v6 = vpack.c.bf16 %v2940_v11, %v2940_v11 }
 0x650   :  { %4005 = vrot.lane.b32.xlu2 %v12766_v0, %s6287_s18  ;;  %v4682_v4 = vsel %vm1933_vm9, %v4618_v9, %v4118_v56  ;;  %v2939_v56 = vld [vmem:[#allocation2 + $0x180] sm:$0xff]  ;;  %v12788_v9 = vld [vmem:[#allocation40_spill] sm:$0xff] }
 0x651   :  { %4407 = vrot.lane.b32.xlu1 %v12775_v29, %s6291_s10  ;;  %v4747_v32 = vsel %vm4703_vm14, %v4682_v4, %v4188_v5  ;;  %v3047_v43 = vpack.c.bf16 %v2939_v56, %v2939_v56  ;;  %v12789_v4 = vld [vmem:[#allocation121_spill] sm:$0xff] }
 0x652   :  { %v4238_v2 = vpop.permute.xlu2 %4237 }
 0x653   :  { %v4356_v46 = vpop.permute.xlu1 %4355 }
 0x654   :  { %4337 = vrot.lane.b32.xlu0 %v12776_v48, %s6292_s8 }
 0x656   :  { %v4262_v16 = vpop.permute.xlu0 %4261 }
 0x657   :  { %v4812_v13 = vsel %vm4768_vm15, %v4747_v32, %v4262_v16  ;;  %v3975_v32 = vunpack.c.l.b16 %v3047_v43 }
 0x658   :  { %4243 = vrot.lane.b32.xlu2 %v12777_v24, %s6289_s2  ;;  %v4877_v41 = vsel %vm4833_vm2, %v4812_v13, %v4356_v46  ;;  %v3976_v13 = vunpack.c.l.b16 %v3048_v6  ;;  %v2944_v6 = vld [vmem:[#allocation2 + $0x1a8] sm:$0x3] }
 0x659   :  { %v4942_v12 = vsel %vm4898_vm4, %v4877_v41, %v4426_v20  ;;  %4195 = vrot.lane.b32.xlu1 %v12769_v59, %s6290_s3  ;;  %v4556_v59 = vsel %vm1673_vm6, %v4492_v45, %v12784_v34  ;;  %v12794_v34 = vld [vmem:[#allocation82_spill] sm:$0xff] }
 0x65a   :  { %v4026_v10 = vpop.permute.xlu2 %4025  ;;  %6120 = vmatmul.msk.bf16.gmra.mxu3 %vm4963_vm5, %v4942_v12  ;;  %v10711_v57 = vpack.c.b16 %v3976_v13, %v3975_v32 }
 0x65b   :  { %v4164_v21 = vpop.permute.xlu1 %4163  ;;  %v4620_v44 = vsel %vm1803_vm7, %v4556_v59, %v4026_v10  ;;  %v12790_v10 = vld [vmem:[#allocation118_spill] sm:$0xff] }
 0x65c   :  { %4125 = vrot.lane.b32.xlu0 %v12771_v31, %s6285_s16  ;;  %v4052_v1 = vshrl.u32 %v10711_v57, 16 }
 0x65e   :  { %v4094_v23 = vpop.permute.xlu0 %4093 }
 0x65f   :  { %v4658_v8 = vsel %vm1933_vm9, %v4594_v62, %v4094_v23 }
 0x660   :  { %4031 = vrot.lane.b32.xlu2 %v12772_v50, %s6287_s18  ;;  %v4723_v26 = vsel %vm4703_vm14, %v4658_v8, %v4164_v21 }
 0x661   :  { %4433 = vrot.lane.b32.xlu1 %v12780_v40, %s6291_s10  ;;  %v4788_v52 = vsel %vm4768_vm15, %v4723_v26, %v4238_v2  ;;  %v2941_v2 = vld [vmem:[#allocation2 + $0x190] sm:$0x3] }
 0x662   :  { %v4264_v28 = vpop.permute.xlu2 %4263  ;;  %v3049_v12 = vpack.c.bf16 %v2941_v2, %v2941_v2  ;;  %v12795_v2 = vld [vmem:[#allocation34_spill] sm:$0xff] }
 0x663   :  { %v4402_v36 = vpop.permute.xlu1 %4401 }
 0x664   :  { %4363 = vrot.lane.b32.xlu0 %v12781_v27, %s6292_s8  ;;  %v4047_v63 = vunpack.c.l.b16 %v3049_v12 }
 0x666   :  { %v4332_v61 = vpop.permute.xlu0 %4331 }
 0x667   :  { %v4853_v33 = vsel %vm4833_vm2, %v4788_v52, %v4332_v61 }
 0x668   :  { %4269 = vrot.lane.b32.xlu2 %v12782_v18, %s6289_s2  ;;  %v4918_v53 = vsel %vm4898_vm4, %v4853_v33, %v4402_v36  ;;  %v4049_v36 = vpack.c.b16 %v4047_v63, %v4047_v63  ;;  %v4139_v33 = vrot.slane %v10711_v57, 1  ;;  %v12798_v63 = vld [vmem:[#allocation122_spill] sm:$0xff] }
 0x669   :  { %6108 = vmatmul.msk.bf16.gmra.mxu1 %vm4963_vm5, %v4918_v53  ;;  %4171 = vrot.lane.b32.xlu1 %v12775_v29, %s6290_s3  ;;  %v4468_v29 = vsel %vm1543_vm3, %v9565_v54, %v12788_v9 }
 0x66a   :  { %v4002_v30 = vpop.permute.xlu2 %4001  ;;  %v4532_v46 = vsel %vm1673_vm6, %v4468_v29, %v12789_v4  ;;  %v4140_v53 = vrot.slane %v4049_v36, 1  ;;  %v4059_v45 = vshll.u32 %v4049_v36, 16  ;;  %v4470_v4 = vsel %vm1543_vm3, %v12742_v7, %v12795_v2 }
 0x66b   :  { %v4190_v47 = vpop.permute.xlu1 %4189  ;;  %v4596_v16 = vsel %vm1803_vm7, %v4532_v46, %v4002_v30  ;;  %v12793_v30 = vld [vmem:[#allocation48_spill] sm:$0xff]  ;;  %v3052_v46 = vpack.c.bf16 %v2944_v6, %v2944_v6 }
 0x66c   :  { %4101 = vrot.lane.b32.xlu0 %v12776_v48, %s6285_s16 }
 0x66e   :  { %v4120_v14 = vpop.permute.xlu0 %4119 }
 0x66f   :  { %v4684_v5 = vsel %vm1933_vm9, %v4620_v44, %v4120_v14 }
 0x670   :  { %4007 = vrot.lane.b32.xlu2 %v12777_v24, %s6287_s18  ;;  %v4749_v31 = vsel %vm4703_vm14, %v4684_v5, %v4190_v47  ;;  %v4494_v47 = vsel %vm1543_vm3, %v12673_v19, %v12793_v30  ;;  %v10739_v19 = vpop.f32.mrf.mxu1 }
 0x671   :  { %4409 = vrot.lane.b32.xlu1 %v12785_v51, %s6291_s10  ;;  %v4814_v3 = vsel %vm4768_vm15, %v4749_v31, %v4264_v28  ;;  %v12792_v28 = vld [vmem:[#allocation93_spill] sm:$0xff]  ;;  %v4558_v59 = vsel %vm1673_vm6, %v4494_v47, %v12794_v34  ;;  %v4061_v31 = vrot.slane %v4059_v45, 1 }
 0x672   :  { %v4240_v39 = vpop.permute.xlu2 %4239  ;;  %v12800_v34 = vld [vmem:[#allocation117_spill] sm:$0xff] }
 0x673   :  { %v4428_v49 = vpop.permute.xlu1 %4427 }
 0x674   :  { %4339 = vrot.lane.b32.xlu0 %v12786_v42, %s6292_s8 }
 0x676   :  { %v4358_v25 = vpop.permute.xlu0 %4357 }
 0x677   :  { %v4879_v15 = vsel %vm4833_vm2, %v4814_v3, %v4358_v25 }
 0x678   :  { %4245 = vrot.lane.b32.xlu2 %v12787_v55, %s6289_s2  ;;  %v4944_v20 = vsel %vm4898_vm4, %v4879_v15, %v4428_v49  ;;  %v10752_v29 = vpop.f32.mrf.mxu1 }
 0x679   :  { %6121 = vmatmul.msk.bf16.gmra.mxu3 %vm4963_vm5, %v4944_v20  ;;  %4197 = vrot.lane.b32.xlu1 %v12780_v40, %s6290_s3  ;;  %v4054_v40 = vshll.u32 %v10711_v57, 16 }
 0x67a   :  { %v4028_v22 = vpop.permute.xlu2 %4027 }
 0x67b   :  { %v4166_v38 = vpop.permute.xlu1 %4165  ;;  %v4056_v52 = vrot.slane %v4054_v40, 1  ;;  %v4622_v44 = vsel %vm1803_vm7, %v4558_v59, %v4028_v22  ;;  %v6253_v22 = vld [vmem:[#allocation2] sm:$0xff]  ;;  %v4496_v59 = vsel %vm1543_vm3, %v12748_v37, %v12800_v34 }
 0x67c   :  { %4127 = vrot.lane.b32.xlu0 %v12781_v27, %s6285_s16 }
 0x67d   :  { %v4057_v5 = vor.u32 %v4056_v52, %v4052_v1 }
 0x67e   :  { %v4096_v48 = vpop.permute.xlu0 %4095 }
 0x67f   :  { %v4660_v41 = vsel %vm1933_vm9, %v4596_v16, %v4096_v48  ;;  %v4062_v25 = vsel %vm392_vm0, %v4057_v5, %v4061_v31  ;;  %v12796_v16 = vld [vmem:[#allocation110_spill] sm:$0xff]  ;;  %v12801_v5 = vld [vmem:[#allocation104_spill] sm:$0xff] }
 0x680   :  { %4033 = vrot.lane.b32.xlu2 %v12782_v18, %s6287_s18  ;;  %v4725_v54 = vsel %vm4703_vm14, %v4660_v41, %v4166_v38  ;;  %v3050_v38 = vpack.c.bf16 %v6253_v22, %v6253_v22  ;;  %v4534_v32 = vsel %vm1673_vm6, %v4470_v4, %v12796_v16  ;;  %v12803_v4 = vld [vmem:[#allocation101_spill] sm:$0xff] }
 0x681   :  { %4435 = vrot.lane.b32.xlu1 %v12790_v10, %s6291_s10  ;;  %v4790_v62 = vsel %vm4768_vm15, %v4725_v54, %v4240_v39  ;;  %v4141_v39 = vsel %vm841_vm1, %v4139_v33, %v4140_v53  ;;  %v4285_v54 = vunpack.c.l.b16 %v3052_v46 }
 0x682   :  { %v4266_v21 = vpop.permute.xlu2 %4265  ;;  %v4213_v48 = vunpack.c.l.b16 %v3050_v38 }
 0x683   :  { %v4404_v58 = vpop.permute.xlu1 %4403 }
 0x684   :  { %4365 = vrot.lane.b32.xlu0 %v12791_v17, %s6292_s8 }
 0x686   :  { %v4334_v23 = vpop.permute.xlu0 %4333 }
 0x687   :  { %v4855_v8 = vsel %vm4833_vm2, %v4790_v62, %v4334_v23  ;;  %v4287_v23 = vpack.c.b16 %v4285_v54, %v4285_v54 }
 0x688   :  { %4271 = vrot.lane.b32.xlu2 %v12792_v28, %s6289_s2  ;;  %v4920_v26 = vsel %vm4898_vm4, %v4855_v8, %v4404_v58  ;;  %v10773_v8 = vpop.f32.mrf.mxu1 }
 0x689   :  { %6109 = vmatmul.msk.bf16.gmra.mxu1 %vm4963_vm5, %v4920_v26  ;;  %4173 = vrot.lane.b32.xlu1 %v12785_v51, %s6290_s3  ;;  %v4297_v53 = vshll.u32 %v4287_v23, 16  ;;  %v4378_v1 = vrot.slane %v4287_v23, 1 }
 0x68a   :  { %v4004_v27 = vpop.permute.xlu2 %4003 }
 0x68b   :  { %v4192_v61 = vpop.permute.xlu1 %4191  ;;  %v4598_v41 = vsel %vm1803_vm7, %v4534_v32, %v4004_v27  ;;  %v12799_v27 = vld [vmem:[#allocation127_spill] sm:$0xff] }
 0x68c   :  { %4103 = vrot.lane.b32.xlu0 %v12786_v42, %s6285_s16 }
 0x68e   :  { %v4122_v14 = vpop.permute.xlu0 %4121 }
 0x68f   :  { %v4686_v51 = vsel %vm1933_vm9, %v4622_v44, %v4122_v14  ;;  %v4299_v44 = vrot.slane %v4297_v53, 1 }
 0x690   :  { %4009 = vrot.lane.b32.xlu2 %v12787_v55, %s6287_s18  ;;  %v4751_v42 = vsel %vm4703_vm14, %v4686_v51, %v4192_v61  ;;  %v4560_v51 = vsel %vm1673_vm6, %v4496_v59, %v12801_v5 }
 0x691   :  { %4411 = vrot.lane.b32.xlu1 %v4141_v39, %s6291_s10  ;;  %v4816_v20 = vsel %vm4768_vm15, %v4751_v42, %v4266_v21  ;;  %v10767_v21 = vpack.c.b16 %v4213_v48, %v4213_v48  ;;  %v10796_v42 = vpop.f32.mrf.mxu1 }
 0x692   :  { %v4242_v49 = vpop.permute.xlu2 %4241 }
 0x693   :  { %v4430_v3 = vpop.permute.xlu1 %4429  ;;  %v4292_v62 = vshll.u32 %v10767_v21, 16  ;;  %v4290_v52 = vshrl.u32 %v10767_v21, 16  ;;  %v4377_v47 = vrot.slane %v10767_v21, 1 }
 0x694   :  { %4341 = vrot.lane.b32.xlu0 %v4062_v25, %s6292_s8 }
 0x695   :  { %v4294_v33 = vrot.slane %v4292_v62, 1  ;;  %v4379_v31 = vsel %vm841_vm1, %v4377_v47, %v4378_v1  ;;  %v2993_v62 = vld [vmem:[#allocation2 + $0x330] sm:$0xff]  ;;  %v12808_v1 = vld [vmem:[#allocation87_spill] sm:$0xff] }
 0x696   :  { %v4360_v15 = vpop.permute.xlu0 %4359 }
 0x697   :  { %v4881_v56 = vsel %vm4833_vm2, %v4816_v20, %v4360_v15  ;;  %v10788_v14 = vor.u32 %v4294_v33, %v4290_v52  ;;  %v12807_v33 = vld [vmem:[#allocation109_spill] sm:$0xff] }
 0x698   :  { %4247 = vrot.lane.b32.xlu2 %v10711_v57, %s6289_s2  ;;  %v4946_v11 = vsel %vm4898_vm4, %v4881_v56, %v4430_v3  ;;  %v4498_v53 = vsel %vm1543_vm3, %v12761_v35, %v12807_v33 }
 0x699   :  { %6122 = vmatmul.msk.bf16.gmra.mxu3 %vm4963_vm5, %v4946_v11  ;;  %4199 = vrot.lane.b32.xlu1 %v12790_v10, %s6290_s3  ;;  %v12797_v10 = vld [vmem:[#allocation98_spill] sm:$0xff]  ;;  %v10814_v38 = vpop.f32.mrf.mxu1 }
 0x69a   :  { %v4030_v43 = vpop.permute.xlu2 %4029 }
 0x69b   :  { %v4168_v9 = vpop.permute.xlu1 %4167 }
 0x69c   :  { %4129 = vrot.lane.b32.xlu0 %v12791_v17, %s6285_s16 }
 0x69e   :  { %v4098_v13 = vpop.permute.xlu0 %4097 }
 0x69f   :  { %v4662_v12 = vsel %vm1933_vm9, %v4598_v41, %v4098_v13  ;;  %v12804_v13 = vld [vmem:[#allocation80_spill] sm:$0xff] }
 0x6a0   :  { %4035 = vrot.lane.b32.xlu2 %v12792_v28, %s6287_s18  ;;  %v4727_v58 = vsel %vm4703_vm14, %v4662_v12, %v4168_v9  ;;  %v12802_v9 = vld [vmem:[#allocation31_spill] sm:$0xff] }
 0x6a1   :  { %4437 = vrot.lane.b32.xlu1 %v12797_v10, %s6291_s10  ;;  %v4792_v26 = vsel %vm4768_vm15, %v4727_v58, %v4242_v49  ;;  %v4624_v49 = vsel %vm1803_vm7, %v4560_v51, %v4030_v43  ;;  %v4472_v2 = vsel %vm1543_vm3, %v12754_v60, %v12802_v9  ;;  %v10830_v54 = vpop.f32.mrf.mxu1  ;;  %v12805_v60 = vld [vmem:[#allocation105_spill] sm:$0xff] }
 0x6a2   :  { %v4268_v7 = vpop.permute.xlu2 %4267  ;;  %v4536_v46 = vsel %vm1673_vm6, %v4472_v2, %v12803_v4 }
 0x6a3   :  { %v4406_v17 = vpop.permute.xlu1 %4405 }
 0x6a4   :  { %4367 = vrot.lane.b32.xlu0 %v12798_v63, %s6292_s8 }
 0x6a6   :  { %v4336_v40 = vpop.permute.xlu0 %4335 }
 0x6a7   :  { %v4857_v36 = vsel %vm4833_vm2, %v4792_v26, %v4336_v40  ;;  %v2994_v40 = vld [vmem:[#allocation2 + $0x338] sm:$0xff] }
 0x6a8   :  { %4273 = vrot.lane.b32.xlu2 %v12799_v27, %s6289_s2  ;;  %v4922_v61 = vsel %vm4898_vm4, %v4857_v36, %v4406_v17  ;;  %v3102_v52 = vpack.c.bf16 %v2994_v40, %v2994_v40 }
 0x6a9   :  { %6110 = vmatmul.msk.bf16.gmra.mxu1 %vm4963_vm5, %v4922_v61  ;;  %4175 = vrot.lane.b32.xlu1 %v4141_v39, %s6290_s3  ;;  %v3101_v61 = vpack.c.bf16 %v2993_v62, %v2993_v62  ;;  %v10849_v34 = vpop.f32.mrf.mxu1 }
 0x6aa   :  { %v4006_v30 = vpop.permute.xlu2 %4005  ;;  %v3978_v51 = vunpack.c.l.b16 %v3102_v52 }
 0x6ab   :  { %v4194_v45 = vpop.permute.xlu1 %4193  ;;  %v4600_v16 = vsel %vm1803_vm7, %v4536_v46, %v4006_v30  ;;  %v2995_v30 = vld [vmem:[#allocation2 + $0x340] sm:$0x3]  ;;  %v3977_v5 = vunpack.c.l.b16 %v3101_v61  ;;  %v2998_v46 = vld [vmem:[#allocation2 + $0x358] sm:$0x3] }
 0x6ac   :  { %4105 = vrot.lane.b32.xlu0 %v4062_v25, %s6285_s16  ;;  %v4300_v25 = vsel %vm392_vm0, %v10788_v14, %v4299_v44 }
 0x6ae   :  { %v4124_v39 = vpop.permute.xlu0 %4123 }
 0x6af   :  { %v4688_v37 = vsel %vm1933_vm9, %v4624_v49, %v4124_v39  ;;  %v12809_v49 = vld [vmem:[#allocation124_spill] sm:$0xff] }
 0x6b0   :  { %4011 = vrot.lane.b32.xlu2 %v10711_v57, %s6287_s18  ;;  %v4753_v15 = vsel %vm4703_vm14, %v4688_v37, %v4194_v45  ;;  %v4562_v45 = vsel %vm1673_vm6, %v4498_v53, %v12808_v1 }
 0x6b1   :  { %4413 = vrot.lane.b32.xlu1 %v4379_v31, %s6291_s10  ;;  %v4818_v11 = vsel %vm4768_vm15, %v4753_v15, %v4268_v7  ;;  %v3103_v31 = vpack.c.bf16 %v2995_v30, %v2995_v30  ;;  %v12810_v15 = vld [vmem:[#allocation95_spill] sm:$0xff] }
 0x6b2   :  { %v4244_v3 = vpop.permute.xlu2 %4243 }
 0x6b3   :  { %v4432_v20 = vpop.permute.xlu1 %4431 }
 0x6b4   :  { %4343 = vrot.lane.b32.xlu0 %v4300_v25, %s6292_s8 }
 0x6b6   :  { %v4362_v56 = vpop.permute.xlu0 %4361 }
 0x6b7   :  { %v4883_v22 = vsel %vm4833_vm2, %v4818_v11, %v4362_v56 }
 0x6b8   :  { %4249 = vrot.lane.b32.xlu2 %v10767_v21, %s6289_s2  ;;  %v4948_v57 = vsel %vm4898_vm4, %v4883_v22, %v4432_v20  ;;  %v4048_v20 = vunpack.c.l.b16 %v3103_v31 }
 0x6b9   :  { %6123 = vmatmul.msk.bf16.gmra.mxu3 %vm4963_vm5, %v4948_v57  ;;  %4201 = vrot.lane.b32.xlu1 %v12797_v10, %s6290_s3 }
 0x6ba   :  { %v4032_v43 = vpop.permute.xlu2 %4031  ;;  %v4050_v2 = vpack.c.b16 %v4048_v20, %v4048_v20 }
 0x6bb   :  { %v4170_v6 = vpop.permute.xlu1 %4169  ;;  %v4626_v44 = vsel %vm1803_vm7, %v4562_v45, %v4032_v43  ;;  %v10865_v43 = vpop.f32.mrf.mxu1 }
 0x6bc   :  { %4131 = vrot.lane.b32.xlu0 %v12798_v63, %s6285_s16  ;;  %v12806_v63 = vld [vmem:[#allocation116_spill] sm:$0xff]  ;;  %v10892_v45 = vpop.f32.mrf.mxu3 }
 0x6bd   :  { %12814 = vst [vmem:[#allocation38_spill] sm:$0xff] %v10892_v45 }
 0x6be   :  { %v4100_v48 = vpop.permute.xlu0 %4099 }
 0x6bf   :  { %v4664_v32 = vsel %vm1933_vm9, %v4600_v16, %v4100_v48 }
 0x6c0   :  { %4037 = vrot.lane.b32.xlu2 %v12799_v27, %s6287_s18  ;;  %v4729_v12 = vsel %vm4703_vm14, %v4664_v32, %v4170_v6  ;;  %v12811_v6 = vld [vmem:[#allocation143_spill] sm:$0xff] }
 0x6c1   :  { %4439 = vrot.lane.b32.xlu1 %v12804_v13, %s6291_s10  ;;  %v4794_v58 = vsel %vm4768_vm15, %v4729_v12, %v4244_v3  ;;  %v10858_v3 = vpack.c.b16 %v3978_v51, %v3977_v5 }
 0x6c2   :  { %v4270_v41 = vpop.permute.xlu2 %4269 }
 0x6c3   :  { %v4408_v10 = vpop.permute.xlu1 %4407  ;;  %v4066_v57 = vshll.u32 %v10858_v3, 16  ;;  %v4142_v32 = vrot.slane %v10858_v3, 1 }
 0x6c4   :  { %4369 = vrot.lane.b32.xlu0 %v12805_v60, %s6292_s8 }
 0x6c5   :  { %v4068_v16 = vrot.slane %v4066_v57, 1  ;;  %v10910_v57 = vpop.f32.mrf.mxu3 }
 0x6c6   :  { %v4338_v7 = vpop.permute.xlu0 %4337  ;;  %12817 = vst [vmem:[#allocation67_spill] sm:$0xff] %v10910_v57 }
 0x6c7   :  { %v4859_v17 = vsel %vm4833_vm2, %v4794_v58, %v4338_v7  ;;  %v3106_v7 = vpack.c.bf16 %v2998_v46, %v2998_v46  ;;  %v12813_v58 = vld [vmem:[#allocation83_spill] sm:$0xff] }
 0x6c8   :  { %4275 = vrot.lane.b32.xlu2 %v12806_v63, %s6289_s2  ;;  %v4924_v23 = vsel %vm4898_vm4, %v4859_v17, %v4408_v10  ;;  %v4064_v10 = vshrl.u32 %v10858_v3, 16 }
 0x6c9   :  { %6111 = vmatmul.msk.bf16.gmra.mxu1 %vm4963_vm5, %v4924_v23  ;;  %4203 = vrot.lane.b32.xlu1 %v12804_v13, %s6290_s3  ;;  %v4143_v13 = vrot.slane %v4050_v2, 1  ;;  %v4286_v33 = vunpack.c.l.b16 %v3106_v7 }
 0x6ca   :  { %v4008_v26 = vpop.permute.xlu2 %4007  ;;  %v4069_v40 = vor.u32 %v4068_v16, %v4064_v10 }
 0x6cb   :  { %v4196_v36 = vpop.permute.xlu1 %4195 }
 0x6cc   :  { %4133 = vrot.lane.b32.xlu0 %v12805_v60, %s6285_s16  ;;  %v4071_v60 = vshll.u32 %v4050_v2, 16 }
 0x6ce   :  { %v4126_v59 = vpop.permute.xlu0 %4125  ;;  %v4073_v52 = vrot.slane %v4071_v60, 1 }
 0x6cf   :  { %v4690_v39 = vsel %vm1933_vm9, %v4626_v44, %v4126_v59  ;;  %v4288_v59 = vpack.c.b16 %v4286_v33, %v4286_v33 }
 0x6d0   :  { %4039 = vrot.lane.b32.xlu2 %v12806_v63, %s6287_s18  ;;  %v4755_v37 = vsel %vm4703_vm14, %v4690_v39, %v4196_v36  ;;  %v10883_v36 = vpop.f32.mrf.mxu1  ;;  %v4074_v1 = vsel %vm392_vm0, %v4069_v40, %v4073_v52 }
 0x6d1   :  { %4441 = vrot.lane.b32.xlu1 %v12809_v49, %s6291_s10  ;;  %v4820_v11 = vsel %vm4768_vm15, %v4755_v37, %v4270_v41  ;;  %v12812_v41 = vld [vmem:[#allocation138_spill] sm:$0xff]  ;;  %v4309_v31 = vshll.u32 %v4288_v59, 16 }
 0x6d2   :  { %v4246_v35 = vpop.permute.xlu2 %4245  ;;  %v4474_v12 = vsel %vm1543_vm3, %v12766_v0, %v12812_v41  ;;  %v4144_v0 = vsel %vm841_vm1, %v4142_v32, %v4143_v13 }
 0x6d3   :  { %v4434_v25 = vpop.permute.xlu1 %4433  ;;  %v4538_v17 = vsel %vm1673_vm6, %v4474_v12, %v12813_v58  ;;  %v12818_v58 = vld [vmem:[#allocation128_spill] sm:$0xff] }
 0x6d4   :  { %4371 = vrot.lane.b32.xlu0 %v12810_v15, %s6292_s8  ;;  %v4602_v62 = vsel %vm1803_vm7, %v4538_v17, %v4008_v26  ;;  %v4476_v17 = vsel %vm1543_vm3, %v12777_v24, %v12818_v58 }
 0x6d6   :  { %v4364_v56 = vpop.permute.xlu0 %4363 }
 0x6d7   :  { %v4885_v22 = vsel %vm4833_vm2, %v4820_v11, %v4364_v56  ;;  %v4311_v56 = vrot.slane %v4309_v31, 1  ;;  %v12816_v11 = vld [vmem:[#allocation112_spill] sm:$0xff] }
 0x6d8   :  { %4277 = vrot.lane.b32.xlu2 %v12811_v6, %s6289_s2  ;;  %v4950_v9 = vsel %vm4898_vm4, %v4885_v22, %v4434_v25  ;;  %v4381_v25 = vrot.slane %v4288_v59, 1 }
 0x6d9   :  { %6124 = vmatmul.msk.bf16.gmra.mxu3 %vm4963_vm5, %v4950_v9  ;;  %4205 = vrot.lane.b32.xlu1 %v12809_v49, %s6290_s3  ;;  %v10902_v49 = vpop.f32.mrf.mxu1 }
 0x6da   :  { %v4034_v4 = vpop.permute.xlu2 %4033  ;;  %v4382_v2 = vsel %vm841_vm1, %v4377_v47, %v4381_v25  ;;  %v10926_v47 = vpop.f32.mrf.mxu3 }
 0x6db   :  { %v4172_v48 = vpop.permute.xlu1 %4171 }
 0x6dc   :  { %4135 = vrot.lane.b32.xlu0 %v12810_v15, %s6285_s16 }
 0x6de   :  { %v4102_v23 = vpop.permute.xlu0 %4101 }
 0x6df   :  { %v4666_v61 = vsel %vm1933_vm9, %v4602_v62, %v4102_v23  ;;  %v12819_v23 = vld [vmem:[#allocation17_spill] sm:$0xff] }
 0x6e0   :  { %4041 = vrot.lane.b32.xlu2 %v12811_v6, %s6287_s18  ;;  %v4731_v30 = vsel %vm4703_vm14, %v4666_v61, %v4172_v48  ;;  %v4540_v62 = vsel %vm1673_vm6, %v4476_v17, %v12819_v23 }
 0x6e1   :  { %4443 = vrot.lane.b32.xlu1 %v4144_v0, %s6291_s10  ;;  %v4796_v5 = vsel %vm4768_vm15, %v4731_v30, %v4246_v35  ;;  %v12815_v35 = vld [vmem:[#allocation26_spill] sm:$0xff]  ;;  %v10922_v16 = vpop.f32.mrf.mxu1 }
 0x6e2   :  { %v4272_v53 = vpop.permute.xlu2 %4271  ;;  %v4500_v20 = vsel %vm1543_vm3, %v12772_v50, %v12815_v35  ;;  %v4312_v50 = vsel %vm392_vm0, %v10788_v14, %v4311_v56 }
 0x6e3   :  { %v4410_v26 = vpop.permute.xlu1 %4409  ;;  %v4564_v22 = vsel %vm1673_vm6, %v4500_v20, %v12816_v11 }
 0x6e4   :  { %4373 = vrot.lane.b32.xlu0 %v4074_v1, %s6292_s8  ;;  %v4628_v46 = vsel %vm1803_vm7, %v4564_v22, %v4034_v4 }
 0x6e6   :  { %v4340_v44 = vpop.permute.xlu0 %4339 }
 0x6e7   :  { %v4861_v51 = vsel %vm4833_vm2, %v4796_v5, %v4340_v44 }
 0x6e8   :  { %4279 = vrot.lane.b32.xlu2 %v10858_v3, %s6289_s2  ;;  %v4926_v39 = vsel %vm4898_vm4, %v4861_v51, %v4410_v26 }
 0x6e9   :  { %6112 = vmatmul.msk.bf16.gmra.mxu1 %vm4963_vm5, %v4926_v39  ;;  %4207 = vrot.lane.b32.xlu1 %v4144_v0, %s6290_s3  ;;  %v10934_v7 = vpop.f32.mrf.mxu1  ;;  %v10942_v0 = vpop.f32.mrf.mxu3  ;;  %v12820_v39 = vld [vmem:[#allocation86_spill] sm:$0xff] }
 0x6ea   :  { %v4010_v37 = vpop.permute.xlu2 %4009  ;;  %v4502_v31 = vsel %vm1543_vm3, %v12782_v18, %v12820_v39 }
 0x6eb   :  { %v4198_v15 = vpop.permute.xlu1 %4197  ;;  %v4604_v61 = vsel %vm1803_vm7, %v4540_v62, %v4010_v37  ;;  %v12821_v37 = vld [vmem:[#allocation72_spill] sm:$0xff] }
 0x6ec   :  { %4137 = vrot.lane.b32.xlu0 %v4074_v1, %s6285_s16  ;;  %v4566_v25 = vsel %vm1673_vm6, %v4502_v31, %v12821_v37 }
 0x6ee   :  { %v4128_v9 = vpop.permute.xlu0 %4127 }
 0x6ef   :  { %v4692_v48 = vsel %vm1933_vm9, %v4628_v46, %v4128_v9 }
 0x6f0   :  { %4043 = vrot.lane.b32.xlu2 %v10858_v3, %s6287_s18  ;;  %v4757_v13 = vsel %vm4703_vm14, %v4692_v48, %v4198_v15 }
 0x6f1   :  { %4445 = vrot.lane.b32.xlu1 %v4382_v2, %s6291_s10  ;;  %v4822_v3 = vsel %vm4768_vm15, %v4757_v13, %v4272_v53  ;;  %v10946_v30 = vpop.f32.mrf.mxu1  ;;  %v10950_v59 = vpop.f32.mrf.mxu3 }
 0x6f2   :  { %v4248_v32 = vpop.permute.xlu2 %4247 }
 0x6f3   :  { %v4436_v41 = vpop.permute.xlu1 %4435 }
 0x6f4   :  { %4375 = vrot.lane.b32.xlu0 %v4312_v50, %s6292_s8 }
 0x6f6   :  { %v4366_v4 = vpop.permute.xlu0 %4365 }
 0x6f7   :  { %v4887_v12 = vsel %vm4833_vm2, %v4822_v3, %v4366_v4  ;;  %v12823_v4 = vld [vmem:[#allocation97_spill] sm:$0xff] }
 0x6f8   :  { %v4952_v10 = vsel %vm4898_vm4, %v4887_v12, %v4436_v41  ;;  %4281 = vrot.lane.b32.xlu2 %v10767_v21, %s6289_s2  ;;  %v4478_v3 = vsel %vm1543_vm3, %v12787_v55, %v12823_v4  ;;  %v12824_v12 = vld [vmem:[#allocation137_spill] sm:$0xff]  ;;  %s6294_s2 = smov 128  }
 0x6f9   :  { %6125 = vmatmul.msk.bf16.gmra.mxu3 %vm4963_vm5, %v4952_v10  ;;  %v10959_v15 = vpop.f32.mrf.mxu1  ;;  %v10963_v11 = vpop.f32.mrf.mxu3  ;;  %v4542_v10 = vsel %vm1673_vm6, %v4478_v3, %v12824_v12  ;;  %v12829_v12 = vld [vmem:[#allocation58_spill] sm:$0xff] }
 0x6fa   :  { %v4036_v14 = vpop.permute.xlu2 %4035  ;;  %12822 = vst [vmem:[#allocation57_spill] sm:$0xff] %v10963_v11 }
 0x6fb   :  { %v4174_v60 = vpop.permute.xlu1 %4173  ;;  %v4630_v20 = vsel %vm1803_vm7, %v4566_v25, %v4036_v14 }
 0x6fe   :  { %v4104_v40 = vpop.permute.xlu0 %4103 }
 0x6ff   :  { %v4668_v21 = vsel %vm1933_vm9, %v4604_v61, %v4104_v40 }
 0x700   :  { %v4733_v33 = vsel %vm4703_vm14, %v4668_v21, %v4174_v60 }
 0x701   :  { %v4798_v26 = vsel %vm4768_vm15, %v4733_v33, %v4248_v32  ;;  %v10966_v46 = vpop.f32.mrf.mxu1  ;;  %v10972_v13 = vpop.f32.mrf.mxu3 }
 0x702   :  { %v4274_v52 = vpop.permute.xlu2 %4273 }
 0x703   :  { %v4412_v53 = vpop.permute.xlu1 %4411 }
 0x706   :  { %v4342_v1 = vpop.permute.xlu0 %4341 }
 0x707   :  { %v4863_v24 = vsel %vm4833_vm2, %v4798_v26, %v4342_v1 }
 0x708   :  { %v4928_v44 = vsel %vm4898_vm4, %v4863_v24, %v4412_v53 }
 0x709   :  { %6113 = vmatmul.msk.bf16.gmra.mxu1 %vm4963_vm5, %v4928_v44  ;;  %v10980_v17 = vpop.f32.mrf.mxu1  ;;  %v10984_v61 = vpop.f32.mrf.mxu3  ;;  %v12825_v44 = vld [vmem:[#allocation134_spill] sm:$0xff] }
 0x70a   :  { %v4012_v5 = vpop.permute.xlu2 %4011 }
 0x70b   :  { %v4200_v51 = vpop.permute.xlu1 %4199  ;;  %v4606_v60 = vsel %vm1803_vm7, %v4542_v10, %v4012_v5  ;;  %v4504_v5 = vsel %vm1543_vm3, %v12792_v28, %v12825_v44 }
 0x70e   :  { %v4130_v35 = vpop.permute.xlu0 %4129 }
 0x70f   :  { %v4694_v56 = vsel %vm1933_vm9, %v4630_v20, %v4130_v35 }
 0x710   :  { %v4759_v22 = vsel %vm4703_vm14, %v4694_v56, %v4200_v51  ;;  %v12826_v51 = vld [vmem:[#allocation21_spill] sm:$0xff] }
 0x711   :  { %v4824_v18 = vsel %vm4768_vm15, %v4759_v22, %v4274_v52  ;;  %v10988_v33 = vpop.f32.mrf.mxu1  ;;  %v10992_v24 = vpop.f32.mrf.mxu3  ;;  %v4568_v39 = vsel %vm1673_vm6, %v4504_v5, %v12826_v51  ;;  %v12830_v51 = vld [vmem:[#allocation139_spill] sm:$0xff] }
 0x712   :  { %v4250_v2 = vpop.permute.xlu2 %4249 }
 0x713   :  { %v4438_v9 = vpop.permute.xlu1 %4437 }
 0x716   :  { %v4368_v48 = vpop.permute.xlu0 %4367 }
 0x717   :  { %v4889_v50 = vsel %vm4833_vm2, %v4824_v18, %v4368_v48 }
 0x718   :  { %v4954_v32 = vsel %vm4898_vm4, %v4889_v50, %v4438_v9 }
 0x719   :  { %6126 = vmatmul.msk.bf16.gmra.mxu3 %vm4963_vm5, %v4954_v32  ;;  %v11001_v35 = vpop.f32.mrf.mxu1  ;;  %v11004_v9 = vpop.f32.mrf.mxu3 }
 0x71a   :  { %v4038_v58 = vpop.permute.xlu2 %4037  ;;  %12827 = vst [vmem:[#allocation88_spill] sm:$0xff] %v11004_v9 }
 0x71b   :  { %v4176_v41 = vpop.permute.xlu1 %4175  ;;  %v4632_v37 = vsel %vm1803_vm7, %v4568_v39, %v4038_v58  ;;  %v4508_v39 = vsel %vm1543_vm3, %v12806_v63, %v12830_v51 }
 0x71e   :  { %v4106_v14 = vpop.permute.xlu0 %4105 }
 0x71f   :  { %v4670_v23 = vsel %vm1933_vm9, %v4606_v60, %v4106_v14 }
 0x720   :  { %v4735_v62 = vsel %vm4703_vm14, %v4670_v23, %v4176_v41  ;;  %v12828_v41 = vld [vmem:[#allocation79_spill] sm:$0xff] }
 0x721   :  { %v4800_v52 = vsel %vm4768_vm15, %v4735_v62, %v4250_v2  ;;  %v11010_v50 = vpop.f32.mrf.mxu1  ;;  %v4506_v4 = vsel %vm1543_vm3, %v12799_v27, %v12828_v41  ;;  %v11017_v14 = vpop.f32.mrf.mxu3 }
 0x722   :  { %v4276_v1 = vpop.permute.xlu2 %4275  ;;  %v4570_v10 = vsel %vm1673_vm6, %v4506_v4, %v12829_v12 }
 0x723   :  { %v4414_v40 = vpop.permute.xlu1 %4413 }
 0x726   :  { %v4344_v21 = vpop.permute.xlu0 %4343 }
 0x727   :  { %v4865_v55 = vsel %vm4833_vm2, %v4800_v52, %v4344_v21 }
 0x728   :  { %v4930_v53 = vsel %vm4898_vm4, %v4865_v55, %v4414_v40 }
 0x729   :  { %6114 = vmatmul.msk.bf16.gmra.mxu1 %vm4963_vm5, %v4930_v53  ;;  %v11022_v21 = vpop.f32.mrf.mxu1 }
 0x72a   :  { %v4040_v20 = vpop.permute.xlu2 %4039 }
 0x72b   :  { %v4202_v26 = vpop.permute.xlu1 %4201  ;;  %v4634_v58 = vsel %vm1803_vm7, %v4570_v10, %v4040_v20 }
 0x72e   :  { %v4132_v31 = vpop.permute.xlu0 %4131 }
 0x72f   :  { %v4696_v25 = vsel %vm1933_vm9, %v4632_v37, %v4132_v31  ;;  %v12831_v31 = vld [vmem:[#allocation54_spill] sm:$0xff] }
 0x730   :  { %v4761_v56 = vsel %vm4703_vm14, %v4696_v25, %v4202_v26  ;;  %v4572_v37 = vsel %vm1673_vm6, %v4508_v39, %v12831_v31 }
 0x731   :  { %v4826_v48 = vsel %vm4768_vm15, %v4761_v56, %v4276_v1  ;;  %v11026_v1 = vpop.f32.mrf.mxu3  ;;  %v11030_v5 = vpop.f32.mrf.mxu1 }
 0x732   :  { %v4278_v3 = vpop.permute.xlu2 %4277 }
 0x733   :  { %v4440_v22 = vpop.permute.xlu1 %4439 }
 0x736   :  { %v4370_v2 = vpop.permute.xlu0 %4369 }
 0x737   :  { %v4891_v28 = vsel %vm4833_vm2, %v4826_v48, %v4370_v2 }
 0x738   :  { %v4956_v18 = vsel %vm4898_vm4, %v4891_v28, %v4440_v22 }
 0x739   :  { %6127 = vmatmul.msk.bf16.gmra.mxu3 %vm4963_vm5, %v4956_v18  ;;  %v11038_v56 = vpop.f32.mrf.mxu3  ;;  %v11042_v18 = vpop.f32.mrf.mxu1 }
 0x73a   :  { %v4042_v27 = vpop.permute.xlu2 %4041 }
 0x73b   :  { %v4204_v32 = vpop.permute.xlu1 %4203  ;;  %v4636_v20 = vsel %vm1803_vm7, %v4572_v37, %v4042_v27 }
 0x73e   :  { %v4134_v60 = vpop.permute.xlu0 %4133 }
 0x73f   :  { %v4698_v23 = vsel %vm1933_vm9, %v4634_v58, %v4134_v60  ;;  %v12833_v60 = vld [vmem:[#allocation108_spill] sm:$0xff] }
 0x740   :  { %v4763_v62 = vsel %vm4703_vm14, %v4698_v23, %v4204_v32  ;;  %v4510_v58 = vsel %vm1543_vm3, %v12811_v6, %v12833_v60  ;;  %v12834_v23 = vld [vmem:[#allocation89_spill] sm:$0xff] }
 0x741   :  { %v4828_v55 = vsel %vm4768_vm15, %v4763_v62, %v4278_v3  ;;  %v11048_v3 = vpop.f32.mrf.mxu3  ;;  %v4574_v62 = vsel %vm1673_vm6, %v4510_v58, %v12834_v23  ;;  %v5334_v58 = vmul.f32 %v10814_v38, %v10814_v38 }
 0x742   :  { %v4280_v2 = vpop.permute.xlu2 %4279  ;;  %12832 = vst [vmem:[#allocation11_spill] sm:$0xff] %v11048_v3 }
 0x743   :  { %v4442_v40 = vpop.permute.xlu1 %4441 }
 0x746   :  { %v4372_v52 = vpop.permute.xlu0 %4371 }
 0x747   :  { %v4893_v53 = vsel %vm4833_vm2, %v4828_v55, %v4372_v52 }
 0x748   :  { %v4958_v26 = vsel %vm4898_vm4, %v4893_v53, %v4442_v40  ;;  %v11055_v40 = vpop.f32.mrf.mxu1 }
 0x749   :  { %6128 = vmatmul.msk.bf16.gmra.mxu3 %vm4963_vm5, %v4958_v26  ;;  %12835 = vst [vmem:[#allocation22_spill] sm:$0xff] %v11055_v40  ;;  %v11059_v53 = vpop.f32.mrf.mxu3 }
 0x74a   :  { %v4044_v12 = vpop.permute.xlu2 %4043 }
 0x74b   :  { %v4206_v44 = vpop.permute.xlu1 %4205  ;;  %v4638_v55 = vsel %vm1803_vm7, %v4574_v62, %v4044_v12  ;;  %v5333_v12 = vmul.f32 %v10796_v42, %v10796_v42 }
 0x74e   :  { %v4136_v25 = vpop.permute.xlu0 %4135 }
 0x74f   :  { %v4700_v22 = vsel %vm1933_vm9, %v4636_v20, %v4136_v25 }
 0x750   :  { %v4765_v48 = vsel %vm4703_vm14, %v4700_v22, %v4206_v44  ;;  %v11064_v37 = vpop.f32.mrf.mxu1 }
 0x751   :  { %v4830_v41 = vsel %vm4768_vm15, %v4765_v48, %v4280_v2  ;;  %v11068_v20 = vpop.f32.mrf.mxu3  ;;  %v5331_v2 = vmul.f32 %v10752_v29, %v10752_v29  ;;  %v5330_v48 = vmul.f32 %v10739_v19, %v10739_v19 }
 0x752   :  { %v4282_v44 = vpop.permute.xlu2 %4281  ;;  %12836 = vst [vmem:[#allocation33_spill] sm:$0xff] %v11068_v20 }
 0x753   :  { %v4444_v28 = vpop.permute.xlu1 %4443 }
 0x756   :  { %v4374_v32 = vpop.permute.xlu0 %4373 }
 0x757   :  { %v4895_v63 = vsel %vm4833_vm2, %v4830_v41, %v4374_v32  ;;  %v5332_v32 = vmul.f32 %v10773_v8, %v10773_v8 }
 0x758   :  { %v4960_v4 = vsel %vm4898_vm4, %v4895_v63, %v4444_v28  ;;  %v11070_v22 = vpop.f32.mrf.mxu1  ;;  %v5261_v28 = vadd.f32 %v10752_v29, %v10739_v19 }
 0x759   :  { %6129 = vmatmul.msk.bf16.gmra.mxu3 %vm4963_vm5, %v4960_v4  ;;  %12837 = vst [vmem:[#allocation99_spill] sm:$0xff] %v11070_v22  ;;  %v11080_v41 = vpop.f32.mrf.mxu3  ;;  %v5394_v4 = vadd.f32 %v5331_v2, %v5330_v48  ;;  %v5338_v48 = vmul.f32 %v10883_v36, %v10883_v36 }
 0x75a   :  { %12838 = vst [vmem:[#allocation41_spill] sm:$0xff] %v11080_v41  ;;  %v5262_v63 = vadd.f32 %v5261_v28, %v10773_v8 }
 0x75b   :  { %v4208_v10 = vpop.permute.xlu1 %4207 }
 0x75c   :  { %v5263_v60 = vadd.f32 %v5262_v63, %v10796_v42  ;;  %v5339_v63 = vmul.f32 %v10902_v49, %v10902_v49 }
 0x75e   :  { %v4138_v52 = vpop.permute.xlu0 %4137  ;;  %v5264_v23 = vadd.f32 %v5263_v60, %v10814_v38  ;;  %v5340_v60 = vmul.f32 %v10922_v16, %v10922_v16 }
 0x75f   :  { %v4702_v27 = vsel %vm1933_vm9, %v4638_v55, %v4138_v52  ;;  %v5335_v52 = vmul.f32 %v10830_v54, %v10830_v54 }
 0x760   :  { %v4767_v26 = vsel %vm4703_vm14, %v4702_v27, %v4208_v10  ;;  %v5395_v10 = vadd.f32 %v5394_v4, %v5332_v32  ;;  %v11091_v55 = vpop.f32.mrf.mxu1 }
 0x761   :  { %v4832_v39 = vsel %vm4768_vm15, %v4767_v26, %v4282_v44  ;;  %v5265_v26 = vadd.f32 %v5264_v23, %v10830_v54  ;;  %v5336_v44 = vmul.f32 %v10849_v34, %v10849_v34 }
 0x762   :  { %v5396_v62 = vadd.f32 %v5395_v10, %v5333_v12 }
 0x763   :  { %v4446_v51 = vpop.permute.xlu1 %4445 }
 0x764   :  { %v5397_v27 = vadd.f32 %v5396_v62, %v5334_v58  ;;  %v5341_v62 = vmul.f32 %v10934_v7, %v10934_v7 }
 0x766   :  { %v4376_v31 = vpop.permute.xlu0 %4375 }
 0x767   :  { %v4897_v6 = vsel %vm4833_vm2, %v4832_v39, %v4376_v31  ;;  %v5398_v39 = vadd.f32 %v5397_v27, %v5335_v52  ;;  %v5337_v31 = vmul.f32 %v10865_v43, %v10865_v43 }
 0x768   :  { %v4962_v25 = vsel %vm4898_vm4, %v4897_v6, %v4446_v51  ;;  %v5266_v51 = vadd.f32 %v5265_v26, %v10849_v34  ;;  %v11099_v6 = vpop.f32.mrf.mxu3  ;;  %v11107_v4 = vpop.f32.mrf.mxu1 }
 0x769   :  { %6130 = vmatmul.msk.bf16.gmra.mxu3 %vm4963_vm5, %v4962_v25  ;;  %12839 = vst [vmem:[#allocation62_spill] sm:$0xff] %v11099_v6  ;;  %v5399_v25 = vadd.f32 %v5398_v39, %v5336_v44  ;;  %v5342_v44 = vmul.f32 %v10946_v30, %v10946_v30 }
 0x76a   :  { %v5267_v2 = vadd.f32 %v5266_v51, %v10865_v43  ;;  %12840 = vst [vmem:[#allocation18_spill] sm:$0xff] %v11107_v4 }
 0x76b   :  { %v5400_v32 = vadd.f32 %v5399_v25, %v5337_v31  ;;  %v5343_v31 = vmul.f32 %v10959_v15, %v10959_v15 }
 0x76c   :  { %v5268_v28 = vadd.f32 %v5267_v2, %v10883_v36 }
 0x76d   :  { %v5401_v12 = vadd.f32 %v5400_v32, %v5338_v48  ;;  %v5344_v48 = vmul.f32 %v10966_v46, %v10966_v46 }
 0x76e   :  { %v5269_v10 = vadd.f32 %v5268_v28, %v10902_v49 }
 0x76f   :  { %v5402_v58 = vadd.f32 %v5401_v12, %v5339_v63  ;;  %v5345_v12 = vmul.f32 %v10980_v17, %v10980_v17 }
 0x770   :  { %v5270_v23 = vadd.f32 %v5269_v10, %v10922_v16  ;;  %v11115_v52 = vpop.f32.mrf.mxu3  ;;  %v11126_v28 = vpop.f32.mrf.mxu1 }
 0x771   :  { %12841 = vst [vmem:[#allocation61_spill] sm:$0xff] %v11115_v52  ;;  %v5403_v27 = vadd.f32 %v5402_v58, %v5340_v60  ;;  %v5346_v58 = vmul.f32 %v10988_v33, %v10988_v33 }
 0x772   :  { %v5271_v26 = vadd.f32 %v5270_v23, %v10934_v7  ;;  %12842 = vst [vmem:[#allocation30_spill] sm:$0xff] %v11126_v28 }
 0x773   :  { %v5404_v51 = vadd.f32 %v5403_v27, %v5341_v62 }
 0x774   :  { %v5272_v39 = vadd.f32 %v5271_v26, %v10946_v30  ;;  %v5347_v26 = vmul.f32 %v11001_v35, %v11001_v35 }
 0x775   :  { %v5405_v25 = vadd.f32 %v5404_v51, %v5342_v44 }
 0x776   :  { %v5273_v2 = vadd.f32 %v5272_v39, %v10959_v15  ;;  %v5348_v39 = vmul.f32 %v11010_v50, %v11010_v50 }
 0x777   :  { %v5406_v32 = vadd.f32 %v5405_v25, %v5343_v31 }
 0x778   :  { %v5274_v63 = vadd.f32 %v5273_v2, %v10966_v46  ;;  %v11134_v23 = vpop.f32.mrf.mxu3 }
 0x779   :  { %v5407_v10 = vadd.f32 %v5406_v32, %v5344_v48  ;;  %12843 = vst [vmem:[#allocation28_spill] sm:$0xff] %v11134_v23  ;;  %v5349_v48 = vmul.f32 %v11022_v21, %v11022_v21 }
 0x77a   :  { %v5275_v60 = vadd.f32 %v5274_v63, %v10980_v17 }
 0x77b   :  { %v5408_v62 = vadd.f32 %v5407_v10, %v5345_v12  ;;  %v5350_v12 = vmul.f32 %v11030_v5, %v11030_v5 }
 0x77c   :  { %v5276_v27 = vadd.f32 %v5275_v60, %v10988_v33 }
 0x77d   :  { %v5409_v44 = vadd.f32 %v5408_v62, %v5346_v58  ;;  %v5351_v62 = vmul.f32 %v11042_v18, %v11042_v18 }
 0x77e   :  { %v5277_v51 = vadd.f32 %v5276_v27, %v11001_v35 }
 0x77f   :  { %v5410_v25 = vadd.f32 %v5409_v44, %v5347_v26  ;;  %v5352_v44 = vmul.f32 %v11055_v40, %v11055_v40 }
 0x780   :  { %v5278_v2 = vadd.f32 %v5277_v51, %v11010_v50  ;;  %v11150_v10 = vpop.f32.mrf.mxu3 }
 0x781   :  { %v5411_v32 = vadd.f32 %v5410_v25, %v5348_v39  ;;  %12844 = vst [vmem:[#allocation37_spill] sm:$0xff] %v11150_v10  ;;  %v5353_v25 = vmul.f32 %v11064_v37, %v11064_v37 }
 0x782   :  { %v5279_v63 = vadd.f32 %v5278_v2, %v11022_v21 }
 0x783   :  { %v5412_v60 = vadd.f32 %v5411_v32, %v5349_v48 }
 0x784   :  { %v5280_v58 = vadd.f32 %v5279_v63, %v11030_v5  ;;  %v5354_v63 = vmul.f32 %v11070_v22, %v11070_v22 }
 0x785   :  { %v5413_v27 = vadd.f32 %v5412_v60, %v5350_v12 }
 0x786   :  { %v11142_v31 = vpop.f32.mrf.mxu1  ;;  %v5281_v26 = vadd.f32 %v5280_v58, %v11042_v18  ;;  %v5355_v58 = vmul.f32 %v11091_v55, %v11091_v55 }
 0x787   :  { %v5414_v51 = vadd.f32 %v5413_v27, %v5351_v62 }
 0x788   :  { %v5282_v39 = vadd.f32 %v5281_v26, %v11055_v40  ;;  %v11169_v62 = vpop.f32.mrf.mxu3  ;;  %v5356_v40 = vmul.f32 %v11107_v4, %v11107_v4 }
 0x789   :  { %v5415_v48 = vadd.f32 %v5414_v51, %v5352_v44  ;;  %12845 = vst [vmem:[#allocation71_spill] sm:$0xff] %v11169_v62 }
 0x78a   :  { %v5283_v32 = vadd.f32 %v5282_v39, %v11064_v37  ;;  %v5357_v39 = vmul.f32 %v11126_v28, %v11126_v28 }
 0x78b   :  { %v5416_v12 = vadd.f32 %v5415_v48, %v5353_v25 }
 0x78c   :  { %v5284_v60 = vadd.f32 %v5283_v32, %v11070_v22  ;;  %v5358_v22 = vmul.f32 %v11142_v31, %v11142_v31 }
 0x78d   :  { %v5417_v27 = vadd.f32 %v5416_v12, %v5354_v63 }
 0x78e   :  { %v11161_v2 = vpop.f32.mrf.mxu1  ;;  %v5285_v26 = vadd.f32 %v5284_v60, %v11091_v55 }
 0x78f   :  { %v5418_v44 = vadd.f32 %v5417_v27, %v5355_v58  ;;  %v5359_v60 = vmul.f32 %v11161_v2, %v11161_v2 }
 0x790   :  { %v5286_v51 = vadd.f32 %v5285_v26, %v11107_v4 }
 0x791   :  { %v5419_v48 = vadd.f32 %v5418_v44, %v5356_v40 }
 0x792   :  { %v5287_v32 = vadd.f32 %v5286_v51, %v11126_v28 }
 0x793   :  { %v5420_v63 = vadd.f32 %v5419_v48, %v5357_v39 }
 0x794   :  { %v5288_v12 = vadd.f32 %v5287_v32, %v11142_v31  ;;  %v5362_v32 = vmul.f32 %v10892_v45, %v10892_v45 }
 0x795   :  { %v5421_v27 = vadd.f32 %v5420_v63, %v5358_v22 }
 0x796   :  { %v5289_v26 = vadd.f32 %v5288_v12, %v11161_v2  ;;  %v5363_v12 = vmul.f32 %v10910_v57, %v10910_v57 }
 0x797   :  { %v5422_v40 = vadd.f32 %v5421_v27, %v5359_v60 }
 0x79c   :  { %v11185_v58 = vpop.f32.mrf.mxu3 }
 0x79d   :  { %12846 = vst [vmem:[#allocation103_spill] sm:$0xff] %v11185_v58 }
 0x7a6   :  { %v11177_v25 = vpop.f32.mrf.mxu1 }
 0x7a7   :  { %v5360_v4 = vmul.f32 %v11177_v25, %v11177_v25  ;;  %v5290_v44 = vadd.f32 %v5289_v26, %v11177_v25  ;;  %v11202_v26 = vpop.f32.mrf.mxu3 }
 0x7a8   :  { %12848 = vst [vmem:[#allocation130_spill] sm:$0xff] %v11202_v26 }
 0x7a9   :  { %v5423_v28 = vadd.f32 %v5422_v40, %v5360_v4  ;;  %v5364_v4 = vmul.f32 %v10926_v47, %v10926_v47 }
 0x7ae   :  { %v11191_v51 = vpop.f32.mrf.mxu1 }
 0x7af   :  { %12847 = vst [vmem:[#allocation47_spill] sm:$0xff] %v11191_v51  ;;  %v5291_v39 = vadd.f32 %v5290_v44, %v11191_v51  ;;  %v5361_v48 = vmul.f32 %v11191_v51, %v11191_v51  ;;  %v5365_v51 = vmul.f32 %v10942_v0, %v10942_v0 }
 0x7b1   :  { %v5292_v22 = vadd.f32 %v5291_v39, %v10892_v45  ;;  %v5424_v63 = vadd.f32 %v5423_v28, %v5361_v48  ;;  %v5366_v48 = vmul.f32 %v10950_v59, %v10950_v59 }
 0x7b3   :  { %v5293_v60 = vadd.f32 %v5292_v22, %v10910_v57  ;;  %v5425_v27 = vadd.f32 %v5424_v63, %v5362_v32  ;;  %v5367_v63 = vmul.f32 %v10963_v11, %v10963_v11 }
 0x7b5   :  { %v5294_v40 = vadd.f32 %v5293_v60, %v10926_v47  ;;  %v5426_v44 = vadd.f32 %v5425_v27, %v5363_v12  ;;  %v5368_v12 = vmul.f32 %v10972_v13, %v10972_v13 }
 0x7b7   :  { %v5295_v39 = vadd.f32 %v5294_v40, %v10942_v0  ;;  %v5427_v28 = vadd.f32 %v5426_v44, %v5364_v4  ;;  %v5369_v40 = vmul.f32 %v10984_v61, %v10984_v61 }
 0x7b9   :  { %v5296_v22 = vadd.f32 %v5295_v39, %v10950_v59  ;;  %v5428_v32 = vadd.f32 %v5427_v28, %v5365_v51  ;;  %v5370_v39 = vmul.f32 %v10992_v24, %v10992_v24 }
 0x7bb   :  { %v5297_v57 = vadd.f32 %v5296_v22, %v10963_v11  ;;  %v5429_v45 = vadd.f32 %v5428_v32, %v5366_v48  ;;  %v5371_v22 = vmul.f32 %v11004_v9, %v11004_v9 }
 0x7bc   :  { %v11216_v60 = vpop.f32.mrf.mxu3 }
 0x7bd   :  { %12849 = vst [vmem:[#allocation25_spill] sm:$0xff] %v11216_v60  ;;  %v5298_v27 = vadd.f32 %v5297_v57, %v10972_v13  ;;  %v5430_v4 = vadd.f32 %v5429_v45, %v5367_v63  ;;  %v5372_v45 = vmul.f32 %v11017_v14, %v11017_v14 }
 0x7bf   :  { %v5299_v44 = vadd.f32 %v5298_v27, %v10984_v61  ;;  %v5431_v51 = vadd.f32 %v5430_v4, %v5368_v12  ;;  %v5373_v27 = vmul.f32 %v11026_v1, %v11026_v1 }
 0x7c1   :  { %v5300_v28 = vadd.f32 %v5299_v44, %v10992_v24  ;;  %v5432_v48 = vadd.f32 %v5431_v51, %v5369_v40  ;;  %v5374_v44 = vmul.f32 %v11038_v56, %v11038_v56 }
 0x7c3   :  { %v5301_v32 = vadd.f32 %v5300_v28, %v11004_v9  ;;  %v5433_v11 = vadd.f32 %v5432_v48, %v5370_v39  ;;  %v5375_v28 = vmul.f32 %v11048_v3, %v11048_v3 }
 0x7c4   :  { %v11230_v57 = vpop.f32.mrf.mxu3 }
 0x7c5   :  { %12850 = vst [vmem:[#allocation78_spill] sm:$0xff] %v11230_v57  ;;  %v5302_v63 = vadd.f32 %v5301_v32, %v11017_v14  ;;  %v5434_v12 = vadd.f32 %v5433_v11, %v5371_v22  ;;  %v5376_v11 = vmul.f32 %v11059_v53, %v11059_v53 }
 0x7c7   :  { %v5303_v4 = vadd.f32 %v5302_v63, %v11026_v1  ;;  %v5435_v40 = vadd.f32 %v5434_v12, %v5372_v45  ;;  %v5377_v63 = vmul.f32 %v11068_v20, %v11068_v20 }
 0x7c9   :  { %v5436_v51 = vadd.f32 %v5435_v40, %v5373_v27  ;;  %v5304_v39 = vadd.f32 %v5303_v4, %v11038_v56  ;;  %v5378_v4 = vmul.f32 %v11080_v41, %v11080_v41 }
 0x7cb   :  { %v5305_v48 = vadd.f32 %v5304_v39, %v11048_v3  ;;  %v5437_v9 = vadd.f32 %v5436_v51, %v5374_v44  ;;  %v5379_v51 = vmul.f32 %v11099_v6, %v11099_v6 }
 0x7cc   :  { %v11244_v32 = vpop.f32.mrf.mxu3 }
 0x7cd   :  { %12851 = vst [vmem:[#allocation119_spill] sm:$0xff] %v11244_v32  ;;  %v5306_v22 = vadd.f32 %v5305_v48, %v11059_v53  ;;  %v5438_v45 = vadd.f32 %v5437_v9, %v5375_v28  ;;  %v5380_v9 = vmul.f32 %v11115_v52, %v11115_v52 }
 0x7cf   :  { %v5307_v12 = vadd.f32 %v5306_v22, %v11068_v20  ;;  %v5439_v27 = vadd.f32 %v5438_v45, %v5376_v11  ;;  %v5381_v22 = vmul.f32 %v11134_v23, %v11134_v23 }
 0x7d1   :  { %v5308_v40 = vadd.f32 %v5307_v12, %v11080_v41  ;;  %v5440_v44 = vadd.f32 %v5439_v27, %v5377_v63  ;;  %v5382_v12 = vmul.f32 %v11150_v10, %v11150_v10 }
 0x7d3   :  { %v5309_v39 = vadd.f32 %v5308_v40, %v11099_v6  ;;  %v5441_v3 = vadd.f32 %v5440_v44, %v5378_v4  ;;  %v5383_v40 = vmul.f32 %v11169_v62, %v11169_v62 }
 0x7d4   :  { %v11258_v48 = vpop.f32.mrf.mxu3 }
 0x7d5   :  { %12852 = vst [vmem:[#allocation75_spill] sm:$0xff] %v11258_v48  ;;  %v5310_v28 = vadd.f32 %v5309_v39, %v11115_v52  ;;  %v5442_v11 = vadd.f32 %v5441_v3, %v5379_v51  ;;  %v5384_v3 = vmul.f32 %v11185_v58, %v11185_v58 }
 0x7d7   :  { %v5311_v45 = vadd.f32 %v5310_v28, %v11134_v23  ;;  %v5443_v63 = vadd.f32 %v5442_v11, %v5380_v9  ;;  %v5385_v28 = vmul.f32 %v11202_v26, %v11202_v26 }
 0x7d9   :  { %v5312_v27 = vadd.f32 %v5311_v45, %v11150_v10  ;;  %v5444_v4 = vadd.f32 %v5443_v63, %v5381_v22  ;;  %v5386_v63 = vmul.f32 %v11216_v60, %v11216_v60 }
 0x7db   :  { %v5313_v44 = vadd.f32 %v5312_v27, %v11169_v62  ;;  %v5445_v6 = vadd.f32 %v5444_v4, %v5382_v12  ;;  %v5387_v62 = vmul.f32 %v11230_v57, %v11230_v57 }
 0x7dc   :  { %v11272_v39 = vpop.f32.mrf.mxu3 }
 0x7dd   :  { %v5314_v51 = vadd.f32 %v5313_v44, %v11185_v58  ;;  %v5446_v9 = vadd.f32 %v5445_v6, %v5383_v40 }
 0x7df   :  { %v5315_v11 = vadd.f32 %v5314_v51, %v11202_v26  ;;  %v5447_v22 = vadd.f32 %v5446_v9, %v5384_v3  ;;  %v5388_v51 = vmul.f32 %v11244_v32, %v11244_v32 }
 0x7e1   :  { %v5316_v45 = vadd.f32 %v5315_v11, %v11216_v60  ;;  %v5448_v12 = vadd.f32 %v5447_v22, %v5385_v28  ;;  %v5389_v11 = vmul.f32 %v11258_v48, %v11258_v48 }
 0x7e3   :  { %v5449_v27 = vadd.f32 %v5448_v12, %v5386_v63  ;;  %v5317_v4 = vadd.f32 %v5316_v45, %v11230_v57  ;;  %v5390_v45 = vmul.f32 %v11272_v39, %v11272_v39 }
 0x7e4   :  { %v5253_v44 = vpop.f32.mrf.mxu3 }
 0x7e5   :  { %v5450_v6 = vadd.f32 %v5449_v27, %v5387_v62  ;;  %v5318_v40 = vadd.f32 %v5317_v4, %v11244_v32  ;;  %v5391_v27 = vmul.f32 %v5253_v44, %v5253_v44 }
 0x7e7   :  { %v5451_v3 = vadd.f32 %v5450_v6, %v5388_v51  ;;  %v5319_v9 = vadd.f32 %v5318_v40, %v11258_v48 }
 0x7e9   :  { %v5452_v28 = vadd.f32 %v5451_v3, %v5389_v11  ;;  %v5320_v22 = vadd.f32 %v5319_v9, %v11272_v39 }
 0x7eb   :  { %v5453_v12 = vadd.f32 %v5452_v28, %v5390_v45  ;;  %v5321_v62 = vadd.f32 %v5320_v22, %v5253_v44 }
 0x7ec   :  { %v5256_v63 = vpop.f32.mrf.mxu3 }
 0x7ed   :  { %v5454_v4 = vadd.f32 %v5453_v12, %v5391_v27  ;;  %v5392_v57 = vmul.f32 %v5256_v63, %v5256_v63  ;;  %v5322_v60 = vadd.f32 %v5321_v62, %v5256_v63 }
 0x7ef   :  { %v5455_v6 = vadd.f32 %v5454_v4, %v5392_v57 }
 0x7f4   :  { %v5258_v32 = vpop.f32.mrf.mxu3 }
 0x7f5   :  { %v5323_v51 = vadd.f32 %v5322_v60, %v5258_v32  ;;  %v5393_v40 = vmul.f32 %v5258_v32, %v5258_v32 }
 0x7f7   :  { %v5324_v26 = vrot.slane %v5323_v51, 4  ;;  %v5456_v58 = vadd.f32 %v5455_v6, %v5393_v40 }
 0x7f9   :  { %v5325_v48 = vadd.f32 %v5324_v26, %v5323_v51  ;;  %v5457_v3 = vrot.slane %v5456_v58, 4 }
 0x7fb   :  { %v5326_v11 = vrot.slane %v5325_v48, 2  ;;  %v5458_v9 = vadd.f32 %v5457_v3, %v5456_v58 }
 0x7fd   :  { %v5327_v10 = vadd.f32 %v5326_v11, %v5325_v48  ;;  %v5459_v23 = vrot.slane %v5458_v9, 2 }
 0x7ff   :  { %v5328_v52 = vrot.slane %v5327_v10, 1  ;;  %v5460_v41 = vadd.f32 %v5459_v23, %v5458_v9  ;;  %v5468_v23 = vld [vmem:[%s11815_s5] sm:$0x1] }
 0x801   :  { %v5329_v28 = vadd.f32 %v5328_v52, %v5327_v10  ;;  %v5461_v22 = vrot.slane %v5460_v41, 1 }
 0x803   :  { %v5462_v45 = vadd.f32 %v5461_v22, %v5460_v41  ;;  %v5463_v12 = vmul.f32 0.001953125, %v5329_v28 }
 0x805   :  { %v5464_v27 = vmul.f32 0.001953125, %v5462_v45  ;;  %v5465_v62 = vmul.f32 %v5463_v12, %v5463_v12 }
 0x807   :  { %v5466_v20 = vsub.f32 %v5464_v27, %v5465_v62 }
 0x809   :  { %v5467_v57 = vmax.f32 %v5466_v20, 0.0  ;;  %v5481_v20 = vld [vmem:[%s11816_s6] sm:$0x1] }
 0x80b   :  { %v5469_v60 = vadd.f32 1e-05, %v5467_v57 }
 0x80d   :  { %6216 = vrsqrt.f32 %v5469_v60  ;;  %vm5476_vm1 = vweird.f32 %v5469_v60 }
 0x813   :  { %v6217_v4 = vpop.eup %6216 }
 0x814   :  { %v5471_v6 = vmul.f32 %v6217_v4, %v5469_v60  ;;  %vm5477_vm0 = vweird.f32 %v6217_v4 }
 0x815   :  { %vm5478_vm3 = vmor %vm5476_vm1, %vm5477_vm0 }
 0x816   :  { %v5472_v26 = vmul.f32 %v6217_v4, %v5471_v6 }
 0x818   :  { %v5473_v51 = vmul.f32 0.5, %v5472_v26 }
 0x81a   :  { %v5474_v40 = vsub.f32 1.5, %v5473_v51 }
 0x81c   :  { %v5475_v52 = vmul.f32 %v6217_v4, %v5474_v40 }
 0x81e   :  { %v5479_v41 = vsel %vm5478_vm3, %v6217_v4, %v5475_v52  ;;  %v12853_v52 = vld [vmem:[#allocation22_spill] sm:$0xff] }
 0x81f   :  { %v5480_v10 = vmul.f32 %v5479_v41, %v5468_v23 }
 0x821   :  { %v5482_v58 = vmul.f32 %v5480_v10, %v5463_v12  ;;  %v11301_v48 = vperm.slane %v5480_v10, 0 }
 0x823   :  { %v5483_v3 = vsub.f32 %v5481_v20, %v5482_v58  ;;  %v5547_v11 = vmul.f32 %v11301_v48, %v11272_v39  ;;  %v5548_v9 = vmul.f32 %v11301_v48, %v5253_v44  ;;  %v5549_v28 = vmul.f32 %v11301_v48, %v5256_v63 }
 0x824   :  { %v5550_v22 = vmul.f32 %v11301_v48, %v5258_v32  ;;  %v11316_v32 = vmul.f32 %v11301_v48, %v10739_v19  ;;  %v11320_v63 = vmul.f32 %v11301_v48, %v10752_v29  ;;  %v11324_v51 = vmul.f32 %v11301_v48, %v10773_v8 }
 0x825   :  { %v11308_v45 = vperm.slane %v5483_v3, 0  ;;  %v11328_v40 = vmul.f32 %v11301_v48, %v10796_v42  ;;  %v11332_v23 = vmul.f32 %v11301_v48, %v10814_v38  ;;  %v11336_v19 = vmul.f32 %v11301_v48, %v10830_v54 }
 0x826   :  { %v11340_v29 = vmul.f32 %v11301_v48, %v10849_v34  ;;  %v11344_v8 = vmul.f32 %v11301_v48, %v10865_v43  ;;  %v11348_v42 = vmul.f32 %v11301_v48, %v10883_v36  ;;  %v11352_v38 = vmul.f32 %v11301_v48, %v10902_v49 }
 0x827   :  { %v5614_v27 = vadd.f32 %v11308_v45, %v5547_v11  ;;  %v5615_v62 = vadd.f32 %v11308_v45, %v5548_v9  ;;  %v5616_v12 = vadd.f32 %v11308_v45, %v5549_v28  ;;  %v5617_v57 = vadd.f32 %v11308_v45, %v5550_v22  ;;  %v12856_v11 = vld [vmem:[#allocation30_spill] sm:$0xff]  ;;  %v12857_v22 = vld [vmem:[#allocation47_spill] sm:$0xff] }
 0x828   :  { %v11356_v54 = vmul.f32 %v11301_v48, %v10922_v16  ;;  %v11360_v34 = vmul.f32 %v11301_v48, %v10934_v7  ;;  %v11364_v43 = vmul.f32 %v11301_v48, %v10946_v30  ;;  %v11368_v36 = vmul.f32 %v11301_v48, %v10959_v15 }
 0x829   :  { %v5678_v60 = vmax.f32 %v5614_v27, 0.0  ;;  %v5679_v4 = vmax.f32 %v5615_v62, 0.0  ;;  %v5680_v6 = vmax.f32 %v5616_v12, 0.0  ;;  %v5681_v39 = vmax.f32 %v5617_v57, 0.0  ;;  %v12858_v62 = vld [vmem:[#allocation38_spill] sm:$0xff]  ;;  %v12859_v57 = vld [vmem:[#allocation67_spill] sm:$0xff] }
 0x82a   :  { %v11372_v49 = vmul.f32 %v11301_v48, %v10966_v46  ;;  %v11376_v16 = vmul.f32 %v11301_v48, %v10980_v17  ;;  %v11380_v7 = vmul.f32 %v11301_v48, %v10988_v33  ;;  %v11384_v30 = vmul.f32 %v11301_v48, %v11001_v35 }
 0x82b   :  { %v5712_v26 = vmax.f32 %v5678_v60, %v5680_v6  ;;  %v5713_v44 = vmax.f32 %v5679_v4, %v5681_v39  ;;  %v11388_v15 = vmul.f32 %v11301_v48, %v11010_v50  ;;  %v11392_v46 = vmul.f32 %v11301_v48, %v11022_v21  ;;  %v12854_v21 = vld [vmem:[#allocation99_spill] sm:$0xff]  ;;  %v12860_v4 = vld [vmem:[#allocation57_spill] sm:$0xff] }
 0x82c   :  { %v11396_v17 = vmul.f32 %v11301_v48, %v11030_v5  ;;  %v11400_v33 = vmul.f32 %v11301_v48, %v11042_v18  ;;  %v11404_v35 = vmul.f32 %v11301_v48, %v12853_v52  ;;  %v11408_v50 = vmul.f32 %v11301_v48, %v11064_v37  ;;  %v12855_v18 = vld [vmem:[#allocation18_spill] sm:$0xff]  ;;  %v12867_v52 = vld [vmem:[#allocation11_spill] sm:$0xff] }
 0x82d   :  { %5744 = vst [vmem:[#allocation3 + $0xf0] sm:$0xff] %v5712_v26  ;;  %v11412_v20 = vmul.f32 %v11301_v48, %v12854_v21  ;;  %v11416_v5 = vmul.f32 %v11301_v48, %v11091_v55  ;;  %v11420_v58 = vmul.f32 %v11301_v48, %v12855_v18  ;;  %v11424_v9 = vmul.f32 %v11301_v48, %v12856_v11  ;;  %v12863_v26 = vld [vmem:[#allocation88_spill] sm:$0xff]  ;;  %v12869_v18 = vld [vmem:[#allocation41_spill] sm:$0xff] }
 0x82e   :  { %5745 = vst [vmem:[#allocation3 + $0xf8] sm:$0xff] %v5713_v44  ;;  %v11428_v37 = vmul.f32 %v11301_v48, %v11142_v31  ;;  %v11432_v28 = vmul.f32 %v11301_v48, %v11161_v2  ;;  %v11436_v55 = vmul.f32 %v11301_v48, %v11177_v25  ;;  %v11440_v27 = vmul.f32 %v11301_v48, %v12857_v22 }
 0x82f   :  { %v11444_v12 = vmul.f32 %v11301_v48, %v12858_v62  ;;  %v11448_v31 = vmul.f32 %v11301_v48, %v12859_v57  ;;  %v11452_v2 = vmul.f32 %v11301_v48, %v10926_v47  ;;  %v11456_v25 = vmul.f32 %v11301_v48, %v10942_v0  ;;  %v12872_v62 = vld [vmem:[#allocation28_spill] sm:$0xff]  ;;  %v12873_v57 = vld [vmem:[#allocation37_spill] sm:$0xff] }
 0x830   :  { %v11460_v60 = vmul.f32 %v11301_v48, %v10950_v59  ;;  %v11464_v6 = vmul.f32 %v11301_v48, %v12860_v4  ;;  %v11468_v39 = vmul.f32 %v11301_v48, %v10972_v13  ;;  %v11472_v47 = vmul.f32 %v11301_v48, %v10984_v61 }
 0x831   :  { %v11476_v0 = vmul.f32 %v11301_v48, %v10992_v24  ;;  %v11480_v59 = vmul.f32 %v11301_v48, %v12863_v26  ;;  %v11484_v44 = vmul.f32 %v11301_v48, %v11017_v14  ;;  %v11488_v13 = vmul.f32 %v11301_v48, %v11026_v1  ;;  %v12871_v1 = vld [vmem:[#allocation61_spill] sm:$0xff]  ;;  %v12874_v26 = vld [vmem:[#allocation71_spill] sm:$0xff] }
 0x832   :  { %12861 = vst [vmem:[#allocation29_spill] sm:$0xff] %v11472_v47  ;;  %v5531_v61 = vmul.f32 %v11301_v48, %v11038_v56  ;;  %v5533_v24 = vmul.f32 %v11301_v48, %v11059_v53  ;;  %v5535_v14 = vmul.f32 %v11301_v48, %v12869_v18  ;;  %v5537_v22 = vmul.f32 %v11301_v48, %v12871_v1  ;;  %v12880_v47 = vld [vmem:[#allocation75_spill] sm:$0xff] }
 0x833   :  { %12862 = vst [vmem:[#allocation42_spill] sm:$0xff] %v11476_v0  ;;  %v5538_v56 = vmul.f32 %v11301_v48, %v12872_v62  ;;  %v5539_v4 = vmul.f32 %v11301_v48, %v12873_v57  ;;  %v5540_v53 = vmul.f32 %v11301_v48, %v12874_v26  ;;  %v12879_v0 = vld [vmem:[#allocation119_spill] sm:$0xff]  ;;  %v5546_v57 = vmul.f32 %v11301_v48, %v12880_v47 }
 0x834   :  { %12864 = vst [vmem:[#allocation92_spill] sm:$0xff] %v11480_v59  ;;  %v12878_v59 = vld [vmem:[#allocation78_spill] sm:$0xff]  ;;  %v5545_v62 = vmul.f32 %v11301_v48, %v12879_v0  ;;  %v11524_v26 = vadd.f32 %v11308_v45, %v11316_v32  ;;  %v11540_v0 = vadd.f32 %v11308_v45, %v11332_v23  ;;  %v11548_v32 = vadd.f32 %v11308_v45, %v11340_v29 }
 0x835   :  { %v5776_v41 = vld [vmem:[#allocation3 + $0xf0] ss:$2 sm:$0xff]  ;;  %v5808_v10 = vld [vmem:[#allocation3 + $0xf1] ss:$2 sm:$0xff]  ;;  %12865 = vst [vmem:[#allocation131_spill] sm:$0xff] %v11484_v44  ;;  %v5544_v1 = vmul.f32 %v11301_v48, %v12878_v59  ;;  %v11536_v59 = vadd.f32 %v11308_v45, %v11328_v40  ;;  %v11560_v40 = vadd.f32 %v11308_v45, %v11352_v38  ;;  %v11564_v23 = vadd.f32 %v11308_v45, %v11356_v54 }
 0x836   :  { %v5824_v3 = vmax.f32 %v5776_v41, %v5808_v10  ;;  %12866 = vst [vmem:[#allocation27_spill] sm:$0xff] %v11488_v13  ;;  %v5532_v41 = vmul.f32 %v11301_v48, %v12867_v52  ;;  %v12868_v10 = vld [vmem:[#allocation33_spill] sm:$0xff]  ;;  %v12875_v52 = vld [vmem:[#allocation103_spill] sm:$0xff]  ;;  %v12876_v13 = vld [vmem:[#allocation130_spill] sm:$0xff]  ;;  %v11579_v47 = vadd.f32 %v11308_v45, %v5535_v14  ;;  %v11585_v54 = vadd.f32 %v11308_v45, %v5537_v22 }
 0x837   :  { %v5534_v21 = vmul.f32 %v11301_v48, %v12868_v10  ;;  %v5541_v10 = vmul.f32 %v11301_v48, %v12875_v52  ;;  %v5542_v18 = vmul.f32 %v11301_v48, %v12876_v13  ;;  %v12877_v44 = vld [vmem:[#allocation25_spill] sm:$0xff]  ;;  %v11528_v52 = vadd.f32 %v11308_v45, %v11320_v63 }
 0x838   :  { %5840 = vst [vmem:[#allocation4 + $0x78] sm:$0xff] %v5824_v3  ;;  %v12870_v3 = vld [vmem:[#allocation62_spill] sm:$0xff]  ;;  %v11552_v63 = vadd.f32 %v11308_v45, %v11344_v8  ;;  %v11570_v29 = vadd.f32 %v11308_v45, %v5532_v41  ;;  %v11573_v8 = vadd.f32 %v11308_v45, %v5533_v24  ;;  %v11588_v13 = vadd.f32 %v11308_v45, %v5538_v56 }
 0x839   :  { %v5536_v11 = vmul.f32 %v11301_v48, %v12870_v3  ;;  %v5543_v3 = vmul.f32 %v11301_v48, %v12877_v44  ;;  %v11532_v44 = vadd.f32 %v11308_v45, %v11324_v51  ;;  %v11544_v48 = vadd.f32 %v11308_v45, %v11336_v19 }
 0x83a   :  { %v11556_v51 = vadd.f32 %v11308_v45, %v11348_v42  ;;  %v11567_v19 = vadd.f32 %v11308_v45, %v5531_v61  ;;  %v11576_v42 = vadd.f32 %v11308_v45, %v5534_v21  ;;  %v11591_v61 = vadd.f32 %v11308_v45, %v5539_v4 }
 0x83b   :  { %v11582_v38 = vadd.f32 %v11308_v45, %v5536_v11  ;;  %v11594_v41 = vadd.f32 %v11308_v45, %v5540_v53  ;;  %v11597_v24 = vadd.f32 %v11308_v45, %v5541_v10  ;;  %v11600_v21 = vadd.f32 %v11308_v45, %v5542_v18 }
 0x83c   :  { %v11603_v14 = vadd.f32 %v11308_v45, %v5543_v3  ;;  %v11606_v11 = vadd.f32 %v11308_v45, %v5544_v1  ;;  %v11609_v22 = vadd.f32 %v11308_v45, %v5545_v62  ;;  %v11613_v56 = vadd.f32 %v11308_v45, %v11360_v34  ;;  %v12886_v1 = vld [vmem:[#allocation29_spill] sm:$0xff] }
 0x83d   :  { %v11617_v4 = vadd.f32 %v11308_v45, %v11364_v43  ;;  %v11621_v53 = vadd.f32 %v11308_v45, %v11368_v36  ;;  %v11624_v10 = vadd.f32 %v11308_v45, %v5546_v57  ;;  %v11628_v18 = vadd.f32 %v11308_v45, %v11372_v49 }
 0x83e   :  { %v11632_v3 = vadd.f32 %v11308_v45, %v11376_v16  ;;  %v11636_v34 = vadd.f32 %v11308_v45, %v11380_v7  ;;  %v11640_v43 = vadd.f32 %v11308_v45, %v11384_v30  ;;  %v11644_v36 = vadd.f32 %v11308_v45, %v11388_v15 }
 0x83f   :  { %v11648_v49 = vadd.f32 %v11308_v45, %v11392_v46  ;;  %v11652_v16 = vadd.f32 %v11308_v45, %v11396_v17  ;;  %v11656_v7 = vadd.f32 %v11308_v45, %v11400_v33  ;;  %v11660_v30 = vadd.f32 %v11308_v45, %v11404_v35 }
 0x840   :  { %v11664_v15 = vadd.f32 %v11308_v45, %v11408_v50  ;;  %v11668_v46 = vadd.f32 %v11308_v45, %v11412_v20  ;;  %v11672_v17 = vadd.f32 %v11308_v45, %v11416_v5  ;;  %v11676_v33 = vadd.f32 %v11308_v45, %v11420_v58 }
 0x841   :  { %v11680_v35 = vadd.f32 %v11308_v45, %v11424_v9  ;;  %v11684_v50 = vadd.f32 %v11308_v45, %v11428_v37  ;;  %v11688_v20 = vadd.f32 %v11308_v45, %v11432_v28  ;;  %v11692_v5 = vadd.f32 %v11308_v45, %v11436_v55 }
 0x842   :  { %v11696_v58 = vadd.f32 %v11308_v45, %v11440_v27  ;;  %v11700_v9 = vadd.f32 %v11308_v45, %v11444_v12  ;;  %v11704_v37 = vadd.f32 %v11308_v45, %v11448_v31  ;;  %v11708_v28 = vadd.f32 %v11308_v45, %v11452_v2 }
 0x843   :  { %v11712_v55 = vadd.f32 %v11308_v45, %v11456_v25  ;;  %v11716_v27 = vadd.f32 %v11308_v45, %v11460_v60  ;;  %v11720_v12 = vadd.f32 %v11308_v45, %v11464_v6  ;;  %v11724_v31 = vadd.f32 %v11308_v45, %v11468_v39 }
 0x844   :  { %12881 = vst [vmem:[#allocation145_spill] sm:$0xff] %v11704_v37  ;;  %v11728_v2 = vadd.f32 %v11308_v45, %v12886_v1  ;;  %v5618_v62 = vmax.f32 %v11524_v26, 0.0  ;;  %v5619_v25 = vmax.f32 %v11528_v52, 0.0  ;;  %v5620_v57 = vmax.f32 %v11532_v44, 0.0 }
 0x845   :  { %12882 = vst [vmem:[#allocation135_spill] sm:$0xff] %v11712_v55  ;;  %v5621_v60 = vmax.f32 %v11536_v59, 0.0  ;;  %v5623_v6 = vmax.f32 %v11544_v48, 0.0  ;;  %v5625_v39 = vmax.f32 %v11552_v63, 0.0  ;;  %v5627_v1 = vmax.f32 %v11560_v40, 0.0 }
 0x846   :  { %12883 = vst [vmem:[#allocation74_spill] sm:$0xff] %v11716_v27  ;;  %v5622_v27 = vmax.f32 %v11540_v0, 0.0  ;;  %v5628_v26 = vmax.f32 %v11564_v23, 0.0  ;;  %v5629_v52 = vmax.f32 %v11613_v56, 0.0  ;;  %v5630_v44 = vmax.f32 %v11617_v4, 0.0 }
 0x847   :  { %12884 = vst [vmem:[#allocation43_spill] sm:$0xff] %v11720_v12  ;;  %v5624_v12 = vmax.f32 %v11548_v32, 0.0  ;;  %v5631_v59 = vmax.f32 %v11621_v53, 0.0  ;;  %v5632_v0 = vmax.f32 %v11628_v18, 0.0  ;;  %v5633_v48 = vmax.f32 %v11632_v3, 0.0 }
 0x848   :  { %12885 = vst [vmem:[#allocation13_spill] sm:$0xff] %v11724_v31  ;;  %v5626_v31 = vmax.f32 %v11556_v51, 0.0  ;;  %v5634_v32 = vmax.f32 %v11636_v34, 0.0  ;;  %v5635_v63 = vmax.f32 %v11640_v43, 0.0  ;;  %v5636_v51 = vmax.f32 %v11644_v36, 0.0 }
 0x849   :  { %12887 = vst [vmem:[#allocation144_spill] sm:$0xff] %v11728_v2  ;;  %v5637_v40 = vmax.f32 %v11648_v49, 0.0  ;;  %v5638_v23 = vmax.f32 %v11652_v16, 0.0  ;;  %v5639_v56 = vmax.f32 %v11656_v7, 0.0  ;;  %v5640_v4 = vmax.f32 %v11660_v30, 0.0 }
 0x84a   :  { %v5641_v53 = vmax.f32 %v11664_v15, 0.0  ;;  %v5662_v18 = vmax.f32 %v11567_v19, 0.0  ;;  %v5663_v3 = vmax.f32 %v11570_v29, 0.0  ;;  %v5664_v34 = vmax.f32 %v11573_v8, 0.0 }
 0x84b   :  { %v5665_v43 = vmax.f32 %v11576_v42, 0.0  ;;  %v5666_v36 = vmax.f32 %v11579_v47, 0.0  ;;  %v5667_v49 = vmax.f32 %v11582_v38, 0.0  ;;  %v5668_v16 = vmax.f32 %v11585_v54, 0.0 }
 0x84c   :  { %v5682_v2 = vmax.f32 %v5618_v62, %v5620_v57  ;;  %v5683_v7 = vmax.f32 %v5619_v25, %v5621_v60  ;;  %v5684_v55 = vmax.f32 %v5622_v27, %v5624_v12  ;;  %v5669_v30 = vmax.f32 %v11588_v13, 0.0 }
 0x84d   :  { %v5670_v15 = vmax.f32 %v11591_v61, 0.0  ;;  %v5671_v19 = vmax.f32 %v11594_v41, 0.0  ;;  %v5685_v29 = vmax.f32 %v5623_v6, %v5625_v39  ;;  %v5672_v8 = vmax.f32 %v11597_v24, 0.0  ;;  %v12889_v39 = vld [vmem:[#allocation92_spill] sm:$0xff] }
 0x84e   :  { %v5673_v42 = vmax.f32 %v11600_v21, 0.0  ;;  %v5674_v47 = vmax.f32 %v11603_v14, 0.0  ;;  %v5686_v37 = vmax.f32 %v5626_v31, %v5628_v26  ;;  %5714 = vst [vmem:[#allocation3] sm:$0xff] %v5682_v2  ;;  %v5675_v38 = vmax.f32 %v11606_v11, 0.0 }
 0x84f   :  { %v5676_v54 = vmax.f32 %v11609_v22, 0.0  ;;  %v5677_v27 = vmax.f32 %v11624_v10, 0.0  ;;  %v5687_v13 = vmax.f32 %v5627_v1, %v5629_v52  ;;  %5715 = vst [vmem:[#allocation3 + $0x8] sm:$0xff] %v5683_v7  ;;  %v5642_v61 = vmax.f32 %v11668_v46, 0.0 }
 0x850   :  { %v5643_v41 = vmax.f32 %v11672_v17, 0.0  ;;  %v5644_v24 = vmax.f32 %v11676_v33, 0.0  ;;  %v5688_v12 = vmax.f32 %v5630_v44, %v5632_v0  ;;  %5716 = vst [vmem:[#allocation3 + $0x10] sm:$0xff] %v5684_v55  ;;  %v5645_v21 = vmax.f32 %v11680_v35, 0.0  ;;  %v12888_v55 = vld [vmem:[#allocation42_spill] sm:$0xff]  ;;  %v12890_v44 = vld [vmem:[#allocation131_spill] sm:$0xff] }
 0x851   :  { %v5689_v14 = vmax.f32 %v5631_v59, %v5633_v48  ;;  %v5690_v31 = vmax.f32 %v5634_v32, %v5636_v51  ;;  %v5704_v2 = vmax.f32 %v5662_v18, %v5664_v34  ;;  %5717 = vst [vmem:[#allocation3 + $0x18] sm:$0xff] %v5685_v29  ;;  %v5705_v11 = vmax.f32 %v5663_v3, %v5665_v43 }
 0x852   :  { %v5706_v22 = vmax.f32 %v5666_v36, %v5668_v16  ;;  %v5707_v62 = vmax.f32 %v5667_v49, %v5669_v30  ;;  %v11774_v10 = vmax.f32 %v5670_v15, %v5672_v8  ;;  %5718 = vst [vmem:[#allocation3 + $0x20] sm:$0xff] %v5686_v37  ;;  %v5691_v25 = vmax.f32 %v5635_v63, %v5637_v40  ;;  %v12892_v63 = vld [vmem:[#allocation145_spill] sm:$0xff]  ;;  %v12893_v40 = vld [vmem:[#allocation135_spill] sm:$0xff] }
 0x853   :  { %v11776_v46 = vmax.f32 %v5671_v19, %v5673_v42  ;;  %v11778_v17 = vmax.f32 %v5674_v47, %v5676_v54  ;;  %v11780_v33 = vmax.f32 %v5675_v38, %v5677_v27  ;;  %5719 = vst [vmem:[#allocation3 + $0x28] sm:$0xff] %v5687_v13  ;;  %v5594_v35 = vadd.f32 %v11308_v45, %v12888_v55 }
 0x854   :  { %v5646_v57 = vmax.f32 %v11684_v50, 0.0  ;;  %v5648_v60 = vmax.f32 %v11692_v5, 0.0  ;;  %v5692_v6 = vmax.f32 %v5638_v23, %v5640_v4  ;;  %5720 = vst [vmem:[#allocation3 + $0x30] sm:$0xff] %v5688_v12  ;;  %v5595_v37 = vadd.f32 %v11308_v45, %v12889_v39  ;;  %v12891_v5 = vld [vmem:[#allocation27_spill] sm:$0xff]  ;;  %v12895_v4 = vld [vmem:[#allocation13_spill] sm:$0xff] }
 0x855   :  { %v5647_v1 = vmax.f32 %v11688_v20, 0.0  ;;  %v5649_v26 = vmax.f32 %v11696_v58, 0.0  ;;  %v5693_v52 = vmax.f32 %v5639_v56, %v5641_v53  ;;  %5721 = vst [vmem:[#allocation3 + $0x38] sm:$0xff] %v5689_v14  ;;  %v5596_v59 = vadd.f32 %v11308_v45, %v12890_v44  ;;  %v12894_v58 = vld [vmem:[#allocation74_spill] sm:$0xff] }
 0x856   :  { %v5650_v0 = vmax.f32 %v11700_v9, 0.0  ;;  %v5652_v50 = vmax.f32 %v11708_v28, 0.0  ;;  %v5694_v48 = vmax.f32 %v5642_v61, %v5644_v24  ;;  %5722 = vst [vmem:[#allocation3 + $0x40] sm:$0xff] %v5690_v31  ;;  %v5597_v32 = vadd.f32 %v11308_v45, %v12891_v5  ;;  %v12896_v9 = vld [vmem:[#allocation43_spill] sm:$0xff]  ;;  %v12897_v28 = vld [vmem:[#allocation144_spill] sm:$0xff] }
 0x857   :  { %v5651_v51 = vmax.f32 %v12892_v63, 0.0  ;;  %v5653_v20 = vmax.f32 %v12893_v40, 0.0  ;;  %v5695_v23 = vmax.f32 %v5643_v41, %v5645_v21  ;;  %5723 = vst [vmem:[#allocation3 + $0x48] sm:$0xff] %v5691_v25  ;;  %v5654_v56 = vmax.f32 %v12894_v58, 0.0  ;;  %v5746_v42 = vld [vmem:[#allocation3] ss:$2 sm:$0xff] }
 0x858   :  { %v5656_v53 = vmax.f32 %v12895_v4, 0.0  ;;  %v5696_v18 = vmax.f32 %v5646_v57, %v5648_v60  ;;  %5724 = vst [vmem:[#allocation3 + $0x50] sm:$0xff] %v5692_v6  ;;  %v5655_v3 = vmax.f32 %v12896_v9, 0.0  ;;  %v5657_v34 = vmax.f32 %v12897_v28, 0.0  ;;  %v5778_v47 = vld [vmem:[#allocation3 + $0x1] ss:$2 sm:$0xff] }
 0x859   :  { %v5697_v43 = vmax.f32 %v5647_v1, %v5649_v26  ;;  %5725 = vst [vmem:[#allocation3 + $0x58] sm:$0xff] %v5693_v52  ;;  %v5658_v36 = vmax.f32 %v5594_v35, 0.0  ;;  %v5660_v45 = vmax.f32 %v5596_v59, 0.0  ;;  %v5698_v49 = vmax.f32 %v5650_v0, %v5652_v50  ;;  %v5748_v38 = vld [vmem:[#allocation3 + $0x10] ss:$2 sm:$0xff] }
 0x85a   :  { %5726 = vst [vmem:[#allocation3 + $0x60] sm:$0xff] %v5694_v48  ;;  %v5659_v16 = vmax.f32 %v5595_v37, 0.0  ;;  %v5661_v7 = vmax.f32 %v5597_v32, 0.0  ;;  %v5699_v30 = vmax.f32 %v5651_v51, %v5653_v20  ;;  %v5700_v15 = vmax.f32 %v5654_v56, %v5656_v53  ;;  %v5780_v54 = vld [vmem:[#allocation3 + $0x11] ss:$2 sm:$0xff] }
 0x85b   :  { %5727 = vst [vmem:[#allocation3 + $0x68] sm:$0xff] %v5695_v23  ;;  %v5701_v19 = vmax.f32 %v5655_v3, %v5657_v34  ;;  %v5702_v29 = vmax.f32 %v5658_v36, %v5660_v45  ;;  %v5750_v27 = vld [vmem:[#allocation3 + $0x20] ss:$2 sm:$0xff]  ;;  %v5782_v13 = vld [vmem:[#allocation3 + $0x21] ss:$2 sm:$0xff]  ;;  %v5809_v24 = vmax.f32 %v5746_v42, %v5778_v47  ;;  %v5810_v14 = vmax.f32 %v5748_v38, %v5780_v54 }
 0x85c   :  { %5728 = vst [vmem:[#allocation3 + $0x70] sm:$0xff] %v5696_v18  ;;  %v5703_v8 = vmax.f32 %v5659_v16, %v5661_v7  ;;  %v5752_v61 = vld [vmem:[#allocation3 + $0x30] ss:$2 sm:$0xff]  ;;  %v5784_v41 = vld [vmem:[#allocation3 + $0x31] ss:$2 sm:$0xff] }
 0x85d   :  { %5729 = vst [vmem:[#allocation3 + $0x78] sm:$0xff] %v5697_v43  ;;  %v5812_v25 = vmax.f32 %v5752_v61, %v5784_v41 }
 0x85e   :  { %5730 = vst [vmem:[#allocation3 + $0x80] sm:$0xff] %v5698_v49  ;;  %v5754_v12 = vld [vmem:[#allocation3 + $0x40] ss:$2 sm:$0xff]  ;;  %v5786_v21 = vld [vmem:[#allocation3 + $0x41] ss:$2 sm:$0xff] }
 0x85f   :  { %5731 = vst [vmem:[#allocation3 + $0x88] sm:$0xff] %v5699_v30  ;;  %v5813_v35 = vmax.f32 %v5754_v12, %v5786_v21 }
 0x860   :  { %5732 = vst [vmem:[#allocation3 + $0x90] sm:$0xff] %v5700_v15  ;;  %v5756_v31 = vld [vmem:[#allocation3 + $0x50] ss:$2 sm:$0xff] }
 0x861   :  { %5733 = vst [vmem:[#allocation3 + $0x98] sm:$0xff] %v5701_v19 }
 0x862   :  { %5734 = vst [vmem:[#allocation3 + $0xa0] sm:$0xff] %v5702_v29 }
 0x863   :  { %5735 = vst [vmem:[#allocation3 + $0xa8] sm:$0xff] %v5703_v8 }
 0x864   :  { %5736 = vst [vmem:[#allocation3 + $0xb0] sm:$0xff] %v5704_v2  ;;  %v5788_v2 = vld [vmem:[#allocation3 + $0x51] ss:$2 sm:$0xff]  ;;  %v5760_v55 = vld [vmem:[#allocation3 + $0x70] ss:$2 sm:$0xff] }
 0x865   :  { %5737 = vst [vmem:[#allocation3 + $0xb8] sm:$0xff] %v5705_v11  ;;  %v5811_v11 = vmax.f32 %v5750_v27, %v5782_v13 }
 0x866   :  { %5738 = vst [vmem:[#allocation3 + $0xc0] sm:$0xff] %v5706_v22  ;;  %v5758_v22 = vld [vmem:[#allocation3 + $0x60] ss:$2 sm:$0xff]  ;;  %v5794_v60 = vld [vmem:[#allocation3 + $0x81] ss:$2 sm:$0xff] }
 0x867   :  { %5739 = vst [vmem:[#allocation3 + $0xc8] sm:$0xff] %v5707_v62  ;;  %v5790_v62 = vld [vmem:[#allocation3 + $0x61] ss:$2 sm:$0xff]  ;;  %v5762_v57 = vld [vmem:[#allocation3 + $0x80] ss:$2 sm:$0xff] }
 0x868   :  { %5740 = vst [vmem:[#allocation3 + $0xd0] sm:$0xff] %v11774_v10  ;;  %v5792_v10 = vld [vmem:[#allocation3 + $0x71] ss:$2 sm:$0xff]  ;;  %v5764_v6 = vld [vmem:[#allocation3 + $0x90] ss:$2 sm:$0xff]  ;;  %v5815_v37 = vmax.f32 %v5758_v22, %v5790_v62  ;;  %v5817_v44 = vmax.f32 %v5762_v57, %v5794_v60 }
 0x869   :  { %5741 = vst [vmem:[#allocation3 + $0xd8] sm:$0xff] %v11776_v46  ;;  %v5814_v46 = vmax.f32 %v5756_v31, %v5788_v2  ;;  %v5796_v39 = vld [vmem:[#allocation3 + $0x91] ss:$2 sm:$0xff]  ;;  %v5816_v26 = vmax.f32 %v5760_v55, %v5792_v10 }
 0x86a   :  { %5742 = vst [vmem:[#allocation3 + $0xe0] sm:$0xff] %v11778_v17  ;;  %v5766_v17 = vld [vmem:[#allocation3 + $0xa0] ss:$2 sm:$0xff]  ;;  %v5798_v1 = vld [vmem:[#allocation3 + $0xa1] ss:$2 sm:$0xff]  ;;  %v5818_v50 = vmax.f32 %v5764_v6, %v5796_v39 }
 0x86b   :  { %5743 = vst [vmem:[#allocation3 + $0xe8] sm:$0xff] %v11780_v33  ;;  %v5819_v32 = vmax.f32 %v5766_v17, %v5798_v1 }
 0x86c   :  { %5825 = vst [vmem:[#allocation4] sm:$0xff] %v5809_v24  ;;  %v5768_v33 = vld [vmem:[#allocation3 + $0xb0] ss:$2 sm:$0xff]  ;;  %v5800_v52 = vld [vmem:[#allocation3 + $0xb1] ss:$2 sm:$0xff] }
 0x86d   :  { %5826 = vst [vmem:[#allocation4 + $0x8] sm:$0xff] %v5810_v14  ;;  %v5820_v40 = vmax.f32 %v5768_v33, %v5800_v52 }
 0x86e   :  { %5827 = vst [vmem:[#allocation4 + $0x10] sm:$0xff] %v5811_v11  ;;  %v5770_v59 = vld [vmem:[#allocation3 + $0xc0] ss:$2 sm:$0xff]  ;;  %v5802_v0 = vld [vmem:[#allocation3 + $0xc1] ss:$2 sm:$0xff] }
 0x86f   :  { %5828 = vst [vmem:[#allocation4 + $0x18] sm:$0xff] %v5812_v25  ;;  %v5821_v20 = vmax.f32 %v5770_v59, %v5802_v0 }
 0x870   :  { %5829 = vst [vmem:[#allocation4 + $0x20] sm:$0xff] %v5813_v35  ;;  %v5772_v48 = vld [vmem:[#allocation3 + $0xd0] ss:$2 sm:$0xff]  ;;  %v5804_v5 = vld [vmem:[#allocation3 + $0xd1] ss:$2 sm:$0xff] }
 0x871   :  { %5830 = vst [vmem:[#allocation4 + $0x28] sm:$0xff] %v5814_v46  ;;  %v5822_v23 = vmax.f32 %v5772_v48, %v5804_v5 }
 0x872   :  { %5831 = vst [vmem:[#allocation4 + $0x30] sm:$0xff] %v5815_v37  ;;  %v5774_v63 = vld [vmem:[#allocation3 + $0xe0] ss:$2 sm:$0xff]  ;;  %v5806_v51 = vld [vmem:[#allocation3 + $0xe1] ss:$2 sm:$0xff] }
 0x873   :  { %5832 = vst [vmem:[#allocation4 + $0x38] sm:$0xff] %v5816_v26  ;;  %v5823_v58 = vmax.f32 %v5774_v63, %v5806_v51 }
 0x874   :  { %5833 = vst [vmem:[#allocation4 + $0x40] sm:$0xff] %v5817_v44 }
 0x875   :  { %5834 = vst [vmem:[#allocation4 + $0x48] sm:$0xff] %v5818_v50 }
 0x876   :  { %5835 = vst [vmem:[#allocation4 + $0x50] sm:$0xff] %v5819_v32 }
 0x877   :  { %5836 = vst [vmem:[#allocation4 + $0x58] sm:$0xff] %v5820_v40 }
 0x878   :  { %5837 = vst [vmem:[#allocation4 + $0x60] sm:$0xff] %v5821_v20 }
 0x879   :  { %5838 = vst [vmem:[#allocation4 + $0x68] sm:$0xff] %v5822_v23 }
 0x87a   :  { %5839 = vst [vmem:[#allocation4 + $0x70] sm:$0xff] %v5823_v58 }
 0x87b   :  { %5853 = dma.vmem_to_hbm [thread:$0]  %s5846_s1, 2048, %s5848_s15, [#allocation5], %s6294_s2, %s6294_s2, %s6281_s19  }
 0x87c   :  { %6278 = dma.done.wait [#allocation5], 2048  }
 0x87d   :  { %6279 = vsyncadd [#allocation5], 4294965248 }
 0x87e   :  { %5858 = vsyncpa [#allocation5], 1 }

</bundles_post_ra>
